<compile_context>
chip_gen: v7x
topology: tpu7x:2x2x1
jax: 0.10.0
libtpu: 0.0.40
codegen_flags: <defaults>
</compile_context>

<pallas_src>
import jax
import jax.numpy as jnp
from jax.experimental import pallas as pl
from jax.experimental.pallas import tpu as pltpu

_LANE = 128
_SUBLANE = 8
_VMEM_SPEC = pl.BlockSpec(memory_space=pltpu.MemorySpace.VMEM)


# ----------------------------------------------------------------------------
# Fused forward kernel
# ----------------------------------------------------------------------------
def _gat_forward_kernel(x_ref, adj_ref, w1_ref, adstT_ref, asrcT_ref, b1_ref,
                        w2r_ref, adst2_ref, asrc2_ref, b2_ref, out_ref):
    f32 = jnp.float32
    bf16 = jnp.bfloat16
    neg_big = -1e30

    heads = adstT_ref.shape[0]          # 8
    hf = w1_ref.shape[1]                # heads * F1 = 64
    f1 = hf // heads                    # 8

    x = x_ref[...]                      # [Np, Fin_p] f32
    adj = adj_ref[...]                  # [Np, Np]   f32 (0/1)
    edge = adj > 0.0                    # edge j -> i mask, shared by both layers

    # ---------------- Layer 1: GATConv(Fin -> F1, heads=8, concat) ----------
    # Linear transform for all heads at once (bf16 MXU, f32 accumulate).
    xw = jnp.dot(x.astype(bf16), w1_ref[...].astype(bf16),
                 preferred_element_type=f32)                       # [Np, H*F1]
    xw_b = xw.astype(bf16)

    # Batched per-head attention coefficients:
    #   adT[h, i] = <xw[i, h*F1:(h+1)*F1], att_dst[h]>   (asT with att_src)
    # as block-diagonal matmuls against xw^T -> full 128-lane outputs,
    # replacing 16 tiny per-head K=8 dot_generals.
    xwT_b = jnp.transpose(xw).astype(bf16)                         # [H*F1, Np]
    adT = jnp.dot(adstT_ref[...].astype(bf16), xwT_b,
                  preferred_element_type=f32)                      # [H, Np]
    asT = jnp.dot(asrcT_ref[...].astype(bf16), xwT_b,
                  preferred_element_type=f32)                      # [H, Np]

    # e[h, i, j] = LeakyReLU(adT[h, i] + asT[h, j]); mask non-edges;
    # softmax over source nodes j — all heads in a single pass (f32).
    e = adT[:, :, None] + asT[:, None, :]                          # [H, Np, Np]
    e = jnp.where(e > 0, e, 0.2 * e)                               # slope 0.2
    e = jnp.where(edge[None, :, :], e, neg_big)
    m = jnp.max(e, axis=-1, keepdims=True)
    p = jnp.exp(e - m)
    attn = p / jnp.sum(p, axis=-1, keepdims=True)                  # [H, Np, Np]
    # TODO(synk): train-mode attention dropout (p=0.6) skipped (eval mode).

    # Aggregate messages per head on the MXU (bf16 in, f32 out), concatenate
    # once into a lane-dense [Np, H*F1] value, add bias once (hoisted).
    head_outs = []
    for h in range(heads):                                         # static unroll
        head_outs.append(
            jnp.dot(attn[h].astype(bf16), xw_b[:, h * f1:(h + 1) * f1],
                    preferred_element_type=f32))                   # [Np, F1]
    h1 = jnp.concatenate(head_outs, axis=1) + b1_ref[...]          # [Np, H*F1]

    # ELU (input/output dropouts are identity in eval mode).
    h1 = jnp.where(h1 > 0, h1, jnp.exp(jnp.minimum(h1, 0.0)) - 1.0)

    # --------- Layer 2: GATConv(H*F1 -> 1, heads=1, concat=False) -----------
    w2r = w2r_ref[...]                                             # [1, H*F1]
    # xw2[i] = <h1[i], w2> — VPU multiply + lane reduce (no width-1 matmul).
    xw2_col = jnp.sum(h1 * w2r, axis=1, keepdims=True)             # [Np, 1]
    # Row layout of the same quantity (source-side broadcast), produced as a
    # full-lane matmul against h1^T.
    xw2_row = jnp.dot(w2r, jnp.transpose(h1),
                      preferred_element_type=f32)                  # [1, Np]

    e2 = adst2_ref[...] * xw2_col + asrc2_ref[...] * xw2_row       # [Np, Np]
    e2 = jnp.where(e2 > 0, e2, 0.2 * e2)
    e2 = jnp.where(edge, e2, neg_big)
    m2 = jnp.max(e2, axis=1, keepdims=True)
    p2 = jnp.exp(e2 - m2)
    attn2 = p2 / jnp.sum(p2, axis=1, keepdims=True)                # [Np, Np]

    # out2[i] = sum_j attn2[i, j] * xw2[j] — VPU multiply + lane reduce.
    out2 = jnp.sum(attn2 * xw2_row, axis=1, keepdims=True) + b2_ref[...]  # [Np,1]
    # heads=1, concat=False -> mean over the single head is the identity.

    # log_softmax over dim=1 (single class column).
    mo = jnp.max(out2, axis=1, keepdims=True)
    lse = jnp.log(jnp.sum(jnp.exp(out2 - mo), axis=1, keepdims=True)) + mo
    out_ref[...] = out2 - lse


# ----------------------------------------------------------------------------
# Wrapper
# ----------------------------------------------------------------------------
def _block_diag_att(a):
    """[H, F] attention vector -> transposed block-diagonal selector [H, H*F].

    result[h, h'*F + f] = a[h, f] if h == h' else 0, so that
    (result @ xw^T)[h, i] = <xw[i, h*F:(h+1)*F], a[h]>.
    """
    h, f = a.shape
    eye = jnp.eye(h, dtype=a.dtype)
    return (eye[:, :, None] * a[:, None, :]).reshape(h, h * f)


def gat_forward(x, adj, params):
    n, fin = x.shape
    n_pad = max(_LANE, ((n + _LANE - 1) // _LANE) * _LANE)
    fin_pad = ((fin + _SUBLANE - 1) // _SUBLANE) * _SUBLANE

    # Zero-pad nodes/features to lane/sublane multiples.  Padded nodes carry a
    # self-loop only, so their (discarded) rows stay finite and real rows are
    # untouched (padded columns are masked out of every real softmax row).
    x_p = jnp.zeros((n_pad, fin_pad), jnp.float32).at[:n, :fin].set(x)
    adj_p = jnp.zeros((n_pad, n_pad), jnp.float32).at[:n, :n].set(adj)
    diag = jnp.arange(n_pad)
    adj_p = adj_p.at[diag, diag].set(1.0)   # self-loops (GATConv add_self_loops)

    hf = params["w1"].shape[1]
    w1_p = jnp.zeros((fin_pad, hf), jnp.float32).at[:fin, :].set(params["w1"])
    adst_t = _block_diag_att(params["adst1"])      # [H, H*F1]
    asrc_t = _block_diag_att(params["asrc1"])      # [H, H*F1]
    b1 = params["b1"].reshape(1, hf)
    w2_row = params["w2"].reshape(1, hf)
    adst2 = params["adst2"].reshape(1, 1)
    asrc2 = params["asrc2"].reshape(1, 1)
    b2 = params["b2"].reshape(1, 1)

    out = pl.pallas_call(
        _gat_forward_kernel,
        out_shape=jax.ShapeDtypeStruct((n_pad, 1), jnp.float32),
        in_specs=[_VMEM_SPEC] * 10,
        out_specs=_VMEM_SPEC,
        compiler_params=pltpu.CompilerParams(
            vmem_limit_bytes=32 * 1024 * 1024),
    )(x_p, adj_p, w1_p, adst_t, asrc_t, b1, w2_row, adst2, asrc2, b2)
    return out[:n]


# ----------------------------------------------------------------------------
# Main
# ----------------------------------------------------------------------------
if __name__ == "__main__":
    N, F_IN = 16, 5
    HID, IN_HEAD, OUT_HEAD = 8, 8, 1

    key = jax.random.PRNGKey(0)
    ks = jax.random.split(key, 8)

    # Node features.
    x = jax.random.normal(ks[0], (N, F_IN), jnp.float32)

    # Deterministic bidirectional ring graph -> edge_index [2, 2N].
    idx = jnp.arange(N)
    src = jnp.concatenate([idx, (idx + 1) % N])
    dst = jnp.concatenate([(idx + 1) % N, idx])
    edge_index = jnp.stack([src, dst])                       # [2, 32]

    # Dense adjacency: adj[i, j] = 1 iff edge j -> i; plus self-loops.
    adj = jnp.zeros((N, N), jnp.float32)
    adj = adj.at[edge_index[1], edge_index[0]].set(1.0)
    adj = adj.at[idx, idx].set(1.0)

    # Deterministic parameters (shapes follow GATConv).
    params = {
        # conv1: GATConv(5, 8, heads=8)
        "w1": jax.random.normal(ks[1], (F_IN, IN_HEAD * HID), jnp.float32) * 0.3,
        "asrc1": jax.random.normal(ks[2], (IN_HEAD, HID), jnp.float32) * 0.3,
        "adst1": jax.random.normal(ks[3], (IN_HEAD, HID), jnp.float32) * 0.3,
        "b1": jnp.zeros((IN_HEAD, HID), jnp.float32),
        # conv2: GATConv(64, 1, heads=1, concat=False)
        "w2": jax.random.normal(ks[4], (IN_HEAD * HID, OUT_HEAD * 1), jnp.float32) * 0.2,
        "asrc2": jax.random.normal(ks[5], (OUT_HEAD, 1), jnp.float32) * 0.3,
        "adst2": jax.random.normal(ks[6], (OUT_HEAD, 1), jnp.float32) * 0.3,
        "b2": jnp.zeros((1, 1), jnp.float32),
    }

    out = jax.jit(gat_forward)(x, adj, params)     # [N, 1] log-probabilities
    jax.block_until_ready(out)
    assert out.shape == (N, 1)
    assert bool(jnp.all(jnp.isfinite(out)))
    print("KERNEL_OK")
</pallas_src>

<mosaic_0001>
module attributes {stable_mosaic.version = 11 : i64} {
  func.func @_gat_forward_kernel(%arg0: memref<128x8xf32, #tpu.memory_space<vmem>>, %arg1: memref<128x128xf32, #tpu.memory_space<vmem>>, %arg2: memref<8x64xf32, #tpu.memory_space<vmem>>, %arg3: memref<8x64xf32, #tpu.memory_space<vmem>>, %arg4: memref<8x64xf32, #tpu.memory_space<vmem>>, %arg5: memref<1x64xf32, #tpu.memory_space<vmem>>, %arg6: memref<1x64xf32, #tpu.memory_space<vmem>>, %arg7: memref<1x1xf32, #tpu.memory_space<vmem>>, %arg8: memref<1x1xf32, #tpu.memory_space<vmem>>, %arg9: memref<1x1xf32, #tpu.memory_space<vmem>>, %arg10: memref<128x1xf32, #tpu.memory_space<vmem>>) attributes {dimension_semantics = [], scalar_prefetch = 0 : i64, scratch_operands = 0 : i64, tpu.core_type = #tpu.core_type<tc>} {
    %c0 = arith.constant 0 : index
    %c0_0 = arith.constant 0 : index
    %0 = vector.load %arg0[%c0, %c0_0] : memref<128x8xf32, #tpu.memory_space<vmem>>, vector<128x8xf32>
    %c0_1 = arith.constant 0 : index
    %c0_2 = arith.constant 0 : index
    %1 = vector.load %arg1[%c0_1, %c0_2] : memref<128x128xf32, #tpu.memory_space<vmem>>, vector<128x128xf32>
    %cst = arith.constant 0.000000e+00 : f32
    %2 = vector.broadcast %cst : f32 to vector<128x128xf32>
    %3 = arith.cmpf ogt, %1, %2 : vector<128x128xf32>
    %4 = arith.truncf %0 : vector<128x8xf32> to vector<128x8xbf16>
    %c0_3 = arith.constant 0 : index
    %c0_4 = arith.constant 0 : index
    %5 = vector.load %arg2[%c0_3, %c0_4] : memref<8x64xf32, #tpu.memory_space<vmem>>, vector<8x64xf32>
    %6 = arith.truncf %5 : vector<8x64xf32> to vector<8x64xbf16>
    %cst_5 = arith.constant dense<0.000000e+00> : vector<128x64xf32>
    %7 = tpu.matmul %4, %6, %cst_5 {dimension_numbers = #tpu.dot_dimension_numbers<[1], [0], [0], [1], [0, 0, 1, 1], [], []>} : vector<128x8xbf16>, vector<8x64xbf16>, vector<128x64xf32> -> vector<128x64xf32>
    %8 = arith.truncf %7 : vector<128x64xf32> to vector<128x64xbf16>
    %9 = tpu.transpose %7, [1, 0] : vector<128x64xf32> -> vector<64x128xf32>
    %10 = arith.truncf %9 : vector<64x128xf32> to vector<64x128xbf16>
    %c0_6 = arith.constant 0 : index
    %c0_7 = arith.constant 0 : index
    %11 = vector.load %arg3[%c0_6, %c0_7] : memref<8x64xf32, #tpu.memory_space<vmem>>, vector<8x64xf32>
    %12 = arith.truncf %11 : vector<8x64xf32> to vector<8x64xbf16>
    %cst_8 = arith.constant dense<0.000000e+00> : vector<8x128xf32>
    %13 = tpu.matmul %12, %10, %cst_8 {dimension_numbers = #tpu.dot_dimension_numbers<[1], [0], [0], [1], [0, 0, 1, 1], [], []>} : vector<8x64xbf16>, vector<64x128xbf16>, vector<8x128xf32> -> vector<8x128xf32>
    %c0_9 = arith.constant 0 : index
    %c0_10 = arith.constant 0 : index
    %14 = vector.load %arg4[%c0_9, %c0_10] : memref<8x64xf32, #tpu.memory_space<vmem>>, vector<8x64xf32>
    %15 = arith.truncf %14 : vector<8x64xf32> to vector<8x64xbf16>
    %cst_11 = arith.constant dense<0.000000e+00> : vector<8x128xf32>
    %16 = tpu.matmul %15, %10, %cst_11 {dimension_numbers = #tpu.dot_dimension_numbers<[1], [0], [0], [1], [0, 0, 1, 1], [], []>} : vector<8x64xbf16>, vector<64x128xbf16>, vector<8x128xf32> -> vector<8x128xf32>
    %17 = vector.shape_cast %13 : vector<8x128xf32> to vector<8x128x1xf32>
    %18 = vector.shape_cast %16 : vector<8x128xf32> to vector<8x1x128xf32>
    %19 = vector.broadcast %17 : vector<8x128x1xf32> to vector<8x128x128xf32>
    %20 = vector.broadcast %18 : vector<8x1x128xf32> to vector<8x128x128xf32>
    %21 = arith.addf %19, %20 : vector<8x128x128xf32>
    %cst_12 = arith.constant 0.000000e+00 : f32
    %22 = vector.broadcast %cst_12 : f32 to vector<8x128x128xf32>
    %23 = arith.cmpf ogt, %21, %22 : vector<8x128x128xf32>
    %cst_13 = arith.constant 2.000000e-01 : f32
    %24 = vector.broadcast %cst_13 : f32 to vector<8x128x128xf32>
    %25 = arith.mulf %24, %21 : vector<8x128x128xf32>
    %26 = arith.select %23, %21, %25 : vector<8x128x128xi1>, vector<8x128x128xf32>
    %27 = vector.shape_cast %3 : vector<128x128xi1> to vector<1x128x128xi1>
    %cst_14 = arith.constant -1.000000e+30 : f32
    %28 = vector.shape_cast %27 : vector<1x128x128xi1> to vector<1x128x128xi1>
    %29 = vector.broadcast %28 : vector<1x128x128xi1> to vector<8x128x128xi1>
    %30 = vector.broadcast %cst_14 : f32 to vector<8x128x128xf32>
    %31 = arith.select %29, %26, %30 : vector<8x128x128xi1>, vector<8x128x128xf32>
    %cst_15 = arith.constant dense<0xFF800000> : vector<8x128xf32>
    %32 = vector.multi_reduction <maximumf>, %31, %cst_15 [2] : vector<8x128x128xf32> to vector<8x128xf32>
    %33 = vector.shape_cast %32 : vector<8x128xf32> to vector<8x128x1xf32>
    %34 = vector.broadcast %33 : vector<8x128x1xf32> to vector<8x128x128xf32>
    %35 = arith.subf %31, %34 : vector<8x128x128xf32>
    %36 = math.exp %35 : vector<8x128x128xf32>
    %cst_16 = arith.constant dense<0.000000e+00> : vector<8x128xf32>
    %37 = vector.multi_reduction <add>, %36, %cst_16 [2] : vector<8x128x128xf32> to vector<8x128xf32>
    %38 = vector.shape_cast %37 : vector<8x128xf32> to vector<8x128x1xf32>
    %39 = vector.broadcast %38 : vector<8x128x1xf32> to vector<8x128x128xf32>
    %40 = arith.divf %36, %39 : vector<8x128x128xf32>
    %41 = vector.extract_strided_slice %40 {offsets = [0, 0, 0], sizes = [1, 128, 128], strides = [1, 1, 1]} : vector<8x128x128xf32> to vector<1x128x128xf32>
    %42 = vector.shape_cast %41 : vector<1x128x128xf32> to vector<128x128xf32>
    %43 = arith.truncf %42 : vector<128x128xf32> to vector<128x128xbf16>
    %44 = vector.extract_strided_slice %8 {offsets = [0, 0], sizes = [128, 8], strides = [1, 1]} : vector<128x64xbf16> to vector<128x8xbf16>
    %cst_17 = arith.constant dense<0.000000e+00> : vector<128x8xf32>
    %45 = tpu.matmul %43, %44, %cst_17 {dimension_numbers = #tpu.dot_dimension_numbers<[1], [0], [0], [1], [0, 0, 1, 1], [], []>} : vector<128x128xbf16>, vector<128x8xbf16>, vector<128x8xf32> -> vector<128x8xf32>
    %46 = vector.extract_strided_slice %40 {offsets = [1, 0, 0], sizes = [1, 128, 128], strides = [1, 1, 1]} : vector<8x128x128xf32> to vector<1x128x128xf32>
    %47 = vector.shape_cast %46 : vector<1x128x128xf32> to vector<128x128xf32>
    %48 = arith.truncf %47 : vector<128x128xf32> to vector<128x128xbf16>
    %49 = vector.extract_strided_slice %8 {offsets = [0, 8], sizes = [128, 8], strides = [1, 1]} : vector<128x64xbf16> to vector<128x8xbf16>
    %cst_18 = arith.constant dense<0.000000e+00> : vector<128x8xf32>
    %50 = tpu.matmul %48, %49, %cst_18 {dimension_numbers = #tpu.dot_dimension_numbers<[1], [0], [0], [1], [0, 0, 1, 1], [], []>} : vector<128x128xbf16>, vector<128x8xbf16>, vector<128x8xf32> -> vector<128x8xf32>
    %51 = vector.extract_strided_slice %40 {offsets = [2, 0, 0], sizes = [1, 128, 128], strides = [1, 1, 1]} : vector<8x128x128xf32> to vector<1x128x128xf32>
    %52 = vector.shape_cast %51 : vector<1x128x128xf32> to vector<128x128xf32>
    %53 = arith.truncf %52 : vector<128x128xf32> to vector<128x128xbf16>
    %54 = vector.extract_strided_slice %8 {offsets = [0, 16], sizes = [128, 8], strides = [1, 1]} : vector<128x64xbf16> to vector<128x8xbf16>
    %cst_19 = arith.constant dense<0.000000e+00> : vector<128x8xf32>
    %55 = tpu.matmul %53, %54, %cst_19 {dimension_numbers = #tpu.dot_dimension_numbers<[1], [0], [0], [1], [0, 0, 1, 1], [], []>} : vector<128x128xbf16>, vector<128x8xbf16>, vector<128x8xf32> -> vector<128x8xf32>
    %56 = vector.extract_strided_slice %40 {offsets = [3, 0, 0], sizes = [1, 128, 128], strides = [1, 1, 1]} : vector<8x128x128xf32> to vector<1x128x128xf32>
    %57 = vector.shape_cast %56 : vector<1x128x128xf32> to vector<128x128xf32>
    %58 = arith.truncf %57 : vector<128x128xf32> to vector<128x128xbf16>
    %59 = vector.extract_strided_slice %8 {offsets = [0, 24], sizes = [128, 8], strides = [1, 1]} : vector<128x64xbf16> to vector<128x8xbf16>
    %cst_20 = arith.constant dense<0.000000e+00> : vector<128x8xf32>
    %60 = tpu.matmul %58, %59, %cst_20 {dimension_numbers = #tpu.dot_dimension_numbers<[1], [0], [0], [1], [0, 0, 1, 1], [], []>} : vector<128x128xbf16>, vector<128x8xbf16>, vector<128x8xf32> -> vector<128x8xf32>
    %61 = vector.extract_strided_slice %40 {offsets = [4, 0, 0], sizes = [1, 128, 128], strides = [1, 1, 1]} : vector<8x128x128xf32> to vector<1x128x128xf32>
    %62 = vector.shape_cast %61 : vector<1x128x128xf32> to vector<128x128xf32>
    %63 = arith.truncf %62 : vector<128x128xf32> to vector<128x128xbf16>
    %64 = vector.extract_strided_slice %8 {offsets = [0, 32], sizes = [128, 8], strides = [1, 1]} : vector<128x64xbf16> to vector<128x8xbf16>
    %cst_21 = arith.constant dense<0.000000e+00> : vector<128x8xf32>
    %65 = tpu.matmul %63, %64, %cst_21 {dimension_numbers = #tpu.dot_dimension_numbers<[1], [0], [0], [1], [0, 0, 1, 1], [], []>} : vector<128x128xbf16>, vector<128x8xbf16>, vector<128x8xf32> -> vector<128x8xf32>
    %66 = vector.extract_strided_slice %40 {offsets = [5, 0, 0], sizes = [1, 128, 128], strides = [1, 1, 1]} : vector<8x128x128xf32> to vector<1x128x128xf32>
    %67 = vector.shape_cast %66 : vector<1x128x128xf32> to vector<128x128xf32>
    %68 = arith.truncf %67 : vector<128x128xf32> to vector<128x128xbf16>
    %69 = vector.extract_strided_slice %8 {offsets = [0, 40], sizes = [128, 8], strides = [1, 1]} : vector<128x64xbf16> to vector<128x8xbf16>
    %cst_22 = arith.constant dense<0.000000e+00> : vector<128x8xf32>
    %70 = tpu.matmul %68, %69, %cst_22 {dimension_numbers = #tpu.dot_dimension_numbers<[1], [0], [0], [1], [0, 0, 1, 1], [], []>} : vector<128x128xbf16>, vector<128x8xbf16>, vector<128x8xf32> -> vector<128x8xf32>
    %71 = vector.extract_strided_slice %40 {offsets = [6, 0, 0], sizes = [1, 128, 128], strides = [1, 1, 1]} : vector<8x128x128xf32> to vector<1x128x128xf32>
    %72 = vector.shape_cast %71 : vector<1x128x128xf32> to vector<128x128xf32>
    %73 = arith.truncf %72 : vector<128x128xf32> to vector<128x128xbf16>
    %74 = vector.extract_strided_slice %8 {offsets = [0, 48], sizes = [128, 8], strides = [1, 1]} : vector<128x64xbf16> to vector<128x8xbf16>
    %cst_23 = arith.constant dense<0.000000e+00> : vector<128x8xf32>
    %75 = tpu.matmul %73, %74, %cst_23 {dimension_numbers = #tpu.dot_dimension_numbers<[1], [0], [0], [1], [0, 0, 1, 1], [], []>} : vector<128x128xbf16>, vector<128x8xbf16>, vector<128x8xf32> -> vector<128x8xf32>
    %76 = vector.extract_strided_slice %40 {offsets = [7, 0, 0], sizes = [1, 128, 128], strides = [1, 1, 1]} : vector<8x128x128xf32> to vector<1x128x128xf32>
    %77 = vector.shape_cast %76 : vector<1x128x128xf32> to vector<128x128xf32>
    %78 = arith.truncf %77 : vector<128x128xf32> to vector<128x128xbf16>
    %79 = vector.extract_strided_slice %8 {offsets = [0, 56], sizes = [128, 8], strides = [1, 1]} : vector<128x64xbf16> to vector<128x8xbf16>
    %cst_24 = arith.constant dense<0.000000e+00> : vector<128x8xf32>
    %80 = tpu.matmul %78, %79, %cst_24 {dimension_numbers = #tpu.dot_dimension_numbers<[1], [0], [0], [1], [0, 0, 1, 1], [], []>} : vector<128x128xbf16>, vector<128x8xbf16>, vector<128x8xf32> -> vector<128x8xf32>
    %81 = tpu.concatenate %45, %50, %55, %60, %65, %70, %75, %80 in 1 : vector<128x8xf32>, vector<128x8xf32>, vector<128x8xf32>, vector<128x8xf32>, vector<128x8xf32>, vector<128x8xf32>, vector<128x8xf32>, vector<128x8xf32> -> vector<128x64xf32>
    %c0_25 = arith.constant 0 : index
    %c0_26 = arith.constant 0 : index
    %82 = vector.load %arg5[%c0_25, %c0_26] : memref<1x64xf32, #tpu.memory_space<vmem>>, vector<1x64xf32>
    %83 = vector.broadcast %82 : vector<1x64xf32> to vector<128x64xf32>
    %84 = arith.addf %81, %83 : vector<128x64xf32>
    %cst_27 = arith.constant 0.000000e+00 : f32
    %85 = vector.broadcast %cst_27 : f32 to vector<128x64xf32>
    %86 = arith.cmpf ogt, %84, %85 : vector<128x64xf32>
    %cst_28 = arith.constant 0.000000e+00 : f32
    %87 = vector.broadcast %cst_28 : f32 to vector<128x64xf32>
    %88 = arith.minimumf %84, %87 : vector<128x64xf32>
    %89 = math.exp %88 : vector<128x64xf32>
    %cst_29 = arith.constant 1.000000e+00 : f32
    %90 = vector.broadcast %cst_29 : f32 to vector<128x64xf32>
    %91 = arith.subf %89, %90 : vector<128x64xf32>
    %92 = arith.select %86, %84, %91 : vector<128x64xi1>, vector<128x64xf32>
    %c0_30 = arith.constant 0 : index
    %c0_31 = arith.constant 0 : index
    %93 = vector.load %arg6[%c0_30, %c0_31] : memref<1x64xf32, #tpu.memory_space<vmem>>, vector<1x64xf32>
    %94 = vector.broadcast %93 : vector<1x64xf32> to vector<128x64xf32>
    %95 = arith.mulf %92, %94 : vector<128x64xf32>
    %cst_32 = arith.constant dense<0.000000e+00> : vector<128xf32>
    %96 = vector.multi_reduction <add>, %95, %cst_32 [1] : vector<128x64xf32> to vector<128xf32>
    %97 = vector.shape_cast %96 : vector<128xf32> to vector<128x1xf32>
    %98 = tpu.transpose %92, [1, 0] : vector<128x64xf32> -> vector<64x128xf32>
    %cst_33 = arith.constant dense<0.000000e+00> : vector<1x128xf32>
    %99 = tpu.matmul %93, %98, %cst_33 {dimension_numbers = #tpu.dot_dimension_numbers<[1], [0], [0], [1], [0, 0, 1, 1], [], []>} : vector<1x64xf32>, vector<64x128xf32>, vector<1x128xf32> -> vector<1x128xf32>
    %c0_34 = arith.constant 0 : index
    %c0_35 = arith.constant 0 : index
    %100 = vector.load %arg7[%c0_34, %c0_35] : memref<1x1xf32, #tpu.memory_space<vmem>>, vector<1x1xf32>
    %101 = vector.broadcast %100 : vector<1x1xf32> to vector<128x1xf32>
    %102 = arith.mulf %101, %97 : vector<128x1xf32>
    %c0_36 = arith.constant 0 : index
    %c0_37 = arith.constant 0 : index
    %103 = vector.load %arg8[%c0_36, %c0_37] : memref<1x1xf32, #tpu.memory_space<vmem>>, vector<1x1xf32>
    %104 = vector.broadcast %103 : vector<1x1xf32> to vector<1x128xf32>
    %105 = arith.mulf %104, %99 : vector<1x128xf32>
    %106 = vector.broadcast %102 : vector<128x1xf32> to vector<128x128xf32>
    %107 = vector.broadcast %105 : vector<1x128xf32> to vector<128x128xf32>
    %108 = arith.addf %106, %107 : vector<128x128xf32>
    %cst_38 = arith.constant 0.000000e+00 : f32
    %109 = vector.broadcast %cst_38 : f32 to vector<128x128xf32>
    %110 = arith.cmpf ogt, %108, %109 : vector<128x128xf32>
    %cst_39 = arith.constant 2.000000e-01 : f32
    %111 = vector.broadcast %cst_39 : f32 to vector<128x128xf32>
    %112 = arith.mulf %111, %108 : vector<128x128xf32>
    %113 = arith.select %110, %108, %112 : vector<128x128xi1>, vector<128x128xf32>
    %cst_40 = arith.constant -1.000000e+30 : f32
    %114 = vector.broadcast %cst_40 : f32 to vector<128x128xf32>
    %115 = arith.select %3, %113, %114 : vector<128x128xi1>, vector<128x128xf32>
    %cst_41 = arith.constant dense<0xFF800000> : vector<128xf32>
    %116 = vector.multi_reduction <maximumf>, %115, %cst_41 [1] : vector<128x128xf32> to vector<128xf32>
    %117 = vector.shape_cast %116 : vector<128xf32> to vector<128x1xf32>
    %118 = vector.broadcast %117 : vector<128x1xf32> to vector<128x128xf32>
    %119 = arith.subf %115, %118 : vector<128x128xf32>
    %120 = math.exp %119 : vector<128x128xf32>
    %cst_42 = arith.constant dense<0.000000e+00> : vector<128xf32>
    %121 = vector.multi_reduction <add>, %120, %cst_42 [1] : vector<128x128xf32> to vector<128xf32>
    %122 = vector.shape_cast %121 : vector<128xf32> to vector<128x1xf32>
    %123 = vector.broadcast %122 : vector<128x1xf32> to vector<128x128xf32>
    %124 = arith.divf %120, %123 : vector<128x128xf32>
    %125 = vector.broadcast %99 : vector<1x128xf32> to vector<128x128xf32>
    %126 = arith.mulf %124, %125 : vector<128x128xf32>
    %cst_43 = arith.constant dense<0.000000e+00> : vector<128xf32>
    %127 = vector.multi_reduction <add>, %126, %cst_43 [1] : vector<128x128xf32> to vector<128xf32>
    %128 = vector.shape_cast %127 : vector<128xf32> to vector<128x1xf32>
    %c0_44 = arith.constant 0 : index
    %c0_45 = arith.constant 0 : index
    %129 = vector.load %arg9[%c0_44, %c0_45] : memref<1x1xf32, #tpu.memory_space<vmem>>, vector<1x1xf32>
    %130 = vector.broadcast %129 : vector<1x1xf32> to vector<128x1xf32>
    %131 = arith.addf %128, %130 : vector<128x1xf32>
    %cst_46 = arith.constant dense<0xFF800000> : vector<128xf32>
    %132 = vector.multi_reduction <maximumf>, %131, %cst_46 [1] : vector<128x1xf32> to vector<128xf32>
    %133 = vector.shape_cast %132 : vector<128xf32> to vector<128x1xf32>
    %134 = arith.subf %131, %133 : vector<128x1xf32>
    %135 = math.exp %134 : vector<128x1xf32>
    %cst_47 = arith.constant dense<0.000000e+00> : vector<128xf32>
    %136 = vector.multi_reduction <add>, %135, %cst_47 [1] : vector<128x1xf32> to vector<128xf32>
    %137 = vector.shape_cast %136 : vector<128xf32> to vector<128x1xf32>
    %138 = math.log %137 : vector<128x1xf32>
    %139 = arith.addf %138, %133 : vector<128x1xf32>
    %140 = arith.subf %131, %139 : vector<128x1xf32>
    %c0_48 = arith.constant 0 : index
    %c0_49 = arith.constant 0 : index
    %141 = vector.load %arg10[%c0_48, %c0_49] : memref<128x1xf32, #tpu.memory_space<vmem>>, vector<128x1xf32>
    tpu.vector_store %arg10[%c0_48, %c0_49], %140 {strides = array<i32>} : memref<128x1xf32, #tpu.memory_space<vmem>>, vector<128x1xf32>,
    return
  }
}

</mosaic_0001>

<bundles_post_ra>
// kernel: gat_forward.1
= control target key start
LH: loop header
LB: loop body
LE: loop exit
PB: predicated region body
PF: predicated region fallthrough
CT: control target
= control target key end

     0   :  { %vm125_vm0 = vcmask 1043456   ;;  %vm10661_vm1 = vcmask 64512   ;;  %v10616_v33 = vmov 0.0   ;;  %vm10666_vm2 = vmmov 0   ;;  %s6542_s14 = smov 112   ;;  %s6543_s15 = smov 104   ;;  %s10605_s2 = inlined_call_operand.vmem [shape: f32[8,64], index: 2, kind: input, shape index: {}]   ;;  %s10606_s0 = inlined_call_operand.vmem [shape: f32[128,8], index: 0, kind: input, shape index: {}]   ;;  %s10607_s3 = inlined_call_operand.vmem [shape: f32[8,64], index: 3, kind: input, shape index: {}]   ;;  %s10608_s4 = inlined_call_operand.vmem [shape: f32[8,64], index: 4, kind: input, shape index: {}]   ;;  %s10609_s1 = inlined_call_operand.vmem [shape: f32[128,128], index: 1, kind: input, shape index: {}]   ;;  %s10610_s5 = inlined_call_operand.vmem [shape: f32[1,64], index: 5, kind: input, shape index: {}]   ;;  %s10611_s7 = inlined_call_operand.<no memory space> [shape: f32[1,1], index: 7, kind: input, shape index: {}]   ;;  %s10612_s6 = inlined_call_operand.vmem [shape: f32[1,64], index: 6, kind: input, shape index: {}]   ;;  %s10613_s8 = inlined_call_operand.<no memory space> [shape: f32[1,1], index: 8, kind: input, shape index: {}]   ;;  %s10614_s9 = inlined_call_operand.<no memory space> [shape: f32[1,1], index: 9, kind: input, shape index: {}]   ;;  %s10615_s10 = inlined_call_operand.vmem [shape: f32[128,1], index: 10, kind: output, shape index: {}]  }
   0x1   :  { %v98_v0 = vld [vmem:[%s10605_s2] sm:$0xff]  ;;  %v43_v2 = vld [vmem:[%s10606_s0 + $0x8] sm:$0xff]  ;;  %v44_v5 = vld [vmem:[%s10606_s0 + $0x10] sm:$0xff]  ;;  %5497 = vmatprep.subr.bf16.mxu1 %v10616_v33  ;;  %5505 = vmatprep.mubr.msk.bf16.mxu1 %vm10666_vm2, %v10616_v33  ;;  %vm10658_vm3 = vcmask 523264   ;;  %s6544_s16 = smov 96   ;;  %s6545_s17 = smov 88  }
   0x2   :  { %v42_v1 = vld [vmem:[%s10606_s0] sm:$0xff]  ;;  %v99_v3 = vpack.c.bf16 %v98_v0, %v98_v0  ;;  %v45_v6 = vld [vmem:[%s10606_s0 + $0x18] sm:$0xff]  ;;  %v47_v8 = vld [vmem:[%s10606_s0 + $0x28] sm:$0xff]  ;;  %s6546_s18 = smov 72   ;;  %s6547_s19 = smov 80  }
   0x3   :  { %v90_v4 = vpack.c.bf16 %v43_v2, %v42_v1  ;;  %v46_v7 = vld [vmem:[%s10606_s0 + $0x20] sm:$0xff]  ;;  %v91_v10 = vpack.c.bf16 %v45_v6, %v44_v5  ;;  %v48_v12 = vld [vmem:[%s10606_s0 + $0x30] sm:$0xff]  ;;  %v49_v13 = vld [vmem:[%s10606_s0 + $0x38] sm:$0xff]  ;;  %s6548_s20 = smov 8   ;;  %s6549_s21 = smov 16  }
   0x4   :  { %5844 = vmatprep.subr.msk.bf16.mxu0 %vm125_vm0, %v99_v3  ;;  %v127_v9 = vsel %vm125_vm0, %v99_v3, 0  ;;  %v92_v11 = vpack.c.bf16 %v47_v8, %v46_v7  ;;  %v50_v14 = vld [vmem:[%s10606_s0 + $0x40] sm:$0xff]  ;;  %v51_v15 = vld [vmem:[%s10606_s0 + $0x48] sm:$0xff]  ;;  %v93_v16 = vpack.c.bf16 %v49_v13, %v48_v12  ;;  %v52_v18 = vld [vmem:[%s10606_s0 + $0x50] sm:$0xff]  ;;  %s6550_s22 = smov 24   ;;  %s6551_s2 = smov 32  }
   0x5   :  { %5481 = vmatprep.mubr.msk.bf16.mxu0 %vm10661_vm1, %v90_v4  ;;  %5480 = vmatpush3.bf16.msra.mxu0 %v127_v9  ;;  %v94_v17 = vpack.c.bf16 %v51_v15, %v50_v14  ;;  %v53_v19 = vld [vmem:[%s10606_s0 + $0x58] sm:$0xff]  ;;  %v54_v20 = vld [vmem:[%s10606_s0 + $0x60] sm:$0xff]  ;;  %v55_v21 = vld [vmem:[%s10606_s0 + $0x68] sm:$0xff]  ;;  %v361_v4 = vlaneseq  ;;  %v6540_v15 = vmov 1966171168   ;;  %s6552_s23 = smov 40  }
   0x6   :  { %v95_v22 = vpack.c.bf16 %v53_v19, %v52_v18  ;;  %v96_v23 = vpack.c.bf16 %v55_v21, %v54_v20  ;;  %v56_v24 = vld [vmem:[%s10606_s0 + $0x70] sm:$0xff]  ;;  %v57_v25 = vld [vmem:[%s10606_s0 + $0x78] sm:$0xff]  ;;  %v270_v62 = vld [vmem:[%s10607_s3] sm:$0xff]  ;;  %s6553_s24 = smov 48   ;;  %s6554_s0 = smov 56  }
   0x7   :  { %v97_v26 = vpack.c.bf16 %v57_v25, %v56_v24  ;;  %v271_v1 = vpack.c.bf16 %v270_v62, %v270_v62  ;;  %v316_v2 = vld [vmem:[%s10608_s4] sm:$0xff]  ;;  %v6723_v5 = vshrl.u32 %v361_v4, 7 }
   0x8   :  { %5482 = vmatmul.mubr.msk.bf16.vlgmr.msra.gmra.mrb[0].mxu0 %vm10661_vm1, %v91_v10  ;;  %v317_v3 = vpack.c.bf16 %v316_v2, %v316_v2 }
   0x9   :  { %5485 = vmatprep.mubr.msk.bf16.mxu0 %vm10661_vm1, %v92_v11  ;;  %v6726_v6 = vsub.s32 0, %v6723_v5  ;;  %v430_v7 = vsub.s32 1, %v6723_v5  ;;  %v497_v14 = vsub.s32 2, %v6723_v5 }
   0xb   :  { %10855 = vst [vmem:[#allocation13_spill] sm:$0xff] %v6726_v6 }
  0x10   :  { %5486 = vmatmul.mubr.msk.bf16.gmra.mrb[4].mxu0 %vm10661_vm1, %v93_v16  ;;  %v900_v16 = vunpack.c.l.s4 %v6540_v15 }
  0x11   :  { %5489 = vmatprep.mubr.msk.bf16.mxu0 %vm10661_vm1, %v94_v17 }
  0x12   :  { %v901_v18 = vunpack.c.0.s8 %v900_v16 }
  0x14   :  { %v6749_v21 = vsub.s32 %v901_v18, %v6723_v5 }
  0x18   :  { %5490 = vmatmul.mubr.msk.bf16.gmra.mrb[8].mxu0 %vm10661_vm1, %v95_v22 }
  0x19   :  { %5493 = vmatprep.mubr.msk.bf16.mxu0 %vm10661_vm1, %v96_v23 }
  0x20   :  { %5494 = vmatmul.mubr.msk.bf16.gmra.mrb[12].mxu0 %vm10661_vm1, %v97_v26 }
  0xdb   :  { %v5483_v27 = vpop.f32.mrb[0].mxu0 }
  0xdc   :  { %v163_v28 = vpop.f32.mrb[1].mxu0 }
  0xdd   :  { %234 = vxpose.xlu0.b32.start [1/16] (narrow) %v163_v28, 64  ;;  %v5484_v29 = vpop.f32.mrb[2].mxu0 }
  0xde   :  { %v6671_v30 = vpack.c.bf16 %v5484_v29, %v5483_v27  ;;  %v166_v31 = vpop.f32.mrb[3].mxu0 }
  0xdf   :  { %v6673_v32 = vpack.c.bf16 %v166_v31, %v163_v28 }
  0xe0   :  { %10847 = vst [vmem:[#allocation5_spill] sm:$0xff] %v6671_v30 }
  0xe1   :  { %10848 = vst [vmem:[#allocation6_spill] sm:$0xff] %v6673_v32  ;;  %235 = vxpose.xlu0.b32.cont [2/16] (narrow) %v166_v31, 64  ;;  %5521 = vmatprep.subr.bf16.mxu0 %v6673_v32 }
  0xe2   :  { %5522 = vmatpush3.bf16.msra.mxu0 %v6673_v32 }
  0xe3   :  { %v5487_v34 = vpop.f32.mrb[4].mxu0  ;;  %5523 = vmatprep.subr.bf16.mxu0 %v6671_v30 }
  0xe4   :  { %v179_v35 = vpop.f32.mrb[5].mxu0 }
  0xe5   :  { %236 = vxpose.xlu0.b32.cont [3/16] (narrow) %v5483_v27, 64  ;;  %v5488_v36 = vpop.f32.mrb[6].mxu0 }
  0xe6   :  { %v6679_v37 = vpack.c.bf16 %v5488_v36, %v5487_v34  ;;  %v182_v38 = vpop.f32.mrb[7].mxu0  ;;  %5524 = vmatpush3.bf16.msra.mxu0 %v6671_v30 }
  0xe7   :  { %v6682_v39 = vpack.c.bf16 %v182_v38, %v179_v35 }
  0xe8   :  { %10849 = vst [vmem:[#allocation7_spill] sm:$0xff] %v6679_v37 }
  0xe9   :  { %10850 = vst [vmem:[#allocation8_spill] sm:$0xff] %v6682_v39  ;;  %237 = vxpose.xlu0.b32.cont [4/16] (narrow) %v5484_v29, 64  ;;  %5525 = vmatprep.subr.bf16.mxu0 %v6682_v39  ;;  %v564_v29 = vsub.s32 3, %v6723_v5 }
  0xea   :  { %5526 = vmatpush3.bf16.msra.mxu0 %v6682_v39 }
  0xeb   :  { %5527 = vmatprep.subr.bf16.mxu0 %v6679_v37  ;;  %v5491_v40 = vpop.f32.mrb[8].mxu0 }
  0xec   :  { %v195_v41 = vpop.f32.mrb[9].mxu0 }
  0xed   :  { %238 = vxpose.xlu0.b32.cont [5/16] (narrow) %v179_v35, 64  ;;  %v5492_v42 = vpop.f32.mrb[10].mxu0 }
  0xee   :  { %5528 = vmatpush3.bf16.msra.mxu0 %v6679_v37  ;;  %v6688_v43 = vpack.c.bf16 %v5492_v42, %v5491_v40  ;;  %v198_v44 = vpop.f32.mrb[11].mxu0 }
  0xef   :  { %v6690_v45 = vpack.c.bf16 %v198_v44, %v195_v41 }
  0xf0   :  { %10851 = vst [vmem:[#allocation9_spill] sm:$0xff] %v6688_v43 }
  0xf1   :  { %10852 = vst [vmem:[#allocation10_spill] sm:$0xff] %v6690_v45  ;;  %239 = vxpose.xlu0.b32.cont [6/16] (narrow) %v182_v38, 64  ;;  %5529 = vmatprep.subr.bf16.mxu0 %v6690_v45 }
  0xf2   :  { %5530 = vmatpush3.bf16.msra.mxu0 %v6690_v45 }
  0xf3   :  { %5531 = vmatprep.subr.bf16.mxu0 %v6688_v43  ;;  %v5495_v46 = vpop.f32.mrb[12].mxu0 }
  0xf4   :  { %v211_v47 = vpop.f32.mrb[13].mxu0 }
  0xf5   :  { %240 = vxpose.xlu0.b32.cont [7/16] (narrow) %v5487_v34, 64  ;;  %v5496_v48 = vpop.f32.mrb[14].mxu0  ;;  %v631_v34 = vsub.s32 4, %v6723_v5 }
  0xf6   :  { %5532 = vmatpush3.bf16.msra.mxu0 %v6688_v43  ;;  %v6696_v49 = vpack.c.bf16 %v5496_v48, %v5495_v46  ;;  %v214_v50 = vpop.f32.mrb[15].mxu0 }
  0xf7   :  { %v6698_v51 = vpack.c.bf16 %v214_v50, %v211_v47 }
  0xf8   :  { %10853 = vst [vmem:[#allocation11_spill] sm:$0xff] %v6696_v49 }
  0xf9   :  { %10854 = vst [vmem:[#allocation12_spill] sm:$0xff] %v6698_v51  ;;  %241 = vxpose.xlu0.b32.cont [8/16] (narrow) %v5488_v36, 64  ;;  %5533 = vmatprep.subr.bf16.mxu0 %v6698_v51  ;;  %v698_v36 = vsub.s32 5, %v6723_v5 }
  0xfa   :  { %5534 = vmatpush3.bf16.msra.mxu0 %v6698_v51 }
  0xfb   :  { %5535 = vmatprep.subr.bf16.mxu0 %v6696_v49 }
  0xfd   :  { %242 = vxpose.xlu0.b32.cont [9/16] (narrow) %v195_v41, 64 }
  0xfe   :  { %5536 = vmatpush3.bf16.msra.mxu0 %v6696_v49 }
 0x101   :  { %243 = vxpose.xlu0.b32.cont [10/16] (narrow) %v198_v44, 64 }
 0x105   :  { %244 = vxpose.xlu0.b32.cont [11/16] (narrow) %v5491_v40, 64 }
 0x109   :  { %245 = vxpose.xlu0.b32.cont [12/16] (narrow) %v5492_v42, 64 }
 0x10d   :  { %246 = vxpose.xlu0.b32.cont [13/16] (narrow) %v211_v47, 64 }
 0x111   :  { %247 = vxpose.xlu0.b32.cont [14/16] (narrow) %v214_v50, 64 }
 0x115   :  { %248 = vxpose.xlu0.b32.cont [15/16] (narrow) %v5495_v46, 64 }
 0x119   :  { %249 = vxpose.xlu0.b32.end [16/16] (narrow) %v5496_v48, 64 }
 0x15d   :  { %v250_v52 = vpop.trf.xlu0 }
 0x161   :  { %v251_v53 = vpop.trf.xlu0 }
 0x162   :  { %v266_v54 = vpack.c.bf16 %v251_v53, %v250_v52 }
 0x164   :  { %5498 = vmatpush3.bf16.msra.mxu1 %v266_v54 }
 0x165   :  { %v252_v55 = vpop.trf.xlu0  ;;  %5499 = vmatprep.subr.bf16.mxu1 %v10616_v33 }
 0x169   :  { %v253_v56 = vpop.trf.xlu0 }
 0x16a   :  { %v267_v57 = vpack.c.bf16 %v253_v56, %v252_v55 }
 0x16c   :  { %5500 = vmatpush3.bf16.msra.mxu1 %v267_v57 }
 0x16d   :  { %v254_v58 = vpop.trf.xlu0  ;;  %5501 = vmatprep.subr.bf16.mxu1 %v10616_v33 }
 0x171   :  { %v255_v59 = vpop.trf.xlu0 }
 0x172   :  { %v268_v60 = vpack.c.bf16 %v255_v59, %v254_v58 }
 0x174   :  { %5502 = vmatpush3.bf16.msra.mxu1 %v268_v60 }
 0x175   :  { %v256_v61 = vpop.trf.xlu0  ;;  %5503 = vmatprep.subr.bf16.mxu1 %v10616_v33 }
 0x179   :  { %v257_v63 = vpop.trf.xlu0 }
 0x17a   :  { %v269_v0 = vpack.c.bf16 %v257_v63, %v256_v61 }
 0x17c   :  { %5504 = vmatpush3.bf16.msra.mxu1 %v269_v0 }
 0x17d   :  { %5509 = vmatprep.subr.bf16.mxu1 %v10616_v33 }
 0x17f   :  { %5506 = vmatmul.mubr.msk.bf16.vlgmr.msra.gmra.mrb[0].mxu1 %vm10658_vm3, %v271_v1 }
 0x180   :  { %5510 = vmatpush3.bf16.msra.mxu1 %v266_v54  ;;  %5517 = vmatprep.mubr.msk.bf16.mxu1 %vm10666_vm2, %v10616_v33  ;;  %v765_v54 = vsub.s32 6, %v6723_v5 }
 0x181   :  { %5511 = vmatprep.subr.bf16.mxu1 %v10616_v33 }
 0x184   :  { %5512 = vmatpush3.bf16.msra.mxu1 %v267_v57 }
 0x185   :  { %5513 = vmatprep.subr.bf16.mxu1 %v10616_v33 }
 0x188   :  { %5514 = vmatpush3.bf16.msra.mxu1 %v268_v60 }
 0x189   :  { %5515 = vmatprep.subr.bf16.mxu1 %v10616_v33 }
 0x18c   :  { %5516 = vmatpush3.bf16.msra.mxu1 %v269_v0 }
 0x18f   :  { %5518 = vmatmul.mubr.msk.bf16.vlgmr.msra.gmra.mrb[4].mxu1 %vm10658_vm3, %v317_v3 }
 0x252   :  { %v6729_v8 = vpop.f32.mrb[0].mxu1 }
 0x253   :  { %v364_v9 = vrot.slane %v6729_v8, %v6726_v6  ;;  %v6734_v10 = vrot.slane %v6729_v8, %v430_v7  ;;  %v5507_v11 = vpop.f32.mrb[1].mxu1  ;;  %v6741_v17 = vrot.slane %v6729_v8, %v497_v14  ;;  %v6767_v31 = vrot.slane %v6729_v8, %v564_v29 }
 0x254   :  { %v313_v12 = vpop.f32.mrb[2].mxu1  ;;  %v6782_v35 = vrot.slane %v6729_v8, %v631_v34  ;;  %v6802_v38 = vrot.slane %v6729_v8, %v698_v36  ;;  %v6846_v57 = vrot.slane %v6729_v8, %v765_v54  ;;  %v832_v11 = vsub.s32 7, %v6723_v5 }
 0x255   :  { %433 = vbcast.lane.b32.xlu0 %v6734_v10, 256  ;;  %366 = vbcast.lane.b32.xlu1 %v364_v9, 256  ;;  %v5508_v13 = vpop.f32.mrb[3].mxu1 }
 0x256   :  { %v6898_v14 = vrot.slane %v6729_v8, %v832_v11 }
 0x259   :  { %481 = vbcast.lane.b32.xlu0 %v6734_v10, 352  ;;  %370 = vbcast.lane.b32.xlu1 %v364_v9, 264 }
 0x25d   :  { %489 = vbcast.lane.b32.xlu0 %v6734_v10, 368  ;;  %374 = vbcast.lane.b32.xlu1 %v364_v9, 272 }
 0x261   :  { %500 = vbcast.lane.b32.xlu0 %v6741_v17, 256  ;;  %378 = vbcast.lane.b32.xlu1 %v364_v9, 280 }
 0x262   :  { %v6744_v19 = vpop.f32.mrb[4].mxu1 }
 0x263   :  { %v898_v20 = vcombine.high %v6744_v19, %v6744_v19  ;;  %v5519_v22 = vpop.f32.mrb[5].mxu1  ;;  %v905_v43 = vrot.slane %v6744_v19, %v6749_v21 }
 0x264   :  { %v358_v23 = vpop.f32.mrb[6].mxu1 }
 0x265   :  { %508 = vbcast.lane.b32.xlu0 %v6741_v17, 272  ;;  %382 = vbcast.lane.b32.xlu1 %v364_v9, 288  ;;  %v912_v24 = vrot.slane %v898_v20, %v6749_v21  ;;  %v5520_v25 = vpop.f32.mrb[7].mxu1  ;;  %v6963_v51 = vrot.slane %v905_v43, %v6749_v21 }
 0x267   :  { %v914_v26 = vcombine.high %v912_v24, %v912_v24  ;;  %v6754_v27 = vrot.slane %v912_v24, %v6749_v21  ;;  %v6972_v39 = vrot.slane %v6963_v51, %v6726_v6 }
 0x269   :  { %516 = vbcast.lane.b32.xlu0 %v6741_v17, 288  ;;  %386 = vbcast.lane.b32.xlu1 %v364_v9, 296  ;;  %v6758_v28 = vrot.slane %v914_v26, %v6749_v21 }
 0x26d   :  { %524 = vbcast.lane.b32.xlu0 %v6741_v17, 304  ;;  %390 = vbcast.lane.b32.xlu1 %v364_v9, 304 }
 0x271   :  { %532 = vbcast.lane.b32.xlu0 %v6741_v17, 320  ;;  %394 = vbcast.lane.b32.xlu1 %v364_v9, 312 }
 0x275   :  { %540 = vbcast.lane.b32.xlu0 %v6741_v17, 336  ;;  %398 = vbcast.lane.b32.xlu1 %v364_v9, 320 }
 0x279   :  { %548 = vbcast.lane.b32.xlu0 %v6741_v17, 352  ;;  %402 = vbcast.lane.b32.xlu1 %v364_v9, 328 }
 0x27d   :  { %556 = vbcast.lane.b32.xlu0 %v6741_v17, 368  ;;  %406 = vbcast.lane.b32.xlu1 %v364_v9, 336 }
 0x281   :  { %567 = vbcast.lane.b32.xlu0 %v6767_v31, 256  ;;  %410 = vbcast.lane.b32.xlu1 %v364_v9, 344 }
 0x285   :  { %575 = vbcast.lane.b32.xlu0 %v6767_v31, 272  ;;  %414 = vbcast.lane.b32.xlu1 %v364_v9, 352 }
 0x289   :  { %583 = vbcast.lane.b32.xlu0 %v6767_v31, 288  ;;  %418 = vbcast.lane.b32.xlu1 %v364_v9, 360 }
 0x28d   :  { %591 = vbcast.lane.b32.xlu0 %v6767_v31, 304  ;;  %422 = vbcast.lane.b32.xlu1 %v364_v9, 368 }
 0x291   :  { %599 = vbcast.lane.b32.xlu0 %v6767_v31, 320  ;;  %426 = vbcast.lane.b32.xlu1 %v364_v9, 376 }
 0x295   :  { %607 = vbcast.lane.b32.xlu0 %v6767_v31, 336  ;;  %437 = vbcast.lane.b32.xlu1 %v6734_v10, 264 }
 0x299   :  { %615 = vbcast.lane.b32.xlu0 %v6767_v31, 352  ;;  %441 = vbcast.lane.b32.xlu1 %v6734_v10, 272 }
 0x29d   :  { %623 = vbcast.lane.b32.xlu0 %v6767_v31, 368  ;;  %445 = vbcast.lane.b32.xlu1 %v6734_v10, 280 }
 0x2a1   :  { %634 = vbcast.lane.b32.xlu0 %v6782_v35, 256  ;;  %449 = vbcast.lane.b32.xlu1 %v6734_v10, 288 }
 0x2a5   :  { %642 = vbcast.lane.b32.xlu0 %v6782_v35, 272  ;;  %453 = vbcast.lane.b32.xlu1 %v6734_v10, 296 }
 0x2a9   :  { %650 = vbcast.lane.b32.xlu0 %v6782_v35, 288  ;;  %457 = vbcast.lane.b32.xlu1 %v6734_v10, 304 }
 0x2ad   :  { %658 = vbcast.lane.b32.xlu0 %v6782_v35, 304  ;;  %461 = vbcast.lane.b32.xlu1 %v6734_v10, 312 }
 0x2b1   :  { %666 = vbcast.lane.b32.xlu0 %v6782_v35, 320  ;;  %465 = vbcast.lane.b32.xlu1 %v6734_v10, 320 }
 0x2b5   :  { %674 = vbcast.lane.b32.xlu0 %v6782_v35, 336  ;;  %469 = vbcast.lane.b32.xlu1 %v6734_v10, 328 }
 0x2b9   :  { %682 = vbcast.lane.b32.xlu0 %v6782_v35, 352  ;;  %473 = vbcast.lane.b32.xlu1 %v6734_v10, 336 }
 0x2bd   :  { %690 = vbcast.lane.b32.xlu0 %v6782_v35, 368  ;;  %477 = vbcast.lane.b32.xlu1 %v6734_v10, 344 }
 0x2c1   :  { %701 = vbcast.lane.b32.xlu0 %v6802_v38, 256  ;;  %485 = vbcast.lane.b32.xlu1 %v6734_v10, 360 }
 0x2c5   :  { %709 = vbcast.lane.b32.xlu0 %v6802_v38, 272  ;;  %493 = vbcast.lane.b32.xlu1 %v6734_v10, 376 }
 0x2c7   :  { %v6808_v40 = vpop.permute.xlu0 %433  ;;  %v6810_v41 = vpop.permute.xlu1 %366 }
 0x2c9   :  { %717 = vbcast.lane.b32.xlu0 %v6802_v38, 288  ;;  %504 = vbcast.lane.b32.xlu1 %v6741_v17, 264 }
 0x2cb   :  { %v6814_v42 = vpop.permute.xlu0 %481  ;;  %v6816_v44 = vpop.permute.xlu1 %370 }
 0x2cd   :  { %725 = vbcast.lane.b32.xlu0 %v6802_v38, 304  ;;  %512 = vbcast.lane.b32.xlu1 %v6741_v17, 280 }
 0x2cf   :  { %v6820_v46 = vpop.permute.xlu0 %489  ;;  %v6822_v47 = vpop.permute.xlu1 %374 }
 0x2d1   :  { %733 = vbcast.lane.b32.xlu0 %v6802_v38, 320  ;;  %520 = vbcast.lane.b32.xlu1 %v6741_v17, 296 }
 0x2d3   :  { %v6826_v48 = vpop.permute.xlu0 %500  ;;  %v6828_v50 = vpop.permute.xlu1 %378 }
 0x2d5   :  { %741 = vbcast.lane.b32.xlu0 %v6802_v38, 336  ;;  %528 = vbcast.lane.b32.xlu1 %v6741_v17, 312 }
 0x2d7   :  { %v6832_v52 = vpop.permute.xlu0 %508  ;;  %v6834_v53 = vpop.permute.xlu1 %382 }
 0x2d9   :  { %749 = vbcast.lane.b32.xlu0 %v6802_v38, 352  ;;  %536 = vbcast.lane.b32.xlu1 %v6741_v17, 328 }
 0x2db   :  { %v6839_v55 = vpop.permute.xlu0 %516  ;;  %v6841_v56 = vpop.permute.xlu1 %386 }
 0x2dd   :  { %757 = vbcast.lane.b32.xlu0 %v6802_v38, 368  ;;  %544 = vbcast.lane.b32.xlu1 %v6741_v17, 344 }
 0x2df   :  { %v6848_v58 = vpop.permute.xlu0 %524  ;;  %v6850_v59 = vpop.permute.xlu1 %390 }
 0x2e1   :  { %768 = vbcast.lane.b32.xlu0 %v6846_v57, 256  ;;  %552 = vbcast.lane.b32.xlu1 %v6741_v17, 360 }
 0x2e3   :  { %v6854_v60 = vpop.permute.xlu0 %532  ;;  %v6856_v61 = vpop.permute.xlu1 %394 }
 0x2e5   :  { %776 = vbcast.lane.b32.xlu0 %v6846_v57, 272  ;;  %560 = vbcast.lane.b32.xlu1 %v6741_v17, 376 }
 0x2e7   :  { %v6860_v62 = vpop.permute.xlu0 %540  ;;  %v6862_v63 = vpop.permute.xlu1 %398 }
 0x2e9   :  { %784 = vbcast.lane.b32.xlu0 %v6846_v57, 288  ;;  %571 = vbcast.lane.b32.xlu1 %v6767_v31, 264 }
 0x2eb   :  { %v6866_v0 = vpop.permute.xlu0 %548  ;;  %v6868_v1 = vpop.permute.xlu1 %402 }
 0x2ed   :  { %792 = vbcast.lane.b32.xlu0 %v6846_v57, 304  ;;  %579 = vbcast.lane.b32.xlu1 %v6767_v31, 280 }
 0x2ef   :  { %v6872_v2 = vpop.permute.xlu0 %556  ;;  %v6874_v3 = vpop.permute.xlu1 %406 }
 0x2f1   :  { %800 = vbcast.lane.b32.xlu0 %v6846_v57, 320  ;;  %587 = vbcast.lane.b32.xlu1 %v6767_v31, 296 }
 0x2f3   :  { %v6878_v4 = vpop.permute.xlu0 %567  ;;  %v6880_v7 = vpop.permute.xlu1 %410 }
 0x2f5   :  { %808 = vbcast.lane.b32.xlu0 %v6846_v57, 336  ;;  %595 = vbcast.lane.b32.xlu1 %v6767_v31, 312 }
 0x2f7   :  { %v6884_v9 = vpop.permute.xlu0 %575  ;;  %v6886_v10 = vpop.permute.xlu1 %414 }
 0x2f9   :  { %816 = vbcast.lane.b32.xlu0 %v6846_v57, 352  ;;  %603 = vbcast.lane.b32.xlu1 %v6767_v31, 328 }
 0x2fb   :  { %v6891_v12 = vpop.permute.xlu0 %583  ;;  %v6893_v13 = vpop.permute.xlu1 %418 }
 0x2fc   :  { %10856 = vst [vmem:[#allocation14_spill] sm:$0xff] %v6893_v13 }
 0x2fd   :  { %824 = vbcast.lane.b32.xlu0 %v6846_v57, 368  ;;  %611 = vbcast.lane.b32.xlu1 %v6767_v31, 344 }
 0x2ff   :  { %v6900_v15 = vpop.permute.xlu0 %591  ;;  %v6902_v16 = vpop.permute.xlu1 %422 }
 0x301   :  { %835 = vbcast.lane.b32.xlu0 %v6898_v14, 256  ;;  %619 = vbcast.lane.b32.xlu1 %v6767_v31, 360 }
 0x303   :  { %v6906_v5 = vpop.permute.xlu0 %599  ;;  %v6908_v17 = vpop.permute.xlu1 %426 }
 0x304   :  { %10857 = vst [vmem:[#allocation15_spill] sm:$0xff] %v6908_v17  ;;  %v989_v17 = vadd.f32 %v6972_v39, %v6822_v47  ;;  %v990_v47 = vadd.f32 %v6972_v39, %v6828_v50 }
 0x305   :  { %843 = vbcast.lane.b32.xlu0 %v6898_v14, 272  ;;  %627 = vbcast.lane.b32.xlu1 %v6767_v31, 376 }
 0x306   :  { %vm1117_vm6 = vcmp.gt.f32.partialorder %v989_v17, 0.0  ;;  %vm1118_vm8 = vcmp.gt.f32.partialorder %v990_v47, 0.0 }
 0x307   :  { %v6912_v18 = vpop.permute.xlu0 %607  ;;  %v6914_v8 = vpop.permute.xlu1 %437 }
 0x308   :  { %10858 = vst [vmem:[#allocation16_spill] sm:$0xff] %v6912_v18  ;;  %v987_v18 = vadd.f32 %v6972_v39, %v6810_v41 }
 0x309   :  { %851 = vbcast.lane.b32.xlu0 %v6898_v14, 288  ;;  %638 = vbcast.lane.b32.xlu1 %v6782_v35, 264 }
 0x30a   :  { %vm1115_vm4 = vcmp.gt.f32.partialorder %v987_v18, 0.0 }
 0x30b   :  { %v6918_v20 = vpop.permute.xlu0 %615  ;;  %v6920_v22 = vpop.permute.xlu1 %441 }
 0x30d   :  { %859 = vbcast.lane.b32.xlu0 %v6898_v14, 304  ;;  %646 = vbcast.lane.b32.xlu1 %v6782_v35, 280 }
 0x30f   :  { %v6924_v23 = vpop.permute.xlu0 %623  ;;  %v6926_v24 = vpop.permute.xlu1 %445 }
 0x311   :  { %867 = vbcast.lane.b32.xlu0 %v6898_v14, 320  ;;  %654 = vbcast.lane.b32.xlu1 %v6782_v35, 296 }
 0x313   :  { %v6930_v25 = vpop.permute.xlu0 %634  ;;  %v6932_v26 = vpop.permute.xlu1 %449 }
 0x315   :  { %875 = vbcast.lane.b32.xlu0 %v6898_v14, 336  ;;  %662 = vbcast.lane.b32.xlu1 %v6782_v35, 312 }
 0x317   :  { %v6936_v29 = vpop.permute.xlu0 %642  ;;  %v6938_v31 = vpop.permute.xlu1 %453 }
 0x318   :  { %10859 = vst [vmem:[#allocation17_spill] sm:$0xff] %v6936_v29  ;;  %v913_v29 = vcombine.high %v905_v43, %v905_v43 }
 0x319   :  { %883 = vbcast.lane.b32.xlu0 %v6898_v14, 352  ;;  %670 = vbcast.lane.b32.xlu1 %v6782_v35, 328 }
 0x31a   :  { %v6985_v32 = vrot.slane %v913_v29, %v6749_v21  ;;  %v1245_v29 = vmul.f32 0.2, %v989_v17 }
 0x31b   :  { %v6942_v34 = vpop.permute.xlu0 %650  ;;  %v6944_v36 = vpop.permute.xlu1 %457 }
 0x31c   :  { %10860 = vst [vmem:[#allocation18_spill] sm:$0xff] %v6942_v34  ;;  %v7002_v21 = vrot.slane %v6985_v32, %v6726_v6 }
 0x31d   :  { %891 = vbcast.lane.b32.xlu0 %v6898_v14, 368  ;;  %678 = vbcast.lane.b32.xlu1 %v6782_v35, 344 }
 0x31e   :  { %v1003_v50 = vadd.f32 %v7002_v21, %v6808_v40 }
 0x31f   :  { %v6948_v54 = vpop.permute.xlu0 %658  ;;  %v6950_v11 = vpop.permute.xlu1 %461 }
 0x320   :  { %10861 = vst [vmem:[#allocation19_spill] sm:$0xff] %v6948_v54  ;;  %v1259_v40 = vmul.f32 0.2, %v1003_v50  ;;  %vm1131_vm10 = vcmp.gt.f32.partialorder %v1003_v50, 0.0 }
 0x321   :  { %686 = vbcast.lane.b32.xlu1 %v6782_v35, 360 }
 0x323   :  { %v6953_v33 = vpop.permute.xlu0 %666  ;;  %v6955_v49 = vpop.permute.xlu1 %465 }
 0x324   :  { %10862 = vst [vmem:[#allocation20_spill] sm:$0xff] %v6953_v33  ;;  %v1243_v33 = vmul.f32 0.2, %v987_v18 }
 0x325   :  { %694 = vbcast.lane.b32.xlu1 %v6782_v35, 376 }
 0x327   :  { %v6960_v37 = vpop.permute.xlu1 %469  ;;  %v6965_v45 = vpop.permute.xlu0 %674 }
 0x328   :  { %10863 = vst [vmem:[#allocation21_spill] sm:$0xff] %v6965_v45 }
 0x329   :  { %705 = vbcast.lane.b32.xlu1 %v6802_v38, 264 }
 0x32b   :  { %v6968_v30 = vpop.permute.xlu1 %473  ;;  %v6975_v35 = vpop.permute.xlu0 %682 }
 0x32c   :  { %10864 = vst [vmem:[#allocation22_spill] sm:$0xff] %v6975_v35  ;;  %v6992_v35 = vld [vmem:[%s10609_s1] sm:$0xff] }
 0x32d   :  { %713 = vbcast.lane.b32.xlu1 %v6802_v38, 280  ;;  %10867 = vst [vmem:[#allocation25_spill] sm:$0xff] %v6992_v35  ;;  %vm10683_vm5 = vcmp.gt.f32.partialorder %v6992_v35, 0.0 }
 0x32f   :  { %v6977_v19 = vpop.permute.xlu1 %477  ;;  %v6994_v43 = vpop.permute.xlu0 %690 }
 0x330   :  { %10865 = vst [vmem:[#allocation23_spill] sm:$0xff] %v6977_v19  ;;  %10868 = vst [vmem:[#allocation26_spill] sm:$0xff] %v6994_v43  ;;  %v7010_v43 = vld [vmem:[%s10609_s1 + $0x10] sm:$0xff]  ;;  %v7028_v19 = vld [vmem:[%s10609_s1 + $0x18] sm:$0xff] }
 0x331   :  { %721 = vbcast.lane.b32.xlu1 %v6802_v38, 296  ;;  %10870 = vst [vmem:[#allocation28_spill] sm:$0xff] %v7010_v43  ;;  %vm10668_vm7 = vcmp.gt.f32.partialorder %v7010_v43, 0.0  ;;  %10873 = vst [vmem:[#allocation31_spill] sm:$0xff] %v7028_v19  ;;  %vm77_vm9 = vcmp.gt.f32.partialorder %v7028_v19, 0.0 }
 0x333   :  { %v6982_v45 = vpop.permute.xlu1 %485 }
 0x334   :  { %10866 = vst [vmem:[#allocation24_spill] sm:$0xff] %v6982_v45  ;;  %v1371_v45 = vsel %vm1115_vm4, %v987_v18, %v1243_v33  ;;  %v1246_v33 = vmul.f32 0.2, %v990_v47  ;;  %v1373_v18 = vsel %vm1117_vm6, %v989_v17, %v1245_v29 }
 0x335   :  { %729 = vbcast.lane.b32.xlu1 %v6802_v38, 312  ;;  %v7018_v54 = vsel %vm10683_vm5, %v1371_v45, -1e+30  ;;  %v7034_v45 = vsel %vm10668_vm7, %v1373_v18, -1e+30 }
 0x336   :  { %10872 = vst [vmem:[#allocation30_spill] sm:$0xff] %v7018_v54  ;;  %10875 = vst [vmem:[#allocation33_spill] sm:$0xff] %v7034_v45  ;;  %v1374_v17 = vsel %vm1118_vm8, %v990_v47, %v1246_v33 }
 0x337   :  { %v6997_v41 = vpop.permute.xlu1 %493  ;;  %v7047_v18 = vsel %vm77_vm9, %v1374_v17, -1e+30 }
 0x338   :  { %10869 = vst [vmem:[#allocation27_spill] sm:$0xff] %v6997_v41  ;;  %v7012_v41 = vpop.permute.xlu0 %701  ;;  %10878 = vst [vmem:[#allocation36_spill] sm:$0xff] %v7047_v18 }
 0x339   :  { %737 = vbcast.lane.b32.xlu1 %v6802_v38, 328 }
 0x33b   :  { %v7014_v13 = vpop.permute.xlu1 %504 }
 0x33c   :  { %10871 = vst [vmem:[#allocation29_spill] sm:$0xff] %v7014_v13  ;;  %1659 = vmax.xlane.f32.xlu0 %v7018_v54  ;;  %v1005_v54 = vadd.f32 %v7002_v21, %v6920_v22  ;;  %v7040_v29 = vpop.permute.xlu0 %709 }
 0x33d   :  { %745 = vbcast.lane.b32.xlu1 %v6802_v38, 344  ;;  %10876 = vst [vmem:[#allocation34_spill] sm:$0xff] %v7040_v29 }
 0x33e   :  { %v1261_v22 = vmul.f32 0.2, %v1005_v54  ;;  %vm1133_vm11 = vcmp.gt.f32.partialorder %v1005_v54, 0.0 }
 0x33f   :  { %v7030_v13 = vpop.permute.xlu1 %512 }
 0x340   :  { %10874 = vst [vmem:[#allocation32_spill] sm:$0xff] %v7030_v13  ;;  %1663 = vmax.xlane.f32.xlu0 %v7034_v45  ;;  %v991_v13 = vadd.f32 %v6972_v39, %v6834_v53  ;;  %v1387_v45 = vsel %vm1131_vm10, %v1003_v50, %v1259_v40  ;;  %v7053_v47 = vpop.permute.xlu0 %717  ;;  %v1389_v53 = vsel %vm1133_vm11, %v1005_v54, %v1261_v22 }
 0x341   :  { %753 = vbcast.lane.b32.xlu1 %v6802_v38, 360  ;;  %v7059_v29 = vsel %vm10683_vm5, %v1387_v45, -1e+30  ;;  %v7074_v45 = vsel %vm10668_vm7, %v1389_v53, -1e+30 }
 0x342   :  { %10880 = vst [vmem:[#allocation38_spill] sm:$0xff] %v7059_v29  ;;  %v1247_v17 = vmul.f32 0.2, %v991_v13  ;;  %vm1119_vm12 = vcmp.gt.f32.partialorder %v991_v13, 0.0  ;;  %10883 = vst [vmem:[#allocation41_spill] sm:$0xff] %v7074_v45 }
 0x343   :  { %v7043_v34 = vpop.permute.xlu1 %520 }
 0x344   :  { %10877 = vst [vmem:[#allocation35_spill] sm:$0xff] %v7043_v34  ;;  %1665 = vmax.xlane.f32.xlu0 %v7047_v18  ;;  %v993_v34 = vadd.f32 %v6972_v39, %v6850_v59  ;;  %v1007_v59 = vadd.f32 %v7002_v21, %v6932_v26  ;;  %v1375_v54 = vsel %vm1119_vm12, %v991_v13, %v1247_v17  ;;  %v7080_v22 = vpop.permute.xlu0 %725  ;;  %v7086_v18 = vld [vmem:[%s10609_s1 + $0x30] sm:$0xff] }
 0x345   :  { %761 = vbcast.lane.b32.xlu1 %v6802_v38, 376  ;;  %v7068_v38 = vld [vmem:[%s10609_s1 + $0x20] sm:$0xff]  ;;  %10884 = vst [vmem:[#allocation42_spill] sm:$0xff] %v7086_v18  ;;  %v1009_v13 = vadd.f32 %v7002_v21, %v6944_v36  ;;  %vm10846_vm15 = vcmp.gt.f32.partialorder %v7086_v18, 0.0 }
 0x346   :  { %10881 = vst [vmem:[#allocation39_spill] sm:$0xff] %v7068_v38  ;;  %v1249_v40 = vmul.f32 0.2, %v993_v34  ;;  %vm78_vm13 = vcmp.gt.f32.partialorder %v7068_v38, 0.0  ;;  %vm1121_vm14 = vcmp.gt.f32.partialorder %v993_v34, 0.0  ;;  %vm1135_vm0 = vcmp.gt.f32.partialorder %v1007_v59, 0.0 }
 0x347   :  { %v7055_v33 = vpop.permute.xlu1 %528  ;;  %v7092_v26 = vsel %vm78_vm13, %v1375_v54, -1e+30  ;;  %v1265_v36 = vmul.f32 0.2, %v1009_v13  ;;  %vm1137_vm4 = vcmp.gt.f32.partialorder %v1009_v13, 0.0 }
 0x348   :  { %10879 = vst [vmem:[#allocation37_spill] sm:$0xff] %v7055_v33  ;;  %1691 = vmax.xlane.f32.xlu0 %v7059_v29  ;;  %10886 = vst [vmem:[#allocation44_spill] sm:$0xff] %v7092_v26  ;;  %v1377_v17 = vsel %vm1121_vm14, %v993_v34, %v1249_v40  ;;  %v7099_v29 = vpop.permute.xlu0 %733 }
 0x349   :  { %772 = vbcast.lane.b32.xlu1 %v6846_v57, 264  ;;  %v7105_v54 = vsel %vm10846_vm15, %v1377_v17, -1e+30  ;;  %v997_v17 = vadd.f32 %v6972_v39, %v6874_v3 }
 0x34a   :  { %10888 = vst [vmem:[#allocation46_spill] sm:$0xff] %v7105_v54 }
 0x34b   :  { %v7070_v50 = vpop.permute.xlu1 %536  ;;  %v1253_v3 = vmul.f32 0.2, %v997_v17  ;;  %vm1125_vm8 = vcmp.gt.f32.partialorder %v997_v17, 0.0 }
 0x34c   :  { %10882 = vst [vmem:[#allocation40_spill] sm:$0xff] %v7070_v50  ;;  %1695 = vmax.xlane.f32.xlu0 %v7074_v45  ;;  %v1263_v45 = vmul.f32 0.2, %v1007_v59  ;;  %v7120_v33 = vpop.permute.xlu0 %741 }
 0x34d   :  { %780 = vbcast.lane.b32.xlu1 %v6846_v57, 280  ;;  %10891 = vst [vmem:[#allocation49_spill] sm:$0xff] %v7120_v33  ;;  %v999_v33 = vadd.f32 %v6972_v39, %v6886_v10 }
 0x34f   :  { %v7088_v53 = vpop.permute.xlu1 %544 }
 0x350   :  { %10885 = vst [vmem:[#allocation43_spill] sm:$0xff] %v7088_v53  ;;  %1667 = vmax.xlane.f32.xlu0 %v7092_v26  ;;  %v995_v53 = vadd.f32 %v6972_v39, %v6862_v63  ;;  %v1391_v26 = vsel %vm1135_vm0, %v1007_v59, %v1263_v45  ;;  %v1393_v63 = vsel %vm1137_vm4, %v1009_v13, %v1265_v36  ;;  %vm1127_vm0 = vcmp.gt.f32.partialorder %v999_v33, 0.0 }
 0x351   :  { %788 = vbcast.lane.b32.xlu1 %v6846_v57, 296  ;;  %v7115_v40 = vsel %vm78_vm13, %v1391_v26, -1e+30  ;;  %v7127_v59 = vsel %vm10846_vm15, %v1393_v63, -1e+30  ;;  %v7132_v26 = vld [vmem:[%s10609_s1 + $0x40] sm:$0xff]  ;;  %v1011_v13 = vadd.f32 %v7002_v21, %v6955_v49 }
 0x352   :  { %10890 = vst [vmem:[#allocation48_spill] sm:$0xff] %v7115_v40  ;;  %vm1123_vm6 = vcmp.gt.f32.partialorder %v995_v53, 0.0  ;;  %10892 = vst [vmem:[#allocation50_spill] sm:$0xff] %v7127_v59  ;;  %vm10844_vm10 = vcmp.gt.f32.partialorder %v7132_v26, 0.0  ;;  %v7150_v49 = vld [vmem:[%s10609_s1 + $0x50] sm:$0xff] }
 0x353   :  { %v7101_v50 = vpop.permute.xlu1 %552  ;;  %10893 = vst [vmem:[#allocation51_spill] sm:$0xff] %v7132_v26  ;;  %10896 = vst [vmem:[#allocation54_spill] sm:$0xff] %v7150_v49  ;;  %vm1139_vm11 = vcmp.gt.f32.partialorder %v1011_v13, 0.0  ;;  %vm10842_vm12 = vcmp.gt.f32.partialorder %v7150_v49, 0.0 }
 0x354   :  { %10887 = vst [vmem:[#allocation45_spill] sm:$0xff] %v7101_v50  ;;  %1671 = vmax.xlane.f32.xlu0 %v7105_v54  ;;  %v1251_v50 = vmul.f32 0.2, %v995_v53 }
 0x355   :  { %796 = vbcast.lane.b32.xlu1 %v6846_v57, 312 }
 0x356   :  { %v1379_v36 = vsel %vm1123_vm6, %v995_v53, %v1251_v50  ;;  %v1013_v50 = vadd.f32 %v7002_v21, %v6968_v30  ;;  %v1381_v53 = vsel %vm1125_vm8, %v997_v17, %v1253_v3 }
 0x357   :  { %v7111_v34 = vpop.permute.xlu1 %560  ;;  %v7145_v54 = vsel %vm10844_vm10, %v1379_v36, -1e+30  ;;  %v7161_v36 = vsel %vm10842_vm12, %v1381_v53, -1e+30  ;;  %v1255_v53 = vmul.f32 0.2, %v999_v33 }
 0x358   :  { %10889 = vst [vmem:[#allocation47_spill] sm:$0xff] %v7111_v34  ;;  %1699 = vmax.xlane.f32.xlu0 %v7115_v40  ;;  %v7139_v40 = vpop.permute.xlu0 %749  ;;  %10895 = vst [vmem:[#allocation53_spill] sm:$0xff] %v7145_v54  ;;  %v1269_v34 = vmul.f32 0.2, %v1013_v50  ;;  %vm1141_vm14 = vcmp.gt.f32.partialorder %v1013_v50, 0.0 }
 0x359   :  { %804 = vbcast.lane.b32.xlu1 %v6846_v57, 328  ;;  %10894 = vst [vmem:[#allocation52_spill] sm:$0xff] %v7139_v40  ;;  %10898 = vst [vmem:[#allocation56_spill] sm:$0xff] %v7161_v36 }
 0x35a   :  { %v1397_v10 = vsel %vm1141_vm14, %v1013_v50, %v1269_v34  ;;  %v1015_v34 = vadd.f32 %v7002_v21, %v6814_v42 }
 0x35b   :  { %v7123_v45 = vpop.permute.xlu1 %571 }
 0x35c   :  { %1703 = vmax.xlane.f32.xlu0 %v7127_v59  ;;  %v1267_v59 = vmul.f32 0.2, %v1011_v13  ;;  %vm1143_vm8 = vcmp.gt.f32.partialorder %v1015_v34, 0.0 }
 0x35d   :  { %812 = vbcast.lane.b32.xlu1 %v6846_v57, 344 }
 0x35e   :  { %v1395_v30 = vsel %vm1139_vm11, %v1011_v13, %v1267_v59  ;;  %v7185_v13 = vsel %vm10842_vm12, %v1397_v10, -1e+30 }
 0x35f   :  { %v7141_v63 = vpop.permute.xlu1 %579  ;;  %v7173_v3 = vsel %vm10844_vm10, %v1395_v30, -1e+30  ;;  %10902 = vst [vmem:[#allocation60_spill] sm:$0xff] %v7185_v13  ;;  %v7190_v30 = vld [vmem:[%s10609_s1 + $0x60] sm:$0xff] }
 0x360   :  { %1675 = vmax.xlane.f32.xlu0 %v7145_v54  ;;  %v7166_v54 = vpop.permute.xlu0 %757  ;;  %10900 = vst [vmem:[#allocation58_spill] sm:$0xff] %v7173_v3  ;;  %10903 = vst [vmem:[#allocation61_spill] sm:$0xff] %v7190_v30  ;;  %vm10687_vm6 = vcmp.gt.f32.partialorder %v7190_v30, 0.0 }
 0x361   :  { %820 = vbcast.lane.b32.xlu1 %v6846_v57, 360  ;;  %10899 = vst [vmem:[#allocation57_spill] sm:$0xff] %v7166_v54  ;;  %v945_v54 = vcombine.high %v6985_v32, %v6985_v32 }
 0x363   :  { %v7157_v40 = vpop.permute.xlu1 %587  ;;  %v7241_v32 = vrot.slane %v945_v54, %v6726_v6 }
 0x364   :  { %10897 = vst [vmem:[#allocation55_spill] sm:$0xff] %v7157_v40  ;;  %1679 = vmax.xlane.f32.xlu0 %v7161_v36  ;;  %v1001_v40 = vadd.f32 %v6972_v39, %v6902_v16  ;;  %v7179_v59 = vpop.permute.xlu0 %768  ;;  %v943_v16 = vcombine.high %v6963_v51, %v6963_v51  ;;  %v7208_v51 = vld [vmem:[%s10609_s1 + $0x70] sm:$0xff] }
 0x365   :  { %828 = vbcast.lane.b32.xlu1 %v6846_v57, 376  ;;  %10901 = vst [vmem:[#allocation59_spill] sm:$0xff] %v7179_v59  ;;  %10905 = vst [vmem:[#allocation63_spill] sm:$0xff] %v7208_v51  ;;  %vm10673_vm11 = vcmp.gt.f32.partialorder %v7208_v51, 0.0  ;;  %v1035_v54 = vadd.f32 %v7241_v32, %v6878_v4 }
 0x366   :  { %v1257_v50 = vmul.f32 0.2, %v1001_v40  ;;  %vm1129_vm4 = vcmp.gt.f32.partialorder %v1001_v40, 0.0  ;;  %v7211_v42 = vrot.slane %v943_v16, %v6726_v6 }
 0x367   :  { %v7169_v17 = vpop.permute.xlu1 %595 }
 0x368   :  { %1707 = vmax.xlane.f32.xlu0 %v7173_v3  ;;  %v1383_v3 = vsel %vm1127_vm0, %v999_v33, %v1255_v53  ;;  %v1271_v33 = vmul.f32 0.2, %v1015_v34  ;;  %v1017_v53 = vadd.f32 %v7002_v21, %v6820_v46  ;;  %v7216_v59 = vpop.permute.xlu0 %776 }
 0x369   :  { %839 = vbcast.lane.b32.xlu1 %v6898_v14, 264  ;;  %v7203_v36 = vsel %vm10687_vm6, %v1383_v3, -1e+30  ;;  %10906 = vst [vmem:[#allocation64_spill] sm:$0xff] %v7216_v59 }
 0x36a   :  { %10904 = vst [vmem:[#allocation62_spill] sm:$0xff] %v7203_v36  ;;  %v1273_v46 = vmul.f32 0.2, %v1017_v53  ;;  %vm1145_vm14 = vcmp.gt.f32.partialorder %v1017_v53, 0.0 }
 0x36b   :  { %v7181_v57 = vpop.permute.xlu1 %603 }
 0x36c   :  { %1711 = vmax.xlane.f32.xlu0 %v7185_v13  ;;  %v1385_v13 = vsel %vm1129_vm4, %v1001_v40, %v1257_v50  ;;  %v1019_v40 = vadd.f32 %v7211_v42, %v6826_v48  ;;  %v1399_v50 = vsel %vm1143_vm8, %v1015_v34, %v1271_v33  ;;  %v1021_v48 = vadd.f32 %v7211_v42, %v6832_v52 }
 0x36d   :  { %847 = vbcast.lane.b32.xlu1 %v6898_v14, 280  ;;  %v7224_v16 = vsel %vm10673_vm11, %v1385_v13, -1e+30  ;;  %v7238_v13 = vsel %vm10687_vm6, %v1399_v50, -1e+30  ;;  %v1401_v34 = vsel %vm1145_vm14, %v1017_v53, %v1273_v46  ;;  %vm1163_vm8 = vcmp.gt.f32.partialorder %v1035_v54, 0.0 }
 0x36e   :  { %10908 = vst [vmem:[#allocation66_spill] sm:$0xff] %v7224_v16  ;;  %10910 = vst [vmem:[#allocation68_spill] sm:$0xff] %v7238_v13  ;;  %vm1147_vm0 = vcmp.gt.f32.partialorder %v1019_v40, 0.0  ;;  %v1277_v50 = vmul.f32 0.2, %v1021_v48  ;;  %vm1149_vm4 = vcmp.gt.f32.partialorder %v1021_v48, 0.0 }
 0x36f   :  { %v7199_v10 = vpop.permute.xlu1 %611 }
 0x370   :  { %1683 = vmax.xlane.f32.xlu0 %v7203_v36  ;;  %v7232_v36 = vpop.permute.xlu0 %784  ;;  %v1405_v4 = vsel %vm1149_vm4, %v1021_v48, %v1277_v50 }
 0x371   :  { %855 = vbcast.lane.b32.xlu1 %v6898_v14, 296  ;;  %10909 = vst [vmem:[#allocation67_spill] sm:$0xff] %v7232_v36  ;;  %v7251_v36 = vsel %vm10673_vm11, %v1401_v34, -1e+30  ;;  %v1291_v34 = vmul.f32 0.2, %v1035_v54 }
 0x372   :  { %10911 = vst [vmem:[#allocation69_spill] sm:$0xff] %v7251_v36 }
 0x373   :  { %v7220_v3 = vpop.permute.xlu1 %619 }
 0x374   :  { %10907 = vst [vmem:[#allocation65_spill] sm:$0xff] %v7220_v3  ;;  %1687 = vmax.xlane.f32.xlu0 %v7224_v16  ;;  %v1275_v3 = vmul.f32 0.2, %v1019_v40  ;;  %v7256_v52 = vpop.permute.xlu0 %792 }
 0x375   :  { %863 = vbcast.lane.b32.xlu1 %v6898_v14, 312  ;;  %10912 = vst [vmem:[#allocation70_spill] sm:$0xff] %v7256_v52 }
 0x376   :  { %v1403_v16 = vsel %vm1147_vm0, %v1019_v40, %v1275_v3  ;;  %v7273_v40 = vsel %vm10668_vm7, %v1405_v4, -1e+30  ;;  %v1025_v4 = vadd.f32 %v7211_v42, %v6848_v58 }
 0x377   :  { %v7234_v59 = vpop.permute.xlu1 %627  ;;  %v7263_v46 = vsel %vm10683_vm5, %v1403_v16, -1e+30  ;;  %10915 = vst [vmem:[#allocation73_spill] sm:$0xff] %v7273_v40  ;;  %v1023_v16 = vadd.f32 %v7211_v42, %v6839_v55 }
 0x378   :  { %1715 = vmax.xlane.f32.xlu0 %v7238_v13  ;;  %10913 = vst [vmem:[#allocation71_spill] sm:$0xff] %v7263_v46  ;;  %v1037_v13 = vadd.f32 %v7241_v32, %v6884_v9  ;;  %v7269_v3 = vpop.permute.xlu0 %800  ;;  %v1419_v9 = vsel %vm1163_vm8, %v1035_v54, %v1291_v34  ;;  %v1281_v54 = vmul.f32 0.2, %v1025_v4  ;;  %v1039_v34 = vadd.f32 %v7241_v32, %v6891_v12 }
 0x379   :  { %871 = vbcast.lane.b32.xlu1 %v6898_v14, 328  ;;  %10914 = vst [vmem:[#allocation72_spill] sm:$0xff] %v7269_v3  ;;  %v7283_v48 = vsel %vm10683_vm5, %v1419_v9, -1e+30  ;;  %v1279_v50 = vmul.f32 0.2, %v1023_v16 }
 0x37a   :  { %vm1165_vm14 = vcmp.gt.f32.partialorder %v1037_v13, 0.0  ;;  %10916 = vst [vmem:[#allocation74_spill] sm:$0xff] %v7283_v48  ;;  %vm1151_vm0 = vcmp.gt.f32.partialorder %v1023_v16, 0.0  ;;  %vm1153_vm4 = vcmp.gt.f32.partialorder %v1025_v4, 0.0  ;;  %vm1167_vm8 = vcmp.gt.f32.partialorder %v1039_v34, 0.0 }
 0x37b   :  { %v7247_v33 = vpop.permute.xlu1 %638  ;;  %v1407_v9 = vsel %vm1151_vm0, %v1023_v16, %v1279_v50  ;;  %v1027_v16 = vadd.f32 %v7211_v42, %v6854_v60 }
 0x37c   :  { %1719 = vmax.xlane.f32.xlu0 %v7251_v36  ;;  %v1293_v36 = vmul.f32 0.2, %v1037_v13 }
 0x37d   :  { %879 = vbcast.lane.b32.xlu1 %v6898_v14, 344  ;;  %vm1155_vm0 = vcmp.gt.f32.partialorder %v1027_v16, 0.0 }
 0x37e   :  { %v1421_v55 = vsel %vm1165_vm14, %v1037_v13, %v1293_v36  ;;  %v7303_v36 = vsel %vm78_vm13, %v1407_v9, -1e+30  ;;  %v1295_v13 = vmul.f32 0.2, %v1039_v34 }
 0x37f   :  { %v7259_v53 = vpop.permute.xlu1 %646  ;;  %10920 = vst [vmem:[#allocation78_spill] sm:$0xff] %v7303_v36 }
 0x380   :  { %1723 = vmax.xlane.f32.xlu0 %v7263_v46  ;;  %v7288_v46 = vpop.permute.xlu0 %808  ;;  %v1423_v9 = vsel %vm1167_vm8, %v1039_v34, %v1295_v13 }
 0x381   :  { %887 = vbcast.lane.b32.xlu1 %v6898_v14, 360  ;;  %10917 = vst [vmem:[#allocation75_spill] sm:$0xff] %v7288_v46  ;;  %v1041_v46 = vadd.f32 %v7241_v32, %v6900_v15 }
 0x383   :  { %v7277_v52 = vpop.permute.xlu1 %654  ;;  %v1297_v50 = vmul.f32 0.2, %v1041_v46  ;;  %vm1169_vm14 = vcmp.gt.f32.partialorder %v1041_v46, 0.0 }
 0x384   :  { %1727 = vmax.xlane.f32.xlu0 %v7273_v40  ;;  %v7299_v58 = vpop.permute.xlu0 %816 }
 0x385   :  { %895 = vbcast.lane.b32.xlu1 %v6898_v14, 376  ;;  %v7294_v14 = vsel %vm10668_vm7, %v1421_v55, -1e+30  ;;  %10919 = vst [vmem:[#allocation77_spill] sm:$0xff] %v7299_v58  ;;  %v1425_v60 = vsel %vm1169_vm14, %v1041_v46, %v1297_v50 }
 0x386   :  { %10918 = vst [vmem:[#allocation76_spill] sm:$0xff] %v7294_v14  ;;  %v7332_v34 = vsel %vm10846_vm15, %v1425_v60, -1e+30  ;;  %v1046_v60 = vadd.f32 %v7241_v32, %v7199_v10 }
 0x387   :  { %v7290_v3 = vpop.permute.xlu1 %662  ;;  %10925 = vst [vmem:[#allocation83_spill] sm:$0xff] %v7332_v34 }
 0x388   :  { %1755 = vmax.xlane.f32.xlu0 %v7283_v48  ;;  %v1409_v48 = vsel %vm1153_vm4, %v1025_v4, %v1281_v54  ;;  %v7317_v58 = vpop.permute.xlu0 %824  ;;  %v7323_v4 = vsel %vm78_vm13, %v1423_v9, -1e+30  ;;  %v1283_v54 = vmul.f32 0.2, %v1027_v16 }
 0x389   :  { %v7312_v12 = vsel %vm10846_vm15, %v1409_v48, -1e+30  ;;  %10922 = vst [vmem:[#allocation80_spill] sm:$0xff] %v7317_v58  ;;  %10923 = vst [vmem:[#allocation81_spill] sm:$0xff] %v7323_v4  ;;  %v1029_v48 = vadd.f32 %v7211_v42, %v6860_v62  ;;  %v1043_v58 = vadd.f32 %v7241_v32, %v6906_v5  ;;  %v988_v62 = vadd.f32 %v6972_v39, %v6816_v44  ;;  %v7355_v44 = vld [vmem:[%s10609_s1 + $0x8] sm:$0xff] }
 0x38a   :  { %10921 = vst [vmem:[#allocation79_spill] sm:$0xff] %v7312_v12  ;;  %10928 = vst [vmem:[#allocation86_spill] sm:$0xff] %v7355_v44 }
 0x38b   :  { %v7307_v55 = vpop.permute.xlu1 %670  ;;  %v1285_v13 = vmul.f32 0.2, %v1029_v48  ;;  %vm1157_vm4 = vcmp.gt.f32.partialorder %v1029_v48, 0.0  ;;  %v1299_v50 = vmul.f32 0.2, %v1043_v58  ;;  %vm1171_vm8 = vcmp.gt.f32.partialorder %v1043_v58, 0.0 }
 0x38c   :  { %1759 = vmax.xlane.f32.xlu0 %v7294_v14  ;;  %vm1116_vm14 = vcmp.gt.f32.partialorder %v988_v62, 0.0 }
 0x38d   :  { %v1413_v5 = vsel %vm1157_vm4, %v1029_v48, %v1285_v13  ;;  %v1302_v48 = vmul.f32 0.2, %v1046_v60  ;;  %vm1174_vm4 = vcmp.gt.f32.partialorder %v1046_v60, 0.0 }
 0x38e   :  { %v7361_v10 = vsel %vm10842_vm12, %v1413_v5, -1e+30 }
 0x38f   :  { %v7319_v15 = vpop.permute.xlu1 %678  ;;  %10929 = vst [vmem:[#allocation87_spill] sm:$0xff] %v7361_v10 }
 0x390   :  { %1731 = vmax.xlane.f32.xlu0 %v7303_v36  ;;  %v7328_v36 = vpop.permute.xlu0 %835 }
 0x391   :  { %10924 = vst [vmem:[#allocation82_spill] sm:$0xff] %v7328_v36 }
 0x393   :  { %v7336_v9 = vpop.permute.xlu1 %686 }
 0x394   :  { %1735 = vmax.xlane.f32.xlu0 %v7312_v12  ;;  %v1411_v12 = vsel %vm1155_vm0, %v1027_v16, %v1283_v54  ;;  %v7350_v16 = vpop.permute.xlu0 %843  ;;  %v1031_v54 = vadd.f32 %v7211_v42, %v6866_v0  ;;  %vm75_vm0 = vcmp.gt.f32.partialorder %v7355_v44, 0.0  ;;  %v7378_v0 = vld [vmem:[%s10609_s1 + $0x58] sm:$0xff] }
 0x395   :  { %v7343_v46 = vsel %vm10844_vm10, %v1411_v12, -1e+30  ;;  %10927 = vst [vmem:[#allocation85_spill] sm:$0xff] %v7350_v16  ;;  %10932 = vst [vmem:[#allocation90_spill] sm:$0xff] %v7378_v0 }
 0x396   :  { %10926 = vst [vmem:[#allocation84_spill] sm:$0xff] %v7343_v46 }
 0x397   :  { %v7357_v12 = vpop.permute.xlu1 %694 }
 0x398   :  { %1763 = vmax.xlane.f32.xlu0 %v7323_v4  ;;  %v1244_v4 = vmul.f32 0.2, %v988_v62  ;;  %v7369_v40 = vpop.permute.xlu0 %851 }
 0x399   :  { %10930 = vst [vmem:[#allocation88_spill] sm:$0xff] %v7369_v40 }
 0x39a   :  { %v1372_v14 = vsel %vm1116_vm14, %v988_v62, %v1244_v4  ;;  %v1430_v4 = vsel %vm1174_vm4, %v1046_v60, %v1302_v48  ;;  %v992_v62 = vadd.f32 %v6972_v39, %v6841_v56  ;;  %vm10737_vm14 = vcmp.gt.f32.partialorder %v7378_v0, 0.0 }
 0x39c   :  { %1767 = vmax.xlane.f32.xlu0 %v7332_v34  ;;  %v1004_v34 = vadd.f32 %v7002_v21, %v6914_v8  ;;  %v1427_v8 = vsel %vm1171_vm8, %v1043_v58, %v1299_v50  ;;  %v1287_v58 = vmul.f32 0.2, %v1031_v54  ;;  %v1033_v50 = vadd.f32 %v7211_v42, %v6872_v2 }
 0x39d   :  { %v7373_v5 = vsel %vm10844_vm10, %v1427_v8, -1e+30  ;;  %vm1159_vm8 = vcmp.gt.f32.partialorder %v1031_v54, 0.0  ;;  %v7395_v2 = vsel %vm10737_vm14, %v1430_v4, -1e+30  ;;  %v7411_v4 = vpop.permute.xlu0 %859  ;;  %vm1120_vm4 = vcmp.gt.f32.partialorder %v992_v62, 0.0 }
 0x39e   :  { %v1260_v13 = vmul.f32 0.2, %v1004_v34  ;;  %vm1132_vm3 = vcmp.gt.f32.partialorder %v1004_v34, 0.0  ;;  %10931 = vst [vmem:[#allocation89_spill] sm:$0xff] %v7373_v5  ;;  %10934 = vst [vmem:[#allocation92_spill] sm:$0xff] %v7395_v2  ;;  %v1415_v60 = vsel %vm1159_vm8, %v1031_v54, %v1287_v58  ;;  %v1049_v58 = vadd.f32 %v7241_v32, %v6924_v23 }
 0x39f   :  { %v1248_v48 = vmul.f32 0.2, %v992_v62  ;;  %10937 = vst [vmem:[#allocation95_spill] sm:$0xff] %v7411_v4  ;;  %v7422_v54 = vsel %vm10687_vm6, %v1415_v60, -1e+30  ;;  %v7435_v4 = vld [vmem:[%s10609_s1 + $0x38] sm:$0xff] }
 0x3a0   :  { %1739 = vmax.xlane.f32.xlu0 %v7343_v46  ;;  %v1006_v46 = vadd.f32 %v7002_v21, %v6926_v24  ;;  %v7387_v24 = vsel %vm75_vm0, %v1372_v14, -1e+30  ;;  %v1388_v40 = vsel %vm1132_vm3, %v1004_v34, %v1260_v13  ;;  %v1047_v14 = vadd.f32 %v7241_v32, %v6918_v20  ;;  %v7407_v34 = vld [vmem:[%s10609_s1 + $0x28] sm:$0xff]  ;;  %10938 = vst [vmem:[#allocation96_spill] sm:$0xff] %v7422_v54 }
 0x3a1   :  { %10933 = vst [vmem:[#allocation91_spill] sm:$0xff] %v7387_v24  ;;  %v7402_v56 = vsel %vm75_vm0, %v1388_v40, -1e+30  ;;  %10936 = vst [vmem:[#allocation94_spill] sm:$0xff] %v7407_v34  ;;  %v994_v13 = vadd.f32 %v6972_v39, %v6856_v61  ;;  %vm1161_vm3 = vcmp.gt.f32.partialorder %v1033_v50, 0.0  ;;  %v7418_v40 = vrot.slane %v6754_v27, %v6726_v6  ;;  %v7440_v23 = vpop.permute.xlu0 %867 }
 0x3a2   :  { %v1262_v8 = vmul.f32 0.2, %v1006_v46  ;;  %vm1134_vm1 = vcmp.gt.f32.partialorder %v1006_v46, 0.0  ;;  %10935 = vst [vmem:[#allocation93_spill] sm:$0xff] %v7402_v56  ;;  %vm79_vm8 = vcmp.gt.f32.partialorder %v7407_v34, 0.0  ;;  %10940 = vst [vmem:[#allocation98_spill] sm:$0xff] %v7435_v4 }
 0x3a3   :  { %v1303_v61 = vmul.f32 0.2, %v1047_v14  ;;  %v1250_v60 = vmul.f32 0.2, %v994_v13  ;;  %vm1122_vm2 = vcmp.gt.f32.partialorder %v994_v13, 0.0  ;;  %10941 = vst [vmem:[#allocation99_spill] sm:$0xff] %v7440_v23 }
 0x3a4   :  { %1743 = vmax.xlane.f32.xlu0 %v7361_v10  ;;  %v7382_v10 = vpop.permute.xlu1 %705  ;;  %v1390_v20 = vsel %vm1134_vm1, %v1006_v46, %v1262_v8  ;;  %vm1175_vm1 = vcmp.gt.f32.partialorder %v1047_v14, 0.0 }
 0x3a5   :  { %v7430_v46 = vsel %vm77_vm9, %v1390_v20, -1e+30  ;;  %v1378_v23 = vsel %vm1122_vm2, %v994_v13, %v1250_v60 }
 0x3a6   :  { %10939 = vst [vmem:[#allocation97_spill] sm:$0xff] %v7430_v46 }
 0x3a8   :  { %1771 = vmax.xlane.f32.xlu0 %v7373_v5  ;;  %v1289_v5 = vmul.f32 0.2, %v1033_v50 }
 0x3a9   :  { %1661 = vmax.xlane.f32.xlu1 %v7387_v24  ;;  %v1376_v24 = vsel %vm1120_vm4, %v992_v62, %v1248_v48  ;;  %v1431_v62 = vsel %vm1175_vm1, %v1047_v14, %v1303_v61  ;;  %vm1177_vm4 = vcmp.gt.f32.partialorder %v1049_v58, 0.0  ;;  %v1054_v14 = vadd.f32 %v7418_v40, %v7259_v53 }
 0x3aa   :  { %v1417_v8 = vsel %vm1161_vm3, %v1033_v50, %v1289_v5  ;;  %vm10845_vm3 = vcmp.gt.f32.partialorder %v7435_v4, 0.0  ;;  %v1305_v5 = vmul.f32 0.2, %v1049_v58  ;;  %v1051_v50 = vadd.f32 %v7418_v40, %v6930_v25 }
 0x3ab   :  { %v7444_v20 = vsel %vm10673_vm11, %v1417_v8, -1e+30  ;;  %v1010_v8 = vadd.f32 %v7002_v21, %v6950_v11  ;;  %v7461_v25 = vrot.slane %v6758_v28, %v6726_v6  ;;  %v7472_v11 = vsel %vm10845_vm3, %v1378_v23, -1e+30 }
 0x3ac   :  { %1777 = vmax.xlane.f32.xlu0 %v7395_v2  ;;  %v7414_v2 = vpop.permute.xlu1 %713  ;;  %10942 = vst [vmem:[#allocation100_spill] sm:$0xff] %v7444_v20  ;;  %v1433_v13 = vsel %vm1177_vm4, %v1049_v58, %v1305_v5  ;;  %v996_v61 = vadd.f32 %v6972_v39, %v6868_v1  ;;  %vm1179_vm2 = vcmp.gt.f32.partialorder %v1051_v50, 0.0  ;;  %v1310_v23 = vmul.f32 0.2, %v1054_v14 }
 0x3ad   :  { %1693 = vmax.xlane.f32.xlu1 %v7402_v56  ;;  %v1008_v56 = vadd.f32 %v7002_v21, %v6938_v31  ;;  %v7454_v31 = vsel %vm79_vm8, %v1376_v24, -1e+30  ;;  %v1307_v24 = vmul.f32 0.2, %v1051_v50  ;;  %v1266_v60 = vmul.f32 0.2, %v1010_v8 }
 0x3ae   :  { %vm1138_vm1 = vcmp.gt.f32.partialorder %v1010_v8, 0.0  ;;  %v7483_v53 = vsel %vm10673_vm11, %v1433_v13, -1e+30  ;;  %v1067_v58 = vadd.f32 %v7461_v25, %v7012_v41  ;;  %v998_v13 = vadd.f32 %v6972_v39, %v6880_v7 }
 0x3af   :  { %v1264_v48 = vmul.f32 0.2, %v1008_v56  ;;  %vm1136_vm7 = vcmp.gt.f32.partialorder %v1008_v56, 0.0  ;;  %10945 = vst [vmem:[#allocation103_spill] sm:$0xff] %v7483_v53  ;;  %v1435_v5 = vsel %vm1179_vm2, %v1051_v50, %v1307_v24  ;;  %v1394_v41 = vsel %vm1138_vm1, %v1010_v8, %v1266_v60 }
 0x3b0   :  { %1747 = vmax.xlane.f32.xlu0 %v7422_v54  ;;  %v7449_v54 = vpop.permute.xlu1 %721  ;;  %vm1124_vm4 = vcmp.gt.f32.partialorder %v996_v61, 0.0  ;;  %v1323_v50 = vmul.f32 0.2, %v1067_v58  ;;  %v1070_v24 = vadd.f32 %v7461_v25, %v7414_v2  ;;  %v7514_v7 = vsel %vm10845_vm3, %v1394_v41, -1e+30  ;;  %v10953_v41 = vld [vmem:[#allocation23_spill] sm:$0xff] }
 0x3b1   :  { %1697 = vmax.xlane.f32.xlu1 %v7430_v46  ;;  %v7476_v46 = vpop.permute.xlu0 %875  ;;  %10949 = vst [vmem:[#allocation107_spill] sm:$0xff] %v7514_v7  ;;  %v1254_v60 = vmul.f32 0.2, %v998_v13  ;;  %vm1195_vm1 = vcmp.gt.f32.partialorder %v1067_v58, 0.0  ;;  %vm1126_vm11 = vcmp.gt.f32.partialorder %v998_v13, 0.0 }
 0x3b2   :  { %10944 = vst [vmem:[#allocation102_spill] sm:$0xff] %v7476_v46  ;;  %v10951_v46 = vld [vmem:[#allocation18_spill] sm:$0xff]  ;;  %v1326_v36 = vmul.f32 0.2, %v1070_v24 }
 0x3b4   :  { %1751 = vmax.xlane.f32.xlu0 %v7444_v20  ;;  %v7465_v20 = vsel %vm10687_vm6, %v1431_v62, -1e+30  ;;  %v1392_v62 = vsel %vm1136_vm7, %v1008_v56, %v1264_v48  ;;  %v7479_v16 = vpop.permute.xlu1 %729  ;;  %v7495_v56 = vld [vmem:[%s10609_s1 + $0x48] sm:$0xff]  ;;  %v1252_v48 = vmul.f32 0.2, %v996_v61  ;;  %vm1182_vm7 = vcmp.gt.f32.partialorder %v1054_v14, 0.0 }
 0x3b5   :  { %1669 = vmax.xlane.f32.xlu1 %v7454_v31  ;;  %10943 = vst [vmem:[#allocation101_spill] sm:$0xff] %v7465_v20  ;;  %v7490_v1 = vsel %vm79_vm8, %v1392_v62, -1e+30  ;;  %10946 = vst [vmem:[#allocation104_spill] sm:$0xff] %v7495_v56  ;;  %v7504_v62 = vsel %vm10683_vm5, %v1435_v5, -1e+30  ;;  %v1438_v8 = vsel %vm1182_vm7, %v1054_v14, %v1310_v23  ;;  %v1012_v5 = vadd.f32 %v7002_v21, %v6960_v37 }
 0x3b6   :  { %10948 = vst [vmem:[#allocation106_spill] sm:$0xff] %v7504_v62  ;;  %vm10843_vm2 = vcmp.gt.f32.partialorder %v7495_v56, 0.0  ;;  %v7521_v2 = vsel %vm77_vm9, %v1438_v8, -1e+30  ;;  %v1451_v37 = vsel %vm1195_vm1, %v1067_v58, %v1323_v50  ;;  %v1382_v8 = vsel %vm1126_vm11, %v998_v13, %v1254_v60  ;;  %v10958_v13 = vld [vmem:[#allocation14_spill] sm:$0xff] }
 0x3b7   :  { %10950 = vst [vmem:[#allocation108_spill] sm:$0xff] %v7521_v2  ;;  %v1268_v23 = vmul.f32 0.2, %v1012_v5  ;;  %vm1198_vm7 = vcmp.gt.f32.partialorder %v1070_v24, 0.0  ;;  %v7546_v50 = vsel %vm10737_vm14, %v1382_v8, -1e+30  ;;  %v1000_v60 = vadd.f32 %v6972_v39, %v10958_v13 }
 0x3b8   :  { %1779 = vmax.xlane.f32.xlu0 %v7465_v20  ;;  %v7509_v20 = vpop.permute.xlu1 %737  ;;  %v1071_v8 = vadd.f32 %v7461_v25, %v7053_v47 }
 0x3b9   :  { %1673 = vmax.xlane.f32.xlu1 %v7472_v11 }
 0x3bc   :  { %1783 = vmax.xlane.f32.xlu0 %v7483_v53  ;;  %v7500_v53 = vpop.permute.xlu0 %883 }
 0x3bd   :  { %1701 = vmax.xlane.f32.xlu1 %v7490_v1  ;;  %10947 = vst [vmem:[#allocation105_spill] sm:$0xff] %v7500_v53  ;;  %v1380_v53 = vsel %vm1124_vm4, %v996_v61, %v1252_v48  ;;  %v1014_v61 = vadd.f32 %v7002_v21, %v10953_v41  ;;  %vm1140_vm4 = vcmp.gt.f32.partialorder %v1012_v5, 0.0  ;;  %v1454_v41 = vsel %vm1198_vm7, %v1070_v24, %v1326_v36 }
 0x3be   :  { %v7528_v14 = vsel %vm10843_vm2, %v1380_v53, -1e+30 }
 0x3bf   :  { %10952 = vst [vmem:[#allocation18_spill] sm:$0xff] %v7528_v14  ;;  %vm1142_vm1 = vcmp.gt.f32.partialorder %v1014_v61, 0.0 }
 0x3c0   :  { %1787 = vmax.xlane.f32.xlu0 %v7504_v62  ;;  %v1055_v62 = vadd.f32 %v7418_v40, %v10951_v46  ;;  %v7532_v48 = vpop.permute.xlu0 %891  ;;  %v7539_v46 = vsel %vm10683_vm5, %v1451_v37, -1e+30  ;;  %v1396_v37 = vsel %vm1140_vm4, %v1012_v5, %v1268_v23  ;;  %v7569_v5 = vld [vmem:[%s10609_s1 + $0x68] sm:$0xff]  ;;  %v1256_v23 = vmul.f32 0.2, %v1000_v60 }
 0x3c1   :  { %1705 = vmax.xlane.f32.xlu1 %v7514_v7  ;;  %10954 = vst [vmem:[#allocation23_spill] sm:$0xff] %v7532_v48  ;;  %v7535_v7 = vpop.permute.xlu1 %745  ;;  %10955 = vst [vmem:[#allocation109_spill] sm:$0xff] %v7539_v46  ;;  %v1270_v48 = vmul.f32 0.2, %v1014_v61  ;;  %v7564_v24 = vsel %vm10843_vm2, %v1396_v37, -1e+30 }
 0x3c2   :  { %v1311_v53 = vmul.f32 0.2, %v1055_v62  ;;  %vm1183_vm11 = vcmp.gt.f32.partialorder %v1055_v62, 0.0  ;;  %10961 = vst [vmem:[#allocation111_spill] sm:$0xff] %v7564_v24  ;;  %10962 = vst [vmem:[#allocation112_spill] sm:$0xff] %v7569_v5  ;;  %vm1128_vm4 = vcmp.gt.f32.partialorder %v1000_v60, 0.0 }
 0x3c3   :  { %v1398_v47 = vsel %vm1142_vm1, %v1014_v61, %v1270_v48  ;;  %v7591_v61 = vld [vmem:[%s10609_s1 + $0x78] sm:$0xff]  ;;  %vm1199_vm1 = vcmp.gt.f32.partialorder %v1071_v8, 0.0  ;;  %s6541_s1 = smov 120  }
 0x3c4   :  { %1793 = vmax.xlane.f32.xlu0 %v7521_v2  ;;  %v10956_v2 = vld [vmem:[#allocation19_spill] sm:$0xff]  ;;  %v1439_v13 = vsel %vm1183_vm11, %v1055_v62, %v1311_v53  ;;  %vm10841_vm11 = vcmp.gt.f32.partialorder %v7569_v5, 0.0  ;;  %v1327_v62 = vmul.f32 0.2, %v1071_v8  ;;  %v1073_v53 = vadd.f32 %v7461_v25, %v7080_v22  ;;  %10967 = vst [vmem:[#allocation115_spill] sm:$0xff] %v7591_v61 }
 0x3c5   :  { %1677 = vmax.xlane.f32.xlu1 %v7528_v14  ;;  %v1057_v58 = vadd.f32 %v7418_v40, %v10956_v2  ;;  %10957 = vst [vmem:[#allocation19_spill] sm:$0xff] %v7546_v50  ;;  %v7555_v2 = vsel %vm77_vm9, %v1454_v41, -1e+30  ;;  %v7559_v36 = vpop.permute.xlu1 %753  ;;  %v10963_v41 = vld [vmem:[#allocation15_spill] sm:$0xff]  ;;  %v7578_v37 = vsel %vm78_vm13, %v1439_v13, -1e+30  ;;  %v1384_v22 = vsel %vm1128_vm4, %v1000_v60, %v1256_v23 }
 0x3c6   :  { %10960 = vst [vmem:[#allocation110_spill] sm:$0xff] %v7555_v2  ;;  %v1002_v35 = vadd.f32 %v6972_v39, %v10963_v41  ;;  %10965 = vst [vmem:[#allocation113_spill] sm:$0xff] %v7578_v37  ;;  %v7586_v39 = vsel %vm10737_vm14, %v1398_v47, -1e+30  ;;  %v10968_v13 = vld [vmem:[#allocation24_spill] sm:$0xff]  ;;  %v1455_v60 = vsel %vm1199_vm1, %v1071_v8, %v1327_v62  ;;  %vm1201_vm4 = vcmp.gt.f32.partialorder %v1073_v53, 0.0 }
 0x3c7   :  { %vm1185_vm7 = vcmp.gt.f32.partialorder %v1057_v58, 0.0  ;;  %10966 = vst [vmem:[#allocation114_spill] sm:$0xff] %v7586_v39  ;;  %v10975_v62 = vld [vmem:[#allocation29_spill] sm:$0xff] }
 0x3c8   :  { %1819 = vmax.xlane.f32.xlu0 %v7539_v46  ;;  %v1313_v46 = vmul.f32 0.2, %v1057_v58  ;;  %v1258_v48 = vmul.f32 0.2, %v1002_v35  ;;  %vm1130_vm5 = vcmp.gt.f32.partialorder %v1002_v35, 0.0 }
 0x3c9   :  { %v7550_v14 = vpop.xlane.xlu0 %1659  ;;  %1681 = vmax.xlane.f32.xlu1 %v7546_v50 }
 0x3ca   :  { %10959 = vst [vmem:[#allocation14_spill] sm:$0xff] %v7550_v14  ;;  %v1441_v41 = vsel %vm1185_vm7, %v1057_v58, %v1313_v46  ;;  %vm10840_vm7 = vcmp.gt.f32.partialorder %v7591_v61, 0.0  ;;  %v10971_v58 = vld [vmem:[#allocation20_spill] sm:$0xff]  ;;  %v1386_v50 = vsel %vm1130_vm5, %v1002_v35, %v1258_v48  ;;  %v1020_v48 = vadd.f32 %v7211_v42, %v10975_v62 }
 0x3cb   :  { %v7602_v46 = vsel %vm10846_vm15, %v1441_v41, -1e+30  ;;  %v1059_v47 = vadd.f32 %v7418_v40, %v10971_v58  ;;  %v7619_v58 = vsel %vm78_vm13, %v1455_v60, -1e+30 }
 0x3cc   :  { %1825 = vmax.xlane.f32.xlu0 %v7555_v2  ;;  %v1016_v2 = vadd.f32 %v7002_v21, %v10968_v13  ;;  %10970 = vst [vmem:[#allocation116_spill] sm:$0xff] %v7602_v46  ;;  %v7610_v13 = vsel %vm10841_vm11, %v1384_v22, -1e+30  ;;  %10973 = vst [vmem:[#allocation20_spill] sm:$0xff] %v7619_v58  ;;  %v1062_v22 = vadd.f32 %v7418_v40, %v7319_v15  ;;  %v1276_v62 = vmul.f32 0.2, %v1020_v48 }
 0x3cd   :  { %v7573_v14 = vpop.xlane.xlu0 %1663  ;;  %1709 = vmax.xlane.f32.xlu1 %v7564_v24  ;;  %v1329_v24 = vmul.f32 0.2, %v1073_v53  ;;  %vm1187_vm5 = vcmp.gt.f32.partialorder %v1059_v47, 0.0  ;;  %v11099_v5 = vld [vmem:[#allocation19_spill] sm:$0xff] }
 0x3ce   :  { %10964 = vst [vmem:[#allocation15_spill] sm:$0xff] %v7573_v14  ;;  %v1272_v23 = vmul.f32 0.2, %v1016_v2  ;;  %vm1144_vm6 = vcmp.gt.f32.partialorder %v1016_v2, 0.0 }
 0x3d0   :  { %1795 = vmax.xlane.f32.xlu0 %v7578_v37  ;;  %v7598_v37 = vpop.permute.xlu1 %761  ;;  %v1400_v38 = vsel %vm1144_vm6, %v1016_v2, %v1272_v23  ;;  %vm1190_vm6 = vcmp.gt.f32.partialorder %v1062_v22, 0.0 }
 0x3d1   :  { %v7595_v14 = vpop.xlane.xlu0 %1665  ;;  %1713 = vmax.xlane.f32.xlu1 %v7586_v39 }
 0x3d2   :  { %10969 = vst [vmem:[#allocation24_spill] sm:$0xff] %v7595_v14  ;;  %v10972_v14 = vld [vmem:[#allocation27_spill] sm:$0xff] }
 0x3d3   :  { %v1018_v39 = vadd.f32 %v7002_v21, %v10972_v14  ;;  %v7628_v21 = vsel %vm10840_vm7, %v1386_v50, -1e+30  ;;  %v1457_v14 = vsel %vm1201_vm4, %v1073_v53, %v1329_v24  ;;  %v1075_v50 = vadd.f32 %v7461_v25, %v7099_v29 }
 0x3d4   :  { %1799 = vmax.xlane.f32.xlu0 %v7602_v46  ;;  %v1315_v46 = vmul.f32 0.2, %v1059_v47  ;;  %v7623_v8 = vpop.permute.xlu1 %772  ;;  %10974 = vst [vmem:[#allocation27_spill] sm:$0xff] %v7628_v21  ;;  %v7637_v15 = vsel %vm10846_vm15, %v1457_v14, -1e+30  ;;  %vm1148_vm4 = vcmp.gt.f32.partialorder %v1020_v48, 0.0 }
 0x3d5   :  { %1685 = vmax.xlane.f32.xlu1 %v7610_v13  ;;  %v7615_v41 = vpop.xlane.xlu0 %1691  ;;  %v1274_v35 = vmul.f32 0.2, %v1018_v39  ;;  %vm1146_vm1 = vcmp.gt.f32.partialorder %v1018_v39, 0.0  ;;  %10976 = vst [vmem:[#allocation29_spill] sm:$0xff] %v7637_v15  ;;  %v7644_v24 = vsel %vm10841_vm11, %v1400_v38, -1e+30 }
 0x3d6   :  { %10977 = vst [vmem:[#allocation117_spill] sm:$0xff] %v7644_v24  ;;  %v1443_v53 = vsel %vm1187_vm5, %v1059_v47, %v1315_v46  ;;  %v1331_v38 = vmul.f32 0.2, %v1075_v50  ;;  %v1078_v46 = vadd.f32 %v7461_v25, %v7535_v7  ;;  %vm1203_vm5 = vcmp.gt.f32.partialorder %v1075_v50, 0.0 }
 0x3d7   :  { %v1402_v14 = vsel %vm1146_vm1, %v1018_v39, %v1274_v35  ;;  %v7655_v29 = vsel %vm10844_vm10, %v1443_v53, -1e+30  ;;  %v1036_v35 = vadd.f32 %v7241_v32, %v7123_v45  ;;  %v1404_v53 = vsel %vm1148_vm4, %v1020_v48, %v1276_v62 }
 0x3d8   :  { %1827 = vmax.xlane.f32.xlu0 %v7619_v58  ;;  %v1318_v58 = vmul.f32 0.2, %v1062_v22  ;;  %v7651_v18 = vpop.permute.xlu1 %780  ;;  %v7662_v47 = vsel %vm10840_vm7, %v1402_v14, -1e+30  ;;  %v1459_v45 = vsel %vm1203_vm5, %v1075_v50, %v1331_v38  ;;  %v1038_v48 = vadd.f32 %v7241_v32, %v7141_v63 }
 0x3d9   :  { %1689 = vmax.xlane.f32.xlu1 %v7628_v21  ;;  %v7633_v60 = vpop.xlane.xlu0 %1695  ;;  %v10978_v21 = vld [vmem:[#allocation32_spill] sm:$0xff]  ;;  %vm1164_vm4 = vcmp.gt.f32.partialorder %v1036_v35, 0.0 }
 0x3da   :  { %v1022_v2 = vadd.f32 %v7211_v42, %v10978_v21  ;;  %10979 = vst [vmem:[#allocation32_spill] sm:$0xff] %v7655_v29  ;;  %v1446_v21 = vsel %vm1190_vm6, %v1062_v22, %v1318_v58  ;;  %v7678_v58 = vsel %vm75_vm0, %v1404_v53, -1e+30  ;;  %v1292_v22 = vmul.f32 0.2, %v1036_v35  ;;  %v10984_v53 = vld [vmem:[#allocation35_spill] sm:$0xff] }
 0x3db   :  { %v7671_v7 = vsel %vm10737_vm14, %v1446_v21, -1e+30  ;;  %10981 = vst [vmem:[#allocation119_spill] sm:$0xff] %v7678_v58  ;;  %vm1206_vm6 = vcmp.gt.f32.partialorder %v1078_v46, 0.0  ;;  %v7687_v21 = vsel %vm10844_vm10, %v1459_v45, -1e+30  ;;  %v1024_v63 = vadd.f32 %v7211_v42, %v10984_v53 }
 0x3dc   :  { %1831 = vmax.xlane.f32.xlu0 %v7637_v15  ;;  %v1278_v39 = vmul.f32 0.2, %v1022_v2  ;;  %vm1150_vm1 = vcmp.gt.f32.partialorder %v1022_v2, 0.0  ;;  %10980 = vst [vmem:[#allocation118_spill] sm:$0xff] %v7671_v7  ;;  %10982 = vst [vmem:[#allocation120_spill] sm:$0xff] %v7687_v21  ;;  %vm1166_vm5 = vcmp.gt.f32.partialorder %v1038_v48, 0.0 }
 0x3dd   :  { %1717 = vmax.xlane.f32.xlu1 %v7644_v24  ;;  %v7649_v23 = vpop.xlane.xlu0 %1667  ;;  %v7673_v24 = vpop.permute.xlu1 %788 }
 0x3de   :  { %v1406_v14 = vsel %vm1150_vm1, %v1022_v2, %v1278_v39  ;;  %v1420_v39 = vsel %vm1164_vm4, %v1036_v35, %v1292_v22  ;;  %vm1152_vm1 = vcmp.gt.f32.partialorder %v1024_v63, 0.0 }
 0x3df   :  { %v7692_v50 = vsel %vm77_vm9, %v1406_v14, -1e+30  ;;  %v10987_v14 = vld [vmem:[#allocation37_spill] sm:$0xff] }
 0x3e0   :  { %1803 = vmax.xlane.f32.xlu0 %v7655_v29  ;;  %v1334_v29 = vmul.f32 0.2, %v1078_v46  ;;  %10983 = vst [vmem:[#allocation121_spill] sm:$0xff] %v7692_v50  ;;  %v1026_v53 = vadd.f32 %v7211_v42, %v10987_v14 }
 0x3e1   :  { %1721 = vmax.xlane.f32.xlu1 %v7662_v47  ;;  %v7667_v15 = vpop.xlane.xlu0 %1671 }
 0x3e2   :  { %v1462_v38 = vsel %vm1206_vm6, %v1078_v46, %v1334_v29  ;;  %v7708_v29 = vsel %vm75_vm0, %v1420_v39, -1e+30  ;;  %v1280_v46 = vmul.f32 0.2, %v1024_v63  ;;  %vm1154_vm6 = vcmp.gt.f32.partialorder %v1026_v53, 0.0 }
 0x3e3   :  { %v7703_v45 = vsel %vm10737_vm14, %v1462_v38, -1e+30  ;;  %10986 = vst [vmem:[#allocation122_spill] sm:$0xff] %v7708_v29 }
 0x3e4   :  { %1809 = vmax.xlane.f32.xlu0 %v7671_v7  ;;  %v1294_v7 = vmul.f32 0.2, %v1038_v48  ;;  %10985 = vst [vmem:[#allocation35_spill] sm:$0xff] %v7703_v45  ;;  %v1408_v14 = vsel %vm1152_vm1, %v1024_v63, %v1280_v46  ;;  %v10996_v46 = vld [vmem:[#allocation40_spill] sm:$0xff] }
 0x3e5   :  { %1725 = vmax.xlane.f32.xlu1 %v7678_v58  ;;  %v7683_v62 = vpop.xlane.xlu0 %1699  ;;  %v7699_v58 = vpop.permute.xlu1 %796 }
 0x3e6   :  { %v1422_v35 = vsel %vm1166_vm5, %v1038_v48, %v1294_v7  ;;  %v7728_v7 = vsel %vm79_vm8, %v1408_v14, -1e+30  ;;  %v1028_v14 = vadd.f32 %v7211_v42, %v10996_v46 }
 0x3e7   :  { %v7719_v38 = vsel %vm77_vm9, %v1422_v35, -1e+30  ;;  %10992 = vst [vmem:[#allocation124_spill] sm:$0xff] %v7728_v7 }
 0x3e8   :  { %1835 = vmax.xlane.f32.xlu0 %v7687_v21  ;;  %10989 = vst [vmem:[#allocation123_spill] sm:$0xff] %v7719_v38  ;;  %vm1156_vm1 = vcmp.gt.f32.partialorder %v1028_v14, 0.0 }
 0x3e9   :  { %1729 = vmax.xlane.f32.xlu1 %v7692_v50  ;;  %v7697_v2 = vpop.xlane.xlu0 %1703  ;;  %v7715_v22 = vpop.permute.xlu1 %804  ;;  %v10990_v50 = vld [vmem:[#allocation55_spill] sm:$0xff] }
 0x3ea   :  { %10988 = vst [vmem:[#allocation37_spill] sm:$0xff] %v7715_v22  ;;  %v1040_v39 = vadd.f32 %v7241_v32, %v10990_v50  ;;  %v1042_v22 = vadd.f32 %v7241_v32, %v7169_v17 }
 0x3ec   :  { %1841 = vmax.xlane.f32.xlu0 %v7703_v45  ;;  %v1282_v45 = vmul.f32 0.2, %v1026_v53  ;;  %v1296_v48 = vmul.f32 0.2, %v1040_v39  ;;  %vm1168_vm4 = vcmp.gt.f32.partialorder %v1040_v39, 0.0  ;;  %vm1170_vm5 = vcmp.gt.f32.partialorder %v1042_v22, 0.0 }
 0x3ed   :  { %v7712_v21 = vpop.xlane.xlu0 %1675  ;;  %1757 = vmax.xlane.f32.xlu1 %v7708_v29  ;;  %v7735_v50 = vpop.permute.xlu1 %812 }
 0x3ee   :  { %v1410_v29 = vsel %vm1154_vm6, %v1026_v53, %v1282_v45  ;;  %10994 = vst [vmem:[#allocation126_spill] sm:$0xff] %v7735_v50  ;;  %v1424_v17 = vsel %vm1168_vm4, %v1040_v39, %v1296_v48  ;;  %v1284_v53 = vmul.f32 0.2, %v1028_v14  ;;  %v10999_v50 = vld [vmem:[#allocation43_spill] sm:$0xff] }
 0x3ef   :  { %v7739_v63 = vsel %vm10845_vm3, %v1410_v29, -1e+30  ;;  %v7750_v45 = vsel %vm79_vm8, %v1424_v17, -1e+30  ;;  %v1030_v29 = vadd.f32 %v7211_v42, %v10999_v50 }
 0x3f0   :  { %10995 = vst [vmem:[#allocation127_spill] sm:$0xff] %v7739_v63  ;;  %10998 = vst [vmem:[#allocation128_spill] sm:$0xff] %v7750_v45 }
 0x3f1   :  { %v7723_v26 = vpop.xlane.xlu0 %1679  ;;  %1761 = vmax.xlane.f32.xlu1 %v7719_v38  ;;  %v1298_v38 = vmul.f32 0.2, %v1042_v22  ;;  %v1286_v48 = vmul.f32 0.2, %v1030_v29  ;;  %vm1158_vm6 = vcmp.gt.f32.partialorder %v1030_v29, 0.0 }
 0x3f2   :  { %10991 = vst [vmem:[#allocation55_spill] sm:$0xff] %v7723_v26 }
 0x3f3   :  { %v1426_v46 = vsel %vm1170_vm5, %v1042_v22, %v1298_v38  ;;  %v11006_v38 = vld [vmem:[#allocation16_spill] sm:$0xff] }
 0x3f4   :  { %v7759_v39 = vsel %vm10845_vm3, %v1426_v46, -1e+30  ;;  %v1045_v46 = vadd.f32 %v7241_v32, %v11006_v38 }
 0x3f5   :  { %v7732_v35 = vpop.xlane.xlu0 %1707  ;;  %1733 = vmax.xlane.f32.xlu1 %v7728_v7  ;;  %11001 = vst [vmem:[#allocation129_spill] sm:$0xff] %v7759_v39 }
 0x3f6   :  { %10993 = vst [vmem:[#allocation125_spill] sm:$0xff] %v7732_v35  ;;  %v7746_v35 = vpop.permute.xlu1 %820  ;;  %vm1173_vm5 = vcmp.gt.f32.partialorder %v1045_v46, 0.0 }
 0x3f7   :  { %10997 = vst [vmem:[#allocation40_spill] sm:$0xff] %v7746_v35  ;;  %v1044_v35 = vadd.f32 %v7241_v32, %v7181_v57 }
 0x3f9   :  { %v7743_v26 = vpop.xlane.xlu0 %1711  ;;  %1737 = vmax.xlane.f32.xlu1 %v7739_v63  ;;  %v1412_v63 = vsel %vm1156_vm1, %v1028_v14, %v1284_v53  ;;  %v1300_v57 = vmul.f32 0.2, %v1044_v35  ;;  %v1414_v14 = vsel %vm1158_vm6, %v1030_v29, %v1286_v48  ;;  %vm1172_vm4 = vcmp.gt.f32.partialorder %v1044_v35, 0.0 }
 0x3fa   :  { %v7766_v50 = vpop.permute.xlu1 %828  ;;  %v7772_v22 = vsel %vm10843_vm2, %v1412_v63, -1e+30 }
 0x3fb   :  { %11003 = vst [vmem:[#allocation131_spill] sm:$0xff] %v7766_v50  ;;  %11005 = vst [vmem:[#allocation132_spill] sm:$0xff] %v7772_v22  ;;  %v7783_v50 = vsel %vm10737_vm14, %v1414_v14, -1e+30  ;;  %v1428_v38 = vsel %vm1172_vm4, %v1044_v35, %v1300_v57  ;;  %vm11060_vm14 = vcmp.gt.f32.partialorder %v7190_v30, 0.0 }
 0x3fc   :  { %11008 = vst [vmem:[#allocation133_spill] sm:$0xff] %v7783_v50  ;;  %v7792_v29 = vsel %vm10843_vm2, %v1428_v38, -1e+30 }
 0x3fd   :  { %v7754_v7 = vpop.xlane.xlu0 %1683  ;;  %1765 = vmax.xlane.f32.xlu1 %v7750_v45  ;;  %v11004_v45 = vld [vmem:[#allocation6_spill] sm:$0xff]  ;;  %11011 = vst [vmem:[#allocation134_spill] sm:$0xff] %v7792_v29 }
 0x3fe   :  { %11000 = vst [vmem:[#allocation43_spill] sm:$0xff] %v7754_v7  ;;  %v7779_v53 = vpop.permute.xlu1 %839 }
 0x401   :  { %v7763_v17 = vpop.xlane.xlu0 %1687  ;;  %1769 = vmax.xlane.f32.xlu1 %v7759_v39  ;;  %v1301_v39 = vmul.f32 0.2, %v1045_v46 }
 0x402   :  { %11002 = vst [vmem:[#allocation130_spill] sm:$0xff] %v7763_v17  ;;  %2932 = vrot.lane.b32.xlu0 %v11004_v45, %s6541_s1  ;;  %v11009_v17 = vld [vmem:[#allocation45_spill] sm:$0xff] }
 0x403   :  { %v1032_v63 = vadd.f32 %v7211_v42, %v11009_v17  ;;  %v7799_v17 = vpop.permute.xlu1 %847 }
 0x405   :  { %v7776_v7 = vpop.xlane.xlu0 %1715  ;;  %1741 = vmax.xlane.f32.xlu1 %v7772_v22  ;;  %v1288_v48 = vmul.f32 0.2, %v1032_v63  ;;  %v11012_v22 = vld [vmem:[#allocation47_spill] sm:$0xff]  ;;  %vm1160_vm1 = vcmp.gt.f32.partialorder %v1032_v63, 0.0 }
 0x406   :  { %11007 = vst [vmem:[#allocation16_spill] sm:$0xff] %v7776_v7  ;;  %v1034_v0 = vadd.f32 %v7211_v42, %v11012_v22  ;;  %v1429_v7 = vsel %vm1173_vm5, %v1045_v46, %v1301_v39 }
 0x407   :  { %v7803_v35 = vsel %vm10842_vm12, %v1429_v7, -1e+30  ;;  %v1416_v42 = vsel %vm1160_vm1, %v1032_v63, %v1288_v48  ;;  %v7810_v22 = vpop.permute.xlu1 %855  ;;  %v1050_v7 = vadd.f32 %v7241_v32, %v7234_v59 }
 0x408   :  { %11014 = vst [vmem:[#allocation135_spill] sm:$0xff] %v7803_v35  ;;  %v1290_v57 = vmul.f32 0.2, %v1034_v0  ;;  %vm1162_vm6 = vcmp.gt.f32.partialorder %v1034_v0, 0.0  ;;  %v7814_v39 = vsel %vm10841_vm11, %v1416_v42, -1e+30  ;;  %v1052_v42 = vadd.f32 %v7418_v40, %v7247_v33 }
 0x409   :  { %v7787_v45 = vpop.xlane.xlu0 %1719  ;;  %1745 = vmax.xlane.f32.xlu1 %v7783_v50  ;;  %v11015_v50 = vld [vmem:[#allocation65_spill] sm:$0xff]  ;;  %v1306_v48 = vmul.f32 0.2, %v1050_v7  ;;  %vm1178_vm5 = vcmp.gt.f32.partialorder %v1050_v7, 0.0 }
 0x40a   :  { %11010 = vst [vmem:[#allocation45_spill] sm:$0xff] %v7787_v45  ;;  %v1048_v38 = vadd.f32 %v7241_v32, %v11015_v50  ;;  %11016 = vst [vmem:[#allocation65_spill] sm:$0xff] %v7814_v39 }
 0x40c   :  { %v1304_v46 = vmul.f32 0.2, %v1048_v38  ;;  %vm1176_vm4 = vcmp.gt.f32.partialorder %v1048_v38, 0.0 }
 0x40d   :  { %v7796_v14 = vpop.xlane.xlu0 %1723  ;;  %1773 = vmax.xlane.f32.xlu1 %v7792_v29  ;;  %v1082_v29 = vadd.f32 %v7461_v25, %v7598_v37  ;;  %v7832_v37 = vpop.permute.xlu1 %863 }
 0x40e   :  { %11013 = vst [vmem:[#allocation47_spill] sm:$0xff] %v7796_v14  ;;  %v1432_v32 = vsel %vm1176_vm4, %v1048_v38, %v1304_v46 }
 0x40f   :  { %v1338_v14 = vmul.f32 0.2, %v1082_v29  ;;  %vm1210_vm1 = vcmp.gt.f32.partialorder %v1082_v29, 0.0 }
 0x411   :  { %v7807_v45 = vpop.xlane.xlu0 %1727  ;;  %1775 = vmax.xlane.f32.xlu1 %v7803_v35  ;;  %v1418_v35 = vsel %vm1162_vm6, %v1034_v0, %v1290_v57  ;;  %v7836_v0 = vsel %vm10841_vm11, %v1432_v32, -1e+30  ;;  %vm1180_vm6 = vcmp.gt.f32.partialorder %v1052_v42, 0.0  ;;  %v7843_v38 = vpop.permute.xlu1 %871 }
 0x412   :  { %v7825_v63 = vsel %vm10840_vm7, %v1418_v35, -1e+30  ;;  %11020 = vst [vmem:[#allocation139_spill] sm:$0xff] %v7836_v0  ;;  %v11021_v35 = vld [vmem:[#allocation17_spill] sm:$0xff]  ;;  %11023 = vst [vmem:[#allocation140_spill] sm:$0xff] %v7843_v38 }
 0x413   :  { %11018 = vst [vmem:[#allocation137_spill] sm:$0xff] %v7825_v63  ;;  %v1053_v57 = vadd.f32 %v7418_v40, %v11021_v35  ;;  %v1068_v35 = vadd.f32 %v7461_v25, %v7382_v10 }
 0x415   :  { %1749 = vmax.xlane.f32.xlu1 %v7814_v39  ;;  %v7821_v50 = vpop.xlane.xlu0 %1755  ;;  %v1308_v39 = vmul.f32 0.2, %v1052_v42  ;;  %vm1181_vm4 = vcmp.gt.f32.partialorder %v1053_v57, 0.0 }
 0x416   :  { %11017 = vst [vmem:[#allocation136_spill] sm:$0xff] %v7821_v50  ;;  %v1466_v50 = vsel %vm1210_vm1, %v1082_v29, %v1338_v14  ;;  %vm11029_vm1 = vcmp.gt.f32.partialorder %v7010_v43, 0.0 }
 0x417   :  { %v7851_v32 = vsel %vm10840_vm7, %v1466_v50, -1e+30  ;;  %v1436_v29 = vsel %vm1180_vm6, %v1052_v42, %v1308_v39 }
 0x418   :  { %11025 = vst [vmem:[#allocation142_spill] sm:$0xff] %v7851_v32  ;;  %v7861_v14 = vsel %vm75_vm0, %v1436_v29, -1e+30  ;;  %v1056_v29 = vadd.f32 %v7418_v40, %v7277_v52 }
 0x419   :  { %1753 = vmax.xlane.f32.xlu1 %v7825_v63  ;;  %v7830_v59 = vpop.xlane.xlu0 %1759  ;;  %v1434_v63 = vsel %vm1178_vm5, %v1050_v7, %v1306_v48  ;;  %11026 = vst [vmem:[#allocation143_spill] sm:$0xff] %v7861_v14  ;;  %v11027_v7 = vld [vmem:[#allocation34_spill] sm:$0xff]  ;;  %vm1196_vm5 = vcmp.gt.f32.partialorder %v1068_v35, 0.0 }
 0x41a   :  { %11019 = vst [vmem:[#allocation138_spill] sm:$0xff] %v7830_v59  ;;  %v7847_v46 = vsel %vm10840_vm7, %v1434_v63, -1e+30  ;;  %v1309_v59 = vmul.f32 0.2, %v1053_v57  ;;  %v1069_v50 = vadd.f32 %v7461_v25, %v11027_v7 }
 0x41b   :  { %11024 = vst [vmem:[#allocation141_spill] sm:$0xff] %v7847_v46  ;;  %v1324_v63 = vmul.f32 0.2, %v1068_v35 }
 0x41c   :  { %v1437_v10 = vsel %vm1181_vm4, %v1053_v57, %v1309_v59  ;;  %v1325_v42 = vmul.f32 0.2, %v1069_v50  ;;  %vm1197_vm6 = vcmp.gt.f32.partialorder %v1069_v50, 0.0  ;;  %v1312_v57 = vmul.f32 0.2, %v1056_v29 }
 0x41d   :  { %1781 = vmax.xlane.f32.xlu1 %v7836_v0  ;;  %v7841_v33 = vpop.xlane.xlu0 %1731  ;;  %v7872_v39 = vsel %vm11029_vm1, %v1437_v10, -1e+30  ;;  %v1452_v7 = vsel %vm1196_vm5, %v1068_v35, %v1324_v63  ;;  %v1058_v10 = vadd.f32 %v7418_v40, %v7290_v3  ;;  %vm1184_vm4 = vcmp.gt.f32.partialorder %v1056_v29, 0.0 }
 0x41e   :  { %11022 = vst [vmem:[#allocation17_spill] sm:$0xff] %v7841_v33  ;;  %11030 = vst [vmem:[#allocation144_spill] sm:$0xff] %v7872_v39  ;;  %v7883_v59 = vsel %vm75_vm0, %v1452_v7, -1e+30  ;;  %v1453_v52 = vsel %vm1197_vm6, %v1069_v50, %v1325_v42 }
 0x41f   :  { %11033 = vst [vmem:[#allocation147_spill] sm:$0xff] %v7883_v59  ;;  %v7892_v35 = vsel %vm11029_vm1, %v1453_v52, -1e+30  ;;  %v1314_v63 = vmul.f32 0.2, %v1058_v10  ;;  %vm1186_vm5 = vcmp.gt.f32.partialorder %v1058_v10, 0.0  ;;  %v1074_v52 = vadd.f32 %v7461_v25, %v7479_v16 }
 0x420   :  { %11035 = vst [vmem:[#allocation149_spill] sm:$0xff] %v7892_v35 }
 0x421   :  { %1785 = vmax.xlane.f32.xlu1 %v7847_v46  ;;  %v7856_v0 = vpop.xlane.xlu0 %1735  ;;  %1849 = vmax.xlane.f32.xlu0 %v7851_v32  ;;  %v7868_v46 = vpop.permute.xlu1 %879 }
 0x422   :  { %11028 = vst [vmem:[#allocation34_spill] sm:$0xff] %v7868_v46 }
 0x425   :  { %v7865_v48 = vpop.xlane.xlu0 %1763  ;;  %1789 = vmax.xlane.f32.xlu1 %v7861_v14  ;;  %v7879_v38 = vpop.permute.xlu1 %887 }
 0x426   :  { %11032 = vst [vmem:[#allocation146_spill] sm:$0xff] %v7879_v38  ;;  %v1072_v38 = vadd.f32 %v7461_v25, %v7449_v54  ;;  %v1442_v54 = vsel %vm1186_vm5, %v1058_v10, %v1314_v63 }
 0x428   :  { %v1328_v42 = vmul.f32 0.2, %v1072_v38  ;;  %vm1200_vm6 = vcmp.gt.f32.partialorder %v1072_v38, 0.0 }
 0x429   :  { %v7876_v32 = vpop.xlane.xlu0 %1767  ;;  %1791 = vmax.xlane.f32.xlu1 %v7872_v39  ;;  %v1440_v39 = vsel %vm1184_vm4, %v1056_v29, %v1312_v57  ;;  %v7899_v3 = vpop.permute.xlu1 %895  ;;  %v11040_v29 = vld [vmem:[#allocation8_spill] sm:$0xff]  ;;  %v7916_v57 = vsel %vm10845_vm3, %v1442_v54, -1e+30  ;;  %vm1202_vm4 = vcmp.gt.f32.partialorder %v1074_v52, 0.0 }
 0x42a   :  { %11031 = vst [vmem:[#allocation145_spill] sm:$0xff] %v7876_v32  ;;  %11037 = vst [vmem:[#allocation151_spill] sm:$0xff] %v7899_v3  ;;  %v7903_v50 = vsel %vm79_vm8, %v1440_v39, -1e+30  ;;  %v1060_v39 = vadd.f32 %v7418_v40, %v7307_v55  ;;  %v1330_v3 = vmul.f32 0.2, %v1074_v52 }
 0x42b   :  { %11038 = vst [vmem:[#allocation152_spill] sm:$0xff] %v7903_v50  ;;  %11041 = vst [vmem:[#allocation8_spill] sm:$0xff] %v7916_v57 }
 0x42c   :  { %v1316_v46 = vmul.f32 0.2, %v1060_v39  ;;  %v1458_v55 = vsel %vm1202_vm4, %v1074_v52, %v1330_v3  ;;  %vm1188_vm1 = vcmp.gt.f32.partialorder %v1060_v39, 0.0  ;;  %v944_v3 = vcombine.high %v6754_v27, %v6754_v27 }
 0x42d   :  { %v7887_v14 = vpop.xlane.xlu0 %1739  ;;  %1821 = vmax.xlane.f32.xlu1 %v7883_v59 }
 0x42e   :  { %11034 = vst [vmem:[#allocation148_spill] sm:$0xff] %v7887_v14 }
 0x431   :  { %v7896_v7 = vpop.xlane.xlu0 %1743  ;;  %1823 = vmax.xlane.f32.xlu1 %v7892_v35  ;;  %v11044_v35 = vld [vmem:[#allocation21_spill] sm:$0xff] }
 0x432   :  { %11036 = vst [vmem:[#allocation150_spill] sm:$0xff] %v7896_v7  ;;  %v1061_v54 = vadd.f32 %v7418_v40, %v11044_v35  ;;  %v1444_v35 = vsel %vm1188_vm1, %v1060_v39, %v1316_v46  ;;  %v7961_v39 = vrot.slane %v944_v3, %v6726_v6  ;;  %v946_v3 = vcombine.high %v6758_v28, %v6758_v28 }
 0x433   :  { %v7951_v52 = vsel %vm10843_vm2, %v1444_v35, -1e+30  ;;  %v11052_v35 = vld [vmem:[#allocation22_spill] sm:$0xff] }
 0x434   :  { %vm1189_vm5 = vcmp.gt.f32.partialorder %v1061_v54, 0.0  ;;  %11048 = vst [vmem:[#allocation158_spill] sm:$0xff] %v7951_v52  ;;  %v7992_v28 = vrot.slane %v946_v3, %v6726_v6 }
 0x435   :  { %v7907_v59 = vpop.xlane.xlu0 %1771  ;;  %1797 = vmax.xlane.f32.xlu1 %v7903_v50  ;;  %v1456_v50 = vsel %vm1200_vm6, %v1072_v38, %v1328_v42  ;;  %v7938_v38 = vsel %vm10845_vm3, %v1458_v55, -1e+30  ;;  %v1317_v42 = vmul.f32 0.2, %v1061_v54  ;;  %v11049_v55 = vld [vmem:[#allocation49_spill] sm:$0xff] }
 0x436   :  { %11039 = vst [vmem:[#allocation153_spill] sm:$0xff] %v7907_v59  ;;  %v7910_v14 = vpop.xlane.xlu1 %1661  ;;  %v7927_v63 = vsel %vm79_vm8, %v1456_v50, -1e+30  ;;  %11046 = vst [vmem:[#allocation156_spill] sm:$0xff] %v7938_v38  ;;  %v1076_v50 = vadd.f32 %v7461_v25, %v7509_v20  ;;  %v1100_v56 = vadd.f32 %v7992_v28, %v7779_v53 }
 0x437   :  { %2936 = vrot.lane.b32.xlu0 %v11040_v29, %s6541_s1  ;;  %11043 = vst [vmem:[#allocation155_spill] sm:$0xff] %v7927_v63 }
 0x438   :  { %v1332_v59 = vmul.f32 0.2, %v1076_v50  ;;  %vm1204_vm6 = vcmp.gt.f32.partialorder %v1076_v50, 0.0 }
 0x439   :  { %v7920_v16 = vpop.xlane.xlu0 %1777  ;;  %1801 = vmax.xlane.f32.xlu1 %v7916_v57 }
 0x43a   :  { %11042 = vst [vmem:[#allocation154_spill] sm:$0xff] %v7920_v16  ;;  %v7923_v10 = vpop.xlane.xlu1 %1693 }
 0x43d   :  { %v7931_v33 = vpop.xlane.xlu0 %1747  ;;  %1829 = vmax.xlane.f32.xlu1 %v7927_v63  ;;  %v1077_v63 = vadd.f32 %v7461_v25, %v11049_v55 }
 0x43e   :  { %11045 = vst [vmem:[#allocation21_spill] sm:$0xff] %v7931_v33  ;;  %v7934_v16 = vpop.xlane.xlu1 %1697 }
 0x43f   :  { %v1333_v55 = vmul.f32 0.2, %v1077_v63  ;;  %vm1205_vm4 = vcmp.gt.f32.partialorder %v1077_v63, 0.0 }
 0x441   :  { %v7942_v57 = vpop.xlane.xlu0 %1751  ;;  %1833 = vmax.xlane.f32.xlu1 %v7938_v38  ;;  %v1445_v38 = vsel %vm1189_vm5, %v1061_v54, %v1317_v42  ;;  %v1084_v54 = vadd.f32 %v7961_v39, %v7623_v8 }
 0x442   :  { %11047 = vst [vmem:[#allocation157_spill] sm:$0xff] %v7942_v57  ;;  %v7945_v33 = vpop.xlane.xlu1 %1669  ;;  %v7965_v27 = vsel %vm10842_vm12, %v1445_v38, -1e+30  ;;  %v1063_v57 = vadd.f32 %v7418_v40, %v11052_v35 }
 0x443   :  { %11051 = vst [vmem:[#allocation159_spill] sm:$0xff] %v7965_v27  ;;  %v1340_v8 = vmul.f32 0.2, %v1084_v54  ;;  %vm1212_vm5 = vcmp.gt.f32.partialorder %v1084_v54, 0.0 }
 0x444   :  { %v1319_v35 = vmul.f32 0.2, %v1063_v57  ;;  %vm1191_vm1 = vcmp.gt.f32.partialorder %v1063_v57, 0.0 }
 0x445   :  { %v7955_v20 = vpop.xlane.xlu0 %1779  ;;  %1805 = vmax.xlane.f32.xlu1 %v7951_v52  ;;  %v1460_v52 = vsel %vm1204_vm6, %v1076_v50, %v1332_v59  ;;  %v1461_v59 = vsel %vm1205_vm4, %v1077_v63, %v1333_v55  ;;  %v1086_v50 = vadd.f32 %v7961_v39, %v7651_v18  ;;  %v1468_v3 = vsel %vm1212_vm5, %v1084_v54, %v1340_v8 }
 0x446   :  { %11050 = vst [vmem:[#allocation49_spill] sm:$0xff] %v7955_v20  ;;  %v7958_v46 = vpop.xlane.xlu1 %1673  ;;  %v7980_v38 = vsel %vm10843_vm2, %v1460_v52, -1e+30  ;;  %v7996_v52 = vsel %vm10842_vm12, %v1461_v59, -1e+30  ;;  %v1447_v18 = vsel %vm1191_vm1, %v1063_v57, %v1319_v35  ;;  %v11059_v59 = vld [vmem:[#allocation38_spill] sm:$0xff]  ;;  %v1066_v57 = vadd.f32 %v7418_v40, %v7357_v12 }
 0x447   :  { %11054 = vst [vmem:[#allocation160_spill] sm:$0xff] %v7980_v38  ;;  %11056 = vst [vmem:[#allocation162_spill] sm:$0xff] %v7996_v52  ;;  %v1342_v55 = vmul.f32 0.2, %v1086_v50  ;;  %v1931_v6 = vsub.f32 %v11059_v59, %v7615_v41  ;;  %vm1214_vm4 = vcmp.gt.f32.partialorder %v1086_v50, 0.0  ;;  %v1102_v41 = vadd.f32 %v7992_v28, %v7799_v17 }
 0x448   :  { %v8020_v53 = vsel %vm75_vm0, %v1468_v3, -1e+30  ;;  %v1356_v8 = vmul.f32 0.2, %v1100_v56  ;;  %vm1228_vm1 = vcmp.gt.f32.partialorder %v1100_v56, 0.0  ;;  %vm1194_vm5 = vcmp.gt.f32.partialorder %v1066_v57, 0.0 }
 0x449   :  { %v7969_v7 = vpop.xlane.xlu0 %1783  ;;  %1807 = vmax.xlane.f32.xlu1 %v7965_v27  ;;  %11063 = vst [vmem:[#allocation164_spill] sm:$0xff] %v8020_v53  ;;  %v2075_v12 = vmul.f32 1.442695, %v1931_v6 }
 0x44a   :  { %11053 = vst [vmem:[#allocation22_spill] sm:$0xff] %v7969_v7  ;;  %v7974_v42 = vpop.xlane.xlu1 %1701  ;;  %v1064_v7 = vadd.f32 %v7418_v40, %v7336_v9  ;;  %v11057_v9 = vld [vmem:[#allocation26_spill] sm:$0xff] }
 0x44b   :  { %5866 = vpow2.f32 %v2075_v12 }
 0x44c   :  { %vm1192_vm6 = vcmp.gt.f32.partialorder %v1064_v7, 0.0 }
 0x44d   :  { %v7984_v20 = vpop.xlane.xlu0 %1787  ;;  %1837 = vmax.xlane.f32.xlu1 %v7980_v38  ;;  %v1320_v38 = vmul.f32 0.2, %v1064_v7 }
 0x44e   :  { %11055 = vst [vmem:[#allocation161_spill] sm:$0xff] %v7984_v20  ;;  %v7989_v27 = vpop.xlane.xlu1 %1705  ;;  %v1065_v20 = vadd.f32 %v7418_v40, %v11057_v9  ;;  %v8011_v9 = vsel %vm11060_vm14, %v1447_v18, -1e+30  ;;  %v1470_v18 = vsel %vm1214_vm4, %v1086_v50, %v1342_v55  ;;  %v1920_v40 = vsub.f32 %v7454_v31, %v7945_v33 }
 0x44f   :  { %11061 = vst [vmem:[#allocation38_spill] sm:$0xff] %v8011_v9  ;;  %v1448_v54 = vsel %vm1192_vm6, %v1064_v7, %v1320_v38  ;;  %v11065_v7 = vld [vmem:[#allocation52_spill] sm:$0xff]  ;;  %v8040_v50 = vsel %vm77_vm9, %v1470_v18, -1e+30  ;;  %v1358_v55 = vmul.f32 0.2, %v1102_v41  ;;  %v1484_v33 = vsel %vm1228_vm1, %v1100_v56, %v1356_v8 }
 0x450   :  { %vm1193_vm14 = vcmp.gt.f32.partialorder %v1065_v20, 0.0  ;;  %v8031_v3 = vsel %vm10841_vm11, %v1448_v54, -1e+30  ;;  %v1079_v38 = vadd.f32 %v7461_v25, %v11065_v7  ;;  %11067 = vst [vmem:[#allocation166_spill] sm:$0xff] %v8040_v50  ;;  %v2053_v54 = vmul.f32 1.442695, %v1920_v40 }
 0x451   :  { %v8000_v63 = vpop.xlane.xlu0 %1793  ;;  %1839 = vmax.xlane.f32.xlu1 %v7996_v52  ;;  %11064 = vst [vmem:[#allocation165_spill] sm:$0xff] %v8031_v3  ;;  %v1922_v7 = vsub.f32 %v7472_v11, %v7958_v46  ;;  %vm1230_vm6 = vcmp.gt.f32.partialorder %v1102_v41, 0.0  ;;  %vm11068_vm4 = vcmp.gt.f32.partialorder %v7208_v51, 0.0  ;;  %v8058_v56 = vsel %vm75_vm0, %v1484_v33, -1e+30 }
 0x452   :  { %11058 = vst [vmem:[#allocation26_spill] sm:$0xff] %v8000_v63  ;;  %v8005_v32 = vpop.xlane.xlu1 %1677  ;;  %v1321_v63 = vmul.f32 0.2, %v1065_v20  ;;  %v1335_v18 = vmul.f32 0.2, %v1079_v38  ;;  %11071 = vst [vmem:[#allocation169_spill] sm:$0xff] %v8058_v56  ;;  %v1486_v11 = vsel %vm1230_vm6, %v1102_v41, %v1358_v55  ;;  %5868 = vpow2.f32 %v2053_v54 }
 0x453   :  { %v2057_v46 = vmul.f32 1.442695, %v1922_v7 }
 0x454   :  { %v1449_v6 = vsel %vm1193_vm14, %v1065_v20, %v1321_v63  ;;  %v1080_v20 = vadd.f32 %v7461_v25, %v7559_v36  ;;  %vm1207_vm14 = vcmp.gt.f32.partialorder %v1079_v38, 0.0  ;;  %v1936_v36 = vsub.f32 %v7490_v1, %v7974_v42  ;;  %v11076_v42 = vld [vmem:[#allocation107_spill] sm:$0xff] }
 0x455   :  { %1811 = vmax.xlane.f32.xlu1 %v8011_v9  ;;  %v8016_v35 = vpop.xlane.xlu0 %1819  ;;  %v1322_v9 = vmul.f32 0.2, %v1066_v57  ;;  %v1463_v41 = vsel %vm1207_vm14, %v1079_v38, %v1335_v18  ;;  %5870 = vpow2.f32 %v2057_v46  ;;  %v8087_v7 = vpop.eup %5866 }
 0x456   :  { %11062 = vst [vmem:[#allocation163_spill] sm:$0xff] %v8016_v35  ;;  %v8024_v59 = vpop.xlane.xlu1 %1681  ;;  %1853 = vmax.xlane.f32.xlu0 %v8020_v53  ;;  %v8049_v53 = vsel %vm11068_vm4, %v1449_v6, -1e+30  ;;  %v11073_v6 = vld [vmem:[#allocation57_spill] sm:$0xff]  ;;  %v1336_v44 = vmul.f32 0.2, %v1080_v20 }
 0x457   :  { %11069 = vst [vmem:[#allocation167_spill] sm:$0xff] %v8049_v53  ;;  %v1450_v8 = vsel %vm1194_vm5, %v1066_v57, %v1322_v9  ;;  %v1081_v33 = vadd.f32 %v7461_v25, %v11073_v6  ;;  %v8076_v57 = vsel %vm77_vm9, %v1486_v11, -1e+30  ;;  %vm1208_vm1 = vcmp.gt.f32.partialorder %v1080_v20, 0.0 }
 0x458   :  { %v8067_v40 = vsel %vm10840_vm7, %v1450_v8, -1e+30  ;;  %11075 = vst [vmem:[#allocation171_spill] sm:$0xff] %v8076_v57  ;;  %v2085_v1 = vmul.f32 1.442695, %v1936_v36  ;;  %v1938_v25 = vsub.f32 %v11076_v42, %v7989_v27  ;;  %vm11077_vm5 = vcmp.gt.f32.partialorder %v7190_v30, 0.0 }
 0x459   :  { %1813 = vmax.xlane.f32.xlu1 %v8031_v3  ;;  %v8036_v17 = vpop.xlane.xlu0 %1825  ;;  %11072 = vst [vmem:[#allocation170_spill] sm:$0xff] %v8067_v40  ;;  %v8085_v54 = vsel %vm11077_vm5, %v1463_v41, -1e+30  ;;  %v1337_v8 = vmul.f32 0.2, %v1081_v33  ;;  %v1464_v18 = vsel %vm1208_vm1, %v1080_v20, %v1336_v44  ;;  %vm1209_vm6 = vcmp.gt.f32.partialorder %v1081_v33, 0.0 }
 0x45a   :  { %11066 = vst [vmem:[#allocation52_spill] sm:$0xff] %v8036_v17  ;;  %v8042_v31 = vpop.xlane.xlu1 %1709  ;;  %1857 = vmax.xlane.f32.xlu0 %v8040_v50  ;;  %11078 = vst [vmem:[#allocation107_spill] sm:$0xff] %v8085_v54  ;;  %5872 = vpow2.f32 %v2085_v1  ;;  %v2089_v46 = vmul.f32 1.442695, %v1938_v25  ;;  %v8097_v27 = vsel %vm10841_vm11, %v1464_v18, -1e+30  ;;  %v1926_v35 = vsub.f32 %v11099_v5, %v8024_v59 }
 0x45b   :  { %11080 = vst [vmem:[#allocation173_spill] sm:$0xff] %v8097_v27  ;;  %v1465_v41 = vsel %vm1209_vm6, %v1081_v33, %v1337_v8  ;;  %v11094_v3 = vld [vmem:[#allocation59_spill] sm:$0xff]  ;;  %v11100_v30 = vld [vmem:[#allocation82_spill] sm:$0xff]  ;;  %v11107_v59 = vld [vmem:[#allocation85_spill] sm:$0xff] }
 0x45c   :  { %v8099_v36 = vpop.eup %5868  ;;  %5874 = vpow2.f32 %v2089_v46  ;;  %v8109_v44 = vsel %vm11068_vm4, %v1465_v41, -1e+30  ;;  %vm11110_vm4 = vcmp.gt.f32.partialorder %v7010_v43, 0.0 }
 0x45d   :  { %1815 = vmax.xlane.f32.xlu1 %v8049_v53  ;;  %v8054_v63 = vpop.xlane.xlu0 %1795  ;;  %11082 = vst [vmem:[#allocation175_spill] sm:$0xff] %v8109_v44 }
 0x45e   :  { %11070 = vst [vmem:[#allocation168_spill] sm:$0xff] %v8054_v63  ;;  %v8060_v12 = vpop.xlane.xlu1 %1713  ;;  %1885 = vmax.xlane.f32.xlu0 %v8058_v56  ;;  %v1083_v63 = vadd.f32 %v7961_v39, %v11094_v3  ;;  %v1099_v3 = vadd.f32 %v7992_v28, %v11100_v30  ;;  %v1101_v30 = vadd.f32 %v7992_v28, %v11107_v59 }
 0x45f   :  { %v8111_v20 = vpop.eup %5870 }
 0x460   :  { %v1339_v17 = vmul.f32 0.2, %v1083_v63  ;;  %vm1211_vm14 = vcmp.gt.f32.partialorder %v1083_v63, 0.0  ;;  %v1355_v5 = vmul.f32 0.2, %v1099_v3  ;;  %vm1227_vm6 = vcmp.gt.f32.partialorder %v1099_v3, 0.0 }
 0x461   :  { %1817 = vmax.xlane.f32.xlu1 %v8067_v40  ;;  %v8072_v9 = vpop.xlane.xlu0 %1799  ;;  %v11089_v40 = vld [vmem:[#allocation5_spill] sm:$0xff] }
 0x462   :  { %11074 = vst [vmem:[#allocation57_spill] sm:$0xff] %v8072_v9  ;;  %v8078_v55 = vpop.xlane.xlu1 %1685  ;;  %1889 = vmax.xlane.f32.xlu0 %v8076_v57 }
 0x464   :  { %v8119_v33 = vpop.eup %5872 }
 0x465   :  { %1843 = vmax.xlane.f32.xlu1 %v8085_v54  ;;  %v8090_v38 = vpop.xlane.xlu0 %1827  ;;  %11084 = vst [vmem:[#allocation177_spill] sm:$0xff] %v8119_v33  ;;  %v11092_v54 = vld [vmem:[#allocation10_spill] sm:$0xff] }
 0x466   :  { %11079 = vst [vmem:[#allocation172_spill] sm:$0xff] %v8090_v38  ;;  %v8092_v11 = vpop.xlane.xlu1 %1689  ;;  %2331 = vadd.xlane.f32.xlu0 %v8087_v7  ;;  %v8126_v46 = vpop.eup %5874 }
 0x467   :  { %11086 = vst [vmem:[#allocation179_spill] sm:$0xff] %v8126_v46 }
 0x469   :  { %1845 = vmax.xlane.f32.xlu1 %v8097_v27  ;;  %v8102_v6 = vpop.xlane.xlu0 %1831 }
 0x46a   :  { %11081 = vst [vmem:[#allocation174_spill] sm:$0xff] %v8102_v6  ;;  %v8104_v42 = vpop.xlane.xlu1 %1717  ;;  %2309 = vadd.xlane.f32.xlu0 %v8099_v36  ;;  %v11097_v6 = vld [vmem:[#allocation64_spill] sm:$0xff] }
 0x46b   :  { %v1085_v38 = vadd.f32 %v7961_v39, %v11097_v6  ;;  %v2065_v6 = vmul.f32 1.442695, %v1926_v35 }
 0x46d   :  { %1847 = vmax.xlane.f32.xlu1 %v8109_v44  ;;  %v8114_v1 = vpop.xlane.xlu0 %1803  ;;  %v1341_v51 = vmul.f32 0.2, %v1085_v38  ;;  %vm1213_vm1 = vcmp.gt.f32.partialorder %v1085_v38, 0.0 }
 0x46e   :  { %11083 = vst [vmem:[#allocation176_spill] sm:$0xff] %v8114_v1  ;;  %v8116_v25 = vpop.xlane.xlu1 %1721  ;;  %2313 = vadd.xlane.f32.xlu0 %v8111_v20 }
 0x471   :  { %v8121_v8 = vpop.xlane.xlu0 %1809 }
 0x472   :  { %11085 = vst [vmem:[#allocation178_spill] sm:$0xff] %v8121_v8  ;;  %v8123_v18 = vpop.xlane.xlu1 %1725  ;;  %2341 = vadd.xlane.f32.xlu0 %v8119_v33  ;;  %v11101_v33 = vld [vmem:[#allocation14_spill] sm:$0xff] }
 0x475   :  { %v8128_v41 = vpop.xlane.xlu0 %1835 }
 0x476   :  { %11087 = vst [vmem:[#allocation180_spill] sm:$0xff] %v8128_v41  ;;  %v8130_v19 = vpop.xlane.xlu1 %1729  ;;  %2345 = vadd.xlane.f32.xlu0 %v8126_v46 }
 0x479   :  { %v8133_v57 = vpop.xlane.xlu0 %1841 }
 0x47a   :  { %11088 = vst [vmem:[#allocation181_spill] sm:$0xff] %v8133_v57  ;;  %v8135_v56 = vpop.xlane.xlu1 %1757 }
 0x47d   :  { %v2933_v50 = vpop.permute.xlu0 %2932 }
 0x47e   :  { %v8137_v27 = vpop.xlane.xlu1 %1761  ;;  %2934 = vrot.lane.b32.xlu1 %v11089_v40, %s6541_s1  ;;  %5553 = vmatprep.subr.bf16.mxu1 %v2933_v50 }
 0x47f   :  { %5554 = vmatpush3.bf16.msra.mxu1 %v2933_v50  ;;  %v11096_v50 = vld [vmem:[#allocation18_spill] sm:$0xff] }
 0x480   :  { %v1924_v41 = vsub.f32 %v11096_v50, %v8005_v32  ;;  %v11102_v32 = vld [vmem:[#allocation30_spill] sm:$0xff] }
 0x481   :  { %v1915_v50 = vsub.f32 %v11102_v32, %v11101_v33  ;;  %v1357_v32 = vmul.f32 0.2, %v1101_v30 }
 0x482   :  { %v8141_v8 = vpop.xlane.xlu1 %1733  ;;  %v2061_v61 = vmul.f32 1.442695, %v1924_v41  ;;  %v11104_v41 = vld [vmem:[#allocation25_spill] sm:$0xff] }
 0x483   :  { %vm11105_vm5 = vcmp.gt.f32.partialorder %v11104_v41, 0.0 }
 0x484   :  { %5876 = vpow2.f32 %v2061_v61  ;;  %v11108_v61 = vld [vmem:[#allocation91_spill] sm:$0xff] }
 0x485   :  { %v1916_v35 = vsub.f32 %v11108_v61, %v7910_v14  ;;  %5878 = vpow2.f32 %v2065_v6 }
 0x486   :  { %v8143_v1 = vpop.xlane.xlu1 %1737 }
 0x487   :  { %11090 = vst [vmem:[#allocation5_spill] sm:$0xff] %v8143_v1  ;;  %v2045_v61 = vmul.f32 1.442695, %v1916_v35 }
 0x48a   :  { %v8145_v44 = vpop.xlane.xlu1 %1765 }
 0x48b   :  { %11091 = vst [vmem:[#allocation182_spill] sm:$0xff] %v8145_v44 }
 0x48c   :  { %2940 = vrot.lane.b32.xlu0 %v11092_v54, %s6541_s1 }
 0x48e   :  { %v8149_v57 = vpop.xlane.xlu1 %1769  ;;  %v8199_v6 = vpop.eup %5876 }
 0x48f   :  { %11093 = vst [vmem:[#allocation10_spill] sm:$0xff] %v8149_v57 }
 0x492   :  { %v8151_v53 = vpop.xlane.xlu1 %1741 }
 0x496   :  { %v8155_v52 = vpop.xlane.xlu1 %1745 }
 0x497   :  { %11095 = vst [vmem:[#allocation59_spill] sm:$0xff] %v8155_v52  ;;  %v1467_v52 = vsel %vm1211_vm14, %v1083_v63, %v1339_v17  ;;  %v1469_v17 = vsel %vm1213_vm1, %v1085_v38, %v1341_v51  ;;  %v2043_v63 = vmul.f32 1.442695, %v1915_v50  ;;  %v1483_v51 = vsel %vm1227_vm6, %v1099_v3, %v1355_v5  ;;  %v11113_v38 = vld [vmem:[#allocation15_spill] sm:$0xff]  ;;  %v11114_v50 = vld [vmem:[#allocation33_spill] sm:$0xff]  ;;  %vm11115_vm1 = vmmov %vm11105_vm5 }
 0x498   :  { %v8175_v44 = vsel %vm11105_vm5, %v1467_v52, -1e+30  ;;  %v8188_v33 = vsel %vm11110_vm4, %v1469_v17, -1e+30  ;;  %v1917_v14 = vsub.f32 %v11114_v50, %v11113_v38  ;;  %vm1229_vm14 = vcmp.gt.f32.partialorder %v1101_v30, 0.0  ;;  %v11118_v5 = vld [vmem:[#allocation24_spill] sm:$0xff]  ;;  %vm11120_vm5 = vmmov %vm11110_vm4 }
 0x499   :  { %11106 = vst [vmem:[#allocation64_spill] sm:$0xff] %v8175_v44  ;;  %11111 = vst [vmem:[#allocation19_spill] sm:$0xff] %v8188_v33  ;;  %5880 = vpow2.f32 %v2043_v63  ;;  %v11119_v63 = vld [vmem:[#allocation36_spill] sm:$0xff] }
 0x49a   :  { %v8161_v9 = vpop.xlane.xlu1 %1773  ;;  %v2047_v3 = vmul.f32 1.442695, %v1917_v14 }
 0x49b   :  { %11098 = vst [vmem:[#allocation18_spill] sm:$0xff] %v8161_v9  ;;  %v11103_v9 = vld [vmem:[#allocation111_spill] sm:$0xff] }
 0x49c   :  { %v1940_v57 = vsub.f32 %v11103_v9, %v8042_v31  ;;  %v11109_v9 = vld [vmem:[#allocation114_spill] sm:$0xff] }
 0x49d   :  { %v1942_v52 = vsub.f32 %v11109_v9, %v8060_v12  ;;  %v8197_v12 = vsel %vm11115_vm1, %v1483_v51, -1e+30  ;;  %v1485_v9 = vsel %vm1229_vm14, %v1101_v30, %v1357_v32  ;;  %v11123_v32 = vld [vmem:[#allocation93_spill] sm:$0xff] }
 0x49e   :  { %v8167_v46 = vpop.xlane.xlu1 %1775  ;;  %v2093_v31 = vmul.f32 1.442695, %v1940_v57  ;;  %11116 = vst [vmem:[#allocation14_spill] sm:$0xff] %v8197_v12  ;;  %v8209_v35 = vsel %vm11120_vm5, %v1485_v9, -1e+30  ;;  %v1932_v51 = vsub.f32 %v11123_v32, %v7923_v10 }
 0x49f   :  { %v2097_v57 = vmul.f32 1.442695, %v1942_v52  ;;  %11121 = vst [vmem:[#allocation111_spill] sm:$0xff] %v8209_v35 }
 0x4a0   :  { %5882 = vpow2.f32 %v2093_v31  ;;  %v8211_v31 = vpop.eup %5878  ;;  %v2077_v9 = vmul.f32 1.442695, %v1932_v51  ;;  %v11130_v51 = vld [vmem:[#allocation44_spill] sm:$0xff] }
 0x4a1   :  { %5884 = vpow2.f32 %v2045_v61  ;;  %v11125_v61 = vld [vmem:[#allocation41_spill] sm:$0xff] }
 0x4a2   :  { %v8179_v1 = vpop.xlane.xlu1 %1749  ;;  %1851 = vmax.xlane.f32.xlu1 %v8175_v44  ;;  %v1918_v44 = vsub.f32 %v11119_v63, %v11118_v5  ;;  %5886 = vpow2.f32 %v2097_v57  ;;  %v1933_v57 = vsub.f32 %v11125_v61, %v7633_v60  ;;  %v11128_v63 = vld [vmem:[#allocation97_spill] sm:$0xff]  ;;  %v1919_v61 = vsub.f32 %v11130_v51, %v7649_v23 }
 0x4a3   :  { %5888 = vpow2.f32 %v2047_v3  ;;  %v8219_v38 = vpop.eup %5880  ;;  %v1934_v32 = vsub.f32 %v11128_v63, %v7934_v16 }
 0x4a4   :  { %v2049_v30 = vmul.f32 1.442695, %v1918_v44  ;;  %v2079_v5 = vmul.f32 1.442695, %v1933_v57  ;;  %v2051_v16 = vmul.f32 1.442695, %v1919_v61 }
 0x4a5   :  { %v2081_v43 = vmul.f32 1.442695, %v1934_v32 }
 0x4a6   :  { %v8190_v59 = vpop.xlane.xlu1 %1753  ;;  %1855 = vmax.xlane.f32.xlu1 %v8188_v33  ;;  %5890 = vpow2.f32 %v2049_v30 }
 0x4a7   :  { %11112 = vst [vmem:[#allocation82_spill] sm:$0xff] %v8190_v59  ;;  %5892 = vpow2.f32 %v2077_v9  ;;  %v11132_v9 = vld [vmem:[#allocation46_spill] sm:$0xff]  ;;  %v11180_v59 = vld [vmem:[#allocation76_spill] sm:$0xff] }
 0x4a8   :  { %5894 = vpow2.f32 %v2079_v5  ;;  %v1921_v63 = vsub.f32 %v11132_v9, %v7667_v15  ;;  %v11134_v5 = vld [vmem:[#allocation48_spill] sm:$0xff] }
 0x4a9   :  { %5896 = vpow2.f32 %v2081_v43  ;;  %v1935_v32 = vsub.f32 %v11134_v5, %v7683_v62  ;;  %v11136_v43 = vld [vmem:[#allocation50_spill] sm:$0xff] }
 0x4aa   :  { %v8201_v17 = vpop.xlane.xlu1 %1781  ;;  %1883 = vmax.xlane.f32.xlu1 %v8197_v12  ;;  %v8221_v50 = vpop.eup %5882  ;;  %5898 = vpow2.f32 %v2051_v16  ;;  %v2055_v23 = vmul.f32 1.442695, %v1921_v63  ;;  %v1937_v61 = vsub.f32 %v11136_v43, %v7697_v2  ;;  %v11138_v63 = vld [vmem:[#allocation12_spill] sm:$0xff] }
 0x4ab   :  { %11117 = vst [vmem:[#allocation30_spill] sm:$0xff] %v8201_v17  ;;  %2317 = vadd.xlane.f32.xlu0 %v8199_v6  ;;  %v8229_v44 = vpop.eup %5884  ;;  %v2083_v15 = vmul.f32 1.442695, %v1935_v32  ;;  %v11146_v17 = vld [vmem:[#allocation117_spill] sm:$0xff] }
 0x4ac   :  { %v8231_v10 = vpop.eup %5886  ;;  %5900 = vpow2.f32 %v2055_v23  ;;  %v2087_v16 = vmul.f32 1.442695, %v1937_v61  ;;  %v1928_v61 = vsub.f32 %v7610_v13, %v8078_v55  ;;  %v1944_v13 = vsub.f32 %v11146_v17, %v8104_v42 }
 0x4ad   :  { %11126 = vst [vmem:[#allocation114_spill] sm:$0xff] %v8231_v10  ;;  %v8239_v30 = vpop.eup %5888  ;;  %5902 = vpow2.f32 %v2083_v15  ;;  %v1090_v17 = vadd.f32 %v7961_v39, %v7699_v58 }
 0x4ae   :  { %v8213_v52 = vpop.xlane.xlu1 %1785  ;;  %1887 = vmax.xlane.f32.xlu1 %v8209_v35  ;;  %5904 = vpow2.f32 %v2087_v16  ;;  %v2069_v16 = vmul.f32 1.442695, %v1928_v61  ;;  %v2101_v61 = vmul.f32 1.442695, %v1944_v13 }
 0x4af   :  { %11122 = vst [vmem:[#allocation85_spill] sm:$0xff] %v8213_v52  ;;  %2321 = vadd.xlane.f32.xlu0 %v8211_v31  ;;  %vm1218_vm4 = vcmp.gt.f32.partialorder %v1090_v17, 0.0 }
 0x4b0   :  { %v8246_v41 = vpop.eup %5890  ;;  %5906 = vpow2.f32 %v2069_v16 }
 0x4b1   :  { %v8253_v35 = vpop.eup %5892 }
 0x4b2   :  { %v8223_v14 = vpop.xlane.xlu1 %1789  ;;  %2299 = vadd.xlane.f32.xlu1 %v8219_v38  ;;  %v8260_v51 = vpop.eup %5894 }
 0x4b3   :  { %11124 = vst [vmem:[#allocation91_spill] sm:$0xff] %v8223_v14  ;;  %2349 = vadd.xlane.f32.xlu0 %v8221_v50  ;;  %v8267_v9 = vpop.eup %5896 }
 0x4b4   :  { %v8272_v62 = vpop.eup %5898 }
 0x4b6   :  { %v8233_v3 = vpop.xlane.xlu1 %1791  ;;  %2301 = vadd.xlane.f32.xlu1 %v8229_v44  ;;  %v8279_v23 = vpop.eup %5900 }
 0x4b7   :  { %11127 = vst [vmem:[#allocation15_spill] sm:$0xff] %v8233_v3  ;;  %2353 = vadd.xlane.f32.xlu0 %v8231_v10  ;;  %v8284_v32 = vpop.eup %5902 }
 0x4b8   :  { %v8289_v43 = vpop.eup %5904 }
 0x4ba   :  { %v8241_v60 = vpop.xlane.xlu1 %1821  ;;  %2303 = vadd.xlane.f32.xlu1 %v8239_v30  ;;  %v8310_v16 = vpop.eup %5906 }
 0x4bb   :  { %11129 = vst [vmem:[#allocation33_spill] sm:$0xff] %v8241_v60 }
 0x4be   :  { %v8248_v57 = vpop.xlane.xlu1 %1823  ;;  %2305 = vadd.xlane.f32.xlu1 %v8246_v41 }
 0x4bf   :  { %11131 = vst [vmem:[#allocation24_spill] sm:$0xff] %v8248_v57 }
 0x4c2   :  { %v8255_v12 = vpop.xlane.xlu1 %1797  ;;  %2333 = vadd.xlane.f32.xlu1 %v8253_v35 }
 0x4c3   :  { %11133 = vst [vmem:[#allocation36_spill] sm:$0xff] %v8255_v12 }
 0x4c6   :  { %v8262_v33 = vpop.xlane.xlu1 %1801  ;;  %2335 = vadd.xlane.f32.xlu1 %v8260_v51 }
 0x4c7   :  { %11135 = vst [vmem:[#allocation93_spill] sm:$0xff] %v8262_v33  ;;  %v11144_v33 = vld [vmem:[#allocation27_spill] sm:$0xff] }
 0x4ca   :  { %v8269_v60 = vpop.xlane.xlu1 %1829  ;;  %2337 = vadd.xlane.f32.xlu1 %v8267_v9 }
 0x4cb   :  { %11137 = vst [vmem:[#allocation41_spill] sm:$0xff] %v8269_v60 }
 0x4cd   :  { %2944 = vrot.lane.b32.xlu0 %v11138_v63, %s6541_s1 }
 0x4ce   :  { %v8276_v5 = vpop.xlane.xlu1 %1833  ;;  %2307 = vadd.xlane.f32.xlu1 %v8272_v62 }
 0x4cf   :  { %11139 = vst [vmem:[#allocation97_spill] sm:$0xff] %v8276_v5 }
 0x4d2   :  { %v8281_v2 = vpop.xlane.xlu1 %1805  ;;  %2311 = vadd.xlane.f32.xlu1 %v8279_v23 }
 0x4d3   :  { %11140 = vst [vmem:[#allocation44_spill] sm:$0xff] %v8281_v2  ;;  %v1930_v2 = vsub.f32 %v11144_v33, %v8092_v11  ;;  %v11149_v11 = vld [vmem:[#allocation7_spill] sm:$0xff] }
 0x4d5   :  { %v2073_v52 = vmul.f32 1.442695, %v1930_v2 }
 0x4d6   :  { %v8286_v15 = vpop.xlane.xlu1 %1807  ;;  %2339 = vadd.xlane.f32.xlu1 %v8284_v32 }
 0x4d7   :  { %11141 = vst [vmem:[#allocation46_spill] sm:$0xff] %v8286_v15  ;;  %v1088_v15 = vadd.f32 %v7961_v39, %v7673_v24  ;;  %5908 = vpow2.f32 %v2073_v52  ;;  %v1946_v52 = vsub.f32 %v7662_v47, %v8116_v25  ;;  %v8338_v25 = vpop.xlane.xlu0 %1849 }
 0x4d8   :  { %5910 = vpow2.f32 %v2101_v61  ;;  %11155 = vst [vmem:[#allocation187_spill] sm:$0xff] %v8338_v25 }
 0x4d9   :  { %vm1216_vm6 = vcmp.gt.f32.partialorder %v1088_v15, 0.0  ;;  %v2105_v61 = vmul.f32 1.442695, %v1946_v52  ;;  %v1106_v52 = vadd.f32 %v7992_v28, %v7832_v37 }
 0x4da   :  { %v8293_v5 = vpop.xlane.xlu1 %1837  ;;  %2343 = vadd.xlane.f32.xlu1 %v8289_v43 }
 0x4db   :  { %11142 = vst [vmem:[#allocation48_spill] sm:$0xff] %v8293_v5  ;;  %v1344_v5 = vmul.f32 0.2, %v1088_v15  ;;  %5912 = vpow2.f32 %v2105_v61  ;;  %v1362_v61 = vmul.f32 0.2, %v1106_v52  ;;  %vm1234_vm1 = vcmp.gt.f32.partialorder %v1106_v52, 0.0 }
 0x4dd   :  { %v1472_v24 = vsel %vm1216_vm6, %v1088_v15, %v1344_v5  ;;  %v1346_v5 = vmul.f32 0.2, %v1090_v17  ;;  %v1104_v15 = vadd.f32 %v7992_v28, %v7810_v22 }
 0x4de   :  { %v8296_v60 = vpop.xlane.xlu1 %1839  ;;  %v8319_v42 = vsel %vm79_vm8, %v1472_v24, -1e+30 }
 0x4df   :  { %11143 = vst [vmem:[#allocation50_spill] sm:$0xff] %v8296_v60  ;;  %11151 = vst [vmem:[#allocation183_spill] sm:$0xff] %v8319_v42  ;;  %v1474_v47 = vsel %vm1218_vm4, %v1090_v17, %v1346_v5  ;;  %vm1232_vm14 = vcmp.gt.f32.partialorder %v1104_v15, 0.0 }
 0x4e0   :  { %v8344_v22 = vsel %vm10845_vm3, %v1474_v47, -1e+30  ;;  %v11161_v47 = vld [vmem:[#allocation56_spill] sm:$0xff] }
 0x4e1   :  { %v8328_v13 = vpop.eup %5908  ;;  %11157 = vst [vmem:[#allocation189_spill] sm:$0xff] %v8344_v22 }
 0x4e2   :  { %v8300_v12 = vpop.xlane.xlu1 %1811  ;;  %v8335_v58 = vpop.eup %5910 }
 0x4e3   :  { %11145 = vst [vmem:[#allocation12_spill] sm:$0xff] %v8300_v12  ;;  %11154 = vst [vmem:[#allocation186_spill] sm:$0xff] %v8335_v58 }
 0x4e6   :  { %v8306_v55 = vpop.xlane.xlu1 %1813 }
 0x4e7   :  { %11147 = vst [vmem:[#allocation27_spill] sm:$0xff] %v8306_v55  ;;  %v2937_v55 = vpop.permute.xlu0 %2936 }
 0x4ea   :  { %v8308_v60 = vpop.xlane.xlu1 %1815 }
 0x4eb   :  { %11148 = vst [vmem:[#allocation117_spill] sm:$0xff] %v8308_v60  ;;  %2938 = vrot.lane.b32.xlu1 %v11149_v11, %s6541_s1 }
 0x4ec   :  { %2325 = vadd.xlane.f32.xlu0 %v8310_v16 }
 0x4ee   :  { %v8315_v33 = vpop.xlane.xlu1 %1817 }
 0x4ef   :  { %11150 = vst [vmem:[#allocation7_spill] sm:$0xff] %v8315_v33 }
 0x4f0   :  { %1861 = vmax.xlane.f32.xlu0 %v8319_v42  ;;  %v1360_v42 = vmul.f32 0.2, %v1104_v15 }
 0x4f2   :  { %v8326_v2 = vpop.xlane.xlu1 %1843 }
 0x4f3   :  { %11152 = vst [vmem:[#allocation184_spill] sm:$0xff] %v8326_v2  ;;  %v1488_v2 = vsel %vm1232_vm14, %v1104_v15, %v1360_v42  ;;  %v11163_v42 = vld [vmem:[#allocation125_spill] sm:$0xff]  ;;  %v11164_v15 = vld [vmem:[#allocation58_spill] sm:$0xff] }
 0x4f4   :  { %2329 = vadd.xlane.f32.xlu0 %v8328_v13  ;;  %v8353_v5 = vsel %vm79_vm8, %v1488_v2, -1e+30 }
 0x4f6   :  { %v8333_v24 = vpop.xlane.xlu1 %1845 }
 0x4f7   :  { %11153 = vst [vmem:[#allocation185_spill] sm:$0xff] %v8333_v24  ;;  %v11158_v24 = vld [vmem:[#allocation53_spill] sm:$0xff] }
 0x4f8   :  { %2357 = vadd.xlane.f32.xlu0 %v8335_v58  ;;  %v1923_v12 = vsub.f32 %v11158_v24, %v7712_v21  ;;  %11159 = vst [vmem:[#allocation53_spill] sm:$0xff] %v8353_v5  ;;  %v8358_v21 = vpop.eup %5912  ;;  %v1939_v24 = vsub.f32 %v11164_v15, %v11163_v42  ;;  %v11170_v15 = vld [vmem:[#allocation119_spill] sm:$0xff] }
 0x4fa   :  { %v8340_v33 = vpop.xlane.xlu1 %1847  ;;  %v2059_v25 = vmul.f32 1.442695, %v1923_v12  ;;  %v1490_v12 = vsel %vm1234_vm1, %v1106_v52, %v1362_v61  ;;  %v2091_v2 = vmul.f32 1.442695, %v1939_v24  ;;  %v1948_v24 = vsub.f32 %v11170_v15, %v8123_v18  ;;  %v11179_v15 = vld [vmem:[#allocation138_spill] sm:$0xff] }
 0x4fb   :  { %11156 = vst [vmem:[#allocation188_spill] sm:$0xff] %v8340_v33  ;;  %v11160_v33 = vld [vmem:[#allocation55_spill] sm:$0xff]  ;;  %v1965_v57 = vsub.f32 %v11180_v59, %v11179_v15  ;;  %v11188_v15 = vld [vmem:[#allocation130_spill] sm:$0xff] }
 0x4fc   :  { %1865 = vmax.xlane.f32.xlu0 %v8344_v22  ;;  %v1925_v60 = vsub.f32 %v11161_v47, %v11160_v33  ;;  %11162 = vst [vmem:[#allocation55_spill] sm:$0xff] %v8358_v21  ;;  %5914 = vpow2.f32 %v2059_v25  ;;  %v8365_v33 = vsel %vm10845_vm3, %v1490_v12, -1e+30  ;;  %v11171_v12 = vld [vmem:[#allocation9_spill] sm:$0xff] }
 0x4fd   :  { %11165 = vst [vmem:[#allocation56_spill] sm:$0xff] %v8365_v33 }
 0x4fe   :  { %v2935_v17 = vpop.permute.xlu1 %2934  ;;  %v2063_v37 = vmul.f32 1.442695, %v1925_v60 }
 0x4ff   :  { %5555 = vmatprep.subr.bf16.mxu1 %v2935_v17 }
 0x500   :  { %5556 = vmatpush3.bf16.msra.mxu1 %v2935_v17  ;;  %1893 = vmax.xlane.f32.xlu0 %v8353_v5  ;;  %5916 = vpow2.f32 %v2063_v37  ;;  %v11166_v17 = vld [vmem:[#allocation60_spill] sm:$0xff]  ;;  %v8384_v37 = vpop.xlane.xlu0 %1853  ;;  %v11176_v5 = vld [vmem:[#allocation74_spill] sm:$0xff] }
 0x501   :  { %5557 = vmatprep.subr.bf16.mxu1 %v2937_v55  ;;  %v1941_v47 = vsub.f32 %v11166_v17, %v7743_v26  ;;  %5918 = vpow2.f32 %v2091_v2  ;;  %v11167_v26 = vld [vmem:[#allocation6_spill] sm:$0xff]  ;;  %11168 = vst [vmem:[#allocation125_spill] sm:$0xff] %v8384_v37  ;;  %v11172_v2 = vld [vmem:[#allocation73_spill] sm:$0xff] }
 0x502   :  { %v1949_v17 = vsub.f32 %v11172_v2, %v7807_v45 }
 0x503   :  { %v2095_v60 = vmul.f32 1.442695, %v1941_v47  ;;  %v2109_v47 = vmul.f32 1.442695, %v1948_v24  ;;  %v2143_v24 = vmul.f32 1.442695, %v1965_v57 }
 0x504   :  { %5558 = vmatpush3.bf16.msra.mxu1 %v2937_v55  ;;  %2361 = vadd.xlane.f32.xlu0 %v8358_v21  ;;  %v8386_v42 = vpop.xlane.xlu0 %1857  ;;  %v2111_v34 = vmul.f32 1.442695, %v1949_v17  ;;  %v11196_v21 = vld [vmem:[#allocation70_spill] sm:$0xff] }
 0x505   :  { %5920 = vpow2.f32 %v2095_v60  ;;  %11169 = vst [vmem:[#allocation58_spill] sm:$0xff] %v8386_v42 }
 0x506   :  { %v8370_v25 = vpop.eup %5914  ;;  %5922 = vpow2.f32 %v2109_v47 }
 0x507   :  { %5924 = vpow2.f32 %v2111_v34 }
 0x508   :  { %1897 = vmax.xlane.f32.xlu0 %v8365_v33  ;;  %v8394_v60 = vpop.xlane.xlu0 %1885  ;;  %v11175_v33 = vld [vmem:[#allocation136_spill] sm:$0xff] }
 0x509   :  { %11173 = vst [vmem:[#allocation60_spill] sm:$0xff] %v8394_v60  ;;  %v1963_v22 = vsub.f32 %v11176_v5, %v11175_v33  ;;  %v11184_v5 = vld [vmem:[#allocation43_spill] sm:$0xff]  ;;  %v11185_v33 = vld [vmem:[#allocation62_spill] sm:$0xff] }
 0x50a   :  { %v8373_v55 = vpop.eup %5916  ;;  %v1927_v47 = vsub.f32 %v11185_v33, %v11184_v5 }
 0x50b   :  { %v8376_v52 = vpop.eup %5918  ;;  %v2139_v18 = vmul.f32 1.442695, %v1963_v22 }
 0x50c   :  { %v8402_v37 = vpop.xlane.xlu0 %1889 }
 0x50d   :  { %11178 = vst [vmem:[#allocation9_spill] sm:$0xff] %v8402_v37  ;;  %5926 = vpow2.f32 %v2139_v18  ;;  %v2067_v37 = vmul.f32 1.442695, %v1927_v47 }
 0x50e   :  { %5928 = vpow2.f32 %v2143_v24 }
 0x50f   :  { %2315 = vadd.xlane.f32.xlu1 %v8370_v25  ;;  %v8379_v61 = vpop.eup %5920 }
 0x510   :  { %v2332_v2 = vpop.xlane.xlu0 %2331  ;;  %v8410_v17 = vpop.eup %5922 }
 0x511   :  { %11183 = vst [vmem:[#allocation74_spill] sm:$0xff] %v8410_v17  ;;  %v8415_v22 = vpop.eup %5924 }
 0x512   :  { %11186 = vst [vmem:[#allocation138_spill] sm:$0xff] %v8415_v22 }
 0x513   :  { %2319 = vadd.xlane.f32.xlu1 %v8373_v55 }
 0x514   :  { %v2310_v59 = vpop.xlane.xlu0 %2309 }
 0x517   :  { %2347 = vadd.xlane.f32.xlu1 %v8376_v52  ;;  %v8418_v18 = vpop.eup %5926 }
 0x518   :  { %11187 = vst [vmem:[#allocation76_spill] sm:$0xff] %v8418_v18  ;;  %v2314_v5 = vpop.xlane.xlu0 %2313  ;;  %v8423_v33 = vpop.eup %5928 }
 0x519   :  { %11190 = vst [vmem:[#allocation43_spill] sm:$0xff] %v8423_v33 }
 0x51b   :  { %2351 = vadd.xlane.f32.xlu1 %v8379_v61 }
 0x51e   :  { %3061 = vrot.lane.b32.xlu0 %v11167_v26, %s6542_s14 }
 0x52c   :  { %2942 = vrot.lane.b32.xlu1 %v11171_v12, %s6541_s1 }
 0x52f   :  { %v8396_v4 = vpop.xlane.xlu1 %1851 }
 0x530   :  { %11174 = vst [vmem:[#allocation6_spill] sm:$0xff] %v8396_v4  ;;  %v11189_v4 = vld [vmem:[#allocation66_spill] sm:$0xff] }
 0x533   :  { %v8400_v42 = vpop.xlane.xlu1 %1855 }
 0x534   :  { %11177 = vst [vmem:[#allocation119_spill] sm:$0xff] %v8400_v42 }
 0x537   :  { %v8406_v45 = vpop.xlane.xlu1 %1883 }
 0x538   :  { %11181 = vst [vmem:[#allocation73_spill] sm:$0xff] %v8406_v45  ;;  %v11191_v45 = vld [vmem:[#allocation67_spill] sm:$0xff] }
 0x539   :  { %v1087_v47 = vadd.f32 %v7961_v39, %v11191_v45 }
 0x53b   :  { %v8408_v60 = vpop.xlane.xlu1 %1887  ;;  %v1343_v14 = vmul.f32 0.2, %v1087_v47  ;;  %vm1215_vm5 = vcmp.gt.f32.partialorder %v1087_v47, 0.0 }
 0x53c   :  { %11182 = vst [vmem:[#allocation136_spill] sm:$0xff] %v8408_v60  ;;  %v1929_v60 = vsub.f32 %v11189_v4, %v11188_v15  ;;  %v8430_v15 = vpop.xlane.xlu0 %2341 }
 0x53d   :  { %2365 = vadd.xlane.f32.xlu0 %v8410_v17 }
 0x53e   :  { %v2071_v42 = vmul.f32 1.442695, %v1929_v60 }
 0x53f   :  { %v2300_v34 = vpop.xlane.xlu1 %2299 }
 0x540   :  { %5930 = vrcp.f32 %v2300_v34  ;;  %v11193_v34 = vld [vmem:[#allocation68_spill] sm:$0xff] }
 0x541   :  { %2367 = vadd.xlane.f32.xlu0 %v8415_v22  ;;  %v11192_v22 = vld [vmem:[#allocation16_spill] sm:$0xff] }
 0x542   :  { %v1943_v3 = vsub.f32 %v11193_v34, %v11192_v22 }
 0x543   :  { %v2302_v57 = vpop.xlane.xlu1 %2301 }
 0x544   :  { %5932 = vrcp.f32 %v2302_v57  ;;  %v2099_v4 = vmul.f32 1.442695, %v1943_v3 }
 0x545   :  { %5934 = vpow2.f32 %v2067_v37  ;;  %2395 = vadd.xlane.f32.xlu0 %v8418_v18 }
 0x547   :  { %v2304_v24 = vpop.xlane.xlu1 %2303 }
 0x548   :  { %5936 = vrcp.f32 %v2304_v24  ;;  %v1471_v24 = vsel %vm1215_vm5, %v1087_v47, %v1343_v14 }
 0x549   :  { %2399 = vadd.xlane.f32.xlu0 %v8423_v33 }
 0x54a   :  { %v5931_v57 = vpop.eup %5930 }
 0x54b   :  { %v2306_v37 = vpop.xlane.xlu1 %2305  ;;  %v2556_v45 = vmul.f32 %v5931_v57, %v8219_v38  ;;  %v1089_v38 = vadd.f32 %v7961_v39, %v11196_v21 }
 0x54c   :  { %5938 = vrcp.f32 %v2306_v37 }
 0x54d   :  { %5940 = vpow2.f32 %v2071_v42  ;;  %v8437_v42 = vpop.xlane.xlu0 %2345  ;;  %vm1217_vm6 = vcmp.gt.f32.partialorder %v1089_v38, 0.0 }
 0x54e   :  { %v5933_v18 = vpop.eup %5932  ;;  %5942 = vrcp.f32 %v2332_v2  ;;  %v8443_v2 = vsel %vm78_vm13, %v1471_v24, -1e+30  ;;  %v1345_v24 = vmul.f32 0.2, %v1089_v38 }
 0x54f   :  { %v8432_v17 = vpop.eup %5934  ;;  %v2334_v60 = vpop.xlane.xlu1 %2333  ;;  %v2558_v22 = vmul.f32 %v5933_v18, %v8229_v44  ;;  %11195 = vst [vmem:[#allocation62_spill] sm:$0xff] %v8443_v2  ;;  %v11197_v44 = vld [vmem:[#allocation45_spill] sm:$0xff] }
 0x550   :  { %5944 = vrcp.f32 %v2334_v60  ;;  %2323 = vadd.xlane.f32.xlu1 %v8432_v17  ;;  %v11198_v18 = vld [vmem:[#allocation69_spill] sm:$0xff] }
 0x551   :  { %5946 = vpow2.f32 %v2099_v4  ;;  %v2811_v34 = vpack.c.bf16 %v2558_v22, %v2556_v45  ;;  %v1945_v14 = vsub.f32 %v11198_v18, %v11197_v44 }
 0x552   :  { %v5937_v33 = vpop.eup %5936  ;;  %5948 = vrcp.f32 %v2310_v59 }
 0x553   :  { %5537 = vmatprep.mubr.bf16.mxu0 %v2811_v34  ;;  %v8439_v3 = vpop.xlane.xlu1 %2335  ;;  %v2560_v4 = vmul.f32 %v5937_v33, %v8239_v30  ;;  %v11199_v34 = vld [vmem:[#allocation88_spill] sm:$0xff]  ;;  %v2103_v21 = vmul.f32 1.442695, %v1945_v14 }
 0x554   :  { %1859 = vmax.xlane.f32.xlu1 %v8443_v2  ;;  %v1103_v58 = vadd.f32 %v7992_v28, %v11199_v34  ;;  %v2941_v2 = vpop.permute.xlu0 %2940  ;;  %v1473_v34 = vsel %vm1217_vm6, %v1089_v38, %v1345_v24 }
 0x556   :  { %v5939_v47 = vpop.eup %5938  ;;  %vm1231_vm4 = vcmp.gt.f32.partialorder %v1103_v58, 0.0 }
 0x557   :  { %v8450_v57 = vpop.eup %5940  ;;  %v2562_v60 = vmul.f32 %v5939_v47, %v8246_v41  ;;  %v8454_v45 = vpop.xlane.xlu1 %2337  ;;  %v1359_v47 = vmul.f32 0.2, %v1103_v58 }
 0x558   :  { %v5943_v22 = vpop.eup %5942  ;;  %2327 = vadd.xlane.f32.xlu1 %v8450_v57  ;;  %v8464_v14 = vpop.xlane.xlu0 %2317 }
 0x559   :  { %v2812_v10 = vpack.c.bf16 %v2562_v60, %v2560_v4  ;;  %v2588_v41 = vmul.f32 %v5943_v22, %v8087_v7  ;;  %v8470_v7 = vsel %vm10846_vm15, %v1473_v34, -1e+30  ;;  %v1487_v38 = vsel %vm1231_vm4, %v1103_v58, %v1359_v47 }
 0x55a   :  { %v5945_v44 = vpop.eup %5944  ;;  %11201 = vst [vmem:[#allocation130_spill] sm:$0xff] %v8470_v7 }
 0x55b   :  { %v8459_v18 = vpop.eup %5946  ;;  %v2308_v30 = vpop.xlane.xlu1 %2307  ;;  %5538 = vmatmul.mubr.bf16.vlgmr.msra.gmra.mrb[16].mxu0 %v2812_v10  ;;  %v2590_v33 = vmul.f32 %v5945_v44, %v8253_v35  ;;  %v11202_v35 = vld [vmem:[#allocation95_spill] sm:$0xff] }
 0x55c   :  { %5950 = vrcp.f32 %v2308_v30  ;;  %2355 = vadd.xlane.f32.xlu1 %v8459_v18  ;;  %v1105_v60 = vadd.f32 %v7992_v28, %v11202_v35  ;;  %v8475_v22 = vpop.xlane.xlu0 %2321 }
 0x55d   :  { %5952 = vpow2.f32 %v2103_v21  ;;  %v2916_v4 = vpack.c.bf16 %v2590_v33, %v2588_v41  ;;  %v5949_v21 = vpop.eup %5948 }
 0x55e   :  { %5954 = vrcp.f32 %v2314_v5  ;;  %v8483_v5 = vsel %vm78_vm13, %v1487_v38, -1e+30  ;;  %v1361_v44 = vmul.f32 0.2, %v1105_v60  ;;  %vm1233_vm14 = vcmp.gt.f32.partialorder %v1105_v60, 0.0 }
 0x55f   :  { %5569 = vmatprep.mubr.bf16.mxu1 %v2916_v4  ;;  %v2312_v59 = vpop.xlane.xlu1 %2311  ;;  %3063 = vrot.lane.b32.xlu0 %v11089_v40, %s6542_s14  ;;  %11203 = vst [vmem:[#allocation66_spill] sm:$0xff] %v8483_v5  ;;  %v2566_v47 = vmul.f32 %v5949_v21, %v8099_v36 }
 0x560   :  { %5956 = vrcp.f32 %v2312_v59  ;;  %1863 = vmax.xlane.f32.xlu1 %v8470_v7  ;;  %v1489_v4 = vsel %vm1233_vm14, %v1105_v60, %v1361_v44  ;;  %v8493_v59 = vpop.xlane.xlu0 %2349  ;;  %v11205_v60 = vld [vmem:[#allocation124_spill] sm:$0xff] }
 0x561   :  { %v1952_v21 = vsub.f32 %v11205_v60, %v8141_v8 }
 0x563   :  { %v8477_v24 = vpop.xlane.xlu1 %2339  ;;  %3194 = vrot.lane.b32.xlu0 %v11040_v29, %s6543_s15 }
 0x564   :  { %1891 = vmax.xlane.f32.xlu1 %v8483_v5  ;;  %v8497_v5 = vsel %vm10846_vm15, %v1489_v4, -1e+30  ;;  %v8504_v44 = vpop.xlane.xlu0 %2353  ;;  %v11208_v4 = vld [vmem:[#allocation81_spill] sm:$0xff] }
 0x565   :  { %11204 = vst [vmem:[#allocation67_spill] sm:$0xff] %v8497_v5  ;;  %v1967_v8 = vsub.f32 %v11208_v4, %v7865_v48 }
 0x566   :  { %v5951_v30 = vpop.eup %5950 }
 0x567   :  { %v8486_v41 = vpop.eup %5952  ;;  %v8488_v58 = vpop.xlane.xlu1 %2343  ;;  %v2564_v33 = vmul.f32 %v5951_v30, %v8272_v62  ;;  %v2117_v30 = vmul.f32 1.442695, %v1952_v21 }
 0x568   :  { %v5955_v34 = vpop.eup %5954  ;;  %2359 = vadd.xlane.f32.xlu1 %v8486_v41 }
 0x569   :  { %v2813_v35 = vpack.c.bf16 %v2566_v47, %v2564_v33  ;;  %v2570_v62 = vmul.f32 %v5955_v34, %v8111_v20  ;;  %v8506_v33 = vpop.permute.xlu0 %2944  ;;  %5958 = vpow2.f32 %v2117_v30  ;;  %v11207_v34 = vld [vmem:[#allocation72_spill] sm:$0xff] }
 0x56a   :  { %v5957_v38 = vpop.eup %5956 }
 0x56b   :  { %v2939_v37 = vpop.permute.xlu1 %2938  ;;  %5541 = vmatprep.mubr.bf16.mxu0 %v2813_v35  ;;  %v2568_v7 = vmul.f32 %v5957_v38, %v8279_v23  ;;  %v11206_v23 = vld [vmem:[#allocation79_spill] sm:$0xff] }
 0x56c   :  { %1895 = vmax.xlane.f32.xlu1 %v8497_v5  ;;  %5559 = vmatprep.subr.bf16.mxu1 %v2939_v37  ;;  %v1953_v47 = vsub.f32 %v11206_v23, %v7856_v0  ;;  %v11209_v35 = vld [vmem:[#allocation11_spill] sm:$0xff] }
 0x56d   :  { %5560 = vmatpush3.bf16.msra.mxu1 %v2939_v37  ;;  %v2814_v36 = vpack.c.bf16 %v2570_v62, %v2568_v7  ;;  %v1091_v37 = vadd.f32 %v7961_v39, %v11207_v34  ;;  %v2147_v62 = vmul.f32 1.442695, %v1967_v8  ;;  %v11214_v23 = vld [vmem:[#allocation75_spill] sm:$0xff]  ;;  %v11215_v34 = vld [vmem:[#allocation145_spill] sm:$0xff] }
 0x56e   :  { %5561 = vmatprep.subr.bf16.mxu1 %v2941_v2  ;;  %v2119_v7 = vmul.f32 1.442695, %v1953_v47  ;;  %v1093_v47 = vadd.f32 %v7961_v39, %v11214_v23 }
 0x56f   :  { %5542 = vmatmul.mubr.bf16.gmra.mrb[20].mxu0 %v2814_v36  ;;  %v1347_v38 = vmul.f32 0.2, %v1091_v37  ;;  %vm1219_vm1 = vcmp.gt.f32.partialorder %v1091_v37, 0.0 }
 0x570   :  { %5960 = vpow2.f32 %v2119_v7  ;;  %v11216_v7 = vld [vmem:[#allocation83_spill] sm:$0xff]  ;;  %vm1221_vm5 = vcmp.gt.f32.partialorder %v1093_v47, 0.0 }
 0x571   :  { %5562 = vmatpush3.bf16.msra.mxu1 %v2941_v2  ;;  %v1475_v60 = vsel %vm1219_vm1, %v1091_v37, %v1347_v38  ;;  %5962 = vpow2.f32 %v2147_v62  ;;  %v1969_v4 = vsub.f32 %v11216_v7, %v11215_v34  ;;  %v1349_v37 = vmul.f32 0.2, %v1093_v47  ;;  %v11219_v38 = vld [vmem:[#allocation99_spill] sm:$0xff] }
 0x572   :  { %v8531_v30 = vsel %vm10844_vm10, %v1475_v60, -1e+30  ;;  %v1107_v62 = vadd.f32 %v7992_v28, %v11219_v38  ;;  %v11223_v38 = vld [vmem:[#allocation47_spill] sm:$0xff] }
 0x573   :  { %v8520_v0 = vpop.eup %5958  ;;  %11213 = vst [vmem:[#allocation70_spill] sm:$0xff] %v8531_v30  ;;  %v2151_v60 = vmul.f32 1.442695, %v1969_v4  ;;  %v1477_v34 = vsel %vm1221_vm5, %v1093_v47, %v1349_v37  ;;  %v11227_v37 = vld [vmem:[#allocation121_spill] sm:$0xff] }
 0x574   :  { %11211 = vst [vmem:[#allocation68_spill] sm:$0xff] %v8520_v0  ;;  %vm1235_vm6 = vcmp.gt.f32.partialorder %v1107_v62, 0.0 }
 0x575   :  { %5964 = vpow2.f32 %v2151_v60  ;;  %v1950_v60 = vsub.f32 %v11227_v37, %v8130_v19 }
 0x579   :  { %v8510_v20 = vpop.xlane.xlu0 %2325 }
 0x57a   :  { %v8538_v8 = vpop.eup %5960 }
 0x57b   :  { %11217 = vst [vmem:[#allocation45_spill] sm:$0xff] %v8538_v8  ;;  %v8545_v5 = vpop.eup %5962 }
 0x57c   :  { %11220 = vst [vmem:[#allocation88_spill] sm:$0xff] %v8545_v5 }
 0x57d   :  { %2946 = vrot.lane.b32.xlu1 %v11209_v35, %s6541_s1  ;;  %v8518_v2 = vpop.xlane.xlu0 %1861 }
 0x57e   :  { %11210 = vst [vmem:[#allocation16_spill] sm:$0xff] %v8518_v2  ;;  %v11224_v2 = vld [vmem:[#allocation71_spill] sm:$0xff] }
 0x57f   :  { %v1947_v4 = vsub.f32 %v11224_v2, %v11223_v38  ;;  %v2113_v2 = vmul.f32 1.442695, %v1950_v60  ;;  %v11229_v38 = vld [vmem:[#allocation122_spill] sm:$0xff] }
 0x581   :  { %3190 = vrot.lane.b32.xlu1 %v11167_v26, %s6543_s15  ;;  %v8524_v36 = vpop.xlane.xlu0 %2329  ;;  %v2107_v47 = vmul.f32 1.442695, %v1947_v4 }
 0x582   :  { %2373 = vadd.xlane.f32.xlu0 %v8520_v0 }
 0x583   :  { %5966 = vpow2.f32 %v2107_v47 }
 0x584   :  { %5968 = vrcp.f32 %v8464_v14 }
 0x585   :  { %v8527_v48 = vpop.xlane.xlu0 %2357 }
 0x586   :  { %1867 = vmax.xlane.f32.xlu0 %v8531_v30  ;;  %v1363_v30 = vmul.f32 0.2, %v1107_v62 }
 0x589   :  { %v8540_v10 = vpop.xlane.xlu0 %1865 }
 0x58a   :  { %11218 = vst [vmem:[#allocation69_spill] sm:$0xff] %v8540_v10  ;;  %2375 = vadd.xlane.f32.xlu0 %v8538_v8  ;;  %v8554_v10 = vsel %vm10842_vm12, %v1477_v34, -1e+30  ;;  %v1491_v8 = vsel %vm1235_vm6, %v1107_v62, %v1363_v30  ;;  %v8568_v34 = vpop.eup %5964  ;;  %v1964_v30 = vsub.f32 %v11229_v38, %v8135_v56  ;;  %v11230_v62 = vld [vmem:[#allocation123_spill] sm:$0xff] }
 0x58b   :  { %11222 = vst [vmem:[#allocation124_spill] sm:$0xff] %v8554_v10  ;;  %11228 = vst [vmem:[#allocation81_spill] sm:$0xff] %v8568_v34  ;;  %v1966_v4 = vsub.f32 %v11230_v62, %v8137_v27 }
 0x58c   :  { %v2141_v19 = vmul.f32 1.442695, %v1964_v30 }
 0x58d   :  { %v8547_v23 = vpop.xlane.xlu0 %1893  ;;  %v2145_v37 = vmul.f32 1.442695, %v1966_v4  ;;  %v8577_v56 = vpop.eup %5966 }
 0x58e   :  { %11221 = vst [vmem:[#allocation95_spill] sm:$0xff] %v8547_v23  ;;  %2403 = vadd.xlane.f32.xlu0 %v8545_v5  ;;  %v8563_v23 = vsel %vm10844_vm10, %v1491_v8, -1e+30  ;;  %v5969_v38 = vpop.eup %5968  ;;  %vm11599_vm10 = vcmask 523264  }
 0x58f   :  { %11226 = vst [vmem:[#allocation72_spill] sm:$0xff] %v8563_v23  ;;  %vm9951_vm3 = vmpackc.low %vm11599_vm10, %vm11599_vm10 }
 0x591   :  { %v8550_v7 = vpop.xlane.xlu0 %2361 }
 0x592   :  { %1871 = vmax.xlane.f32.xlu0 %v8554_v10 }
 0x595   :  { %v8559_v0 = vpop.xlane.xlu0 %1897 }
 0x596   :  { %11225 = vst [vmem:[#allocation79_spill] sm:$0xff] %v8559_v0  ;;  %1899 = vmax.xlane.f32.xlu0 %v8563_v23 }
 0x599   :  { %v3062_v5 = vpop.permute.xlu0 %3061 }
 0x59a   :  { %2407 = vadd.xlane.f32.xlu0 %v8568_v34  ;;  %5585 = vmatprep.subr.bf16.mxu0 %v3062_v5  ;;  %v11252_v34 = vld [vmem:[#allocation10_spill] sm:$0xff] }
 0x59b   :  { %5586 = vmatpush3.bf16.msra.mxu0 %v3062_v5 }
 0x59c   :  { %v2316_v8 = vpop.xlane.xlu1 %2315 }
 0x59d   :  { %5970 = vrcp.f32 %v2316_v8 }
 0x59e   :  { %5972 = vpow2.f32 %v2113_v2 }
 0x59f   :  { %5974 = vrcp.f32 %v8475_v22  ;;  %v2574_v22 = vmul.f32 %v5969_v38, %v8199_v6  ;;  %v11233_v38 = vld [vmem:[#allocation150_spill] sm:$0xff] }
 0x5a0   :  { %v2320_v47 = vpop.xlane.xlu1 %2319 }
 0x5a1   :  { %5976 = vrcp.f32 %v2320_v47 }
 0x5a2   :  { %5978 = vpow2.f32 %v2141_v19 }
 0x5a3   :  { %5980 = vpow2.f32 %v2145_v37 }
 0x5a4   :  { %v8579_v60 = vpop.xlane.xlu1 %2347 }
 0x5a5   :  { %2363 = vadd.xlane.f32.xlu1 %v8577_v56 }
 0x5a7   :  { %v5971_v14 = vpop.eup %5970 }
 0x5a8   :  { %v8582_v5 = vpop.eup %5972  ;;  %v8584_v2 = vpop.xlane.xlu1 %2351  ;;  %v2572_v27 = vmul.f32 %v5971_v14, %v8370_v25  ;;  %v11234_v14 = vld [vmem:[#allocation87_spill] sm:$0xff] }
 0x5a9   :  { %v5975_v30 = vpop.eup %5974  ;;  %2369 = vadd.xlane.f32.xlu1 %v8582_v5 }
 0x5aa   :  { %v2815_v8 = vpack.c.bf16 %v2574_v22, %v2572_v27  ;;  %v2578_v37 = vmul.f32 %v5975_v30, %v8211_v31  ;;  %v11232_v31 = vld [vmem:[#allocation132_spill] sm:$0xff]  ;;  %v1957_v27 = vsub.f32 %v11234_v14, %v11233_v38  ;;  %v11238_v14 = vld [vmem:[#allocation17_spill] sm:$0xff] }
 0x5ab   :  { %v5977_v19 = vpop.eup %5976 }
 0x5ac   :  { %v8589_v62 = vpop.eup %5978  ;;  %v2943_v4 = vpop.permute.xlu1 %2942  ;;  %5545 = vmatprep.mubr.bf16.mxu0 %v2815_v8  ;;  %v2576_v47 = vmul.f32 %v5977_v19, %v8373_v55  ;;  %v1956_v55 = vsub.f32 %v11232_v31, %v8151_v53  ;;  %v2127_v30 = vmul.f32 1.442695, %v1957_v27  ;;  %v11235_v8 = vld [vmem:[#allocation153_spill] sm:$0xff]  ;;  %v11237_v53 = vld [vmem:[#allocation135_spill] sm:$0xff]  ;;  %v11239_v27 = vld [vmem:[#allocation78_spill] sm:$0xff] }
 0x5ad   :  { %2397 = vadd.xlane.f32.xlu1 %v8589_v62  ;;  %5563 = vmatprep.subr.bf16.mxu1 %v2943_v4  ;;  %v8595_v6 = vpop.eup %5980  ;;  %v11236_v19 = vld [vmem:[#allocation89_spill] sm:$0xff]  ;;  %v1951_v0 = vsub.f32 %v11239_v27, %v11238_v14 }
 0x5ae   :  { %5564 = vmatpush3.bf16.msra.mxu1 %v2943_v4  ;;  %v2816_v25 = vpack.c.bf16 %v2578_v37, %v2576_v47  ;;  %11231 = vst [vmem:[#allocation11_spill] sm:$0xff] %v8595_v6  ;;  %v2125_v22 = vmul.f32 1.442695, %v1956_v55  ;;  %v1971_v4 = vsub.f32 %v11236_v19, %v11235_v8 }
 0x5af   :  { %5565 = vmatprep.subr.bf16.mxu1 %v8506_v33  ;;  %v2115_v8 = vmul.f32 1.442695, %v1951_v0  ;;  %v11245_v0 = vld [vmem:[#allocation37_spill] sm:$0xff] }
 0x5b0   :  { %3067 = vrot.lane.b32.xlu0 %v11149_v11, %s6542_s14  ;;  %5546 = vmatmul.mubr.bf16.gmra.mrb[24].mxu0 %v2816_v25  ;;  %5982 = vpow2.f32 %v2125_v22  ;;  %v2155_v37 = vmul.f32 1.442695, %v1971_v4  ;;  %v1973_v25 = vsub.f32 %v11237_v53, %v8167_v46  ;;  %v11241_v4 = vld [vmem:[#allocation5_spill] sm:$0xff]  ;;  %v1092_v14 = vadd.f32 %v7961_v39, %v11245_v0 }
 0x5b1   :  { %2401 = vadd.xlane.f32.xlu1 %v8595_v6  ;;  %5984 = vpow2.f32 %v2127_v30  ;;  %v11253_v6 = vld [vmem:[#allocation129_spill] sm:$0xff] }
 0x5b2   :  { %5566 = vmatpush3.bf16.msra.mxu1 %v8506_v33  ;;  %5986 = vpow2.f32 %v2155_v37  ;;  %v2159_v21 = vmul.f32 1.442695, %v1973_v25  ;;  %v11242_v37 = vld [vmem:[#allocation127_spill] sm:$0xff]  ;;  %vm1220_vm4 = vcmp.gt.f32.partialorder %v1092_v14, 0.0 }
 0x5b3   :  { %v1954_v53 = vsub.f32 %v11242_v37, %v11241_v4 }
 0x5b4   :  { %3069 = vrot.lane.b32.xlu0 %v11092_v54, %s6542_s14  ;;  %5988 = vpow2.f32 %v2159_v21 }
 0x5b5   :  { %5990 = vrcp.f32 %v8510_v20  ;;  %v2121_v27 = vmul.f32 1.442695, %v1954_v53  ;;  %v11246_v20 = vld [vmem:[#allocation182_spill] sm:$0xff] }
 0x5b8   :  { %3198 = vrot.lane.b32.xlu0 %v11092_v54, %s6543_s15 }
 0x5ba   :  { %v8623_v38 = vpop.eup %5982 }
 0x5bb   :  { %v8630_v22 = vpop.eup %5984 }
 0x5bc   :  { %v8634_v19 = vpop.eup %5986 }
 0x5bd   :  { %11240 = vst [vmem:[#allocation75_spill] sm:$0xff] %v8634_v19 }
 0x5be   :  { %v8641_v25 = vpop.eup %5988 }
 0x5bf   :  { %11244 = vst [vmem:[#allocation83_spill] sm:$0xff] %v8641_v25 }
 0x5c2   :  { %3192 = vrot.lane.b32.xlu1 %v11089_v40, %s6543_s15 }
 0x5c6   :  { %3065 = vrot.lane.b32.xlu1 %v11040_v29, %s6542_s14 }
 0x5ca   :  { %v8613_v33 = vpop.xlane.xlu0 %2365 }
 0x5ce   :  { %v8617_v47 = vpop.xlane.xlu0 %2367 }
 0x5d2   :  { %v8621_v31 = vpop.xlane.xlu0 %2395 }
 0x5d6   :  { %v8625_v55 = vpop.xlane.xlu0 %2399 }
 0x5d7   :  { %2381 = vadd.xlane.f32.xlu0 %v8623_v38 }
 0x5da   :  { %v3064_v30 = vpop.permute.xlu0 %3063 }
 0x5db   :  { %2383 = vadd.xlane.f32.xlu0 %v8630_v22  ;;  %5587 = vmatprep.subr.bf16.mxu0 %v3064_v30 }
 0x5dc   :  { %5588 = vmatpush3.bf16.msra.mxu0 %v3064_v30  ;;  %v11247_v30 = vld [vmem:[#allocation128_spill] sm:$0xff] }
 0x5dd   :  { %v2324_v46 = vpop.xlane.xlu1 %2323  ;;  %v1968_v23 = vsub.f32 %v11247_v30, %v11246_v20  ;;  %v11248_v30 = vld [vmem:[#allocation126_spill] sm:$0xff] }
 0x5de   :  { %5992 = vrcp.f32 %v2324_v46  ;;  %v5991_v46 = vpop.eup %5990 }
 0x5df   :  { %5994 = vpow2.f32 %v2115_v8  ;;  %2411 = vadd.xlane.f32.xlu0 %v8634_v19  ;;  %v1348_v8 = vmul.f32 0.2, %v1092_v14  ;;  %v2149_v37 = vmul.f32 1.442695, %v1968_v23  ;;  %v2582_v0 = vmul.f32 %v5991_v46, %v8310_v16 }
 0x5e0   :  { %5996 = vrcp.f32 %v8524_v36 }
 0x5e1   :  { %v8639_v21 = vpop.xlane.xlu1 %1859  ;;  %5998 = vpow2.f32 %v2121_v27  ;;  %v1476_v20 = vsel %vm1220_vm4, %v1092_v14, %v1348_v8  ;;  %v1094_v27 = vadd.f32 %v7961_v39, %v11248_v30  ;;  %v11254_v8 = vld [vmem:[#allocation140_spill] sm:$0xff] }
 0x5e2   :  { %11243 = vst [vmem:[#allocation145_spill] sm:$0xff] %v8639_v21 }
 0x5e3   :  { %2415 = vadd.xlane.f32.xlu0 %v8641_v25  ;;  %v8662_v25 = vsel %vm10843_vm2, %v1476_v20, -1e+30  ;;  %v1350_v46 = vmul.f32 0.2, %v1094_v27  ;;  %vm1222_vm14 = vcmp.gt.f32.partialorder %v1094_v27, 0.0 }
 0x5e4   :  { %11251 = vst [vmem:[#allocation47_spill] sm:$0xff] %v8662_v25 }
 0x5e5   :  { %v2328_v4 = vpop.xlane.xlu1 %2327 }
 0x5e6   :  { %6000 = vrcp.f32 %v2328_v4  ;;  %v11304_v4 = vld [vmem:[#allocation74_spill] sm:$0xff] }
 0x5e7   :  { %6002 = vpow2.f32 %v2149_v37  ;;  %v1108_v37 = vadd.f32 %v7992_v28, %v11254_v8 }
 0x5e8   :  { %v5993_v21 = vpop.eup %5992  ;;  %6004 = vrcp.f32 %v8454_v45 }
 0x5e9   :  { %v8649_v10 = vpop.eup %5994  ;;  %v8651_v19 = vpop.xlane.xlu1 %2355  ;;  %v2580_v53 = vmul.f32 %v5993_v21, %v8432_v17  ;;  %v1970_v17 = vsub.f32 %v11253_v6, %v11252_v34  ;;  %6006 = vrcp.f32 %v8477_v24  ;;  %vm1236_vm1 = vcmp.gt.f32.partialorder %v1108_v37, 0.0 }
 0x5ea   :  { %2371 = vadd.xlane.f32.xlu1 %v8649_v10  ;;  %v5997_v16 = vpop.eup %5996  ;;  %6008 = vrcp.f32 %v8439_v3  ;;  %v1478_v3 = vsel %vm1222_vm14, %v1094_v27, %v1350_v46 }
 0x5eb   :  { %v2817_v36 = vpack.c.bf16 %v2582_v0, %v2580_v53  ;;  %v8668_v21 = vpop.eup %5998  ;;  %v2153_v0 = vmul.f32 1.442695, %v1970_v17  ;;  %6010 = vrcp.f32 %v8430_v15  ;;  %v2586_v34 = vmul.f32 %v5997_v16, %v8328_v13  ;;  %v11260_v16 = vld [vmem:[#allocation102_spill] sm:$0xff] }
 0x5ec   :  { %v1109_v27 = vadd.f32 %v7992_v28, %v11260_v16 }
 0x5ed   :  { %v8658_v23 = vpop.xlane.xlu1 %1863  ;;  %5549 = vmatprep.mubr.bf16.mxu0 %v2817_v36  ;;  %v1364_v36 = vmul.f32 0.2, %v1108_v37  ;;  %6012 = vpow2.f32 %v2153_v0 }
 0x5ee   :  { %11249 = vst [vmem:[#allocation99_spill] sm:$0xff] %v8658_v23  ;;  %1869 = vmax.xlane.f32.xlu1 %v8662_v25  ;;  %6014 = vrcp.f32 %v8488_v58  ;;  %vm1237_vm6 = vcmp.gt.f32.partialorder %v1109_v27, 0.0 }
 0x5ef   :  { %6016 = vrcp.f32 %v8579_v60  ;;  %v1492_v58 = vsel %vm1236_vm1, %v1108_v37, %v1364_v36 }
 0x5f0   :  { %v6001_v14 = vpop.eup %6000  ;;  %6018 = vrcp.f32 %v8437_v42  ;;  %v8703_v8 = vsel %vm10843_vm2, %v1492_v58, -1e+30  ;;  %vm11598_vm2 = vcmask 64512  }
 0x5f1   :  { %v8674_v53 = vpop.xlane.xlu1 %1891  ;;  %v2584_v45 = vmul.f32 %v6001_v14, %v8450_v57  ;;  %v8680_v6 = vpop.eup %6002  ;;  %v11257_v57 = vld [vmem:[#allocation90_spill] sm:$0xff]  ;;  %6020 = vrcp.f32 %v8493_v59  ;;  %11261 = vst [vmem:[#allocation123_spill] sm:$0xff] %v8703_v8 }
 0x5f2   :  { %11255 = vst [vmem:[#allocation71_spill] sm:$0xff] %v8674_v53  ;;  %2377 = vadd.xlane.f32.xlu1 %v8668_v21  ;;  %v6005_v15 = vpop.eup %6004  ;;  %vm11258_vm5 = vcmp.gt.f32.partialorder %v11257_v57, 0.0  ;;  %6022 = vrcp.f32 %v8584_v2  ;;  %v11373_v53 = vld [vmem:[#allocation33_spill] sm:$0xff] }
 0x5f3   :  { %v2818_v24 = vpack.c.bf16 %v2586_v34, %v2584_v45  ;;  %v8692_v30 = vsel %vm11258_vm5, %v1478_v3, -1e+30  ;;  %v6007_v17 = vpop.eup %6006  ;;  %v2594_v14 = vmul.f32 %v6005_v15, %v8267_v9  ;;  %v1365_v45 = vmul.f32 0.2, %v1109_v27  ;;  %v11262_v34 = vld [vmem:[#allocation34_spill] sm:$0xff]  ;;  %v11263_v9 = vld [vmem:[#allocation177_spill] sm:$0xff]  ;;  %vm11267_vm14 = vmmov %vm11258_vm5 }
 0x5f4   :  { %11259 = vst [vmem:[#allocation122_spill] sm:$0xff] %v8692_v30  ;;  %v6009_v60 = vpop.eup %6008  ;;  %v2596_v0 = vmul.f32 %v6007_v17, %v8284_v32  ;;  %v1110_v59 = vadd.f32 %v7992_v28, %v11262_v34  ;;  %6024 = vrcp.f32 %v8651_v19  ;;  %v11266_v34 = vld [vmem:[#allocation65_spill] sm:$0xff] }
 0x5f5   :  { %v2360_v20 = vpop.xlane.xlu1 %2359  ;;  %5550 = vmatmul.mubr.bf16.gmra.mrb[28].mxu0 %v2818_v24  ;;  %v6011_v42 = vpop.eup %6010  ;;  %v2592_v37 = vmul.f32 %v6009_v60, %v8260_v51  ;;  %6026 = vrcp.f32 %v8504_v44  ;;  %v1493_v51 = vsel %vm1237_vm6, %v1109_v27, %v1365_v45 }
 0x5f6   :  { %2405 = vadd.xlane.f32.xlu1 %v8680_v6  ;;  %v2598_v24 = vmul.f32 %v6011_v42, %v11263_v9  ;;  %v1366_v58 = vmul.f32 0.2, %v1110_v59  ;;  %6028 = vrcp.f32 %v8527_v48  ;;  %vm1238_vm4 = vcmp.gt.f32.partialorder %v1110_v59, 0.0 }
 0x5f7   :  { %v8712_v36 = vpop.eup %6012  ;;  %v2917_v32 = vpack.c.bf16 %v2594_v14, %v2592_v37  ;;  %v8721_v44 = vsel %vm10842_vm12, %v1493_v51, -1e+30  ;;  %v11265_v14 = vld [vmem:[#allocation179_spill] sm:$0xff]  ;;  %6030 = vrcp.f32 %v2360_v20  ;;  %v1960_v37 = vsub.f32 %v11266_v34, %v8179_v1  ;;  %v11269_v1 = vld [vmem:[#allocation114_spill] sm:$0xff]  ;;  %v11272_v51 = vld [vmem:[#allocation100_spill] sm:$0xff] }
 0x5f8   :  { %v6015_v3 = vpop.eup %6014  ;;  %v2918_v17 = vpack.c.bf16 %v2598_v24, %v2596_v0  ;;  %11264 = vst [vmem:[#allocation132_spill] sm:$0xff] %v8721_v44  ;;  %v1494_v48 = vsel %vm1238_vm4, %v1110_v59, %v1366_v58  ;;  %6032 = vrcp.f32 %v8550_v7  ;;  %v11270_v7 = vld [vmem:[#allocation186_spill] sm:$0xff]  ;;  %v11271_v58 = vld [vmem:[#allocation157_spill] sm:$0xff] }
 0x5f9   :  { %v8686_v13 = vpop.xlane.xlu1 %1895  ;;  %3071 = vrot.lane.b32.xlu0 %v11171_v12, %s6542_s14  ;;  %v6017_v16 = vpop.eup %6016  ;;  %v2600_v19 = vmul.f32 %v6015_v3, %v8289_v43  ;;  %v8732_v43 = vsel %vm11267_vm14, %v1494_v48, -1e+30  ;;  %v2133_v24 = vmul.f32 1.442695, %v1960_v37 }
 0x5fa   :  { %11256 = vst [vmem:[#allocation121_spill] sm:$0xff] %v8686_v13  ;;  %1873 = vmax.xlane.f32.xlu1 %v8692_v30  ;;  %v6019_v2 = vpop.eup %6018  ;;  %v2604_v42 = vmul.f32 %v6017_v16, %v8376_v52  ;;  %11268 = vst [vmem:[#allocation150_spill] sm:$0xff] %v8732_v43  ;;  %v8747_v37 = vpop.permute.xlu0 %3194  ;;  %v11320_v30 = vld [vmem:[#allocation96_spill] sm:$0xff] }
 0x5fb   :  { %v6021_v60 = vpop.eup %6020  ;;  %6034 = vpow2.f32 %v2133_v24  ;;  %v11357_v13 = vld [vmem:[#allocation20_spill] sm:$0xff] }
 0x5fc   :  { %v2606_v27 = vmul.f32 %v6021_v60, %v8221_v50  ;;  %v6023_v45 = vpop.eup %6022 }
 0x5fd   :  { %v2947_v46 = vpop.permute.xlu1 %2946  ;;  %3202 = vrot.lane.b32.xlu0 %v11138_v63, %s6543_s15  ;;  %v2608_v50 = vmul.f32 %v6023_v45, %v8379_v61 }
 0x5fe   :  { %1901 = vmax.xlane.f32.xlu1 %v8703_v8  ;;  %5567 = vmatprep.subr.bf16.mxu1 %v2947_v46  ;;  %v2920_v52 = vpack.c.bf16 %v2606_v27, %v2604_v42  ;;  %v6025_v9 = vpop.eup %6024  ;;  %v11273_v42 = vld [vmem:[#allocation77_spill] sm:$0xff] }
 0x5ff   :  { %5568 = vmatpush3.bf16.msra.mxu1 %v2947_v46  ;;  %v2602_v46 = vmul.f32 %v6019_v2, %v11265_v14  ;;  %v6027_v59 = vpop.eup %6026  ;;  %v1961_v2 = vsub.f32 %v11272_v51, %v11271_v58  ;;  %v1095_v61 = vadd.f32 %v7961_v39, %v11273_v42  ;;  %v11274_v14 = vld [vmem:[#allocation49_spill] sm:$0xff] }
 0x600   :  { %v6029_v20 = vpop.eup %6028  ;;  %v2610_v3 = vmul.f32 %v6027_v59, %v11269_v1  ;;  %v11284_v51 = vld [vmem:[#allocation105_spill] sm:$0xff] }
 0x601   :  { %v3191_v15 = vpop.permute.xlu1 %3190  ;;  %v2919_v0 = vpack.c.bf16 %v2602_v46, %v2600_v19  ;;  %v6031_v16 = vpop.eup %6030  ;;  %v11275_v46 = vld [vmem:[#allocation101_spill] sm:$0xff]  ;;  %v1351_v34 = vmul.f32 0.2, %v1095_v61  ;;  %vm1223_vm1 = vcmp.gt.f32.partialorder %v1095_v61, 0.0 }
 0x602   :  { %2409 = vadd.xlane.f32.xlu1 %v8712_v36  ;;  %5570 = vmatmul.mubr.bf16.vlgmr.msra.gmra.mrb[8].mxu1 %v2917_v32  ;;  %v2612_v32 = vmul.f32 %v6025_v9, %v8459_v18  ;;  %v6033_v19 = vpop.eup %6032  ;;  %v2616_v48 = vmul.f32 %v6031_v16, %v8486_v41  ;;  %v2135_v18 = vmul.f32 1.442695, %v1961_v2  ;;  %v1975_v27 = vsub.f32 %v11275_v46, %v11274_v14  ;;  %v11288_v46 = vld [vmem:[#allocation148_spill] sm:$0xff] }
 0x603   :  { %5617 = vmatprep.subr.bf16.mxu1 %v3191_v15  ;;  %5573 = vmatprep.mubr.bf16.mxu1 %v2918_v17  ;;  %v2921_v17 = vpack.c.bf16 %v2610_v3, %v2608_v50  ;;  %v11277_v50 = vld [vmem:[#allocation61_spill] sm:$0xff]  ;;  %v11281_v3 = vld [vmem:[#allocation22_spill] sm:$0xff]  ;;  %v1111_v2 = vadd.f32 %v7992_v28, %v11284_v51 }
 0x604   :  { %5618 = vmatpush3.bf16.msra.mxu1 %v3191_v15  ;;  %v2614_v15 = vmul.f32 %v6029_v20, %v11270_v7  ;;  %6036 = vpow2.f32 %v2135_v18  ;;  %v2163_v9 = vmul.f32 1.442695, %v1975_v27  ;;  %v1479_v20 = vsel %vm1223_vm1, %v1095_v61, %v1351_v34  ;;  %v11282_v7 = vld [vmem:[#allocation103_spill] sm:$0xff]  ;;  %v11289_v27 = vld [vmem:[#allocation84_spill] sm:$0xff] }
 0x605   :  { %v8749_v59 = vpop.eup %6034  ;;  %vm11278_vm5 = vcmp.gt.f32.partialorder %v11277_v50, 0.0  ;;  %v1367_v42 = vmul.f32 0.2, %v1111_v2  ;;  %vm1239_vm4 = vcmp.gt.f32.partialorder %v1111_v2, 0.0  ;;  %v11285_v18 = vld [vmem:[#allocation63_spill] sm:$0xff] }
 0x606   :  { %1903 = vmax.xlane.f32.xlu1 %v8721_v44  ;;  %v2922_v60 = vpack.c.bf16 %v2614_v15, %v2612_v32  ;;  %6038 = vpow2.f32 %v2163_v9  ;;  %v8758_v24 = vsel %vm11278_vm5, %v1479_v20, -1e+30  ;;  %v11280_v32 = vld [vmem:[#allocation80_spill] sm:$0xff]  ;;  %v1977_v15 = vsub.f32 %v11282_v7, %v11281_v3  ;;  %vm11292_vm1 = vmmov %vm11278_vm5  ;;  %v11295_v3 = vld [vmem:[#allocation133_spill] sm:$0xff] }
 0x607   :  { %11279 = vst [vmem:[#allocation87_spill] sm:$0xff] %v8758_v24  ;;  %v1097_v1 = vadd.f32 %v7961_v39, %v11280_v32  ;;  %vm11286_vm14 = vcmp.gt.f32.partialorder %v11285_v18, 0.0 }
 0x609   :  { %v1353_v58 = vmul.f32 0.2, %v1097_v1  ;;  %vm1225_vm6 = vcmp.gt.f32.partialorder %v1097_v1, 0.0 }
 0x60a   :  { %1905 = vmax.xlane.f32.xlu1 %v8732_v43  ;;  %5574 = vmatmul.mubr.bf16.gmra.mrb[12].mxu1 %v2919_v0  ;;  %v11276_v0 = vld [vmem:[#allocation55_spill] sm:$0xff] }
 0x60b   :  { %5577 = vmatprep.mubr.bf16.mxu1 %v2920_v52  ;;  %v2618_v45 = vmul.f32 %v6033_v19, %v11276_v0  ;;  %v1955_v0 = vsub.f32 %v11289_v27, %v11288_v46 }
 0x60d   :  { %v2923_v52 = vpack.c.bf16 %v2618_v45, %v2616_v48  ;;  %v1481_v48 = vsel %vm1225_vm6, %v1097_v1, %v1353_v58  ;;  %v1495_v45 = vsel %vm1239_vm4, %v1111_v2, %v1367_v42  ;;  %v2123_v32 = vmul.f32 1.442695, %v1955_v0  ;;  %v11294_v1 = vld [vmem:[#allocation59_spill] sm:$0xff]  ;;  %v11298_v42 = vld [vmem:[#allocation18_spill] sm:$0xff] }
 0x60e   :  { %v8767_v16 = vpop.eup %6036  ;;  %v8779_v14 = vsel %vm11286_vm14, %v1481_v48, -1e+30  ;;  %v8792_v20 = vsel %vm11292_vm1, %v1495_v45, -1e+30  ;;  %v1958_v7 = vsub.f32 %v11295_v3, %v11294_v1  ;;  %v11299_v48 = vld [vmem:[#allocation134_spill] sm:$0xff]  ;;  %v11302_v1 = vld [vmem:[#allocation92_spill] sm:$0xff] }
 0x60f   :  { %v8753_v41 = vpop.xlane.xlu0 %2373  ;;  %11287 = vst [vmem:[#allocation89_spill] sm:$0xff] %v8779_v14  ;;  %11293 = vst [vmem:[#allocation78_spill] sm:$0xff] %v8792_v20  ;;  %v1972_v46 = vsub.f32 %v11299_v48, %v11298_v42  ;;  %v11301_v45 = vld [vmem:[#allocation154_spill] sm:$0xff] }
 0x610   :  { %v8772_v19 = vpop.eup %6038 }
 0x611   :  { %v2157_v3 = vmul.f32 1.442695, %v1972_v46 }
 0x612   :  { %5578 = vmatmul.mubr.bf16.gmra.mrb[16].mxu1 %v2921_v17 }
 0x613   :  { %5581 = vmatprep.mubr.bf16.mxu1 %v2922_v60  ;;  %v8765_v17 = vpop.xlane.xlu0 %1867  ;;  %v2167_v60 = vmul.f32 1.442695, %v1977_v15 }
 0x614   :  { %11283 = vst [vmem:[#allocation153_spill] sm:$0xff] %v8765_v17  ;;  %v11328_v17 = vld [vmem:[#allocation30_spill] sm:$0xff] }
 0x615   :  { %6040 = vpow2.f32 %v2167_v60  ;;  %v2129_v60 = vmul.f32 1.442695, %v1958_v7 }
 0x616   :  { %6042 = vrcp.f32 %v8613_v33  ;;  %v1974_v33 = vsub.f32 %v11302_v1, %v11301_v45 }
 0x617   :  { %v8774_v61 = vpop.xlane.xlu0 %2375 }
 0x61a   :  { %5582 = vmatmul.mubr.bf16.gmra.mrb[20].mxu1 %v2923_v52 }
 0x61b   :  { %3196 = vrot.lane.b32.xlu1 %v11149_v11, %s6543_s15  ;;  %v8784_v34 = vpop.xlane.xlu0 %2403 }
 0x61c   :  { %2389 = vadd.xlane.f32.xlu0 %v8749_v59 }
 0x61f   :  { %v8802_v2 = vpop.eup %6040  ;;  %v8806_v27 = vpop.xlane.xlu0 %1871 }
 0x620   :  { %1875 = vmax.xlane.f32.xlu0 %v8758_v24  ;;  %11300 = vst [vmem:[#allocation37_spill] sm:$0xff] %v8806_v27  ;;  %v6043_v7 = vpop.eup %6042 }
 0x621   :  { %v2622_v45 = vmul.f32 %v6043_v7, %v11304_v4 }
 0x623   :  { %v8814_v50 = vpop.xlane.xlu0 %1899 }
 0x624   :  { %2391 = vadd.xlane.f32.xlu0 %v8767_v16  ;;  %11303 = vst [vmem:[#allocation182_spill] sm:$0xff] %v8814_v50  ;;  %v11337_v50 = vld [vmem:[#allocation131_spill] sm:$0xff] }
 0x625   :  { %v1098_v27 = vadd.f32 %v7961_v39, %v11337_v50 }
 0x627   :  { %vm1226_vm6 = vcmp.gt.f32.partialorder %v1098_v27, 0.0 }
 0x628   :  { %2419 = vadd.xlane.f32.xlu0 %v8772_v19 }
 0x62c   :  { %1879 = vmax.xlane.f32.xlu0 %v8779_v14 }
 0x62e   :  { %v8786_v52 = vpop.f32.mrb[16].mxu0 }
 0x62f   :  { %11290 = vst [vmem:[#allocation135_spill] sm:$0xff] %v8786_v52  ;;  %v8788_v9 = vpop.f32.mrb[17].mxu0 }
 0x630   :  { %11291 = vst [vmem:[#allocation17_spill] sm:$0xff] %v8788_v9  ;;  %1907 = vmax.xlane.f32.xlu0 %v8792_v20  ;;  %v8797_v15 = vpop.f32.mrb[18].mxu0 }
 0x631   :  { %11296 = vst [vmem:[#allocation5_spill] sm:$0xff] %v8797_v15  ;;  %v8800_v58 = vpop.f32.mrb[19].mxu0 }
 0x632   :  { %11297 = vst [vmem:[#allocation127_spill] sm:$0xff] %v8800_v58  ;;  %v2364_v51 = vpop.xlane.xlu1 %2363 }
 0x633   :  { %6044 = vrcp.f32 %v2364_v51  ;;  %v2161_v51 = vmul.f32 1.442695, %v1974_v33 }
 0x634   :  { %6046 = vpow2.f32 %v2123_v32  ;;  %2423 = vadd.xlane.f32.xlu0 %v8802_v2 }
 0x635   :  { %6048 = vpow2.f32 %v2129_v60 }
 0x636   :  { %v8809_v0 = vpop.xlane.xlu1 %2369  ;;  %6050 = vrcp.f32 %v8621_v31  ;;  %v8823_v31 = vpop.xlane.xlu0 %2407 }
 0x63a   :  { %v2398_v32 = vpop.xlane.xlu1 %2397 }
 0x63b   :  { %6052 = vrcp.f32 %v2398_v32 }
 0x63c   :  { %6054 = vpow2.f32 %v2157_v3 }
 0x63d   :  { %v6045_v42 = vpop.eup %6044  ;;  %6056 = vpow2.f32 %v2161_v51  ;;  %v3068_v51 = vpop.permute.xlu0 %3067 }
 0x63e   :  { %v8816_v48 = vpop.eup %6046  ;;  %v8818_v57 = vpop.xlane.xlu1 %2401  ;;  %v2620_v49 = vmul.f32 %v6045_v42, %v8577_v56 }
 0x63f   :  { %2379 = vadd.xlane.f32.xlu1 %v8816_v48  ;;  %v8825_v46 = vpop.eup %6048 }
 0x640   :  { %v3053_v60 = vpack.c.bf16 %v2622_v45, %v2620_v49  ;;  %v6051_v3 = vpop.eup %6050  ;;  %v11309_v45 = vld [vmem:[#allocation76_spill] sm:$0xff] }
 0x642   :  { %v3193_v1 = vpop.permute.xlu1 %3192  ;;  %v8827_v33 = vpop.f32.mrb[20].mxu0  ;;  %5601 = vmatprep.mubr.bf16.mxu0 %v3053_v60  ;;  %v2652_v60 = vmul.f32 %v6051_v3, %v11309_v45 }
 0x643   :  { %11305 = vst [vmem:[#allocation128_spill] sm:$0xff] %v8827_v33  ;;  %2385 = vadd.xlane.f32.xlu1 %v8825_v46  ;;  %v8830_v32 = vpop.f32.mrb[21].mxu0  ;;  %5619 = vmatprep.subr.bf16.mxu1 %v3193_v1 }
 0x644   :  { %11306 = vst [vmem:[#allocation126_spill] sm:$0xff] %v8830_v32  ;;  %v8832_v56 = vpop.f32.mrb[22].mxu0  ;;  %5620 = vmatpush3.bf16.msra.mxu1 %v3193_v1 }
 0x645   :  { %11307 = vst [vmem:[#allocation10_spill] sm:$0xff] %v8832_v56  ;;  %v6053_v4 = vpop.eup %6052  ;;  %v8834_v7 = vpop.f32.mrb[23].mxu0  ;;  %5621 = vmatprep.subr.bf16.mxu1 %v8747_v37 }
 0x646   :  { %11308 = vst [vmem:[#allocation129_spill] sm:$0xff] %v8834_v7  ;;  %v8837_v49 = vpop.eup %6054  ;;  %v3066_v42 = vpop.permute.xlu1 %3065  ;;  %v2654_v33 = vmul.f32 %v6053_v4, %v8589_v62  ;;  %v11310_v62 = vld [vmem:[#allocation91_spill] sm:$0xff] }
 0x647   :  { %2413 = vadd.xlane.f32.xlu1 %v8837_v49  ;;  %5589 = vmatprep.subr.bf16.mxu0 %v3066_v42  ;;  %v8843_v56 = vpop.eup %6056  ;;  %v3070_v7 = vpop.permute.xlu0 %3069 }
 0x648   :  { %5590 = vmatpush3.bf16.msra.mxu0 %v3066_v42  ;;  %5622 = vmatpush3.bf16.msra.mxu1 %v8747_v37  ;;  %v3182_v1 = vpack.c.bf16 %v2654_v33, %v2652_v60  ;;  %v11311_v37 = vld [vmem:[#allocation143_spill] sm:$0xff]  ;;  %v11313_v42 = vld [vmem:[#allocation144_spill] sm:$0xff] }
 0x649   :  { %5591 = vmatprep.subr.bf16.mxu0 %v3068_v51  ;;  %v1980_v33 = vsub.f32 %v11311_v37, %v11310_v62  ;;  %v11314_v60 = vld [vmem:[#allocation163_spill] sm:$0xff]  ;;  %v11316_v62 = vld [vmem:[#allocation24_spill] sm:$0xff]  ;;  %v11317_v37 = vld [vmem:[#allocation149_spill] sm:$0xff] }
 0x64a   :  { %3075 = vrot.lane.b32.xlu0 %v11209_v35, %s6542_s14  ;;  %5633 = vmatprep.mubr.bf16.mxu1 %v3182_v1  ;;  %v11315_v1 = vld [vmem:[#allocation109_spill] sm:$0xff]  ;;  %v1997_v58 = vsub.f32 %v11317_v37, %v11316_v62 }
 0x64b   :  { %2417 = vadd.xlane.f32.xlu1 %v8843_v56  ;;  %v8856_v3 = vpop.permute.xlu0 %3198  ;;  %v2173_v4 = vmul.f32 1.442695, %v1980_v33  ;;  %v1995_v32 = vsub.f32 %v11315_v1, %v11314_v60  ;;  %v11324_v1 = vld [vmem:[#allocation137_spill] sm:$0xff] }
 0x64c   :  { %5592 = vmatpush3.bf16.msra.mxu0 %v3068_v51  ;;  %v11312_v51 = vld [vmem:[#allocation15_spill] sm:$0xff]  ;;  %v2207_v33 = vmul.f32 1.442695, %v1997_v58 }
 0x64d   :  { %5593 = vmatprep.subr.bf16.mxu0 %v3070_v7  ;;  %v1981_v45 = vsub.f32 %v11313_v42, %v11312_v51  ;;  %6058 = vpow2.f32 %v2173_v4  ;;  %v2203_v9 = vmul.f32 1.442695, %v1995_v32  ;;  %v11319_v42 = vld [vmem:[#allocation21_spill] sm:$0xff] }
 0x64e   :  { %3319 = vrot.lane.b32.xlu0 %v11167_v26, %s6544_s16  ;;  %v1959_v60 = vsub.f32 %v11320_v30, %v11319_v42 }
 0x64f   :  { %v2175_v15 = vmul.f32 1.442695, %v1981_v45  ;;  %v11323_v45 = vld [vmem:[#allocation82_spill] sm:$0xff] }
 0x650   :  { %5594 = vmatpush3.bf16.msra.mxu0 %v3070_v7  ;;  %v2131_v32 = vmul.f32 1.442695, %v1959_v60  ;;  %v1962_v62 = vsub.f32 %v11324_v1, %v11323_v45 }
 0x651   :  { %6060 = vpow2.f32 %v2175_v15 }
 0x652   :  { %3448 = vrot.lane.b32.xlu0 %v11167_v26, %s6545_s17  ;;  %6062 = vpow2.f32 %v2203_v9  ;;  %v2137_v60 = vmul.f32 1.442695, %v1962_v62 }
 0x653   :  { %6064 = vpow2.f32 %v2207_v33  ;;  %v11327_v33 = vld [vmem:[#allocation40_spill] sm:$0xff] }
 0x654   :  { %6066 = vpow2.f32 %v2131_v32  ;;  %v1096_v42 = vadd.f32 %v7961_v39, %v11327_v33 }
 0x655   :  { %6068 = vpow2.f32 %v2137_v60 }
 0x656   :  { %v1352_v32 = vmul.f32 0.2, %v1096_v42  ;;  %vm1224_vm5 = vcmp.gt.f32.partialorder %v1096_v42, 0.0 }
 0x657   :  { %v8872_v8 = vpop.eup %6058 }
 0x658   :  { %11318 = vst [vmem:[#allocation140_spill] sm:$0xff] %v8872_v8  ;;  %v1480_v33 = vsel %vm1224_vm5, %v1096_v42, %v1352_v32  ;;  %vm11349_vm5 = vcmp.gt.f32.partialorder %v11285_v18, 0.0 }
 0x659   :  { %v8917_v60 = vsel %vm10841_vm11, %v1480_v33, -1e+30 }
 0x65a   :  { %11336 = vst [vmem:[#allocation77_spill] sm:$0xff] %v8917_v60 }
 0x65b   :  { %v8879_v4 = vpop.eup %6060 }
 0x65c   :  { %3200 = vrot.lane.b32.xlu1 %v11171_v12, %s6543_s15  ;;  %11321 = vst [vmem:[#allocation102_spill] sm:$0xff] %v8879_v4  ;;  %v8884_v58 = vpop.eup %6062 }
 0x65d   :  { %11322 = vst [vmem:[#allocation34_spill] sm:$0xff] %v8884_v58  ;;  %v8891_v37 = vpop.eup %6064 }
 0x65e   :  { %11326 = vst [vmem:[#allocation179_spill] sm:$0xff] %v8891_v37  ;;  %v8900_v1 = vpop.eup %6066 }
 0x65f   :  { %v8924_v42 = vpop.eup %6068 }
 0x660   :  { %3073 = vrot.lane.b32.xlu1 %v11138_v63, %s6542_s14 }
 0x664   :  { %v8862_v7 = vpop.xlane.xlu0 %2381 }
 0x668   :  { %v8866_v52 = vpop.xlane.xlu0 %2383 }
 0x66c   :  { %v8870_v43 = vpop.xlane.xlu0 %2411 }
 0x670   :  { %v8874_v51 = vpop.xlane.xlu0 %2415 }
 0x671   :  { %2429 = vadd.xlane.f32.xlu0 %v8872_v8  ;;  %v11376_v8 = vld [vmem:[#allocation110_spill] sm:$0xff] }
 0x674   :  { %v3072_v15 = vpop.permute.xlu0 %3071 }
 0x675   :  { %2431 = vadd.xlane.f32.xlu0 %v8879_v4  ;;  %5595 = vmatprep.subr.bf16.mxu0 %v3072_v15  ;;  %v11339_v4 = vld [vmem:[#allocation141_spill] sm:$0xff] }
 0x676   :  { %5596 = vmatpush3.bf16.msra.mxu0 %v3072_v15  ;;  %v11329_v15 = vld [vmem:[#allocation139_spill] sm:$0xff] }
 0x677   :  { %v8882_v9 = vpop.xlane.xlu1 %2371  ;;  %v1976_v20 = vsub.f32 %v11329_v15, %v11328_v17 }
 0x679   :  { %2459 = vadd.xlane.f32.xlu0 %v8884_v58  ;;  %v2165_v45 = vmul.f32 1.442695, %v1976_v20  ;;  %v11352_v20 = vld [vmem:[#allocation152_spill] sm:$0xff] }
 0x67b   :  { %v8889_v30 = vpop.xlane.xlu1 %1869  ;;  %6070 = vpow2.f32 %v2165_v45  ;;  %v1354_v45 = vmul.f32 0.2, %v1098_v27 }
 0x67c   :  { %11325 = vst [vmem:[#allocation177_spill] sm:$0xff] %v8889_v30 }
 0x67d   :  { %2463 = vadd.xlane.f32.xlu0 %v8891_v37 }
 0x67f   :  { %v8898_v14 = vpop.xlane.xlu1 %2377 }
 0x683   :  { %v8902_v24 = vpop.xlane.xlu1 %2405  ;;  %v8904_v44 = vpop.f32.mrb[24].mxu0 }
 0x684   :  { %11330 = vst [vmem:[#allocation65_spill] sm:$0xff] %v8904_v44  ;;  %2387 = vadd.xlane.f32.xlu1 %v8900_v1  ;;  %v8907_v62 = vpop.f32.mrb[25].mxu0  ;;  %v11338_v44 = vld [vmem:[#allocation85_spill] sm:$0xff] }
 0x685   :  { %11331 = vst [vmem:[#allocation114_spill] sm:$0xff] %v8907_v62  ;;  %v8909_v17 = vpop.f32.mrb[26].mxu0  ;;  %v1978_v62 = vsub.f32 %v11339_v4, %v11338_v44  ;;  %v1482_v44 = vsel %vm1226_vm6, %v1098_v27, %v1354_v45  ;;  %vm11570_vm6 = vmmov 0  }
 0x686   :  { %11332 = vst [vmem:[#allocation186_spill] sm:$0xff] %v8909_v17  ;;  %v8911_v15 = vpop.f32.mrb[27].mxu0  ;;  %v11341_v17 = vld [vmem:[#allocation146_spill] sm:$0xff] }
 0x687   :  { %11333 = vst [vmem:[#allocation157_spill] sm:$0xff] %v8911_v15  ;;  %v8913_v37 = vpop.xlane.xlu1 %1873  ;;  %v1112_v15 = vadd.f32 %v7992_v28, %v11341_v17  ;;  %v2169_v33 = vmul.f32 1.442695, %v1978_v62  ;;  %v11345_v62 = vld [vmem:[#allocation23_spill] sm:$0xff] }
 0x688   :  { %11334 = vst [vmem:[#allocation100_spill] sm:$0xff] %v8913_v37  ;;  %1877 = vmax.xlane.f32.xlu1 %v8917_v60  ;;  %v8931_v37 = vpop.eup %6070  ;;  %v8942_v60 = vsel %vm10840_vm7, %v1482_v44, -1e+30 }
 0x689   :  { %v1368_v50 = vmul.f32 0.2, %v1112_v15  ;;  %6072 = vpow2.f32 %v2169_v33  ;;  %vm1240_vm4 = vcmp.gt.f32.partialorder %v1112_v15, 0.0  ;;  %11344 = vst [vmem:[#allocation55_spill] sm:$0xff] %v8942_v60  ;;  %v11348_v33 = vld [vmem:[#allocation151_spill] sm:$0xff] }
 0x68a   :  { %v1114_v44 = vadd.f32 %v7992_v28, %v11348_v33  ;;  %v11351_v33 = vld [vmem:[#allocation36_spill] sm:$0xff] }
 0x68b   :  { %v8926_v32 = vpop.xlane.xlu1 %1901  ;;  %v1496_v25 = vsel %vm1240_vm4, %v1112_v15, %v1368_v50  ;;  %vm4291_vm4 = vcmask 130048  }
 0x68c   :  { %11340 = vst [vmem:[#allocation49_spill] sm:$0xff] %v8926_v32  ;;  %2393 = vadd.xlane.f32.xlu1 %v8924_v42  ;;  %v1113_v32 = vadd.f32 %v7992_v28, %v11345_v62  ;;  %v8953_v27 = vsel %vm10841_vm11, %v1496_v25, -1e+30  ;;  %v1370_v15 = vmul.f32 0.2, %v1114_v44  ;;  %vm1242_vm1 = vcmp.gt.f32.partialorder %v1114_v44, 0.0 }
 0x68d   :  { %11347 = vst [vmem:[#allocation22_spill] sm:$0xff] %v8953_v27  ;;  %vm4359_vm11 = vcmask 392192  }
 0x68e   :  { %v1369_v45 = vmul.f32 0.2, %v1113_v32  ;;  %vm1241_vm14 = vcmp.gt.f32.partialorder %v1113_v32, 0.0  ;;  %v1498_v28 = vsel %vm1242_vm1, %v1114_v44, %v1370_v15  ;;  %v11358_v44 = vld [vmem:[#allocation174_spill] sm:$0xff]  ;;  %v11359_v15 = vld [vmem:[#allocation29_spill] sm:$0xff] }
 0x68f   :  { %v8933_v39 = vpop.xlane.xlu1 %2409 }
 0x690   :  { %2421 = vadd.xlane.f32.xlu1 %v8931_v37  ;;  %v1497_v50 = vsel %vm1241_vm14, %v1113_v32, %v1369_v45  ;;  %v11355_v32 = vld [vmem:[#allocation116_spill] sm:$0xff]  ;;  %vm11588_vm14 = vcmask 64512  }
 0x691   :  { %v8964_v25 = vsel %vm11349_vm5, %v1497_v50, -1e+30  ;;  %vm11590_vm1 = vmmov %vm11588_vm14  ;;  %vm4325_vm5 = vcmask 261120  }
 0x692   :  { %11350 = vst [vmem:[#allocation103_spill] sm:$0xff] %v8964_v25 }
 0x693   :  { %v8936_v4 = vpop.xlane.xlu1 %1903  ;;  %3321 = vrot.lane.b32.xlu0 %v11089_v40, %s6544_s16  ;;  %v8958_v62 = vpop.eup %6072 }
 0x694   :  { %11342 = vst [vmem:[#allocation101_spill] sm:$0xff] %v8936_v4  ;;  %1881 = vmax.xlane.f32.xlu1 %v8942_v60  ;;  %v11356_v4 = vld [vmem:[#allocation172_spill] sm:$0xff] }
 0x697   :  { %v8947_v30 = vpop.xlane.xlu1 %1905  ;;  %3452 = vrot.lane.b32.xlu0 %v11040_v29, %s6545_s17 }
 0x698   :  { %11346 = vst [vmem:[#allocation80_spill] sm:$0xff] %v8947_v30  ;;  %1909 = vmax.xlane.f32.xlu1 %v8953_v27  ;;  %v1984_v27 = vsub.f32 %v11352_v20, %v11351_v33  ;;  %v8972_v30 = vsel %vm10840_vm7, %v1498_v28, -1e+30  ;;  %v2001_v20 = vsub.f32 %v11359_v15, %v11358_v44  ;;  %v8981_v33 = vpop.permute.xlu0 %3202  ;;  %v11368_v15 = vld [vmem:[#allocation26_spill] sm:$0xff]  ;;  %vm4342_vm7 = vcmask 326656  }
 0x699   :  { %11353 = vst [vmem:[#allocation105_spill] sm:$0xff] %v8972_v30 }
 0x69a   :  { %v2181_v18 = vmul.f32 1.442695, %v1984_v27  ;;  %v2215_v28 = vmul.f32 1.442695, %v2001_v20  ;;  %v11369_v20 = vld [vmem:[#allocation108_spill] sm:$0xff] }
 0x69b   :  { %v3197_v60 = vpop.permute.xlu1 %3196 }
 0x69c   :  { %2425 = vadd.xlane.f32.xlu1 %v8958_v62  ;;  %5623 = vmatprep.subr.bf16.mxu1 %v3197_v60  ;;  %6074 = vpow2.f32 %v2181_v18 }
 0x69d   :  { %5624 = vmatpush3.bf16.msra.mxu1 %v3197_v60  ;;  %v11354_v60 = vld [vmem:[#allocation57_spill] sm:$0xff] }
 0x69e   :  { %5625 = vmatprep.subr.bf16.mxu1 %v8856_v3  ;;  %v1985_v45 = vsub.f32 %v11355_v32, %v11354_v60  ;;  %v11365_v60 = vld [vmem:[#allocation161_spill] sm:$0xff]  ;;  %v11366_v32 = vld [vmem:[#allocation106_spill] sm:$0xff] }
 0x6a0   :  { %1911 = vmax.xlane.f32.xlu1 %v8964_v25  ;;  %v2183_v50 = vmul.f32 1.442695, %v1985_v45  ;;  %v1999_v25 = vsub.f32 %v11357_v13, %v11356_v4  ;;  %v1979_v45 = vsub.f32 %v11366_v32, %v11365_v60 }
 0x6a1   :  { %5626 = vmatpush3.bf16.msra.mxu1 %v8856_v3 }
 0x6a2   :  { %6076 = vpow2.f32 %v2183_v50  ;;  %v2211_v3 = vmul.f32 1.442695, %v1999_v25  ;;  %v2171_v44 = vmul.f32 1.442695, %v1979_v45  ;;  %v11375_v45 = vld [vmem:[#allocation52_spill] sm:$0xff] }
 0x6a4   :  { %1913 = vmax.xlane.f32.xlu1 %v8972_v30  ;;  %6078 = vpow2.f32 %v2211_v3 }
 0x6a5   :  { %6080 = vpow2.f32 %v2215_v28  ;;  %v1982_v28 = vsub.f32 %v11369_v20, %v11368_v15  ;;  %v1998_v15 = vsub.f32 %v11376_v8, %v11375_v45 }
 0x6a6   :  { %v8983_v17 = vpop.eup %6074  ;;  %6082 = vpow2.f32 %v2171_v44 }
 0x6a7   :  { %11360 = vst [vmem:[#allocation148_spill] sm:$0xff] %v8983_v17  ;;  %v2177_v60 = vmul.f32 1.442695, %v1982_v28 }
 0x6a9   :  { %v8985_v30 = vpop.xlane.xlu0 %2389  ;;  %6084 = vpow2.f32 %v2177_v60 }
 0x6ac   :  { %v8990_v13 = vpop.eup %6076 }
 0x6ad   :  { %11361 = vst [vmem:[#allocation84_spill] sm:$0xff] %v8990_v13  ;;  %v8993_v18 = vpop.xlane.xlu0 %1875 }
 0x6ae   :  { %11362 = vst [vmem:[#allocation59_spill] sm:$0xff] %v8993_v18  ;;  %v8995_v4 = vpop.eup %6078 }
 0x6af   :  { %11363 = vst [vmem:[#allocation133_spill] sm:$0xff] %v8995_v4  ;;  %v8998_v27 = vpop.eup %6080 }
 0x6b0   :  { %11364 = vst [vmem:[#allocation18_spill] sm:$0xff] %v8998_v27 }
 0x6b1   :  { %v9000_v25 = vpop.xlane.xlu0 %2391 }
 0x6b5   :  { %3204 = vrot.lane.b32.xlu1 %v11209_v35, %s6543_s15  ;;  %v9005_v50 = vpop.xlane.xlu0 %2419 }
 0x6b6   :  { %2437 = vadd.xlane.f32.xlu0 %v8983_v17 }
 0x6b9   :  { %v9019_v58 = vpop.xlane.xlu0 %1879 }
 0x6ba   :  { %2439 = vadd.xlane.f32.xlu0 %v8990_v13 }
 0x6bd   :  { %v9023_v20 = vpop.xlane.xlu0 %1907 }
 0x6be   :  { %2467 = vadd.xlane.f32.xlu0 %v8995_v4  ;;  %11377 = vst [vmem:[#allocation76_spill] sm:$0xff] %v9023_v20  ;;  %v11391_v20 = vld [vmem:[#allocation44_spill] sm:$0xff] }
 0x6c2   :  { %2471 = vadd.xlane.f32.xlu0 %v8998_v27  ;;  %v11374_v27 = vld [vmem:[#allocation147_spill] sm:$0xff] }
 0x6c3   :  { %v1996_v23 = vsub.f32 %v11374_v27, %v11373_v53 }
 0x6c8   :  { %v9007_v3 = vpop.f32.mrb[28].mxu0 }
 0x6c9   :  { %11367 = vst [vmem:[#allocation134_spill] sm:$0xff] %v9007_v3  ;;  %v9011_v18 = vpop.f32.mrb[29].mxu0  ;;  %v2205_v3 = vmul.f32 1.442695, %v1996_v23  ;;  %v9035_v23 = vpop.eup %6082 }
 0x6ca   :  { %11370 = vst [vmem:[#allocation154_spill] sm:$0xff] %v9011_v18  ;;  %v9013_v4 = vpop.f32.mrb[30].mxu0 }
 0x6cb   :  { %11371 = vst [vmem:[#allocation92_spill] sm:$0xff] %v9013_v4  ;;  %v9015_v13 = vpop.f32.mrb[31].mxu0  ;;  %6086 = vpow2.f32 %v2205_v3 }
 0x6cc   :  { %11372 = vst [vmem:[#allocation74_spill] sm:$0xff] %v9015_v13  ;;  %v2380_v17 = vpop.xlane.xlu1 %2379  ;;  %v2209_v13 = vmul.f32 1.442695, %v1998_v15  ;;  %6088 = vrcp.f32 %v8809_v0  ;;  %v9045_v0 = vpop.xlane.xlu0 %2423 }
 0x6cd   :  { %6090 = vrcp.f32 %v8882_v9  ;;  %v9048_v9 = vpop.eup %6084 }
 0x6ce   :  { %6092 = vrcp.f32 %v8617_v47 }
 0x6cf   :  { %6094 = vrcp.f32 %v8753_v41 }
 0x6d0   :  { %v2386_v32 = vpop.xlane.xlu1 %2385  ;;  %6096 = vpow2.f32 %v2209_v13  ;;  %v3076_v60 = vpop.permute.xlu0 %3075 }
 0x6d1   :  { %6098 = vrcp.f32 %v8898_v14 }
 0x6d2   :  { %6100 = vrcp.f32 %v2380_v17 }
 0x6d3   :  { %6102 = vrcp.f32 %v8774_v61 }
 0x6d4   :  { %v9025_v18 = vpop.xlane.xlu1 %2413  ;;  %6104 = vrcp.f32 %v8862_v7 }
 0x6d5   :  { %v9027_v4 = vpop.f32.mrb[8].mxu1  ;;  %v9058_v41 = vpop.eup %6086  ;;  %6106 = vrcp.f32 %v2386_v32 }
 0x6d6   :  { %11378 = vst [vmem:[#allocation91_spill] sm:$0xff] %v9027_v4  ;;  %v9030_v53 = vpop.f32.mrb[9].mxu1  ;;  %v6089_v45 = vpop.eup %6088  ;;  %6108 = vrcp.f32 %v8866_v52  ;;  %v11397_v52 = vld [vmem:[#allocation45_spill] sm:$0xff] }
 0x6d7   :  { %11379 = vst [vmem:[#allocation143_spill] sm:$0xff] %v9030_v53  ;;  %v9033_v27 = vpop.f32.mrb[10].mxu1  ;;  %v3320_v4 = vpop.permute.xlu0 %3319 }
 0x6d8   :  { %11380 = vst [vmem:[#allocation15_spill] sm:$0xff] %v9033_v27  ;;  %v9038_v8 = vpop.xlane.xlu1 %2417  ;;  %v9040_v44 = vpop.f32.mrb[11].mxu1  ;;  %3325 = vrot.lane.b32.xlu0 %v11149_v11, %s6544_s16 }
 0x6d9   :  { %11381 = vst [vmem:[#allocation144_spill] sm:$0xff] %v9040_v44  ;;  %2427 = vadd.xlane.f32.xlu1 %v9035_v23 }
 0x6dc   :  { %v3201_v3 = vpop.permute.xlu1 %3200  ;;  %3456 = vrot.lane.b32.xlu0 %v11092_v54, %s6545_s17 }
 0x6dd   :  { %2433 = vadd.xlane.f32.xlu1 %v9048_v9  ;;  %v9053_v47 = vpop.f32.mrb[12].mxu1  ;;  %5627 = vmatprep.subr.bf16.mxu1 %v3201_v3 }
 0x6de   :  { %11382 = vst [vmem:[#allocation163_spill] sm:$0xff] %v9053_v47  ;;  %v9056_v28 = vpop.f32.mrb[13].mxu1  ;;  %5628 = vmatpush3.bf16.msra.mxu1 %v3201_v3  ;;  %v6091_v47 = vpop.eup %6090  ;;  %v2626_v3 = vmul.f32 %v6089_v45, %v8582_v5 }
 0x6df   :  { %11383 = vst [vmem:[#allocation109_spill] sm:$0xff] %v9056_v28  ;;  %v9060_v13 = vpop.f32.mrb[14].mxu1  ;;  %5629 = vmatprep.subr.bf16.mxu1 %v8981_v33  ;;  %v6093_v14 = vpop.eup %6092  ;;  %v2628_v61 = vmul.f32 %v6091_v47, %v8649_v10  ;;  %v11386_v28 = vld [vmem:[#allocation138_spill] sm:$0xff] }
 0x6e0   :  { %11384 = vst [vmem:[#allocation24_spill] sm:$0xff] %v9060_v13  ;;  %v3074_v15 = vpop.permute.xlu1 %3073  ;;  %v9064_v27 = vpop.f32.mrb[15].mxu1  ;;  %v11392_v10 = vld [vmem:[#allocation158_spill] sm:$0xff] }
 0x6e1   :  { %11385 = vst [vmem:[#allocation149_spill] sm:$0xff] %v9064_v27  ;;  %2461 = vadd.xlane.f32.xlu1 %v9058_v41  ;;  %5597 = vmatprep.subr.bf16.mxu0 %v3074_v15  ;;  %v6095_v17 = vpop.eup %6094  ;;  %v2624_v27 = vmul.f32 %v6093_v14, %v11386_v28  ;;  %v1988_v47 = vsub.f32 %v11392_v10, %v11391_v20 }
 0x6e2   :  { %5598 = vmatpush3.bf16.msra.mxu0 %v3074_v15  ;;  %5630 = vmatpush3.bf16.msra.mxu1 %v8981_v33  ;;  %v9070_v13 = vpop.eup %6096  ;;  %v11389_v33 = vld [vmem:[#allocation68_spill] sm:$0xff] }
 0x6e3   :  { %5599 = vmatprep.subr.bf16.mxu0 %v3076_v60  ;;  %v2630_v15 = vmul.f32 %v6095_v17, %v11389_v33  ;;  %v3054_v5 = vpack.c.bf16 %v2626_v3, %v2624_v27  ;;  %v6099_v45 = vpop.eup %6098  ;;  %v2189_v33 = vmul.f32 1.442695, %v1988_v47  ;;  %v11395_v27 = vld [vmem:[#allocation159_spill] sm:$0xff] }
 0x6e4   :  { %v2634_v17 = vmul.f32 %v6099_v45, %v8668_v21  ;;  %v11401_v21 = vld [vmem:[#allocation120_spill] sm:$0xff] }
 0x6e5   :  { %2465 = vadd.xlane.f32.xlu1 %v9070_v13  ;;  %v9075_v7 = vpop.f32.mrb[16].mxu1  ;;  %v3055_v14 = vpack.c.bf16 %v2630_v15, %v2628_v61  ;;  %6110 = vpow2.f32 %v2189_v33 }
 0x6e6   :  { %11387 = vst [vmem:[#allocation21_spill] sm:$0xff] %v9075_v7  ;;  %v9077_v44 = vpop.f32.mrb[17].mxu1  ;;  %5600 = vmatpush3.bf16.msra.mxu0 %v3076_v60  ;;  %v6101_v7 = vpop.eup %6100 }
 0x6e7   :  { %11388 = vst [vmem:[#allocation96_spill] sm:$0xff] %v9077_v44  ;;  %v9080_v53 = vpop.f32.mrb[18].mxu1  ;;  %5649 = vmatprep.subr.bf16.mxu0 %v3320_v4  ;;  %v6103_v32 = vpop.eup %6102  ;;  %v2636_v44 = vmul.f32 %v6101_v7, %v8816_v48 }
 0x6e8   :  { %11390 = vst [vmem:[#allocation82_spill] sm:$0xff] %v9080_v53  ;;  %v9085_v28 = vpop.f32.mrb[19].mxu1  ;;  %v6105_v60 = vpop.eup %6104  ;;  %v11394_v53 = vld [vmem:[#allocation46_spill] sm:$0xff]  ;;  %v2632_v10 = vmul.f32 %v6103_v32, %v11397_v52 }
 0x6e9   :  { %11393 = vst [vmem:[#allocation137_spill] sm:$0xff] %v9085_v28  ;;  %5602 = vmatmul.mubr.bf16.vlgmr.msra.gmra.mrb[32].mxu0 %v3054_v5  ;;  %v1989_v3 = vsub.f32 %v11395_v27, %v11394_v53  ;;  %v2638_v61 = vmul.f32 %v6105_v60, %v8623_v38  ;;  %v6107_v5 = vpop.eup %6106  ;;  %v11403_v38 = vld [vmem:[#allocation50_spill] sm:$0xff] }
 0x6ea   :  { %5605 = vmatprep.mubr.bf16.mxu0 %v3055_v14  ;;  %5650 = vmatpush3.bf16.msra.mxu0 %v3320_v4  ;;  %v3056_v4 = vpack.c.bf16 %v2634_v17, %v2632_v10  ;;  %v11400_v14 = vld [vmem:[#allocation180_spill] sm:$0xff]  ;;  %v6109_v7 = vpop.eup %6108  ;;  %v2642_v32 = vmul.f32 %v6107_v5, %v8825_v46  ;;  %v11404_v60 = vld [vmem:[#allocation162_spill] sm:$0xff]  ;;  %v9111_v10 = vpop.permute.xlu0 %3448 }
 0x6eb   :  { %v2003_v45 = vsub.f32 %v11401_v21, %v11400_v14  ;;  %v2191_v47 = vmul.f32 1.442695, %v1989_v3  ;;  %v3057_v48 = vpack.c.bf16 %v2638_v61, %v2636_v44  ;;  %v2005_v52 = vsub.f32 %v11404_v60, %v11403_v38  ;;  %v11408_v38 = vld [vmem:[#allocation8_spill] sm:$0xff] }
 0x6ec   :  { %v2640_v17 = vmul.f32 %v6109_v7, %v8630_v22 }
 0x6ed   :  { %v9091_v20 = vpop.f32.mrb[20].mxu1  ;;  %v2219_v27 = vmul.f32 1.442695, %v2003_v45  ;;  %6112 = vpow2.f32 %v2191_v47  ;;  %v2223_v3 = vmul.f32 1.442695, %v2005_v52  ;;  %v11405_v45 = vld [vmem:[#allocation168_spill] sm:$0xff] }
 0x6ee   :  { %11396 = vst [vmem:[#allocation40_spill] sm:$0xff] %v9091_v20  ;;  %v9094_v28 = vpop.f32.mrb[21].mxu1  ;;  %v3058_v33 = vpack.c.bf16 %v2642_v32, %v2640_v17  ;;  %v11406_v47 = vld [vmem:[#allocation113_spill] sm:$0xff] }
 0x6ef   :  { %11398 = vst [vmem:[#allocation30_spill] sm:$0xff] %v9094_v28  ;;  %v9097_v15 = vpop.f32.mrb[22].mxu1  ;;  %6114 = vpow2.f32 %v2219_v27  ;;  %v9109_v44 = vpop.eup %6110  ;;  %v11407_v27 = vld [vmem:[#allocation93_spill] sm:$0xff] }
 0x6f0   :  { %11399 = vst [vmem:[#allocation139_spill] sm:$0xff] %v9097_v15  ;;  %v9101_v53 = vpop.f32.mrb[23].mxu1  ;;  %6116 = vpow2.f32 %v2223_v3  ;;  %v1986_v60 = vsub.f32 %v11408_v38, %v11407_v27  ;;  %v11409_v17 = vld [vmem:[#allocation41_spill] sm:$0xff] }
 0x6f1   :  { %11402 = vst [vmem:[#allocation131_spill] sm:$0xff] %v9101_v53  ;;  %5606 = vmatmul.mubr.bf16.gmra.mrb[36].mxu0 %v3056_v4  ;;  %6118 = vrcp.f32 %v8985_v30 }
 0x6f2   :  { %5609 = vmatprep.mubr.bf16.mxu0 %v3057_v48  ;;  %v1983_v48 = vsub.f32 %v11406_v47, %v11405_v45  ;;  %v2185_v15 = vmul.f32 1.442695, %v1986_v60  ;;  %v11412_v45 = vld [vmem:[#allocation97_spill] sm:$0xff]  ;;  %v11413_v47 = vld [vmem:[#allocation156_spill] sm:$0xff] }
 0x6f4   :  { %v2179_v32 = vmul.f32 1.442695, %v1983_v48  ;;  %v2002_v48 = vsub.f32 %v11413_v47, %v11412_v45 }
 0x6f6   :  { %3450 = vrot.lane.b32.xlu1 %v11089_v40, %s6545_s17  ;;  %v2217_v30 = vmul.f32 1.442695, %v2002_v48 }
 0x6f7   :  { %v9116_v46 = vpop.eup %6112 }
 0x6f9   :  { %5610 = vmatmul.mubr.bf16.gmra.mrb[40].mxu0 %v3058_v33  ;;  %v9121_v61 = vpop.eup %6114  ;;  %v11410_v33 = vld [vmem:[#allocation155_spill] sm:$0xff] }
 0x6fa   :  { %3323 = vrot.lane.b32.xlu1 %v11040_v29, %s6544_s16  ;;  %v9126_v5 = vpop.eup %6116  ;;  %v2000_v3 = vsub.f32 %v11410_v33, %v11409_v17 }
 0x6fb   :  { %2445 = vadd.xlane.f32.xlu0 %v9109_v44  ;;  %v6119_v38 = vpop.eup %6118 }
 0x6fc   :  { %v2213_v53 = vmul.f32 1.442695, %v2000_v3 }
 0x6fe   :  { %v9118_v22 = vpop.xlane.xlu0 %2429 }
 0x6ff   :  { %2447 = vadd.xlane.f32.xlu0 %v9116_v46 }
 0x702   :  { %v9123_v4 = vpop.xlane.xlu0 %2431 }
 0x703   :  { %2475 = vadd.xlane.f32.xlu0 %v9121_v61 }
 0x706   :  { %v9128_v14 = vpop.xlane.xlu0 %2459 }
 0x707   :  { %2479 = vadd.xlane.f32.xlu0 %v9126_v5 }
 0x70a   :  { %v9131_v21 = vpop.xlane.xlu0 %2463 }
 0x70e   :  { %v3322_v7 = vpop.permute.xlu0 %3321 }
 0x70f   :  { %5651 = vmatprep.subr.bf16.mxu0 %v3322_v7 }
 0x710   :  { %5652 = vmatpush3.bf16.msra.mxu0 %v3322_v7 }
 0x711   :  { %v2388_v52 = vpop.xlane.xlu1 %2387 }
 0x712   :  { %6120 = vrcp.f32 %v2388_v52 }
 0x713   :  { %6122 = vpow2.f32 %v2179_v32 }
 0x714   :  { %6124 = vpow2.f32 %v2185_v15  ;;  %v2646_v15 = vmul.f32 %v6119_v38, %v8749_v59  ;;  %v11416_v38 = vld [vmem:[#allocation27_spill] sm:$0xff] }
 0x715   :  { %v9140_v20 = vpop.xlane.xlu1 %1877  ;;  %6126 = vrcp.f32 %v9000_v25 }
 0x716   :  { %11411 = vst [vmem:[#allocation85_spill] sm:$0xff] %v9140_v20  ;;  %6128 = vpow2.f32 %v2213_v53 }
 0x719   :  { %v2394_v27 = vpop.xlane.xlu1 %2393 }
 0x71a   :  { %6130 = vrcp.f32 %v2394_v27 }
 0x71b   :  { %6132 = vpow2.f32 %v2217_v30  ;;  %v11417_v30 = vld [vmem:[#allocation165_spill] sm:$0xff] }
 0x71c   :  { %v6121_v7 = vpop.eup %6120  ;;  %6134 = vrcp.f32 %v8818_v57  ;;  %v11419_v57 = vld [vmem:[#allocation167_spill] sm:$0xff] }
 0x71d   :  { %v9145_v28 = vpop.eup %6122  ;;  %v2422_v52 = vpop.xlane.xlu1 %2421  ;;  %3329 = vrot.lane.b32.xlu0 %v11171_v12, %s6544_s16  ;;  %v2644_v32 = vmul.f32 %v6121_v7, %v8900_v1  ;;  %6136 = vrcp.f32 %v8902_v24 }
 0x71e   :  { %2435 = vadd.xlane.f32.xlu1 %v9145_v28  ;;  %v9152_v60 = vpop.eup %6124  ;;  %6138 = vrcp.f32 %v8625_v55 }
 0x71f   :  { %v3059_v25 = vpack.c.bf16 %v2646_v15, %v2644_v32  ;;  %v6127_v17 = vpop.eup %6126  ;;  %6140 = vrcp.f32 %v8784_v34 }
 0x720   :  { %v9159_v33 = vpop.eup %6128  ;;  %v2648_v59 = vmul.f32 %v6127_v17, %v8767_v16  ;;  %v1992_v16 = vsub.f32 %v11417_v30, %v11416_v38  ;;  %6142 = vrcp.f32 %v8933_v39  ;;  %v11423_v38 = vld [vmem:[#allocation107_spill] sm:$0xff] }
 0x721   :  { %v9154_v53 = vpop.xlane.xlu1 %1881  ;;  %3460 = vrot.lane.b32.xlu0 %v11138_v63, %s6545_s17  ;;  %5613 = vmatprep.mubr.bf16.mxu0 %v3059_v25  ;;  %6144 = vrcp.f32 %v9025_v18 }
 0x722   :  { %11414 = vst [vmem:[#allocation141_spill] sm:$0xff] %v9154_v53  ;;  %2441 = vadd.xlane.f32.xlu1 %v9152_v60  ;;  %v2197_v55 = vmul.f32 1.442695, %v1992_v16  ;;  %6146 = vrcp.f32 %v8823_v31  ;;  %v11424_v16 = vld [vmem:[#allocation43_spill] sm:$0xff] }
 0x723   :  { %6148 = vrcp.f32 %v8870_v43 }
 0x724   :  { %v6131_v1 = vpop.eup %6130  ;;  %6150 = vpow2.f32 %v2197_v55 }
 0x725   :  { %v9161_v3 = vpop.xlane.xlu1 %1909  ;;  %v2650_v45 = vmul.f32 %v6131_v1, %v8924_v42  ;;  %v9168_v48 = vpop.eup %6132  ;;  %v11418_v42 = vld [vmem:[#allocation117_spill] sm:$0xff] }
 0x726   :  { %11415 = vst [vmem:[#allocation146_spill] sm:$0xff] %v9161_v3  ;;  %2469 = vadd.xlane.f32.xlu1 %v9159_v33  ;;  %v1993_v32 = vsub.f32 %v11419_v57, %v11418_v42  ;;  %v6135_v24 = vpop.eup %6134  ;;  %v11425_v42 = vld [vmem:[#allocation88_spill] sm:$0xff]  ;;  %v11469_v3 = vld [vmem:[#allocation130_spill] sm:$0xff] }
 0x727   :  { %v3060_v47 = vpack.c.bf16 %v2650_v45, %v2648_v59  ;;  %v6137_v15 = vpop.eup %6136  ;;  %v11421_v59 = vld [vmem:[#allocation11_spill] sm:$0xff]  ;;  %v11426_v57 = vld [vmem:[#allocation188_spill] sm:$0xff] }
 0x728   :  { %v2199_v25 = vmul.f32 1.442695, %v1993_v32  ;;  %v6139_v17 = vpop.eup %6138  ;;  %v2658_v45 = vmul.f32 %v6135_v24, %v11421_v59  ;;  %v2662_v18 = vmul.f32 %v6137_v15, %v8680_v6  ;;  %v11427_v32 = vld [vmem:[#allocation175_spill] sm:$0xff] }
 0x729   :  { %v2426_v27 = vpop.xlane.xlu1 %2425  ;;  %5614 = vmatmul.mubr.bf16.gmra.mrb[44].mxu0 %v3060_v47  ;;  %v6141_v1 = vpop.eup %6140  ;;  %v11422_v47 = vld [vmem:[#allocation184_spill] sm:$0xff]  ;;  %v2656_v31 = vmul.f32 %v6139_v17, %v11424_v16 }
 0x72a   :  { %2473 = vadd.xlane.f32.xlu1 %v9168_v48  ;;  %v2007_v39 = vsub.f32 %v11423_v38, %v11422_v47  ;;  %6152 = vpow2.f32 %v2199_v25  ;;  %v2660_v43 = vmul.f32 %v6141_v1, %v11425_v42  ;;  %v6143_v55 = vpop.eup %6142 }
 0x72b   :  { %6154 = vrcp.f32 %v9038_v8  ;;  %v3183_v24 = vpack.c.bf16 %v2658_v45, %v2656_v31  ;;  %v6145_v15 = vpop.eup %6144  ;;  %v11430_v31 = vld [vmem:[#allocation83_spill] sm:$0xff] }
 0x72c   :  { %6156 = vrcp.f32 %v2422_v52  ;;  %v2227_v59 = vmul.f32 1.442695, %v2007_v39  ;;  %v3184_v6 = vpack.c.bf16 %v2662_v18, %v2660_v43  ;;  %v6147_v8 = vpop.eup %6146  ;;  %v2666_v52 = vmul.f32 %v6143_v55, %v8712_v36 }
 0x72d   :  { %v9175_v7 = vpop.xlane.xlu1 %1911  ;;  %6158 = vrcp.f32 %v8874_v51  ;;  %v6149_v25 = vpop.eup %6148  ;;  %v2670_v1 = vmul.f32 %v6145_v15, %v8837_v49  ;;  %v11428_v51 = vld [vmem:[#allocation81_spill] sm:$0xff]  ;;  %v11433_v15 = vld [vmem:[#allocation32_spill] sm:$0xff] }
 0x72e   :  { %6160 = vrcp.f32 %v9005_v50  ;;  %v2664_v45 = vmul.f32 %v6147_v8, %v11428_v51  ;;  %v9203_v47 = vpop.eup %6150  ;;  %v11429_v50 = vld [vmem:[#allocation75_spill] sm:$0xff] }
 0x72f   :  { %6162 = vpow2.f32 %v2227_v59  ;;  %v2668_v38 = vmul.f32 %v6149_v25, %v11429_v50  ;;  %v11437_v50 = vld [vmem:[#allocation160_spill] sm:$0xff] }
 0x730   :  { %6164 = vrcp.f32 %v2426_v27 }
 0x731   :  { %v9182_v34 = vpop.xlane.xlu1 %1913  ;;  %v3186_v49 = vpack.c.bf16 %v2670_v1, %v2668_v38 }
 0x732   :  { %11420 = vst [vmem:[#allocation23_spill] sm:$0xff] %v9182_v34  ;;  %v2009_v34 = vsub.f32 %v11427_v32, %v11426_v57 }
 0x734   :  { %v2231_v17 = vmul.f32 1.442695, %v2009_v34  ;;  %v9208_v39 = vpop.eup %6152 }
 0x735   :  { %v3205_v30 = vpop.permute.xlu1 %3204  ;;  %v6155_v36 = vpop.eup %6154 }
 0x736   :  { %5631 = vmatprep.subr.bf16.mxu1 %v3205_v30  ;;  %6166 = vpow2.f32 %v2231_v17  ;;  %v6157_v34 = vpop.eup %6156  ;;  %v2674_v18 = vmul.f32 %v6155_v36, %v8843_v56  ;;  %v11434_v17 = vld [vmem:[#allocation178_spill] sm:$0xff]  ;;  %v11439_v36 = vld [vmem:[#allocation35_spill] sm:$0xff] }
 0x737   :  { %5632 = vmatpush3.bf16.msra.mxu1 %v3205_v30  ;;  %6168 = vrcp.f32 %v9045_v0  ;;  %v6159_v30 = vpop.eup %6158  ;;  %v2678_v16 = vmul.f32 %v6157_v34, %v8931_v37  ;;  %v3453_v34 = vpop.permute.xlu0 %3452 }
 0x738   :  { %5681 = vmatprep.subr.bf16.mxu1 %v9111_v10  ;;  %v6161_v27 = vpop.eup %6160  ;;  %v2672_v42 = vmul.f32 %v6159_v30, %v11430_v31 }
 0x739   :  { %v9216_v43 = vpop.eup %6162  ;;  %v2676_v57 = vmul.f32 %v6161_v27, %v8772_v19 }
 0x73a   :  { %5634 = vmatmul.mubr.bf16.vlgmr.msra.gmra.mrb[24].mxu1 %v3183_v24  ;;  %v3187_v0 = vpack.c.bf16 %v2674_v18, %v2672_v42  ;;  %v6165_v32 = vpop.eup %6164 }
 0x73b   :  { %3454 = vrot.lane.b32.xlu1 %v11149_v11, %s6545_s17  ;;  %5637 = vmatprep.mubr.bf16.mxu1 %v3184_v6  ;;  %v3188_v24 = vpack.c.bf16 %v2678_v16, %v2676_v57  ;;  %v2682_v56 = vmul.f32 %v6165_v32, %v8958_v62  ;;  %v11432_v6 = vld [vmem:[#allocation176_spill] sm:$0xff] }
 0x73c   :  { %5682 = vmatpush3.bf16.msra.mxu1 %v9111_v10  ;;  %v3185_v10 = vpack.c.bf16 %v2666_v52, %v2664_v45  ;;  %v1987_v8 = vsub.f32 %v11433_v15, %v11432_v6  ;;  %v11435_v52 = vld [vmem:[#allocation118_spill] sm:$0xff]  ;;  %v11436_v45 = vld [vmem:[#allocation48_spill] sm:$0xff] }
 0x73d   :  { %v1990_v1 = vsub.f32 %v11435_v52, %v11434_v17  ;;  %v2004_v38 = vsub.f32 %v11437_v50, %v11436_v45  ;;  %v11443_v52 = vld [vmem:[#allocation119_spill] sm:$0xff] }
 0x73e   :  { %v2187_v25 = vmul.f32 1.442695, %v1987_v8 }
 0x73f   :  { %3327 = vrot.lane.b32.xlu1 %v11092_v54, %s6544_s16  ;;  %v2193_v51 = vmul.f32 1.442695, %v1990_v1  ;;  %v11444_v1 = vld [vmem:[#allocation19_spill] sm:$0xff] }
 0x740   :  { %2453 = vadd.xlane.f32.xlu0 %v9203_v47  ;;  %v9220_v55 = vpop.eup %6166  ;;  %6170 = vpow2.f32 %v2187_v25 }
 0x741   :  { %11431 = vst [vmem:[#allocation151_spill] sm:$0xff] %v9220_v55  ;;  %v6169_v59 = vpop.eup %6168  ;;  %6172 = vpow2.f32 %v2193_v51  ;;  %v2013_v51 = vsub.f32 %v11444_v1, %v11443_v52  ;;  %v11454_v52 = vld [vmem:[#allocation12_spill] sm:$0xff]  ;;  %v11455_v1 = vld [vmem:[#allocation38_spill] sm:$0xff] }
 0x742   :  { %5638 = vmatmul.mubr.bf16.gmra.mrb[28].mxu1 %v3185_v10  ;;  %v2680_v37 = vmul.f32 %v6169_v59, %v8802_v2  ;;  %v11438_v10 = vld [vmem:[#allocation181_spill] sm:$0xff] }
 0x743   :  { %5641 = vmatprep.mubr.bf16.mxu1 %v3186_v49  ;;  %v2006_v62 = vsub.f32 %v11439_v36, %v11438_v10  ;;  %v2221_v49 = vmul.f32 1.442695, %v2004_v38  ;;  %v9238_v27 = vpop.xlane.xlu0 %2437  ;;  %v2239_v36 = vmul.f32 1.442695, %v2013_v51  ;;  %v1991_v51 = vsub.f32 %v11455_v1, %v11454_v52 }
 0x744   :  { %2455 = vadd.xlane.f32.xlu0 %v9208_v39  ;;  %v3189_v19 = vpack.c.bf16 %v2682_v56, %v2680_v37  ;;  %v11440_v56 = vld [vmem:[#allocation125_spill] sm:$0xff]  ;;  %v11441_v37 = vld [vmem:[#allocation164_spill] sm:$0xff] }
 0x745   :  { %v2225_v2 = vmul.f32 1.442695, %v2006_v62  ;;  %6174 = vpow2.f32 %v2221_v49  ;;  %v2012_v6 = vsub.f32 %v11441_v37, %v11440_v56  ;;  %v11445_v62 = vld [vmem:[#allocation73_spill] sm:$0xff] }
 0x747   :  { %6176 = vpow2.f32 %v2225_v2  ;;  %v9248_v42 = vpop.xlane.xlu0 %2439  ;;  %v2237_v17 = vmul.f32 1.442695, %v2012_v6  ;;  %v11448_v6 = vld [vmem:[#allocation136_spill] sm:$0xff] }
 0x748   :  { %2483 = vadd.xlane.f32.xlu0 %v9216_v43  ;;  %6178 = vrcp.f32 %v9118_v22 }
 0x74a   :  { %5642 = vmatmul.mubr.bf16.gmra.mrb[32].mxu1 %v3187_v0  ;;  %v9233_v30 = vpop.eup %6170 }
 0x74b   :  { %5645 = vmatprep.mubr.bf16.mxu1 %v3188_v24  ;;  %v9241_v18 = vpop.eup %6172  ;;  %v9257_v24 = vpop.xlane.xlu0 %2467 }
 0x74c   :  { %2487 = vadd.xlane.f32.xlu0 %v9220_v55 }
 0x74f   :  { %v9246_v31 = vpop.eup %6174  ;;  %v9267_v45 = vpop.xlane.xlu0 %2471 }
 0x751   :  { %v9254_v22 = vpop.eup %6176 }
 0x752   :  { %5646 = vmatmul.mubr.bf16.gmra.mrb[36].mxu1 %v3189_v19  ;;  %v6179_v32 = vpop.eup %6178  ;;  %v11442_v19 = vld [vmem:[#allocation140_spill] sm:$0xff] }
 0x753   :  { %v2686_v25 = vmul.f32 %v6179_v32, %v11442_v19 }
 0x762   :  { %3333 = vrot.lane.b32.xlu0 %v11209_v35, %s6544_s16 }
 0x763   :  { %2443 = vadd.xlane.f32.xlu1 %v9233_v30 }
 0x766   :  { %v2428_v16 = vpop.xlane.xlu1 %2427  ;;  %3706 = vrot.lane.b32.xlu0 %v11167_v26, %s6546_s18 }
 0x767   :  { %6180 = vrcp.f32 %v2428_v16  ;;  %2449 = vadd.xlane.f32.xlu1 %v9241_v18  ;;  %v11447_v16 = vld [vmem:[#allocation34_spill] sm:$0xff] }
 0x768   :  { %6182 = vrcp.f32 %v9128_v14 }
 0x76a   :  { %v9250_v57 = vpop.xlane.xlu1 %2433 }
 0x76b   :  { %2477 = vadd.xlane.f32.xlu1 %v9246_v31 }
 0x76e   :  { %v2462_v0 = vpop.xlane.xlu1 %2461 }
 0x76f   :  { %6184 = vrcp.f32 %v2462_v0  ;;  %2481 = vadd.xlane.f32.xlu1 %v9254_v22 }
 0x770   :  { %6186 = vpow2.f32 %v2237_v17 }
 0x771   :  { %v6181_v59 = vpop.eup %6180  ;;  %6188 = vpow2.f32 %v2239_v36 }
 0x772   :  { %v9261_v15 = vpop.xlane.xlu1 %2465  ;;  %v2684_v8 = vmul.f32 %v6181_v59, %v9035_v23  ;;  %v6183_v38 = vpop.eup %6182  ;;  %v11446_v23 = vld [vmem:[#allocation14_spill] sm:$0xff] }
 0x773   :  { %v2027_v49 = vsub.f32 %v11446_v23, %v11445_v62  ;;  %v2716_v0 = vmul.f32 %v6183_v38, %v11447_v16  ;;  %v3326_v59 = vpop.permute.xlu0 %3325  ;;  %v11456_v38 = vld [vmem:[#allocation7_spill] sm:$0xff]  ;;  %v11458_v23 = vld [vmem:[#allocation185_spill] sm:$0xff] }
 0x774   :  { %v3311_v14 = vpack.c.bf16 %v2686_v25, %v2684_v8  ;;  %v11449_v8 = vld [vmem:[#allocation111_spill] sm:$0xff] }
 0x775   :  { %v2267_v37 = vmul.f32 1.442695, %v2027_v49  ;;  %v2029_v19 = vsub.f32 %v11449_v8, %v11448_v6  ;;  %v11459_v49 = vld [vmem:[#allocation173_spill] sm:$0xff]  ;;  %v11460_v16 = vld [vmem:[#allocation187_spill] sm:$0xff] }
 0x776   :  { %v3451_v50 = vpop.permute.xlu1 %3450  ;;  %5665 = vmatprep.mubr.bf16.mxu0 %v3311_v14 }
 0x777   :  { %5683 = vmatprep.subr.bf16.mxu1 %v3451_v50  ;;  %6190 = vpow2.f32 %v2267_v37  ;;  %v2271_v25 = vmul.f32 1.442695, %v2029_v19  ;;  %v3457_v37 = vpop.permute.xlu0 %3456 }
 0x778   :  { %5684 = vmatpush3.bf16.msra.mxu1 %v3451_v50  ;;  %v2195_v50 = vmul.f32 1.442695, %v1991_v51 }
 0x779   :  { %v6185_v10 = vpop.eup %6184  ;;  %5685 = vmatprep.subr.bf16.mxu1 %v3453_v34  ;;  %6192 = vpow2.f32 %v2271_v25 }
 0x77a   :  { %v3324_v2 = vpop.permute.xlu1 %3323  ;;  %v2718_v32 = vmul.f32 %v6185_v10, %v9058_v41  ;;  %v9277_v14 = vpop.eup %6186  ;;  %v11457_v10 = vld [vmem:[#allocation170_spill] sm:$0xff]  ;;  %6194 = vpow2.f32 %v2195_v50 }
 0x77b   :  { %5653 = vmatprep.subr.bf16.mxu0 %v3324_v2  ;;  %11450 = vst [vmem:[#allocation36_spill] sm:$0xff] %v9277_v14  ;;  %v9282_v41 = vpop.eup %6188  ;;  %v1994_v36 = vsub.f32 %v11457_v10, %v11456_v38 }
 0x77c   :  { %5654 = vmatpush3.bf16.msra.mxu0 %v3324_v2  ;;  %5686 = vmatpush3.bf16.msra.mxu1 %v3453_v34  ;;  %v3440_v56 = vpack.c.bf16 %v2718_v32, %v2716_v0  ;;  %11451 = vst [vmem:[#allocation152_spill] sm:$0xff] %v9282_v41  ;;  %v2008_v2 = vsub.f32 %v11459_v49, %v11458_v23  ;;  %v11461_v0 = vld [vmem:[#allocation142_spill] sm:$0xff] }
 0x77d   :  { %5655 = vmatprep.subr.bf16.mxu0 %v3326_v59  ;;  %v2201_v62 = vmul.f32 1.442695, %v1994_v36  ;;  %v2010_v32 = vsub.f32 %v11461_v0, %v11460_v16  ;;  %v11466_v0 = vld [vmem:[#allocation16_spill] sm:$0xff] }
 0x77e   :  { %5697 = vmatprep.mubr.bf16.mxu1 %v3440_v56 }
 0x77f   :  { %6196 = vpow2.f32 %v2201_v62  ;;  %v2233_v56 = vmul.f32 1.442695, %v2010_v32  ;;  %v11467_v32 = vld [vmem:[#allocation183_spill] sm:$0xff] }
 0x780   :  { %3458 = vrot.lane.b32.xlu1 %v11171_v12, %s6545_s17  ;;  %5656 = vmatpush3.bf16.msra.mxu0 %v3326_v59  ;;  %v2229_v59 = vmul.f32 1.442695, %v2008_v2 }
 0x781   :  { %v9285_v34 = vpop.eup %6190 }
 0x782   :  { %11452 = vst [vmem:[#allocation57_spill] sm:$0xff] %v9285_v34  ;;  %6198 = vpow2.f32 %v2229_v59  ;;  %v2016_v59 = vsub.f32 %v11467_v32, %v11466_v0 }
 0x783   :  { %v9288_v17 = vpop.eup %6192  ;;  %6200 = vpow2.f32 %v2233_v56 }
 0x784   :  { %3331 = vrot.lane.b32.xlu1 %v11138_v63, %s6544_s16  ;;  %11453 = vst [vmem:[#allocation116_spill] sm:$0xff] %v9288_v17  ;;  %v9299_v6 = vpop.eup %6194 }
 0x785   :  { %2493 = vadd.xlane.f32.xlu0 %v9277_v14 }
 0x788   :  { %v9304_v8 = vpop.xlane.xlu0 %2445 }
 0x789   :  { %2495 = vadd.xlane.f32.xlu0 %v9282_v41  ;;  %v9306_v19 = vpop.eup %6196 }
 0x78c   :  { %v9313_v52 = vpop.eup %6198  ;;  %v9315_v1 = vpop.xlane.xlu0 %2447 }
 0x78d   :  { %2523 = vadd.xlane.f32.xlu0 %v9285_v34  ;;  %v9322_v50 = vpop.eup %6200  ;;  %v2245_v34 = vmul.f32 1.442695, %v2016_v59  ;;  %v11477_v59 = vld [vmem:[#allocation67_spill] sm:$0xff] }
 0x78e   :  { %11462 = vst [vmem:[#allocation172_spill] sm:$0xff] %v9322_v50 }
 0x78f   :  { %6202 = vpow2.f32 %v2245_v34 }
 0x790   :  { %v9329_v10 = vpop.xlane.xlu0 %2475 }
 0x791   :  { %2527 = vadd.xlane.f32.xlu0 %v9288_v17 }
 0x794   :  { %v9333_v62 = vpop.xlane.xlu0 %2479 }
 0x798   :  { %v3330_v41 = vpop.permute.xlu0 %3329 }
 0x7a7   :  { %3579 = vrot.lane.b32.xlu0 %v11089_v40, %s6547_s19 }
 0x7a8   :  { %2451 = vadd.xlane.f32.xlu1 %v9299_v6 }
 0x7ab   :  { %v9308_v25 = vpop.xlane.xlu1 %2435  ;;  %3710 = vrot.lane.b32.xlu0 %v11040_v29, %s6546_s18 }
 0x7ac   :  { %2457 = vadd.xlane.f32.xlu1 %v9306_v19 }
 0x7af   :  { %v9317_v51 = vpop.xlane.xlu1 %2441  ;;  %3712 = vrot.lane.b32.xlu0 %v11149_v11, %s6546_s18 }
 0x7b0   :  { %2485 = vadd.xlane.f32.xlu1 %v9313_v52 }
 0x7b3   :  { %v9324_v38 = vpop.xlane.xlu1 %2469  ;;  %3714 = vrot.lane.b32.xlu0 %v11092_v54, %s6546_s18 }
 0x7b4   :  { %2489 = vadd.xlane.f32.xlu1 %v9322_v50 }
 0x7b7   :  { %v9331_v36 = vpop.xlane.xlu1 %2473 }
 0x7bb   :  { %v3455_v23 = vpop.permute.xlu1 %3454 }
 0x7bc   :  { %v9335_v49 = vpop.f32.mrb[32].mxu0  ;;  %5687 = vmatprep.subr.bf16.mxu1 %v3455_v23 }
 0x7bd   :  { %11463 = vst [vmem:[#allocation20_spill] sm:$0xff] %v9335_v49  ;;  %v9337_v2 = vpop.f32.mrb[33].mxu0  ;;  %5688 = vmatpush3.bf16.msra.mxu1 %v3455_v23  ;;  %v11468_v49 = vld [vmem:[#allocation99_spill] sm:$0xff] }
 0x7be   :  { %11464 = vst [vmem:[#allocation174_spill] sm:$0xff] %v9337_v2  ;;  %v9339_v16 = vpop.f32.mrb[34].mxu0  ;;  %5689 = vmatprep.subr.bf16.mxu1 %v3457_v37  ;;  %v2017_v14 = vsub.f32 %v11469_v3, %v11468_v49  ;;  %v11476_v49 = vld [vmem:[#allocation121_spill] sm:$0xff] }
 0x7bf   :  { %11465 = vst [vmem:[#allocation29_spill] sm:$0xff] %v9339_v16  ;;  %v3328_v56 = vpop.permute.xlu1 %3327  ;;  %v9343_v17 = vpop.f32.mrb[35].mxu0  ;;  %v11473_v16 = vld [vmem:[#allocation71_spill] sm:$0xff] }
 0x7c0   :  { %5657 = vmatprep.subr.bf16.mxu0 %v3328_v56  ;;  %v2247_v32 = vmul.f32 1.442695, %v2017_v14 }
 0x7c1   :  { %5658 = vmatpush3.bf16.msra.mxu0 %v3328_v56  ;;  %5690 = vmatpush3.bf16.msra.mxu1 %v3457_v37  ;;  %v11474_v56 = vld [vmem:[#allocation66_spill] sm:$0xff] }
 0x7c2   :  { %5659 = vmatprep.subr.bf16.mxu0 %v3330_v41  ;;  %v2031_v37 = vsub.f32 %v11474_v56, %v11473_v16  ;;  %6204 = vpow2.f32 %v2247_v32  ;;  %v9371_v16 = vpop.eup %6202  ;;  %v11485_v56 = vld [vmem:[#allocation6_spill] sm:$0xff] }
 0x7c3   :  { %11482 = vst [vmem:[#allocation138_spill] sm:$0xff] %v9371_v16 }
 0x7c4   :  { %v9347_v2 = vpop.f32.mrb[36].mxu0  ;;  %v2275_v3 = vmul.f32 1.442695, %v2031_v37  ;;  %v11486_v37 = vld [vmem:[#allocation64_spill] sm:$0xff] }
 0x7c5   :  { %11470 = vst [vmem:[#allocation161_spill] sm:$0xff] %v9347_v2  ;;  %3462 = vrot.lane.b32.xlu1 %v11209_v35, %s6545_s17  ;;  %v9351_v23 = vpop.f32.mrb[37].mxu0  ;;  %5660 = vmatpush3.bf16.msra.mxu0 %v3330_v41  ;;  %v2033_v2 = vsub.f32 %v11477_v59, %v11476_v49  ;;  %v2011_v49 = vsub.f32 %v11486_v37, %v11485_v56  ;;  %v11489_v59 = vld [vmem:[#allocation166_spill] sm:$0xff]  ;;  %v3461_v37 = vpop.permute.xlu0 %3460 }
 0x7c6   :  { %11471 = vst [vmem:[#allocation106_spill] sm:$0xff] %v9351_v23  ;;  %v9353_v0 = vpop.f32.mrb[38].mxu0  ;;  %6206 = vpow2.f32 %v2275_v3 }
 0x7c7   :  { %11472 = vst [vmem:[#allocation26_spill] sm:$0xff] %v9353_v0  ;;  %v9357_v53 = vpop.f32.mrb[39].mxu0  ;;  %v2279_v14 = vmul.f32 1.442695, %v2033_v2  ;;  %v11488_v2 = vld [vmem:[#allocation58_spill] sm:$0xff] }
 0x7c8   :  { %11475 = vst [vmem:[#allocation108_spill] sm:$0xff] %v9357_v53 }
 0x7c9   :  { %3577 = vrot.lane.b32.xlu1 %v11167_v26, %s6547_s19  ;;  %6208 = vpow2.f32 %v2279_v14 }
 0x7cc   :  { %v9363_v20 = vpop.f32.mrb[40].mxu0  ;;  %v9374_v26 = vpop.eup %6204 }
 0x7cd   :  { %11478 = vst [vmem:[#allocation33_spill] sm:$0xff] %v9363_v20  ;;  %v9365_v41 = vpop.f32.mrb[41].mxu0  ;;  %11483 = vst [vmem:[#allocation68_spill] sm:$0xff] %v9374_v26  ;;  %v2235_v20 = vmul.f32 1.442695, %v2011_v49  ;;  %v9393_v50 = vpop.xlane.xlu0 %2453 }
 0x7ce   :  { %11479 = vst [vmem:[#allocation147_spill] sm:$0xff] %v9365_v41  ;;  %v9367_v0 = vpop.f32.mrb[42].mxu0  ;;  %v11491_v41 = vld [vmem:[#allocation169_spill] sm:$0xff] }
 0x7cf   :  { %11480 = vst [vmem:[#allocation52_spill] sm:$0xff] %v9367_v0  ;;  %v9369_v34 = vpop.f32.mrb[43].mxu0  ;;  %v2014_v0 = vsub.f32 %v11489_v59, %v11488_v2  ;;  %6210 = vpow2.f32 %v2235_v20 }
 0x7d0   :  { %11481 = vst [vmem:[#allocation110_spill] sm:$0xff] %v9369_v34  ;;  %v9377_v32 = vpop.eup %6206  ;;  %v11490_v34 = vld [vmem:[#allocation60_spill] sm:$0xff] }
 0x7d1   :  { %11484 = vst [vmem:[#allocation44_spill] sm:$0xff] %v9377_v32  ;;  %v2241_v14 = vmul.f32 1.442695, %v2014_v0  ;;  %v2028_v53 = vsub.f32 %v11491_v41, %v11490_v34  ;;  %v9399_v20 = vpop.xlane.xlu0 %2455 }
 0x7d2   :  { %2501 = vadd.xlane.f32.xlu0 %v9371_v16  ;;  %v11493_v16 = vld [vmem:[#allocation171_spill] sm:$0xff] }
 0x7d3   :  { %v9382_v3 = vpop.eup %6208  ;;  %6212 = vpow2.f32 %v2241_v14  ;;  %v2269_v23 = vmul.f32 1.442695, %v2028_v53 }
 0x7d4   :  { %11487 = vst [vmem:[#allocation158_spill] sm:$0xff] %v9382_v3 }
 0x7d5   :  { %6214 = vpow2.f32 %v2269_v23 }
 0x7d6   :  { %2503 = vadd.xlane.f32.xlu0 %v9374_v26  ;;  %v11492_v26 = vld [vmem:[#allocation9_spill] sm:$0xff] }
 0x7d7   :  { %v2030_v56 = vsub.f32 %v11493_v16, %v11492_v26  ;;  %v9412_v16 = vpop.xlane.xlu0 %2483 }
 0x7d9   :  { %v9391_v55 = vpop.eup %6210 }
 0x7da   :  { %2531 = vadd.xlane.f32.xlu0 %v9377_v32  ;;  %v2273_v32 = vmul.f32 1.442695, %v2030_v56  ;;  %11494 = vst [vmem:[#allocation46_spill] sm:$0xff] %v9391_v55 }
 0x7db   :  { %v9427_v59 = vpop.xlane.xlu0 %2487 }
 0x7dc   :  { %6216 = vpow2.f32 %v2273_v32 }
 0x7dd   :  { %v9396_v0 = vpop.eup %6212  ;;  %6218 = vrcp.f32 %v9250_v57 }
 0x7de   :  { %2535 = vadd.xlane.f32.xlu0 %v9382_v3  ;;  %11495 = vst [vmem:[#allocation159_spill] sm:$0xff] %v9396_v0  ;;  %6220 = vrcp.f32 %v9308_v25 }
 0x7df   :  { %v9401_v53 = vpop.eup %6214  ;;  %6222 = vrcp.f32 %v9123_v4 }
 0x7e0   :  { %11496 = vst [vmem:[#allocation45_spill] sm:$0xff] %v9401_v53  ;;  %6224 = vrcp.f32 %v9238_v27 }
 0x7e1   :  { %6226 = vrcp.f32 %v9317_v51  ;;  %v11502_v51 = vld [vmem:[#allocation177_spill] sm:$0xff] }
 0x7e6   :  { %v9406_v23 = vpop.eup %6216 }
 0x7e7   :  { %11497 = vst [vmem:[#allocation180_spill] sm:$0xff] %v9406_v23  ;;  %v6219_v4 = vpop.eup %6218 }
 0x7e8   :  { %v6221_v56 = vpop.eup %6220 }
 0x7e9   :  { %v2692_v3 = vmul.f32 %v6221_v56, %v9145_v28 }
 0x7ed   :  { %2491 = vadd.xlane.f32.xlu1 %v9391_v55  ;;  %v11507_v55 = vld [vmem:[#allocation124_spill] sm:$0xff] }
 0x7f0   :  { %v2444_v49 = vpop.xlane.xlu1 %2443 }
 0x7f1   :  { %2497 = vadd.xlane.f32.xlu1 %v9396_v0  ;;  %6228 = vrcp.f32 %v2444_v49 }
 0x7f2   :  { %6230 = vrcp.f32 %v9248_v42 }
 0x7f3   :  { %6232 = vrcp.f32 %v9304_v8  ;;  %v11505_v8 = vld [vmem:[#allocation148_spill] sm:$0xff] }
 0x7f4   :  { %v2450_v41 = vpop.xlane.xlu1 %2449  ;;  %3587 = vrot.lane.b32.xlu0 %v11171_v12, %s6547_s19 }
 0x7f5   :  { %2525 = vadd.xlane.f32.xlu1 %v9401_v53  ;;  %6234 = vrcp.f32 %v2450_v41  ;;  %v11506_v53 = vld [vmem:[#allocation37_spill] sm:$0xff] }
 0x7f6   :  { %6236 = vrcp.f32 %v9315_v1  ;;  %v11509_v1 = vld [vmem:[#allocation72_spill] sm:$0xff] }
 0x7f8   :  { %v9408_v34 = vpop.xlane.xlu1 %2477  ;;  %3718 = vrot.lane.b32.xlu0 %v11138_v63, %s6546_s18 }
 0x7f9   :  { %2529 = vadd.xlane.f32.xlu1 %v9406_v23  ;;  %v11504_v23 = vld [vmem:[#allocation102_spill] sm:$0xff] }
 0x7fc   :  { %v9418_v26 = vpop.xlane.xlu1 %2481  ;;  %3720 = vrot.lane.b32.xlu0 %v11209_v35, %s6546_s18  ;;  %v9423_v32 = vpop.f32.mrb[44].mxu0 }
 0x7fd   :  { %11498 = vst [vmem:[#allocation120_spill] sm:$0xff] %v9423_v32  ;;  %v9425_v2 = vpop.f32.mrb[45].mxu0  ;;  %v6223_v32 = vpop.eup %6222 }
 0x7fe   :  { %11499 = vst [vmem:[#allocation50_spill] sm:$0xff] %v9425_v2  ;;  %v9429_v14 = vpop.f32.mrb[46].mxu0  ;;  %v3334_v2 = vpop.permute.xlu0 %3333  ;;  %v2688_v42 = vmul.f32 %v6223_v32, %v11504_v23 }
 0x7ff   :  { %11500 = vst [vmem:[#allocation162_spill] sm:$0xff] %v9429_v14  ;;  %v9431_v57 = vpop.f32.mrb[47].mxu0  ;;  %v6225_v14 = vpop.eup %6224 }
 0x800   :  { %11501 = vst [vmem:[#allocation168_spill] sm:$0xff] %v9431_v57  ;;  %v3459_v25 = vpop.permute.xlu1 %3458  ;;  %v2690_v57 = vmul.f32 %v6219_v4, %v9048_v9  ;;  %v2694_v0 = vmul.f32 %v6225_v14, %v11505_v8  ;;  %v2021_v9 = vsub.f32 %v11507_v55, %v11506_v53  ;;  %v11511_v8 = vld [vmem:[#allocation101_spill] sm:$0xff] }
 0x801   :  { %5691 = vmatprep.subr.bf16.mxu1 %v3459_v25 }
 0x802   :  { %5692 = vmatpush3.bf16.msra.mxu1 %v3459_v25  ;;  %v11503_v25 = vld [vmem:[#allocation47_spill] sm:$0xff]  ;;  %v2255_v53 = vmul.f32 1.442695, %v2021_v9 }
 0x803   :  { %5693 = vmatprep.subr.bf16.mxu1 %v3461_v37  ;;  %v2020_v49 = vsub.f32 %v11503_v25, %v11502_v51  ;;  %v3313_v51 = vpack.c.bf16 %v2694_v0, %v2692_v3 }
 0x804   :  { %v3332_v27 = vpop.permute.xlu1 %3331 }
 0x805   :  { %5661 = vmatprep.subr.bf16.mxu0 %v3332_v27  ;;  %v2253_v4 = vmul.f32 1.442695, %v2020_v49 }
 0x806   :  { %5662 = vmatpush3.bf16.msra.mxu0 %v3332_v27  ;;  %5694 = vmatpush3.bf16.msra.mxu1 %v3461_v37  ;;  %v3312_v27 = vpack.c.bf16 %v2690_v57, %v2688_v42  ;;  %v6227_v37 = vpop.eup %6226  ;;  %v11510_v57 = vld [vmem:[#allocation84_spill] sm:$0xff] }
 0x807   :  { %5663 = vmatprep.subr.bf16.mxu0 %v3334_v2  ;;  %v6229_v25 = vpop.eup %6228  ;;  %v2698_v55 = vmul.f32 %v6227_v37, %v9152_v60  ;;  %6238 = vpow2.f32 %v2253_v4 }
 0x808   :  { %v6231_v41 = vpop.eup %6230  ;;  %v2700_v14 = vmul.f32 %v6229_v25, %v9233_v30  ;;  %6240 = vpow2.f32 %v2255_v53 }
 0x809   :  { %v6233_v23 = vpop.eup %6232  ;;  %v2696_v56 = vmul.f32 %v6231_v41, %v11510_v57  ;;  %v11513_v41 = vld [vmem:[#allocation59_spill] sm:$0xff] }
 0x80a   :  { %3708 = vrot.lane.b32.xlu1 %v11089_v40, %s6546_s18  ;;  %5664 = vmatpush3.bf16.msra.mxu0 %v3334_v2  ;;  %v11508_v2 = vld [vmem:[#allocation182_spill] sm:$0xff]  ;;  %v6235_v42 = vpop.eup %6234 }
 0x80b   :  { %v2035_v3 = vsub.f32 %v11509_v1, %v11508_v2  ;;  %v3314_v49 = vpack.c.bf16 %v2698_v55, %v2696_v56 }
 0x80d   :  { %v9447_v28 = vpop.f32.mrb[24].mxu1  ;;  %5666 = vmatmul.mubr.bf16.vlgmr.msra.gmra.mrb[48].mxu0 %v3312_v27  ;;  %v2283_v60 = vmul.f32 1.442695, %v2035_v3  ;;  %v11512_v27 = vld [vmem:[#allocation132_spill] sm:$0xff] }
 0x80e   :  { %3581 = vrot.lane.b32.xlu1 %v11040_v29, %s6547_s19  ;;  %v9451_v40 = vpop.f32.mrb[25].mxu1  ;;  %5669 = vmatprep.mubr.bf16.mxu0 %v3313_v51  ;;  %v2702_v29 = vmul.f32 %v6233_v23, %v9109_v44  ;;  %v2037_v37 = vsub.f32 %v11512_v27, %v11511_v8  ;;  %v6237_v51 = vpop.eup %6236  ;;  %v2706_v44 = vmul.f32 %v6235_v42, %v9241_v18  ;;  %v11514_v23 = vld [vmem:[#allocation87_spill] sm:$0xff]  ;;  %v11518_v42 = vld [vmem:[#allocation76_spill] sm:$0xff] }
 0x80f   :  { %v9453_v32 = vpop.f32.mrb[26].mxu1  ;;  %6242 = vpow2.f32 %v2283_v60  ;;  %v2023_v55 = vsub.f32 %v11514_v23, %v11513_v41  ;;  %v2704_v2 = vmul.f32 %v6237_v51, %v9116_v46  ;;  %v11519_v60 = vld [vmem:[#allocation78_spill] sm:$0xff]  ;;  %v11523_v23 = vld [vmem:[#allocation145_spill] sm:$0xff] }
 0x810   :  { %v9458_v0 = vpop.f32.mrb[27].mxu1  ;;  %v3315_v9 = vpack.c.bf16 %v2702_v29, %v2700_v14  ;;  %v2287_v25 = vmul.f32 1.442695, %v2037_v37  ;;  %v11515_v14 = vld [vmem:[#allocation89_spill] sm:$0xff]  ;;  %v2039_v8 = vsub.f32 %v11519_v60, %v11518_v42  ;;  %v11529_v60 = vld [vmem:[#allocation95_spill] sm:$0xff] }
 0x811   :  { %v9481_v1 = vpop.eup %6238  ;;  %v2259_v3 = vmul.f32 1.442695, %v2023_v55  ;;  %v2025_v57 = vsub.f32 %v11515_v14, %v9019_v58  ;;  %v11524_v55 = vld [vmem:[#allocation62_spill] sm:$0xff] }
 0x812   :  { %3583 = vrot.lane.b32.xlu1 %v11149_v11, %s6547_s19  ;;  %6244 = vpow2.f32 %v2287_v25  ;;  %v9488_v56 = vpop.eup %6240  ;;  %v2291_v58 = vmul.f32 1.442695, %v2039_v8  ;;  %v11530_v8 = vld [vmem:[#allocation53_spill] sm:$0xff] }
 0x813   :  { %6246 = vpow2.f32 %v2259_v3  ;;  %v2263_v46 = vmul.f32 1.442695, %v2025_v57  ;;  %v11527_v57 = vld [vmem:[#allocation69_spill] sm:$0xff] }
 0x815   :  { %v9467_v4 = vpop.f32.mrb[28].mxu1  ;;  %5670 = vmatmul.mubr.bf16.gmra.mrb[52].mxu0 %v3314_v49  ;;  %6248 = vpow2.f32 %v2263_v46  ;;  %v11528_v46 = vld [vmem:[#allocation189_spill] sm:$0xff] }
 0x816   :  { %3585 = vrot.lane.b32.xlu1 %v11092_v54, %s6547_s19  ;;  %v9471_v30 = vpop.f32.mrb[29].mxu1  ;;  %5673 = vmatprep.mubr.bf16.mxu0 %v3315_v9  ;;  %v3316_v54 = vpack.c.bf16 %v2706_v44, %v2704_v2  ;;  %v11520_v9 = vld [vmem:[#allocation103_spill] sm:$0xff]  ;;  %v2015_v2 = vsub.f32 %v11524_v55, %v11523_v23  ;;  %6250 = vpow2.f32 %v2291_v58  ;;  %v9526_v58 = vpop.permute.xlu0 %3706 }
 0x817   :  { %v9473_v11 = vpop.f32.mrb[30].mxu1  ;;  %v2041_v51 = vsub.f32 %v11520_v9, %v9175_v7  ;;  %v2018_v7 = vsub.f32 %v11528_v46, %v11527_v57  ;;  %v2032_v9 = vsub.f32 %v11530_v8, %v11529_v60  ;;  %v11531_v57 = vld [vmem:[#allocation79_spill] sm:$0xff]  ;;  %v11532_v46 = vld [vmem:[#allocation56_spill] sm:$0xff] }
 0x818   :  { %v9478_v53 = vpop.f32.mrb[31].mxu1  ;;  %v2034_v60 = vsub.f32 %v11532_v46, %v11531_v57 }
 0x819   :  { %v9499_v37 = vpop.eup %6242  ;;  %v2295_v3 = vmul.f32 1.442695, %v2041_v51  ;;  %v2249_v23 = vmul.f32 1.442695, %v2018_v7 }
 0x81a   :  { %v2281_v7 = vmul.f32 1.442695, %v2034_v60 }
 0x81b   :  { %2509 = vadd.xlane.f32.xlu0 %v9481_v1  ;;  %6252 = vpow2.f32 %v2295_v3 }
 0x81c   :  { %v9506_v25 = vpop.eup %6244 }
 0x81d   :  { %v9486_v18 = vpop.f32.mrb[32].mxu1  ;;  %5674 = vmatmul.mubr.bf16.gmra.mrb[56].mxu0 %v3316_v54  ;;  %v9519_v42 = vpop.eup %6246 }
 0x81e   :  { %11516 = vst [vmem:[#allocation113_spill] sm:$0xff] %v9486_v18  ;;  %v9490_v29 = vpop.f32.mrb[33].mxu1 }
 0x81f   :  { %v9492_v49 = vpop.f32.mrb[34].mxu1  ;;  %2511 = vadd.xlane.f32.xlu0 %v9488_v56  ;;  %v9524_v55 = vpop.eup %6248 }
 0x820   :  { %11517 = vst [vmem:[#allocation93_spill] sm:$0xff] %v9492_v49  ;;  %v9497_v27 = vpop.f32.mrb[35].mxu1  ;;  %v9529_v51 = vpop.eup %6250 }
 0x823   :  { %2539 = vadd.xlane.f32.xlu0 %v9499_v37 }
 0x825   :  { %v9504_v44 = vpop.f32.mrb[36].mxu1  ;;  %v9539_v3 = vpop.eup %6252 }
 0x826   :  { %11521 = vst [vmem:[#allocation8_spill] sm:$0xff] %v9504_v44  ;;  %v9508_v41 = vpop.f32.mrb[37].mxu1  ;;  %v2243_v44 = vmul.f32 1.442695, %v2015_v2  ;;  %v9534_v2 = vpop.xlane.xlu0 %2493 }
 0x827   :  { %11522 = vst [vmem:[#allocation41_spill] sm:$0xff] %v9508_v41  ;;  %2543 = vadd.xlane.f32.xlu0 %v9506_v25  ;;  %v9513_v54 = vpop.f32.mrb[38].mxu1 }
 0x828   :  { %11525 = vst [vmem:[#allocation155_spill] sm:$0xff] %v9513_v54  ;;  %v9515_v14 = vpop.f32.mrb[39].mxu1  ;;  %v2277_v54 = vmul.f32 1.442695, %v2032_v9  ;;  %6254 = vpow2.f32 %v2243_v44 }
 0x829   :  { %11526 = vst [vmem:[#allocation97_spill] sm:$0xff] %v9515_v14  ;;  %6256 = vpow2.f32 %v2249_v23 }
 0x82a   :  { %6258 = vpow2.f32 %v2277_v54  ;;  %v9547_v54 = vpop.xlane.xlu0 %2495 }
 0x82b   :  { %2515 = vadd.xlane.f32.xlu0 %v9519_v42  ;;  %6260 = vrcp.f32 %v9131_v21 }
 0x82c   :  { %6262 = vrcp.f32 %v9393_v50 }
 0x82d   :  { %6264 = vrcp.f32 %v9261_v15 }
 0x82f   :  { %2519 = vadd.xlane.f32.xlu0 %v9524_v55 }
 0x832   :  { %v9544_v21 = vpop.eup %6254 }
 0x833   :  { %2547 = vadd.xlane.f32.xlu0 %v9529_v51  ;;  %v9550_v15 = vpop.eup %6256 }
 0x834   :  { %v9552_v8 = vpop.eup %6258 }
 0x835   :  { %v2452_v44 = vpop.xlane.xlu1 %2451 }
 0x836   :  { %6266 = vrcp.f32 %v2452_v44 }
 0x837   :  { %6268 = vrcp.f32 %v9324_v38  ;;  %2551 = vadd.xlane.f32.xlu0 %v9539_v3  ;;  %v6261_v38 = vpop.eup %6260 }
 0x838   :  { %6270 = vrcp.f32 %v9399_v20  ;;  %v6263_v23 = vpop.eup %6262 }
 0x839   :  { %6272 = vrcp.f32 %v9257_v24  ;;  %v2458_v50 = vpop.xlane.xlu1 %2457  ;;  %v6265_v20 = vpop.eup %6264 }
 0x83a   :  { %6274 = vrcp.f32 %v2458_v50  ;;  %2499 = vadd.xlane.f32.xlu1 %v9544_v21  ;;  %v9556_v24 = vpop.xlane.xlu0 %2523  ;;  %v2722_v49 = vmul.f32 %v6265_v20, %v9070_v13  ;;  %v11534_v20 = vld [vmem:[#allocation133_spill] sm:$0xff] }
 0x83b   :  { %6276 = vpow2.f32 %v2281_v7  ;;  %v2710_v7 = vmul.f32 %v6263_v23, %v9203_v47 }
 0x83c   :  { %6278 = vrcp.f32 %v9331_v36 }
 0x83d   :  { %v2486_v9 = vpop.xlane.xlu1 %2485  ;;  %6280 = vrcp.f32 %v9408_v34 }
 0x83e   :  { %2505 = vadd.xlane.f32.xlu1 %v9550_v15  ;;  %6282 = vrcp.f32 %v9267_v45  ;;  %v9567_v34 = vpop.xlane.xlu0 %2527 }
 0x83f   :  { %6284 = vrcp.f32 %v9329_v10  ;;  %v11533_v10 = vld [vmem:[#allocation179_spill] sm:$0xff] }
 0x840   :  { %v6267_v57 = vpop.eup %6266  ;;  %6286 = vrcp.f32 %v9418_v26 }
 0x841   :  { %v6269_v46 = vpop.eup %6268  ;;  %v2490_v60 = vpop.xlane.xlu1 %2489  ;;  %v2708_v44 = vmul.f32 %v6267_v57, %v9299_v6  ;;  %v2720_v57 = vmul.f32 %v6261_v38, %v11533_v10  ;;  %6288 = vrcp.f32 %v2486_v9 }
 0x842   :  { %v6271_v50 = vpop.eup %6270  ;;  %2533 = vadd.xlane.f32.xlu1 %v9552_v8  ;;  %v2726_v23 = vmul.f32 %v6269_v46, %v9159_v33  ;;  %6290 = vrcp.f32 %v9333_v62  ;;  %v3580_v38 = vpop.permute.xlu0 %3579  ;;  %v11535_v62 = vld [vmem:[#allocation143_spill] sm:$0xff]  ;;  %v11536_v46 = vld [vmem:[#allocation18_spill] sm:$0xff] }
 0x843   :  { %v6273_v14 = vpop.eup %6272  ;;  %v3317_v36 = vpack.c.bf16 %v2710_v7, %v2708_v44  ;;  %v2712_v6 = vmul.f32 %v6271_v50, %v9208_v39  ;;  %v3441_v7 = vpack.c.bf16 %v2722_v49, %v2720_v57  ;;  %6292 = vrcp.f32 %v9412_v16 }
 0x844   :  { %v6275_v41 = vpop.eup %6274  ;;  %v2724_v44 = vmul.f32 %v6273_v14, %v11534_v20  ;;  %6294 = vrcp.f32 %v2490_v60 }
 0x845   :  { %v9565_v18 = vpop.eup %6276  ;;  %v3463_v45 = vpop.permute.xlu1 %3462  ;;  %5677 = vmatprep.mubr.bf16.mxu0 %v3317_v36  ;;  %v2714_v47 = vmul.f32 %v6275_v41, %v9306_v19  ;;  %6296 = vrcp.f32 %v9427_v59 }
 0x846   :  { %2537 = vadd.xlane.f32.xlu1 %v9565_v18  ;;  %5695 = vmatprep.subr.bf16.mxu1 %v3463_v45  ;;  %v6279_v39 = vpop.eup %6278  ;;  %v3442_v33 = vpack.c.bf16 %v2726_v23, %v2724_v44  ;;  %v3711_v44 = vpop.permute.xlu0 %3710 }
 0x847   :  { %5696 = vmatpush3.bf16.msra.mxu1 %v3463_v45  ;;  %v3318_v13 = vpack.c.bf16 %v2714_v47, %v2712_v6  ;;  %v6281_v41 = vpop.eup %6280  ;;  %v2730_v49 = vmul.f32 %v6279_v39, %v9168_v48  ;;  %v11541_v39 = vld [vmem:[#allocation100_spill] sm:$0xff] }
 0x848   :  { %5745 = vmatprep.subr.bf16.mxu1 %v9526_v58  ;;  %v6283_v26 = vpop.eup %6282  ;;  %v2734_v9 = vmul.f32 %v6281_v41, %v9246_v31 }
 0x849   :  { %v3578_v19 = vpop.permute.xlu1 %3577  ;;  %5678 = vmatmul.mubr.bf16.gmra.mrb[60].mxu0 %v3318_v13  ;;  %v6285_v14 = vpop.eup %6284  ;;  %v2728_v16 = vmul.f32 %v6283_v26, %v11536_v46  ;;  %v11538_v13 = vld [vmem:[#allocation151_spill] sm:$0xff]  ;;  %v11543_v26 = vld [vmem:[#allocation49_spill] sm:$0xff] }
 0x84a   :  { %5698 = vmatmul.mubr.bf16.vlgmr.msra.gmra.mrb[40].mxu1 %v3441_v7  ;;  %5713 = vmatprep.subr.bf16.mxu0 %v3578_v19  ;;  %v2732_v50 = vmul.f32 %v6285_v14, %v9121_v61  ;;  %v6287_v45 = vpop.eup %6286  ;;  %v9607_v41 = vpop.permute.xlu0 %3712 }
 0x84b   :  { %5701 = vmatprep.mubr.bf16.mxu1 %v3442_v33  ;;  %5714 = vmatpush3.bf16.msra.mxu0 %v3578_v19  ;;  %v3443_v36 = vpack.c.bf16 %v2730_v49, %v2728_v16  ;;  %v2738_v47 = vmul.f32 %v6287_v45, %v9254_v22  ;;  %v11537_v22 = vld [vmem:[#allocation172_spill] sm:$0xff]  ;;  %v11542_v19 = vld [vmem:[#allocation122_spill] sm:$0xff]  ;;  %v11547_v45 = vld [vmem:[#allocation85_spill] sm:$0xff] }
 0x84c   :  { %5746 = vmatpush3.bf16.msra.mxu1 %v9526_v58  ;;  %5715 = vmatprep.subr.bf16.mxu0 %v3580_v38  ;;  %v3444_v48 = vpack.c.bf16 %v2734_v9, %v2732_v50  ;;  %v6289_v58 = vpop.eup %6288  ;;  %v2022_v33 = vsub.f32 %v11542_v19, %v11541_v39  ;;  %v11546_v9 = vld [vmem:[#allocation150_spill] sm:$0xff] }
 0x84d   :  { %3843 = vrot.lane.b32.xlu0 %v11535_v62, %s6548_s20  ;;  %v6291_v6 = vpop.eup %6290  ;;  %v2742_v61 = vmul.f32 %v6289_v58, %v9313_v52  ;;  %v11545_v62 = vld [vmem:[#allocation80_spill] sm:$0xff] }
 0x84e   :  { %v6293_v31 = vpop.eup %6292  ;;  %v2736_v59 = vmul.f32 %v6291_v6, %v9126_v5  ;;  %v2038_v46 = vsub.f32 %v11546_v9, %v11545_v62  ;;  %v9614_v16 = vpop.permute.xlu0 %3714 }
 0x84f   :  { %5716 = vmatpush3.bf16.msra.mxu0 %v3580_v38  ;;  %v6295_v23 = vpop.eup %6294  ;;  %v11544_v38 = vld [vmem:[#allocation123_spill] sm:$0xff] }
 0x850   :  { %v3445_v60 = vpack.c.bf16 %v2738_v47, %v2736_v59  ;;  %v6297_v57 = vpop.eup %6296  ;;  %v2036_v14 = vsub.f32 %v11544_v38, %v11543_v26  ;;  %v11549_v59 = vld [vmem:[#allocation141_spill] sm:$0xff]  ;;  %v11555_v26 = vld [vmem:[#allocation23_spill] sm:$0xff] }
 0x851   :  { %3909 = vrot.lane.b32.xlu0 %v9343_v17, %s6549_s21  ;;  %v2740_v17 = vmul.f32 %v6293_v31, %v9216_v43  ;;  %v2744_v52 = vmul.f32 %v6297_v57, %v11538_v13  ;;  %v11540_v43 = vld [vmem:[#allocation70_spill] sm:$0xff]  ;;  %v11552_v13 = vld [vmem:[#allocation36_spill] sm:$0xff]  ;;  %v11556_v38 = vld [vmem:[#allocation105_spill] sm:$0xff] }
 0x852   :  { %5702 = vmatmul.mubr.bf16.gmra.mrb[44].mxu1 %v3443_v36  ;;  %v2285_v49 = vmul.f32 1.442695, %v2036_v14  ;;  %v2289_v36 = vmul.f32 1.442695, %v2038_v46  ;;  %v2042_v14 = vsub.f32 %v11556_v38, %v11555_v26  ;;  %v11557_v46 = vld [vmem:[#allocation57_spill] sm:$0xff]  ;;  %v11562_v26 = vld [vmem:[#allocation180_spill] sm:$0xff] }
 0x853   :  { %5705 = vmatprep.mubr.bf16.mxu1 %v3444_v48  ;;  %v3446_v10 = vpack.c.bf16 %v2742_v61, %v2740_v17  ;;  %v11548_v48 = vld [vmem:[#allocation77_spill] sm:$0xff]  ;;  %v11550_v17 = vld [vmem:[#allocation55_spill] sm:$0xff] }
 0x854   :  { %v2024_v58 = vsub.f32 %v11548_v48, %v11547_v45  ;;  %v11558_v45 = vld [vmem:[#allocation45_spill] sm:$0xff] }
 0x855   :  { %3973 = vrot.lane.b32.xlu0 %v9458_v0, %s6550_s22  ;;  %v2746_v0 = vmul.f32 %v6295_v23, %v11537_v22 }
 0x856   :  { %v2261_v61 = vmul.f32 1.442695, %v2024_v58  ;;  %v2297_v58 = vmul.f32 1.442695, %v2042_v14 }
 0x857   :  { %3716 = vrot.lane.b32.xlu1 %v11171_v12, %s6546_s18  ;;  %v3447_v5 = vpack.c.bf16 %v2746_v0, %v2744_v52  ;;  %v11539_v12 = vld [vmem:[#allocation153_spill] sm:$0xff] }
 0x858   :  { %v2019_v20 = vsub.f32 %v11540_v43, %v11539_v12  ;;  %v11553_v12 = vld [vmem:[#allocation146_spill] sm:$0xff] }
 0x859   :  { %v11554_v43 = vld [vmem:[#allocation22_spill] sm:$0xff] }
 0x85a   :  { %5706 = vmatmul.mubr.bf16.gmra.mrb[48].mxu1 %v3445_v60  ;;  %v2251_v7 = vmul.f32 1.442695, %v2019_v20  ;;  %v2026_v60 = vsub.f32 %v11550_v17, %v11549_v59  ;;  %v2040_v20 = vsub.f32 %v11554_v43, %v11553_v12 }
 0x85b   :  { %3589 = vrot.lane.b32.xlu1 %v11138_v63, %s6547_s19  ;;  %5709 = vmatprep.mubr.bf16.mxu1 %v3446_v10  ;;  %v2257_v63 = vmul.f32 1.442695, %v2022_v33 }
 0x85c   :  { %6298 = vpow2.f32 %v2251_v7 }
 0x85d   :  { %6300 = vrcp.f32 %v9534_v2 }
 0x85f   :  { %3591 = vrot.lane.b32.xlu1 %v11209_v35, %s6547_s19  ;;  %v9620_v6 = vpop.xlane.xlu0 %2501 }
 0x862   :  { %5710 = vmatmul.mubr.bf16.gmra.mrb[52].mxu1 %v3447_v5  ;;  %v2265_v5 = vmul.f32 1.442695, %v2026_v60 }
 0x863   :  { %v9630_v57 = vpop.xlane.xlu0 %2503 }
 0x866   :  { %v9623_v2 = vpop.eup %6298 }
 0x867   :  { %v6301_v47 = vpop.eup %6300 }
 0x868   :  { %v2750_v52 = vmul.f32 %v6301_v47, %v11552_v13 }
 0x87a   :  { %v2492_v35 = vpop.xlane.xlu1 %2491 }
 0x87b   :  { %6302 = vrcp.f32 %v2492_v35  ;;  %v2532_v35 = vpop.xlane.xlu0 %2531 }
 0x87c   :  { %6304 = vpow2.f32 %v2257_v63  ;;  %v2293_v63 = vmul.f32 1.442695, %v2040_v20 }
 0x87d   :  { %6306 = vpow2.f32 %v2285_v49 }
 0x87e   :  { %v9616_v50 = vpop.xlane.xlu1 %2497  ;;  %6308 = vrcp.f32 %v9556_v24  ;;  %v11551_v24 = vld [vmem:[#allocation46_spill] sm:$0xff] }
 0x882   :  { %v2526_v31 = vpop.xlane.xlu1 %2525 }
 0x883   :  { %6310 = vrcp.f32 %v2526_v31  ;;  %2507 = vadd.xlane.f32.xlu1 %v9623_v2 }
 0x884   :  { %6312 = vpow2.f32 %v2289_v36 }
 0x885   :  { %v6303_v23 = vpop.eup %6302  ;;  %6314 = vpow2.f32 %v2261_v61  ;;  %v2536_v61 = vpop.xlane.xlu0 %2535 }
 0x886   :  { %v9628_v10 = vpop.eup %6304  ;;  %v9632_v22 = vpop.xlane.xlu1 %2529  ;;  %v2748_v0 = vmul.f32 %v6303_v23, %v11551_v24  ;;  %6316 = vpow2.f32 %v2265_v5 }
 0x887   :  { %2513 = vadd.xlane.f32.xlu1 %v9628_v10  ;;  %v9639_v39 = vpop.eup %6306  ;;  %6318 = vpow2.f32 %v2293_v63 }
 0x888   :  { %v3569_v7 = vpack.c.bf16 %v2750_v52, %v2748_v0  ;;  %v6309_v33 = vpop.eup %6308  ;;  %6320 = vpow2.f32 %v2297_v58  ;;  %v11560_v0 = vld [vmem:[#allocation174_spill] sm:$0xff] }
 0x889   :  { %v2780_v36 = vmul.f32 %v6309_v33, %v11557_v46  ;;  %v3588_v60 = vpop.permute.xlu0 %3587  ;;  %6322 = vrcp.f32 %v9547_v54  ;;  %v11561_v33 = vld [vmem:[#allocation159_spill] sm:$0xff]  ;;  %v11564_v46 = vld [vmem:[#allocation116_spill] sm:$0xff] }
 0x88a   :  { %v3709_v19 = vpop.permute.xlu1 %3708  ;;  %5729 = vmatprep.mubr.bf16.mxu0 %v3569_v7  ;;  %6324 = vrcp.f32 %v9567_v34 }
 0x88b   :  { %2541 = vadd.xlane.f32.xlu1 %v9639_v39  ;;  %5747 = vmatprep.subr.bf16.mxu1 %v3709_v19  ;;  %6326 = vrcp.f32 %v9616_v50 }
 0x88c   :  { %5748 = vmatpush3.bf16.msra.mxu1 %v3709_v19  ;;  %6328 = vrcp.f32 %v9632_v22 }
 0x88d   :  { %v6311_v49 = vpop.eup %6310  ;;  %5749 = vmatprep.subr.bf16.mxu1 %v3711_v44  ;;  %v3719_v12 = vpop.permute.xlu0 %3718 }
 0x88e   :  { %v9644_v62 = vpop.eup %6312  ;;  %v3582_v9 = vpop.permute.xlu1 %3581  ;;  %v2782_v48 = vmul.f32 %v6311_v49, %v11558_v45  ;;  %v11563_v49 = vld [vmem:[#allocation152_spill] sm:$0xff] }
 0x88f   :  { %2545 = vadd.xlane.f32.xlu1 %v9644_v62  ;;  %5717 = vmatprep.subr.bf16.mxu0 %v3582_v9  ;;  %v9650_v47 = vpop.eup %6314 }
 0x890   :  { %5718 = vmatpush3.bf16.msra.mxu0 %v3582_v9  ;;  %5750 = vmatpush3.bf16.msra.mxu1 %v3711_v44  ;;  %v3698_v31 = vpack.c.bf16 %v2782_v48, %v2780_v36  ;;  %v9655_v17 = vpop.eup %6316 }
 0x891   :  { %5751 = vmatprep.subr.bf16.mxu1 %v9607_v41  ;;  %v9659_v23 = vpop.eup %6318 }
 0x892   :  { %v3584_v59 = vpop.permute.xlu1 %3583  ;;  %5761 = vmatprep.mubr.bf16.mxu1 %v3698_v31  ;;  %v9662_v24 = vpop.eup %6320  ;;  %v11565_v31 = vld [vmem:[#allocation138_spill] sm:$0xff] }
 0x893   :  { %2517 = vadd.xlane.f32.xlu1 %v9650_v47  ;;  %5719 = vmatprep.subr.bf16.mxu0 %v3584_v59 }
 0x894   :  { %5720 = vmatpush3.bf16.msra.mxu0 %v3584_v59  ;;  %5752 = vmatpush3.bf16.msra.mxu1 %v9607_v41  ;;  %v11559_v41 = vld [vmem:[#allocation144_spill] sm:$0xff] }
 0x895   :  { %5753 = vmatprep.subr.bf16.mxu1 %v9614_v16 }
 0x896   :  { %v3586_v44 = vpop.permute.xlu1 %3585 }
 0x897   :  { %2521 = vadd.xlane.f32.xlu1 %v9655_v17  ;;  %5721 = vmatprep.subr.bf16.mxu0 %v3586_v44 }
 0x898   :  { %5722 = vmatpush3.bf16.msra.mxu0 %v3586_v44  ;;  %5754 = vmatpush3.bf16.msra.mxu1 %v9614_v16 }
 0x899   :  { %5723 = vmatprep.subr.bf16.mxu0 %v3588_v60 }
 0x89b   :  { %2549 = vadd.xlane.f32.xlu1 %v9659_v23 }
 0x89c   :  { %5724 = vmatpush3.bf16.msra.mxu0 %v3588_v60 }
 0x89f   :  { %2553 = vadd.xlane.f32.xlu1 %v9662_v24 }
 0x8b0   :  { %3845 = vrot.lane.b32.xlu1 %v11559_v41, %s6548_s20  ;;  %v11566_v41 = vld [vmem:[#allocation44_spill] sm:$0xff] }
 0x8b4   :  { %3907 = vrot.lane.b32.xlu1 %v11560_v0, %s6549_s21 }
 0x8b8   :  { %3971 = vrot.lane.b32.xlu1 %v9451_v40, %s6550_s22  ;;  %v6323_v40 = vpop.eup %6322 }
 0x8b9   :  { %v6325_v20 = vpop.eup %6324  ;;  %v2752_v9 = vmul.f32 %v6323_v40, %v11563_v49 }
 0x8ba   :  { %v6327_v54 = vpop.eup %6326  ;;  %v2784_v36 = vmul.f32 %v6325_v20, %v11564_v46 }
 0x8bb   :  { %v6329_v34 = vpop.eup %6328  ;;  %v2754_v63 = vmul.f32 %v6327_v54, %v11561_v33  ;;  %v11567_v54 = vld [vmem:[#allocation68_spill] sm:$0xff] }
 0x8bc   :  { %v2786_v38 = vmul.f32 %v6329_v34, %v11562_v26 }
 0x8be   :  { %v3699_v60 = vpack.c.bf16 %v2786_v38, %v2784_v36 }
 0x8c7   :  { %v2500_v16 = vpop.xlane.xlu1 %2499 }
 0x8c8   :  { %6330 = vrcp.f32 %v2500_v16 }
 0x8cb   :  { %v2506_v13 = vpop.xlane.xlu1 %2505 }
 0x8cf   :  { %v2534_v52 = vpop.xlane.xlu1 %2533 }
 0x8d0   :  { %6332 = vrcp.f32 %v2534_v52 }
 0x8d1   :  { %6334 = vrcp.f32 %v9620_v6  ;;  %v3721_v6 = vpop.permute.xlu0 %3720 }
 0x8d2   :  { %6336 = vrcp.f32 %v2532_v35  ;;  %v6331_v22 = vpop.eup %6330 }
 0x8d3   :  { %v2538_v5 = vpop.xlane.xlu1 %2537  ;;  %6338 = vrcp.f32 %v2506_v13 }
 0x8d4   :  { %6340 = vrcp.f32 %v2538_v5 }
 0x8d5   :  { %6342 = vrcp.f32 %v9630_v57  ;;  %v2756_v57 = vmul.f32 %v6331_v22, %v9544_v21  ;;  %v3570_v21 = vpack.c.bf16 %v2754_v63, %v2752_v9 }
 0x8d6   :  { %6344 = vrcp.f32 %v2536_v61 }
 0x8d7   :  { %v3717_v43 = vpop.permute.xlu1 %3716 }
 0x8d8   :  { %5755 = vmatprep.subr.bf16.mxu1 %v3717_v43 }
 0x8d9   :  { %5756 = vmatpush3.bf16.msra.mxu1 %v3717_v43 }
 0x8da   :  { %5757 = vmatprep.subr.bf16.mxu1 %v3719_v12  ;;  %v6333_v7 = vpop.eup %6332 }
 0x8db   :  { %v3590_v50 = vpop.permute.xlu1 %3589  ;;  %v6335_v19 = vpop.eup %6334  ;;  %v2790_v48 = vmul.f32 %v6333_v7, %v9552_v8 }
 0x8dc   :  { %5725 = vmatprep.subr.bf16.mxu0 %v3590_v50  ;;  %v6337_v14 = vpop.eup %6336  ;;  %v2758_v61 = vmul.f32 %v6335_v19, %v11565_v31 }
 0x8dd   :  { %5726 = vmatpush3.bf16.msra.mxu0 %v3590_v50  ;;  %5758 = vmatpush3.bf16.msra.mxu1 %v3719_v12  ;;  %v6339_v59 = vpop.eup %6338  ;;  %v2788_v0 = vmul.f32 %v6337_v14, %v11566_v41  ;;  %v11568_v50 = vld [vmem:[#allocation158_spill] sm:$0xff]  ;;  %v2510_v14 = vpop.xlane.xlu0 %2509 }
 0x8de   :  { %5759 = vmatprep.subr.bf16.mxu1 %v3721_v6  ;;  %v6341_v16 = vpop.eup %6340  ;;  %v3571_v52 = vpack.c.bf16 %v2758_v61, %v2756_v57  ;;  %v2762_v43 = vmul.f32 %v6339_v59, %v9550_v15  ;;  %6346 = vrcp.f32 %v2510_v14 }
 0x8df   :  { %v3592_v35 = vpop.permute.xlu1 %3591  ;;  %v6343_v5 = vpop.eup %6342  ;;  %v3700_v8 = vpack.c.bf16 %v2790_v48, %v2788_v0  ;;  %v2794_v40 = vmul.f32 %v6341_v16, %v9565_v18 }
 0x8e0   :  { %v9682_v45 = vpop.f32.mrb[48].mxu0  ;;  %5727 = vmatprep.subr.bf16.mxu0 %v3592_v35  ;;  %v6345_v12 = vpop.eup %6344  ;;  %v2760_v34 = vmul.f32 %v6343_v5, %v11567_v54 }
 0x8e1   :  { %v3377_v58 = vpop.f32.mrb[49].mxu0  ;;  %5728 = vmatpush3.bf16.msra.mxu0 %v3592_v35  ;;  %5760 = vmatpush3.bf16.msra.mxu1 %v3721_v6  ;;  %v2792_v22 = vmul.f32 %v6345_v12, %v11568_v50  ;;  %v2512_v35 = vpop.xlane.xlu0 %2511 }
 0x8e2   :  { %4035 = vrot.lane.b32.xlu1 %v3377_v58, %s6551_s2  ;;  %v9687_v44 = vpop.f32.mrb[50].mxu0  ;;  %v3572_v19 = vpack.c.bf16 %v2762_v43, %v2760_v34 }
 0x8e3   :  { %v3380_v13 = vpop.f32.mrb[51].mxu0  ;;  %v3701_v33 = vpack.c.bf16 %v2794_v40, %v2792_v22 }
 0x8e4   :  { %5730 = vmatmul.mubr.bf16.vlgmr.msra.gmra.mrb[64].mxu0 %v3570_v21  ;;  %5762 = vmatmul.mubr.bf16.vlgmr.msra.gmra.mrb[56].mxu1 %v3699_v60 }
 0x8e5   :  { %4037 = vrot.lane.b32.xlu0 %v3380_v13, %s6551_s2  ;;  %5733 = vmatprep.mubr.bf16.mxu0 %v3571_v52  ;;  %v2540_v57 = vpop.xlane.xlu0 %2539 }
 0x8e6   :  { %5765 = vmatprep.mubr.bf16.mxu1 %v3700_v8 }
 0x8e8   :  { %v9693_v20 = vpop.f32.mrb[52].mxu0  ;;  %v6347_v58 = vpop.eup %6346 }
 0x8e9   :  { %v9697_v7 = vpop.f32.mrb[53].mxu0  ;;  %v2544_v49 = vpop.xlane.xlu0 %2543  ;;  %v2766_v41 = vmul.f32 %v6347_v58, %v9481_v1 }
 0x8ea   :  { %v9699_v6 = vpop.f32.mrb[54].mxu0 }
 0x8eb   :  { %v9701_v63 = vpop.f32.mrb[55].mxu0 }
 0x8ec   :  { %5734 = vmatmul.mubr.bf16.gmra.mrb[68].mxu0 %v3572_v19  ;;  %5766 = vmatmul.mubr.bf16.gmra.mrb[60].mxu1 %v3701_v33 }
 0x8ed   :  { %v2516_v36 = vpop.xlane.xlu0 %2515 }
 0x8f0   :  { %v9703_v26 = vpop.f32.mrb[56].mxu0 }
 0x8f1   :  { %v9705_v15 = vpop.f32.mrb[57].mxu0  ;;  %v2520_v61 = vpop.xlane.xlu0 %2519 }
 0x8f2   :  { %v9707_v18 = vpop.f32.mrb[58].mxu0 }
 0x8f3   :  { %v9709_v38 = vpop.f32.mrb[59].mxu0 }
 0x8f5   :  { %v2548_v22 = vpop.xlane.xlu0 %2547 }
 0x910   :  { %v2508_v9 = vpop.xlane.xlu1 %2507 }
 0x911   :  { %6348 = vrcp.f32 %v2508_v9 }
 0x912   :  { %6350 = vrcp.f32 %v2512_v35 }
 0x914   :  { %v2514_v46 = vpop.xlane.xlu1 %2513 }
 0x915   :  { %6352 = vrcp.f32 %v2514_v46 }
 0x916   :  { %6354 = vrcp.f32 %v2540_v57 }
 0x918   :  { %v2542_v48 = vpop.xlane.xlu1 %2541 }
 0x919   :  { %6356 = vrcp.f32 %v2542_v48 }
 0x91a   :  { %6358 = vrcp.f32 %v2544_v49 }
 0x91b   :  { %v6349_v31 = vpop.eup %6348 }
 0x91c   :  { %v2546_v59 = vpop.xlane.xlu1 %2545  ;;  %v9711_v21 = vpop.f32.mrb[60].mxu0  ;;  %v2764_v60 = vmul.f32 %v6349_v31, %v9623_v2 }
 0x91d   :  { %v6351_v0 = vpop.eup %6350  ;;  %6360 = vrcp.f32 %v2546_v59  ;;  %v9715_v16 = vpop.f32.mrb[61].mxu0 }
 0x91e   :  { %v9717_v13 = vpop.f32.mrb[40].mxu1  ;;  %v9719_v52 = vpop.f32.mrb[62].mxu0  ;;  %v3573_v8 = vpack.c.bf16 %v2766_v41, %v2764_v60  ;;  %6362 = vrcp.f32 %v2516_v36  ;;  %v2768_v54 = vmul.f32 %v6351_v0, %v9488_v56 }
 0x91f   :  { %v3506_v5 = vpop.f32.mrb[41].mxu1  ;;  %v6353_v12 = vpop.eup %6352 }
 0x920   :  { %v9721_v43 = vpop.f32.mrb[42].mxu1  ;;  %4099 = vrot.lane.b32.xlu1 %v3506_v5, %s6552_s23  ;;  %v9724_v2 = vpop.f32.mrb[63].mxu0  ;;  %5737 = vmatprep.mubr.bf16.mxu0 %v3573_v8  ;;  %v2770_v34 = vmul.f32 %v6353_v12, %v9628_v10 }
 0x921   :  { %v2518_v1 = vpop.xlane.xlu1 %2517  ;;  %v3509_v40 = vpop.f32.mrb[43].mxu1 }
 0x922   :  { %v6355_v50 = vpop.eup %6354  ;;  %6364 = vrcp.f32 %v2518_v1  ;;  %4101 = vrot.lane.b32.xlu0 %v3509_v40, %s6552_s23  ;;  %v3574_v19 = vpack.c.bf16 %v2770_v34, %v2768_v54  ;;  %v2552_v36 = vpop.xlane.xlu0 %2551 }
 0x923   :  { %v6357_v33 = vpop.eup %6356  ;;  %6366 = vrcp.f32 %v2520_v61  ;;  %v2796_v35 = vmul.f32 %v6355_v50, %v9499_v37 }
 0x924   :  { %5738 = vmatmul.mubr.bf16.gmra.mrb[72].mxu0 %v3574_v19  ;;  %v2798_v57 = vmul.f32 %v6357_v33, %v9639_v39  ;;  %v6359_v49 = vpop.eup %6358 }
 0x925   :  { %v2522_v14 = vpop.xlane.xlu1 %2521  ;;  %v9731_v9 = vpop.f32.mrb[44].mxu1  ;;  %v2800_v37 = vmul.f32 %v6359_v49, %v9506_v25 }
 0x926   :  { %6368 = vrcp.f32 %v2522_v14  ;;  %v9733_v56 = vpop.f32.mrb[45].mxu1  ;;  %v3702_v10 = vpack.c.bf16 %v2798_v57, %v2796_v35  ;;  %v11569_v57 = vmov 0.0  }
 0x927   :  { %v6361_v46 = vpop.eup %6360  ;;  %6370 = vrcp.f32 %v2548_v22  ;;  %v9735_v48 = vpop.f32.mrb[46].mxu1 }
 0x928   :  { %v9737_v31 = vpop.f32.mrb[47].mxu1  ;;  %5769 = vmatprep.mubr.bf16.mxu1 %v3702_v10  ;;  %v2802_v39 = vmul.f32 %v6361_v46, %v9644_v62  ;;  %v6363_v61 = vpop.eup %6362 }
 0x929   :  { %v2550_v58 = vpop.xlane.xlu1 %2549  ;;  %v2772_v0 = vmul.f32 %v6363_v61, %v9519_v42 }
 0x92a   :  { %6372 = vrcp.f32 %v2550_v58  ;;  %v3703_v59 = vpack.c.bf16 %v2802_v39, %v2800_v37 }
 0x92b   :  { %6374 = vrcp.f32 %v2552_v36 }
 0x92c   :  { %v6365_v60 = vpop.eup %6364  ;;  %5770 = vmatmul.mubr.bf16.gmra.mrb[64].mxu1 %v3703_v59 }
 0x92d   :  { %v2554_v41 = vpop.xlane.xlu1 %2553  ;;  %v2774_v5 = vmul.f32 %v6365_v60, %v9650_v47  ;;  %v6367_v8 = vpop.eup %6366 }
 0x92e   :  { %6376 = vrcp.f32 %v2554_v41  ;;  %v9743_v12 = vpop.f32.mrb[48].mxu1  ;;  %v2776_v34 = vmul.f32 %v6367_v8, %v9524_v55 }
 0x92f   :  { %v9745_v1 = vpop.f32.mrb[49].mxu1  ;;  %v3575_v25 = vpack.c.bf16 %v2774_v5, %v2772_v0 }
 0x930   :  { %v6369_v40 = vpop.eup %6368  ;;  %v9747_v62 = vpop.f32.mrb[50].mxu1 }
 0x931   :  { %v9749_v54 = vpop.f32.mrb[51].mxu1  ;;  %5741 = vmatprep.mubr.bf16.mxu0 %v3575_v25  ;;  %v2778_v50 = vmul.f32 %v6369_v40, %v9655_v17  ;;  %v6371_v42 = vpop.eup %6370  ;;  %v11571_v40 = vld [vmem:[#allocation91_spill] sm:$0xff] }
 0x932   :  { %v2804_v19 = vmul.f32 %v6371_v42, %v9529_v51 }
 0x933   :  { %v3576_v22 = vpack.c.bf16 %v2778_v50, %v2776_v34 }
 0x934   :  { %v6373_v47 = vpop.eup %6372 }
 0x935   :  { %5742 = vmatmul.mubr.bf16.gmra.mrb[76].mxu0 %v3576_v22  ;;  %v2806_v33 = vmul.f32 %v6373_v47, %v9659_v23  ;;  %v6375_v14 = vpop.eup %6374  ;;  %v9755_v35 = vpop.f32.mrb[52].mxu1  ;;  %v11572_v22 = vld [vmem:[#allocation15_spill] sm:$0xff]  ;;  %v11573_v47 = vld [vmem:[#allocation20_spill] sm:$0xff] }
 0x936   :  { %5809 = vmatprep.mubr.msk.f32.mxu0 %vm11570_vm6, %v11569_v57  ;;  %v9759_v49 = vpop.f32.mrb[53].mxu1  ;;  %v2808_v36 = vmul.f32 %v6375_v14, %v9539_v3  ;;  %v11582_v14 = vld [vmem:[#allocation26_spill] sm:$0xff]  ;;  %vm4308_vm6 = vcmask 195584  }
 0x937   :  { %v3704_v10 = vpack.c.bf16 %v2806_v33, %v2804_v19  ;;  %v9761_v46 = vpop.f32.mrb[54].mxu1  ;;  %v11574_v19 = vld [vmem:[#allocation29_spill] sm:$0xff]  ;;  %v6555_v33 = vmov 0.0|0.0  }
 0x938   :  { %v6377_v55 = vpop.eup %6376  ;;  %v9763_v17 = vpop.f32.mrb[55].mxu1  ;;  %5812 = vmatprep.subr.bf16.mxu0 %v6555_v33 }
 0x939   :  { %5773 = vmatprep.mubr.bf16.mxu1 %v3704_v10  ;;  %v2810_v51 = vmul.f32 %v6377_v55, %v9662_v24 }
 0x93b   :  { %v3705_v23 = vpack.c.bf16 %v2810_v51, %v2808_v36 }
 0x93d   :  { %5774 = vmatmul.mubr.bf16.gmra.mrb[68].mxu1 %v3705_v23 }
 0x9b7   :  { %v5731_v58 = vpop.f32.mrb[64].mxu0  ;;  %v5763_v37 = vpop.f32.mrb[56].mxu1 }
 0x9b8   :  { %v3635_v39 = vpop.f32.mrb[65].mxu0  ;;  %v3764_v61 = vpop.f32.mrb[57].mxu1 }
 0x9b9   :  { %v5764_v59 = vpop.f32.mrb[58].mxu1  ;;  %4163 = vrot.lane.b32.xlu1 %v3635_v39, %s6553_s24  ;;  %v5732_v60 = vpop.f32.mrb[66].mxu0  ;;  %v11584_v39 = vld [vmem:[#allocation137_spill] sm:$0xff] }
 0x9ba   :  { %v3638_v41 = vpop.f32.mrb[67].mxu0  ;;  %v3767_v0 = vpop.f32.mrb[59].mxu1 }
 0x9bb   :  { %4165 = vrot.lane.b32.xlu0 %v3638_v41, %s6553_s24  ;;  %v11586_v41 = vld [vmem:[#allocation110_spill] sm:$0xff] }
 0x9bd   :  { %4227 = vrot.lane.b32.xlu1 %v3764_v61, %s6554_s0 }
 0x9bf   :  { %v9770_v3 = vpop.f32.mrb[60].mxu1  ;;  %4229 = vrot.lane.b32.xlu0 %v3767_v0, %s6554_s0  ;;  %v5735_v24 = vpop.f32.mrb[68].mxu0 }
 0x9c0   :  { %v3651_v5 = vpop.f32.mrb[69].mxu0  ;;  %v3780_v8 = vpop.f32.mrb[61].mxu1 }
 0x9c1   :  { %v9773_v25 = vpop.f32.mrb[62].mxu1  ;;  %3847 = vrot.lane.b32.xlu1 %v11571_v40, %s6548_s20  ;;  %v5736_v34 = vpop.f32.mrb[70].mxu0 }
 0x9c2   :  { %v3654_v50 = vpop.f32.mrb[71].mxu0  ;;  %v3783_v42 = vpop.f32.mrb[63].mxu1 }
 0x9c3   :  { %3849 = vrot.lane.b32.xlu0 %v11572_v22, %s6548_s20 }
 0x9c5   :  { %3911 = vrot.lane.b32.xlu1 %v11573_v47, %s6549_s21 }
 0x9c7   :  { %3913 = vrot.lane.b32.xlu0 %v11574_v19, %s6549_s21  ;;  %v9910_v19 = vld [vmem:[%s10610_s5] ss:$0 sm:$0xff] }
 0x9c9   :  { %3975 = vrot.lane.b32.xlu1 %v9447_v28, %s6550_s22  ;;  %v11575_v28 = vld [vmem:[#allocation109_spill] sm:$0xff] }
 0x9cb   :  { %3977 = vrot.lane.b32.xlu0 %v9453_v32, %s6550_s22  ;;  %v11576_v32 = vld [vmem:[#allocation149_spill] sm:$0xff] }
 0x9cd   :  { %4039 = vrot.lane.b32.xlu1 %v9682_v45, %s6551_s2  ;;  %v11577_v45 = vld [vmem:[#allocation106_spill] sm:$0xff] }
 0x9cf   :  { %4041 = vrot.lane.b32.xlu0 %v9687_v44, %s6551_s2  ;;  %v11578_v44 = vld [vmem:[#allocation108_spill] sm:$0xff] }
 0x9d1   :  { %4103 = vrot.lane.b32.xlu1 %v9717_v13, %s6552_s23 }
 0x9d3   :  { %4105 = vrot.lane.b32.xlu0 %v9721_v43, %s6552_s23  ;;  %v11580_v43 = vld [vmem:[#allocation24_spill] sm:$0xff] }
 0x9d5   :  { %4167 = vrot.lane.b32.xlu1 %v5731_v58, %s6553_s24  ;;  %v3846_v58 = vpop.permute.xlu1 %3845 }
 0x9d7   :  { %4169 = vrot.lane.b32.xlu0 %v5732_v60, %s6553_s24 }
 0x9d9   :  { %4231 = vrot.lane.b32.xlu1 %v5763_v37, %s6554_s0  ;;  %v11583_v37 = vld [vmem:[#allocation96_spill] sm:$0xff]  ;;  %v3908_v61 = vpop.permute.xlu1 %3907 }
 0x9db   :  { %4233 = vrot.lane.b32.xlu0 %v5764_v59, %s6554_s0  ;;  %v11585_v59 = vld [vmem:[#allocation147_spill] sm:$0xff] }
 0x9dd   :  { %3851 = vrot.lane.b32.xlu1 %v11575_v28, %s6548_s20  ;;  %v3972_v0 = vpop.permute.xlu1 %3971 }
 0x9df   :  { %3853 = vrot.lane.b32.xlu0 %v11576_v32, %s6548_s20 }
 0x9e1   :  { %3915 = vrot.lane.b32.xlu1 %v11577_v45, %s6549_s21 }
 0x9e3   :  { %3917 = vrot.lane.b32.xlu0 %v11578_v44, %s6549_s21 }
 0x9e5   :  { %3979 = vrot.lane.b32.xlu1 %v9471_v30, %s6550_s22 }
 0x9e7   :  { %3981 = vrot.lane.b32.xlu0 %v9478_v53, %s6550_s22 }
 0x9e9   :  { %4043 = vrot.lane.b32.xlu1 %v9697_v7, %s6551_s2  ;;  %v11579_v7 = vld [vmem:[#allocation163_spill] sm:$0xff] }
 0x9eb   :  { %4045 = vrot.lane.b32.xlu0 %v9701_v63, %s6551_s2 }
 0x9ed   :  { %4107 = vrot.lane.b32.xlu1 %v9733_v56, %s6552_s23  ;;  %v11581_v56 = vld [vmem:[#allocation161_spill] sm:$0xff] }
 0x9ef   :  { %4109 = vrot.lane.b32.xlu0 %v9737_v31, %s6552_s23 }
 0x9f1   :  { %4171 = vrot.lane.b32.xlu1 %v3651_v5, %s6553_s24 }
 0x9f3   :  { %4173 = vrot.lane.b32.xlu0 %v3654_v50, %s6553_s24 }
 0x9f5   :  { %4235 = vrot.lane.b32.xlu1 %v3780_v8, %s6554_s0 }
 0x9f7   :  { %4237 = vrot.lane.b32.xlu0 %v3783_v42, %s6554_s0  ;;  %v9824_v30 = vpop.f32.mrb[72].mxu0 }
 0x9f8   :  { %v3667_v53 = vpop.f32.mrb[73].mxu0 }
 0x9f9   :  { %3855 = vrot.lane.b32.xlu1 %v11579_v7, %s6548_s20  ;;  %v9828_v63 = vpop.f32.mrb[74].mxu0 }
 0x9fa   :  { %v3670_v13 = vpop.f32.mrb[75].mxu0 }
 0x9fb   :  { %3857 = vrot.lane.b32.xlu0 %v11580_v43, %s6548_s20 }
 0x9fd   :  { %3919 = vrot.lane.b32.xlu1 %v11581_v56, %s6549_s21  ;;  %v11591_v56 = vld [vmem:[#allocation21_spill] sm:$0xff] }
 0x9ff   :  { %v9834_v31 = vpop.f32.mrb[64].mxu1  ;;  %3921 = vrot.lane.b32.xlu0 %v11582_v14, %s6549_s21 }
 0xa00   :  { %v3796_v57 = vpop.f32.mrb[65].mxu1 }
 0xa01   :  { %v9838_v10 = vpop.f32.mrb[66].mxu1  ;;  %3983 = vrot.lane.b32.xlu1 %v9467_v4, %s6550_s22 }
 0xa02   :  { %v3799_v55 = vpop.f32.mrb[67].mxu1 }
 0xa03   :  { %3985 = vrot.lane.b32.xlu0 %v9473_v11, %s6550_s22 }
 0xa05   :  { %4047 = vrot.lane.b32.xlu1 %v9693_v20, %s6551_s2 }
 0xa07   :  { %4049 = vrot.lane.b32.xlu0 %v9699_v6, %s6551_s2 }
 0xa08   :  { %v9848_v36 = vpop.f32.mrb[76].mxu0 }
 0xa09   :  { %v9850_v51 = vpop.f32.mrb[77].mxu0  ;;  %4111 = vrot.lane.b32.xlu1 %v9731_v9, %s6552_s23 }
 0xa0a   :  { %v9854_v23 = vpop.f32.mrb[78].mxu0 }
 0xa0b   :  { %v9856_v4 = vpop.f32.mrb[79].mxu0  ;;  %4113 = vrot.lane.b32.xlu0 %v9735_v48, %s6552_s23  ;;  %v3844_v48 = vpop.permute.xlu0 %3843 }
 0xa0d   :  { %4175 = vrot.lane.b32.xlu1 %v5735_v24, %s6553_s24  ;;  %v4036_v24 = vpop.permute.xlu1 %4035 }
 0xa0f   :  { %4177 = vrot.lane.b32.xlu0 %v5736_v34, %s6553_s24  ;;  %v3910_v60 = vpop.permute.xlu0 %3909 }
 0xa10   :  { %v9861_v11 = vpop.f32.mrb[68].mxu1 }
 0xa11   :  { %v9864_v20 = vpop.f32.mrb[69].mxu1  ;;  %4239 = vrot.lane.b32.xlu1 %v9770_v3, %s6554_s0  ;;  %v4100_v8 = vpop.permute.xlu1 %4099 }
 0xa12   :  { %v9866_v6 = vpop.f32.mrb[70].mxu1 }
 0xa13   :  { %v9870_v9 = vpop.f32.mrb[71].mxu1  ;;  %4241 = vrot.lane.b32.xlu0 %v9773_v25, %s6554_s0  ;;  %v3974_v3 = vpop.permute.xlu0 %3973 }
 0xa15   :  { %3859 = vrot.lane.b32.xlu1 %v11583_v37, %s6548_s20 }
 0xa17   :  { %3861 = vrot.lane.b32.xlu0 %v11584_v39, %s6548_s20  ;;  %v4038_v5 = vpop.permute.xlu0 %4037 }
 0xa19   :  { %3923 = vrot.lane.b32.xlu1 %v11585_v59, %s6549_s21  ;;  %v11593_v59 = vld [vmem:[#allocation33_spill] sm:$0xff] }
 0xa1b   :  { %3925 = vrot.lane.b32.xlu0 %v11586_v41, %s6549_s21  ;;  %v4102_v25 = vpop.permute.xlu0 %4101 }
 0xa1d   :  { %3987 = vrot.lane.b32.xlu1 %v9490_v29, %s6550_s22  ;;  %v11587_v29 = vld [vmem:[#allocation127_spill] sm:$0xff] }
 0xa1f   :  { %3989 = vrot.lane.b32.xlu0 %v9497_v27, %s6550_s22  ;;  %v4276_v27 = vsel %vm11588_vm14, %v11587_v29, %v3846_v58  ;;  %vm4376_vm14 = vcmask 457728  }
 0xa21   :  { %4051 = vrot.lane.b32.xlu1 %v9705_v15, %s6551_s2  ;;  %v11589_v15 = vld [vmem:[#allocation17_spill] sm:$0xff] }
 0xa22   :  { %v4275_v40 = vsel %vm11590_vm1, %v11589_v15, %v3844_v48 }
 0xa23   :  { %4053 = vrot.lane.b32.xlu0 %v9709_v38, %s6551_s2  ;;  %v4293_v38 = vsel %vm4291_vm4, %v4276_v27, %v3910_v60  ;;  %v4292_v34 = vsel %vm4291_vm4, %v4275_v40, %v3908_v61 }
 0xa24   :  { %v4310_v22 = vsel %vm4308_vm6, %v4293_v38, %v3974_v3 }
 0xa25   :  { %4115 = vrot.lane.b32.xlu1 %v9745_v1, %s6552_s23  ;;  %v4327_v28 = vsel %vm4325_vm5, %v4310_v22, %v4038_v5 }
 0xa26   :  { %v4344_v44 = vsel %vm4342_vm7, %v4327_v28, %v4102_v25 }
 0xa27   :  { %4117 = vrot.lane.b32.xlu0 %v9749_v54, %s6552_s23  ;;  %v4309_v54 = vsel %vm4308_vm6, %v4292_v34, %v3972_v0  ;;  %v11594_v0 = vld [vmem:[#allocation52_spill] sm:$0xff] }
 0xa28   :  { %v4326_v50 = vsel %vm4325_vm5, %v4309_v54, %v4036_v24  ;;  %v11595_v24 = vld [vmem:[#allocation113_spill] sm:$0xff] }
 0xa29   :  { %4179 = vrot.lane.b32.xlu1 %v3667_v53, %s6553_s24  ;;  %v4343_v47 = vsel %vm4342_vm7, %v4326_v50, %v4100_v8  ;;  %v11596_v8 = vld [vmem:[#allocation93_spill] sm:$0xff]  ;;  %v11597_v50 = vld [vmem:[#allocation135_spill] sm:$0xff] }
 0xa2b   :  { %v4164_v1 = vpop.permute.xlu1 %4163  ;;  %4181 = vrot.lane.b32.xlu0 %v3670_v13, %s6553_s24 }
 0xa2c   :  { %v4360_v32 = vsel %vm4359_vm11, %v4343_v47, %v4164_v1 }
 0xa2d   :  { %v4166_v42 = vpop.permute.xlu0 %4165  ;;  %4243 = vrot.lane.b32.xlu1 %v3796_v57, %s6554_s0 }
 0xa2e   :  { %v4361_v7 = vsel %vm4359_vm11, %v4344_v44, %v4166_v42 }
 0xa2f   :  { %v4228_v45 = vpop.permute.xlu1 %4227  ;;  %4245 = vrot.lane.b32.xlu0 %v3799_v55, %s6554_s0  ;;  %v11592_v55 = vld [vmem:[#allocation82_spill] sm:$0xff] }
 0xa30   :  { %v4377_v53 = vsel %vm4376_vm14, %v4360_v32, %v4228_v45 }
 0xa31   :  { %v4400_v13 = vadd.f32 %v9910_v19, %v4377_v53  ;;  %v4230_v43 = vpop.permute.xlu0 %4229  ;;  %3863 = vrot.lane.b32.xlu1 %v11591_v56, %s6548_s20 }
 0xa32   :  { %v4378_v14 = vsel %vm4376_vm14, %v4361_v7, %v4230_v43 }
 0xa33   :  { %v4432_v57 = vmin.f32 %v4400_v13, 0.0  ;;  %v4401_v58 = vadd.f32 %v9910_v19, %v4378_v14  ;;  %v3848_v48 = vpop.permute.xlu1 %3847  ;;  %3865 = vrot.lane.b32.xlu0 %v11592_v55, %s6548_s20  ;;  %vm4416_vm1 = vcmp.gt.f32.partialorder %v4400_v13, 0.0  ;;  %v11604_v55 = vld [vmem:[#allocation30_spill] sm:$0xff] }
 0xa35   :  { %v4448_v37 = vmul.f32 1.442695, %v4432_v57  ;;  %v4433_v39 = vmin.f32 %v4401_v58, 0.0  ;;  %v3850_v61 = vpop.permute.xlu0 %3849  ;;  %3927 = vrot.lane.b32.xlu1 %v11593_v59, %s6549_s21  ;;  %vm4417_vm12 = vcmp.gt.f32.partialorder %v4401_v58, 0.0 }
 0xa37   :  { %6378 = vpow2.f32 %v4448_v37  ;;  %v4450_v60 = vmul.f32 1.442695, %v4433_v39  ;;  %v3912_v41 = vpop.permute.xlu1 %3911  ;;  %3929 = vrot.lane.b32.xlu0 %v11594_v0, %s6549_s21 }
 0xa39   :  { %6380 = vpow2.f32 %v4450_v60  ;;  %v3914_v3 = vpop.permute.xlu0 %3913  ;;  %3991 = vrot.lane.b32.xlu1 %v11595_v24, %s6550_s22 }
 0xa3b   :  { %v3976_v5 = vpop.permute.xlu1 %3975  ;;  %3993 = vrot.lane.b32.xlu0 %v11596_v8, %s6550_s22  ;;  %v11607_v8 = vld [vmem:[#allocation168_spill] sm:$0xff] }
 0xa3d   :  { %v3978_v29 = vpop.permute.xlu0 %3977  ;;  %4055 = vrot.lane.b32.xlu1 %v9703_v26, %s6551_s2 }
 0xa3f   :  { %v4040_v27 = vpop.permute.xlu1 %4039  ;;  %4057 = vrot.lane.b32.xlu0 %v9707_v18, %s6551_s2 }
 0xa41   :  { %v6379_v25 = vpop.eup %6378  ;;  %v4042_v15 = vpop.permute.xlu0 %4041  ;;  %4119 = vrot.lane.b32.xlu1 %v9743_v12, %s6552_s23  ;;  %v4277_v12 = vsel %vm11598_vm2, %v11597_v50, %v3848_v48 }
 0xa42   :  { %v5280_v40 = vadd.f32 -1.0, %v6379_v25  ;;  %v4294_v22 = vsel %vm4291_vm4, %v4277_v12, %v3912_v41 }
 0xa43   :  { %v6381_v38 = vpop.eup %6380  ;;  %v4104_v34 = vpop.permute.xlu1 %4103  ;;  %4121 = vrot.lane.b32.xlu0 %v9747_v62, %s6552_s23  ;;  %v4311_v32 = vsel %vm4308_vm6, %v4294_v22, %v3976_v5 }
 0xa44   :  { %v5281_v1 = vadd.f32 -1.0, %v6381_v38  ;;  %v9943_v26 = vsel %vm4416_vm1, %v4400_v13, %v5280_v40  ;;  %v4328_v44 = vsel %vm4325_vm5, %v4311_v32, %v4040_v27  ;;  %v11608_v27 = vld [vmem:[#allocation41_spill] sm:$0xff] }
 0xa45   :  { %v4106_v54 = vpop.permute.xlu0 %4105  ;;  %4183 = vrot.lane.b32.xlu1 %v9824_v30, %s6553_s24  ;;  %v11602_v30 = vld [vmem:[#allocation5_spill] sm:$0xff] }
 0xa46   :  { %v9945_v18 = vsel %vm4417_vm12, %v4401_v58, %v5281_v1  ;;  %vm11603_vm12 = vmmov %vm11598_vm2  ;;  %v11612_v32 = vld [vmem:[#allocation129_spill] sm:$0xff] }
 0xa47   :  { %v5813_v62 = vpack.c.bf16 %v9945_v18, %v9943_v26  ;;  %v4168_v47 = vpop.permute.xlu1 %4167  ;;  %4185 = vrot.lane.b32.xlu0 %v9828_v63, %s6553_s24  ;;  %v4278_v28 = vsel %vm11603_vm12, %v11602_v30, %v3850_v61  ;;  %v4345_v63 = vsel %vm4342_vm7, %v4328_v44, %v4104_v34  ;;  %vm11611_vm1 = vmmov %vm11603_vm12 }
 0xa48   :  { %v4295_v45 = vsel %vm4291_vm4, %v4278_v28, %v3914_v3  ;;  %v4362_v43 = vsel %vm4359_vm11, %v4345_v63, %v4168_v47  ;;  %v11606_v3 = vld [vmem:[#allocation50_spill] sm:$0xff]  ;;  %vm11613_vm12 = vmmov %vm11611_vm1 }
 0xa49   :  { %5815 = vmatpush3.bf16.xpose.msk.msra.mxu0 %vm9951_vm3, %v5813_v62  ;;  %v4170_v53 = vpop.permute.xlu0 %4169  ;;  %4247 = vrot.lane.b32.xlu1 %v9834_v31, %s6554_s0  ;;  %v4312_v7 = vsel %vm4308_vm6, %v4295_v45, %v3978_v29  ;;  %v11610_v47 = vld [vmem:[#allocation126_spill] sm:$0xff] }
 0xa4a   :  { %5816 = vmatprep.subr.bf16.mxu0 %v6555_v33  ;;  %v4329_v13 = vsel %vm4325_vm5, %v4312_v7, %v4042_v15  ;;  %v11609_v15 = vld [vmem:[#allocation97_spill] sm:$0xff] }
 0xa4b   :  { %v4232_v56 = vpop.permute.xlu1 %4231  ;;  %4249 = vrot.lane.b32.xlu0 %v9838_v10, %s6554_s0  ;;  %v4346_v14 = vsel %vm4342_vm7, %v4329_v13, %v4106_v54  ;;  %v11605_v10 = vld [vmem:[#allocation131_spill] sm:$0xff] }
 0xa4c   :  { %v4379_v57 = vsel %vm4376_vm14, %v4362_v43, %v4232_v56  ;;  %v4363_v31 = vsel %vm4359_vm11, %v4346_v14, %v4170_v53 }
 0xa4d   :  { %v4402_v58 = vadd.f32 %v9910_v19, %v4379_v57  ;;  %v4234_v48 = vpop.permute.xlu0 %4233  ;;  %3867 = vrot.lane.b32.xlu1 %v11604_v55, %s6548_s20 }
 0xa4e   :  { %v4380_v37 = vsel %vm4376_vm14, %v4363_v31, %v4234_v48  ;;  %v11614_v48 = vld [vmem:[#allocation40_spill] sm:$0xff] }
 0xa4f   :  { %v4434_v39 = vmin.f32 %v4402_v58, 0.0  ;;  %v4403_v61 = vadd.f32 %v9910_v19, %v4380_v37  ;;  %v3852_v59 = vpop.permute.xlu1 %3851  ;;  %3869 = vrot.lane.b32.xlu0 %v11605_v10, %s6548_s20  ;;  %vm4418_vm10 = vcmp.gt.f32.partialorder %v4402_v58, 0.0 }
 0xa51   :  { %v4452_v60 = vmul.f32 1.442695, %v4434_v39  ;;  %v4435_v41 = vmin.f32 %v4403_v61, 0.0  ;;  %v3854_v0 = vpop.permute.xlu0 %3853  ;;  %3931 = vrot.lane.b32.xlu1 %v11606_v3, %s6549_s21  ;;  %vm4419_vm2 = vcmp.gt.f32.partialorder %v4403_v61, 0.0 }
 0xa52   :  { %v4280_v45 = vsel %vm11613_vm12, %v11612_v32, %v3854_v0  ;;  %vm11622_vm12 = vmmov %vm11611_vm1 }
 0xa53   :  { %6382 = vpow2.f32 %v4452_v60  ;;  %v4454_v24 = vmul.f32 1.442695, %v4435_v41  ;;  %v3916_v5 = vpop.permute.xlu1 %3915  ;;  %3933 = vrot.lane.b32.xlu0 %v11607_v8, %s6549_s21  ;;  %v11616_v41 = vld [vmem:[#allocation120_spill] sm:$0xff] }
 0xa54   :  { %v11618_v8 = vld [vmem:[#allocation8_spill] sm:$0xff] }
 0xa55   :  { %6384 = vpow2.f32 %v4454_v24  ;;  %v3918_v29 = vpop.permute.xlu0 %3917  ;;  %3995 = vrot.lane.b32.xlu1 %v11608_v27, %s6550_s22  ;;  %v11617_v24 = vld [vmem:[#allocation162_spill] sm:$0xff]  ;;  %v11619_v27 = vld [vmem:[#allocation155_spill] sm:$0xff] }
 0xa56   :  { %v4297_v44 = vsel %vm4291_vm4, %v4280_v45, %v3918_v29 }
 0xa57   :  { %v3980_v25 = vpop.permute.xlu1 %3979  ;;  %3997 = vrot.lane.b32.xlu0 %v11609_v15, %s6550_s22 }
 0xa59   :  { %v3982_v40 = vpop.permute.xlu0 %3981  ;;  %4059 = vrot.lane.b32.xlu1 %v9715_v16, %s6551_s2 }
 0xa5a   :  { %v4314_v63 = vsel %vm4308_vm6, %v4297_v44, %v3982_v40 }
 0xa5b   :  { %v4044_v38 = vpop.permute.xlu1 %4043  ;;  %4061 = vrot.lane.b32.xlu0 %v9724_v2, %s6551_s2 }
 0xa5d   :  { %v6383_v34 = vpop.eup %6382  ;;  %v4046_v1 = vpop.permute.xlu0 %4045  ;;  %4123 = vrot.lane.b32.xlu1 %v9759_v49, %s6552_s23  ;;  %v4279_v49 = vsel %vm11611_vm1, %v11610_v47, %v3852_v59 }
 0xa5e   :  { %v5282_v54 = vadd.f32 -1.0, %v6383_v34  ;;  %v4296_v28 = vsel %vm4291_vm4, %v4279_v49, %v3916_v5  ;;  %v4331_v13 = vsel %vm4325_vm5, %v4314_v63, %v4046_v1  ;;  %v11621_v49 = vld [vmem:[#allocation10_spill] sm:$0xff] }
 0xa5f   :  { %v6385_v50 = vpop.eup %6384  ;;  %v4108_v12 = vpop.permute.xlu1 %4107  ;;  %4125 = vrot.lane.b32.xlu0 %v9763_v17, %s6552_s23 }
 0xa60   :  { %v5283_v62 = vadd.f32 -1.0, %v6385_v50  ;;  %v10004_v16 = vsel %vm4418_vm10, %v4402_v58, %v5282_v54 }
 0xa61   :  { %v4110_v22 = vpop.permute.xlu0 %4109  ;;  %4187 = vrot.lane.b32.xlu1 %v9850_v51, %s6553_s24  ;;  %v4313_v51 = vsel %vm4308_vm6, %v4296_v28, %v3980_v25 }
 0xa62   :  { %v10006_v2 = vsel %vm4419_vm2, %v4403_v61, %v5283_v62  ;;  %v4330_v53 = vsel %vm4325_vm5, %v4313_v51, %v4044_v38  ;;  %v4348_v14 = vsel %vm4342_vm7, %v4331_v13, %v4110_v22  ;;  %v11620_v62 = vld [vmem:[#allocation128_spill] sm:$0xff] }
 0xa63   :  { %v5817_v30 = vpack.c.bf16 %v10006_v2, %v10004_v16  ;;  %v4172_v17 = vpop.permute.xlu1 %4171  ;;  %4189 = vrot.lane.b32.xlu0 %v9856_v4, %s6553_s24  ;;  %v4347_v4 = vsel %vm4342_vm7, %v4330_v53, %v4108_v12 }
 0xa64   :  { %v4364_v43 = vsel %vm4359_vm11, %v4347_v4, %v4172_v17 }
 0xa65   :  { %5819 = vmatpush3.bf16.xpose.msk.msra.mxu0 %vm9951_vm3, %v5817_v30  ;;  %v4174_v7 = vpop.permute.xlu0 %4173  ;;  %4251 = vrot.lane.b32.xlu1 %v9864_v20, %s6554_s0 }
 0xa66   :  { %5820 = vmatprep.subr.bf16.mxu0 %v6555_v33  ;;  %v4365_v20 = vsel %vm4359_vm11, %v4348_v14, %v4174_v7 }
 0xa67   :  { %v4236_v56 = vpop.permute.xlu1 %4235  ;;  %4253 = vrot.lane.b32.xlu0 %v9870_v9, %s6554_s0  ;;  %v11615_v9 = vld [vmem:[#allocation139_spill] sm:$0xff] }
 0xa68   :  { %v4381_v57 = vsel %vm4376_vm14, %v4364_v43, %v4236_v56 }
 0xa69   :  { %v4404_v31 = vadd.f32 %v9910_v19, %v4381_v57  ;;  %v4238_v58 = vpop.permute.xlu0 %4237  ;;  %3871 = vrot.lane.b32.xlu1 %v11614_v48, %s6548_s20 }
 0xa6a   :  { %v4382_v55 = vsel %vm4376_vm14, %v4365_v20, %v4238_v58 }
 0xa6b   :  { %v4436_v37 = vmin.f32 %v4404_v31, 0.0  ;;  %v4405_v39 = vadd.f32 %v9910_v19, %v4382_v55  ;;  %v3856_v61 = vpop.permute.xlu1 %3855  ;;  %3873 = vrot.lane.b32.xlu0 %v11615_v9, %s6548_s20  ;;  %vm4420_vm10 = vcmp.gt.f32.partialorder %v4404_v31, 0.0 }
 0xa6d   :  { %v4456_v59 = vmul.f32 1.442695, %v4436_v37  ;;  %v4437_v10 = vmin.f32 %v4405_v39, 0.0  ;;  %v3858_v60 = vpop.permute.xlu0 %3857  ;;  %3935 = vrot.lane.b32.xlu1 %v11616_v41, %s6549_s21  ;;  %vm4421_vm2 = vcmp.gt.f32.partialorder %v4405_v39, 0.0 }
 0xa6e   :  { %v4282_v30 = vsel %vm11622_vm12, %v11621_v49, %v3858_v60  ;;  %vm11626_vm12 = vmmov %vm11611_vm1 }
 0xa6f   :  { %6386 = vpow2.f32 %v4456_v59  ;;  %v4458_v0 = vmul.f32 1.442695, %v4437_v10  ;;  %v3920_v3 = vpop.permute.xlu1 %3919  ;;  %3937 = vrot.lane.b32.xlu0 %v11617_v24, %s6549_s21  ;;  %v15_v10 = vstv %s10611_s7  ;;  %v10098_v24 = vld [vmem:[%s10612_s6] sm:$0x1] }
 0xa70   :  { %16 = vst [vmem:[#allocation2] sm:$0x1] %v15_v10 }
 0xa71   :  { %6388 = vpow2.f32 %v4458_v0  ;;  %v3922_v5 = vpop.permute.xlu0 %3921  ;;  %3999 = vrot.lane.b32.xlu1 %v11618_v8, %s6550_s22 }
 0xa72   :  { %v4299_v28 = vsel %vm4291_vm4, %v4282_v30, %v3922_v5 }
 0xa73   :  { %v3984_v29 = vpop.permute.xlu1 %3983  ;;  %4001 = vrot.lane.b32.xlu0 %v11619_v27, %s6550_s22  ;;  %v11623_v27 = vld [vmem:[#allocation114_spill] sm:$0xff] }
 0xa75   :  { %v3986_v25 = vpop.permute.xlu0 %3985  ;;  %4063 = vrot.lane.b32.xlu1 %v9711_v21, %s6551_s2 }
 0xa76   :  { %v4316_v45 = vsel %vm4308_vm6, %v4299_v28, %v3986_v25 }
 0xa77   :  { %v4048_v15 = vpop.permute.xlu1 %4047  ;;  %4065 = vrot.lane.b32.xlu0 %v9719_v52, %s6551_s2 }
 0xa79   :  { %v6387_v40 = vpop.eup %6386  ;;  %v4050_v38 = vpop.permute.xlu0 %4049  ;;  %4127 = vrot.lane.b32.xlu1 %v9755_v35, %s6552_s23  ;;  %v4281_v35 = vsel %vm11611_vm1, %v11620_v62, %v3856_v61 }
 0xa7a   :  { %v5284_v34 = vadd.f32 -1.0, %v6387_v40  ;;  %v4298_v47 = vsel %vm4291_vm4, %v4281_v35, %v3920_v3  ;;  %v4333_v51 = vsel %vm4325_vm5, %v4316_v45, %v4050_v38 }
 0xa7b   :  { %v6389_v1 = vpop.eup %6388  ;;  %v4112_v54 = vpop.permute.xlu1 %4111  ;;  %4129 = vrot.lane.b32.xlu0 %v9761_v46, %s6552_s23 }
 0xa7c   :  { %v5285_v50 = vadd.f32 -1.0, %v6389_v1  ;;  %v10059_v21 = vsel %vm4420_vm10, %v4404_v31, %v5284_v34  ;;  %v11624_v34 = vld [vmem:[#allocation13_spill] sm:$0xff] }
 0xa7d   :  { %v4114_v12 = vpop.permute.xlu0 %4113  ;;  %4191 = vrot.lane.b32.xlu1 %v9848_v36, %s6553_s24  ;;  %v4315_v36 = vsel %vm4308_vm6, %v4298_v47, %v3984_v29  ;;  %v10105_v1 = vrot.slane %v10098_v24, %v11624_v34 }
 0xa7e   :  { %v10061_v52 = vsel %vm4421_vm2, %v4405_v39, %v5285_v50  ;;  %v4332_v17 = vsel %vm4325_vm5, %v4315_v36, %v4048_v15  ;;  %v4350_v7 = vsel %vm4342_vm7, %v4333_v51, %v4114_v12 }
 0xa7f   :  { %v5821_v22 = vpack.c.bf16 %v10061_v52, %v10059_v21  ;;  %v4176_v46 = vpop.permute.xlu1 %4175  ;;  %4193 = vrot.lane.b32.xlu0 %v9854_v23, %s6553_s24  ;;  %v4349_v23 = vsel %vm4342_vm7, %v4332_v17, %v4112_v54  ;;  %v11625_v54 = vld [vmem:[#allocation157_spill] sm:$0xff]  ;;  %v4520_v47 = vmul.f32 %v10105_v1, %v9945_v18  ;;  %v4519_v45 = vmul.f32 %v10105_v1, %v9943_v26 }
 0xa80   :  { %v4366_v44 = vsel %vm4359_vm11, %v4349_v23, %v4176_v46  ;;  %v4522_v26 = vmul.f32 %v10105_v1, %v10006_v2 }
 0xa81   :  { %5823 = vmatpush3.bf16.xpose.msk.msra.mxu0 %vm9951_vm3, %v5821_v22  ;;  %v4178_v32 = vpop.permute.xlu0 %4177  ;;  %4255 = vrot.lane.b32.xlu1 %v9861_v11, %s6554_s0 }
 0xa82   :  { %5824 = vmatprep.subr.bf16.mxu0 %v6555_v33  ;;  %v4367_v11 = vsel %vm4359_vm11, %v4350_v7, %v4178_v32 }
 0xa83   :  { %v4240_v53 = vpop.permute.xlu1 %4239  ;;  %4257 = vrot.lane.b32.xlu0 %v9866_v6, %s6554_s0 }
 0xa84   :  { %v4383_v63 = vsel %vm4376_vm14, %v4366_v44, %v4240_v53  ;;  %v4521_v53 = vmul.f32 %v10105_v1, %v10004_v16  ;;  %v4523_v16 = vmul.f32 %v10105_v1, %v10059_v21 }
 0xa85   :  { %v4406_v4 = vadd.f32 %v9910_v19, %v4383_v63  ;;  %v4242_v13 = vpop.permute.xlu0 %4241 }
 0xa86   :  { %v4384_v43 = vsel %vm4376_vm14, %v4367_v11, %v4242_v13 }
 0xa87   :  { %v4438_v56 = vmin.f32 %v4406_v4, 0.0  ;;  %v4407_v14 = vadd.f32 %v9910_v19, %v4384_v43  ;;  %v3860_v57 = vpop.permute.xlu1 %3859  ;;  %vm4422_vm10 = vcmp.gt.f32.partialorder %v4406_v4, 0.0 }
 0xa88   :  { %v4283_v25 = vsel %vm11611_vm1, %v11623_v27, %v3860_v57 }
 0xa89   :  { %v4460_v20 = vmul.f32 1.442695, %v4438_v56  ;;  %v4439_v31 = vmin.f32 %v4407_v14, 0.0  ;;  %v3862_v58 = vpop.permute.xlu0 %3861  ;;  %vm4423_vm2 = vcmp.gt.f32.partialorder %v4407_v14, 0.0 }
 0xa8a   :  { %v4284_v50 = vsel %vm11626_vm12, %v11625_v54, %v3862_v58 }
 0xa8b   :  { %6390 = vpow2.f32 %v4460_v20  ;;  %v4462_v6 = vmul.f32 1.442695, %v4439_v31  ;;  %v3924_v48 = vpop.permute.xlu1 %3923 }
 0xa8c   :  { %v4300_v40 = vsel %vm4291_vm4, %v4283_v25, %v3924_v48  ;;  %v6556_v25 = vmov 0  }
 0xa8d   :  { %6392 = vpow2.f32 %v4462_v6  ;;  %v3926_v55 = vpop.permute.xlu0 %3925  ;;  %v4524_v6 = vmul.f32 %v10105_v1, %v10061_v52  ;;  %5865 = vset.pattern.permute.xlu1 %v6556_v25  ;;  %5864 = vset.pattern.permute.xlu0 %v6556_v25 }
 0xa8e   :  { %v4301_v62 = vsel %vm4291_vm4, %v4284_v50, %v3926_v55 }
 0xa8f   :  { %v3988_v37 = vpop.permute.xlu1 %3987 }
 0xa90   :  { %v4317_v12 = vsel %vm4308_vm6, %v4300_v40, %v3988_v37  ;;  %v11634_v40 = vld [vmem:[#allocation65_spill] sm:$0xff] }
 0xa91   :  { %v3990_v39 = vpop.permute.xlu0 %3989 }
 0xa92   :  { %v4318_v46 = vsel %vm4308_vm6, %v4301_v62, %v3990_v39 }
 0xa93   :  { %v4052_v61 = vpop.permute.xlu1 %4051 }
 0xa94   :  { %v4334_v35 = vsel %vm4325_vm5, %v4317_v12, %v4052_v61 }
 0xa95   :  { %v6391_v9 = vpop.eup %6390  ;;  %v4054_v59 = vpop.permute.xlu0 %4053 }
 0xa96   :  { %v5286_v60 = vadd.f32 -1.0, %v6391_v9  ;;  %v4335_v30 = vsel %vm4325_vm5, %v4318_v46, %v4054_v59 }
 0xa97   :  { %v6393_v41 = vpop.eup %6392  ;;  %v4116_v0 = vpop.permute.xlu1 %4115 }
 0xa98   :  { %v5287_v3 = vadd.f32 -1.0, %v6393_v41  ;;  %v4502_v8 = vsel %vm4422_vm10, %v4406_v4, %v5286_v60  ;;  %v4351_v49 = vsel %vm4342_vm7, %v4334_v35, %v4116_v0  ;;  %vm11627_vm10 = vcmask 523264  }
 0xa99   :  { %v4118_v5 = vpop.permute.xlu0 %4117  ;;  %v4538_v44 = vsel %vm11627_vm10, %v4520_v47, 0.0  ;;  %v4525_v55 = vmul.f32 %v10105_v1, %v4502_v8  ;;  %v11636_v47 = vld [vmem:[#allocation186_spill] sm:$0xff] }
 0xa9a   :  { %v4503_v29 = vsel %vm4423_vm2, %v4407_v14, %v5287_v3  ;;  %v4352_v17 = vsel %vm4342_vm7, %v4335_v30, %v4118_v5  ;;  %vm11628_vm2 = vmmov %vm11627_vm10 }
 0xa9b   :  { %v5825_v15 = vpack.c.bf16 %v4503_v29, %v4502_v8  ;;  %v4180_v38 = vpop.permute.xlu1 %4179  ;;  %v4535_v13 = vsel %vm11628_vm2, %v4519_v45, 0.0  ;;  %vm11629_vm1 = vmmov %vm11628_vm2  ;;  %v4526_v39 = vmul.f32 %v10105_v1, %v4503_v29 }
 0xa9c   :  { %v4368_v36 = vsel %vm4359_vm11, %v4351_v49, %v4180_v38  ;;  %v4541_v57 = vsel %vm11629_vm1, %v4521_v53, 0.0  ;;  %vm11630_vm12 = vmmov %vm11629_vm1  ;;  %v4553_v9 = vsel %vm11629_vm1, %v4525_v55, 0.0 }
 0xa9d   :  { %5827 = vmatpush3.bf16.xpose.msk.msra.mxu0 %vm9951_vm3, %v5825_v15  ;;  %v4182_v22 = vpop.permute.xlu0 %4181  ;;  %v4544_v58 = vsel %vm11630_vm12, %v4522_v26, 0.0  ;;  %vm11631_vm10 = vmmov %vm11629_vm1  ;;  %v17_v15 = vstv %s10613_s8 }
 0xa9e   :  { %5828 = vmatprep.subr.bf16.mxu0 %v6555_v33  ;;  %v4369_v18 = vsel %vm4359_vm11, %v4352_v17, %v4182_v22  ;;  %v4547_v48 = vsel %vm11631_vm10, %v4523_v16, 0.0  ;;  %vm11632_vm2 = vmmov %vm11629_vm1  ;;  %18 = vst [vmem:[#allocation3] sm:$0x1] %v17_v15 }
 0xa9f   :  { %v4244_v28 = vpop.permute.xlu1 %4243  ;;  %v4550_v21 = vsel %vm11632_vm2, %v4524_v6, 0.0  ;;  %vm11633_vm12 = vmmov %vm11629_vm1  ;;  %vm11635_vm1 = vcmask 64512  }
 0xaa0   :  { %v4385_v32 = vsel %vm4376_vm14, %v4368_v36, %v4244_v28  ;;  %v4556_v52 = vsel %vm11633_vm12, %v4526_v39, 0.0 }
 0xaa1   :  { %v4408_v23 = vadd.f32 %v9910_v19, %v4385_v32  ;;  %v4246_v51 = vpop.permute.xlu0 %4245 }
 0xaa2   :  { %v4386_v7 = vsel %vm4376_vm14, %v4369_v18, %v4246_v51  ;;  %4539 = vadd.xlane.f32.xlu0 %v4538_v44 }
 0xaa3   :  { %v4440_v63 = vmin.f32 %v4408_v23, 0.0  ;;  %v4409_v11 = vadd.f32 %v9910_v19, %v4386_v7  ;;  %v3864_v4 = vpop.permute.xlu1 %3863  ;;  %vm4424_vm10 = vcmp.gt.f32.partialorder %v4408_v23, 0.0 }
 0xaa4   :  { %v4285_v38 = vsel %vm11635_vm1, %v11634_v40, %v3864_v4 }
 0xaa5   :  { %v4464_v43 = vmul.f32 1.442695, %v4440_v63  ;;  %v4441_v56 = vmin.f32 %v4409_v11, 0.0  ;;  %v3866_v14 = vpop.permute.xlu0 %3865  ;;  %4536 = vadd.xlane.f32.xlu1 %v4535_v13  ;;  %vm4425_vm2 = vcmp.gt.f32.partialorder %v4409_v11, 0.0 }
 0xaa6   :  { %4542 = vadd.xlane.f32.xlu0 %v4541_v57 }
 0xaa7   :  { %6394 = vpow2.f32 %v4464_v43  ;;  %v4466_v20 = vmul.f32 1.442695, %v4441_v56  ;;  %v3928_v31 = vpop.permute.xlu1 %3927 }
 0xaa8   :  { %v4302_v50 = vsel %vm4291_vm4, %v4285_v38, %v3928_v31 }
 0xaa9   :  { %6396 = vpow2.f32 %v4466_v20  ;;  %v3930_v2 = vpop.permute.xlu0 %3929  ;;  %4545 = vadd.xlane.f32.xlu1 %v4544_v58 }
 0xaaa   :  { %4548 = vadd.xlane.f32.xlu0 %v4547_v48 }
 0xaab   :  { %v3992_v37 = vpop.permute.xlu1 %3991 }
 0xaac   :  { %v4319_v49 = vsel %vm4308_vm6, %v4302_v50, %v3992_v37 }
 0xaad   :  { %v3994_v61 = vpop.permute.xlu0 %3993  ;;  %4551 = vadd.xlane.f32.xlu1 %v4550_v21 }
 0xaae   :  { %4554 = vadd.xlane.f32.xlu0 %v4553_v9 }
 0xaaf   :  { %v4056_v59 = vpop.permute.xlu1 %4055 }
 0xab0   :  { %v4336_v36 = vsel %vm4325_vm5, %v4319_v49, %v4056_v59 }
 0xab1   :  { %v6395_v10 = vpop.eup %6394  ;;  %v4058_v60 = vpop.permute.xlu0 %4057  ;;  %4557 = vadd.xlane.f32.xlu1 %v4556_v52 }
 0xab2   :  { %v5288_v41 = vadd.f32 -1.0, %v6395_v10  ;;  %v11639_v10 = vld [vmem:[#allocation154_spill] sm:$0xff] }
 0xab3   :  { %v6397_v0 = vpop.eup %6396  ;;  %v4120_v3 = vpop.permute.xlu1 %4119 }
 0xab4   :  { %v5289_v5 = vadd.f32 -1.0, %v6397_v0  ;;  %v4504_v8 = vsel %vm4424_vm10, %v4408_v23, %v5288_v41  ;;  %vm11637_vm10 = vmmov %vm11635_vm1  ;;  %v4353_v45 = vsel %vm4342_vm7, %v4336_v36, %v4120_v3 }
 0xab5   :  { %v4122_v27 = vpop.permute.xlu0 %4121  ;;  %v4527_v29 = vmul.f32 %v10105_v1, %v4504_v8  ;;  %v4286_v46 = vsel %vm11637_vm10, %v11636_v47, %v3866_v14  ;;  %vm11641_vm15 = vmmov %vm11637_vm10 }
 0xab6   :  { %v4505_v54 = vsel %vm4425_vm2, %v4409_v11, %v5289_v5  ;;  %v4303_v30 = vsel %vm4291_vm4, %v4286_v46, %v3930_v2  ;;  %vm11638_vm2 = vmmov %vm11633_vm12 }
 0xab7   :  { %v4184_v12 = vpop.permute.xlu1 %4183  ;;  %v4559_v62 = vsel %vm11633_vm12, %v4527_v29, 0.0  ;;  %v5829_v35 = vpack.c.bf16 %v4505_v54, %v4504_v8  ;;  %v4528_v22 = vmul.f32 %v10105_v1, %v4505_v54  ;;  %v4320_v32 = vsel %vm4308_vm6, %v4303_v30, %v3994_v61  ;;  %v11640_v29 = vld [vmem:[#allocation74_spill] sm:$0xff] }
 0xab8   :  { %4560 = vadd.xlane.f32.xlu0 %v4559_v62  ;;  %v4337_v18 = vsel %vm4325_vm5, %v4320_v32, %v4058_v60  ;;  %v4370_v23 = vsel %vm4359_vm11, %v4353_v45, %v4184_v12 }
 0xab9   :  { %5831 = vmatpush3.bf16.xpose.msk.msra.mxu0 %vm9951_vm3, %v5829_v35  ;;  %v4186_v28 = vpop.permute.xlu0 %4185  ;;  %v4562_v17 = vsel %vm11638_vm2, %v4528_v22, 0.0  ;;  %v4354_v44 = vsel %vm4342_vm7, %v4337_v18, %v4122_v27 }
 0xaba   :  { %4563 = vadd.xlane.f32.xlu1 %v4562_v17  ;;  %5832 = vmatprep.subr.bf16.mxu0 %v6555_v33  ;;  %v4371_v7 = vsel %vm4359_vm11, %v4354_v44, %v4186_v28 }
 0xabb   :  { %v4248_v51 = vpop.permute.xlu1 %4247 }
 0xabc   :  { %v4387_v53 = vsel %vm4376_vm14, %v4370_v23, %v4248_v51 }
 0xabd   :  { %v4410_v63 = vadd.f32 %v9910_v19, %v4387_v53  ;;  %v4250_v11 = vpop.permute.xlu0 %4249 }
 0xabe   :  { %v4388_v4 = vsel %vm4376_vm14, %v4371_v7, %v4250_v11 }
 0xabf   :  { %v4442_v13 = vmin.f32 %v4410_v63, 0.0  ;;  %v4411_v26 = vadd.f32 %v9910_v19, %v4388_v4  ;;  %v3868_v43 = vpop.permute.xlu1 %3867  ;;  %vm4426_vm1 = vcmp.gt.f32.partialorder %v4410_v63, 0.0 }
 0xac0   :  { %v4287_v60 = vsel %vm11637_vm10, %v11639_v10, %v3868_v43 }
 0xac1   :  { %v4468_v56 = vmul.f32 1.442695, %v4442_v13  ;;  %v4443_v14 = vmin.f32 %v4411_v26, 0.0  ;;  %v3870_v57 = vpop.permute.xlu0 %3869  ;;  %vm4427_vm12 = vcmp.gt.f32.partialorder %v4411_v26, 0.0 }
 0xac2   :  { %v4288_v25 = vsel %vm11641_vm15, %v11640_v29, %v3870_v57 }
 0xac3   :  { %6398 = vpow2.f32 %v4468_v56  ;;  %v4470_v16 = vmul.f32 1.442695, %v4443_v14  ;;  %v3932_v20 = vpop.permute.xlu1 %3931 }
 0xac4   :  { %v4304_v0 = vsel %vm4291_vm4, %v4287_v60, %v3932_v20 }
 0xac5   :  { %6400 = vpow2.f32 %v4470_v16  ;;  %v3934_v31 = vpop.permute.xlu0 %3933 }
 0xac6   :  { %v4305_v40 = vsel %vm4291_vm4, %v4288_v25, %v3934_v31 }
 0xac7   :  { %v3996_v58 = vpop.permute.xlu1 %3995 }
 0xac8   :  { %v4321_v15 = vsel %vm4308_vm6, %v4304_v0, %v3996_v58 }
 0xac9   :  { %v3998_v6 = vpop.permute.xlu0 %3997 }
 0xaca   :  { %v4322_v12 = vsel %vm4308_vm6, %v4305_v40, %v3998_v6  ;;  %v11643_v6 = vld [vmem:[#allocation134_spill] sm:$0xff] }
 0xacb   :  { %v4060_v2 = vpop.permute.xlu1 %4059 }
 0xacc   :  { %v4338_v38 = vsel %vm4325_vm5, %v4321_v15, %v4060_v2 }
 0xacd   :  { %v6399_v48 = vpop.eup %6398  ;;  %v4062_v55 = vpop.permute.xlu0 %4061 }
 0xace   :  { %v5290_v37 = vadd.f32 -1.0, %v6399_v48  ;;  %v4339_v35 = vsel %vm4325_vm5, %v4322_v12, %v4062_v55 }
 0xacf   :  { %v6401_v21 = vpop.eup %6400  ;;  %v4124_v39 = vpop.permute.xlu1 %4123 }
 0xad0   :  { %v5291_v61 = vadd.f32 -1.0, %v6401_v21  ;;  %v4506_v9 = vsel %vm4426_vm1, %v4410_v63, %v5290_v37  ;;  %vm11642_vm1 = vmmov %vm11638_vm2  ;;  %v4355_v62 = vsel %vm4342_vm7, %v4338_v38, %v4124_v39 }
 0xad1   :  { %v4126_v59 = vpop.permute.xlu0 %4125  ;;  %v4529_v52 = vmul.f32 %v10105_v1, %v4506_v9 }
 0xad2   :  { %v4507_v41 = vsel %vm4427_vm12, %v4411_v26, %v5291_v61  ;;  %v4356_v46 = vsel %vm4342_vm7, %v4339_v35, %v4126_v59 }
 0xad3   :  { %v4188_v3 = vpop.permute.xlu1 %4187  ;;  %v4565_v5 = vsel %vm11638_vm2, %v4529_v52, 0.0  ;;  %v5833_v8 = vpack.c.bf16 %v4507_v41, %v4506_v9  ;;  %v4530_v27 = vmul.f32 %v10105_v1, %v4507_v41  ;;  %vm11644_vm2 = vmmov %vm11642_vm1  ;;  %v11645_v9 = vld [vmem:[#allocation92_spill] sm:$0xff] }
 0xad4   :  { %4566 = vadd.xlane.f32.xlu0 %v4565_v5  ;;  %v4372_v22 = vsel %vm4359_vm11, %v4355_v62, %v4188_v3 }
 0xad5   :  { %5835 = vmatpush3.bf16.xpose.msk.msra.mxu0 %vm9951_vm3, %v5833_v8  ;;  %v4190_v54 = vpop.permute.xlu0 %4189  ;;  %v4568_v50 = vsel %vm11642_vm1, %v4530_v27, 0.0  ;;  %vm11646_vm1 = vmmov %vm11637_vm10 }
 0xad6   :  { %4569 = vadd.xlane.f32.xlu1 %v4568_v50  ;;  %5836 = vmatprep.subr.bf16.mxu0 %v6555_v33  ;;  %v4373_v30 = vsel %vm4359_vm11, %v4356_v46, %v4190_v54 }
 0xad7   :  { %v4252_v47 = vpop.permute.xlu1 %4251 }
 0xad8   :  { %v4389_v49 = vsel %vm4376_vm14, %v4372_v22, %v4252_v47 }
 0xad9   :  { %v4412_v36 = vadd.f32 %v9910_v19, %v4389_v49  ;;  %v4254_v28 = vpop.permute.xlu0 %4253 }
 0xada   :  { %v4390_v17 = vsel %vm4376_vm14, %v4373_v30, %v4254_v28 }
 0xadb   :  { %v4444_v32 = vmin.f32 %v4412_v36, 0.0  ;;  %v4413_v45 = vadd.f32 %v9910_v19, %v4390_v17  ;;  %v3872_v18 = vpop.permute.xlu1 %3871  ;;  %vm4428_vm15 = vcmp.gt.f32.partialorder %v4412_v36, 0.0 }
 0xadc   :  { %v4289_v2 = vsel %vm11637_vm10, %v11643_v6, %v3872_v18 }
 0xadd   :  { %v4472_v23 = vmul.f32 1.442695, %v4444_v32  ;;  %v4445_v51 = vmin.f32 %v4413_v45, 0.0  ;;  %v3874_v44 = vpop.permute.xlu0 %3873  ;;  %vm4429_vm12 = vcmp.gt.f32.partialorder %v4413_v45, 0.0 }
 0xade   :  { %v4290_v59 = vsel %vm11646_vm1, %v11645_v9, %v3874_v44 }
 0xadf   :  { %6402 = vpow2.f32 %v4472_v23  ;;  %v4474_v53 = vmul.f32 1.442695, %v4445_v51  ;;  %v3936_v7 = vpop.permute.xlu1 %3935  ;;  %v4726_v23 = vld [vmem:[#allocation3] sm:$0x1]  ;;  %v5313_v51 = vld [vmem:[#allocation2] ss:$0 sm:$0xff] }
 0xae0   :  { %v4306_v55 = vsel %vm4291_vm4, %v4289_v2, %v3936_v7 }
 0xae1   :  { %6404 = vpow2.f32 %v4474_v53  ;;  %v3938_v63 = vpop.permute.xlu0 %3937 }
 0xae2   :  { %v4307_v10 = vsel %vm4291_vm4, %v4290_v59, %v3938_v63  ;;  %vm11648_vm4 = vmmov %vm11644_vm2 }
 0xae3   :  { %v4000_v11 = vpop.permute.xlu1 %3999 }
 0xae4   :  { %v4323_v52 = vsel %vm4308_vm6, %v4306_v55, %v4000_v11 }
 0xae5   :  { %v4002_v4 = vpop.permute.xlu0 %4001 }
 0xae6   :  { %v4324_v3 = vsel %vm4308_vm6, %v4307_v10, %v4002_v4  ;;  %vm11650_vm6 = vmmov %vm11644_vm2 }
 0xae7   :  { %v4064_v13 = vpop.permute.xlu1 %4063 }
 0xae8   :  { %v4340_v60 = vsel %vm4325_vm5, %v4323_v52, %v4064_v13 }
 0xae9   :  { %v6403_v26 = vpop.eup %6402  ;;  %v4066_v43 = vpop.permute.xlu0 %4065 }
 0xaea   :  { %v5292_v56 = vadd.f32 -1.0, %v6403_v26  ;;  %v4341_v8 = vsel %vm4325_vm5, %v4324_v3, %v4066_v43  ;;  %vm11649_vm5 = vmmov %vm11644_vm2 }
 0xaeb   :  { %v6405_v14 = vpop.eup %6404  ;;  %v4128_v57 = vpop.permute.xlu1 %4127 }
 0xaec   :  { %v5293_v16 = vadd.f32 -1.0, %v6405_v14  ;;  %v4508_v20 = vsel %vm4428_vm15, %v4412_v36, %v5292_v56  ;;  %vm11647_vm15 = vmmov %vm11644_vm2  ;;  %v4357_v5 = vsel %vm4342_vm7, %v4340_v60, %v4128_v57 }
 0xaed   :  { %v4130_v31 = vpop.permute.xlu0 %4129  ;;  %v4531_v58 = vmul.f32 %v10105_v1, %v4508_v20 }
 0xaee   :  { %v4509_v48 = vsel %vm4429_vm12, %v4413_v45, %v5293_v16  ;;  %v4358_v25 = vsel %vm4342_vm7, %v4341_v8, %v4130_v31 }
 0xaef   :  { %v4192_v37 = vpop.permute.xlu1 %4191  ;;  %v4571_v21 = vsel %vm11644_vm2, %v4531_v58, 0.0  ;;  %v5837_v39 = vpack.c.bf16 %v4509_v48, %v4508_v20  ;;  %v4532_v61 = vmul.f32 %v10105_v1, %v4509_v48 }
 0xaf0   :  { %4572 = vadd.xlane.f32.xlu0 %v4571_v21  ;;  %v4374_v27 = vsel %vm4359_vm11, %v4357_v5, %v4192_v37 }
 0xaf1   :  { %5839 = vmatpush3.bf16.xpose.msk.msra.mxu0 %vm9951_vm3, %v5837_v39  ;;  %v4194_v41 = vpop.permute.xlu0 %4193  ;;  %v4574_v0 = vsel %vm11647_vm15, %v4532_v61, 0.0 }
 0xaf2   :  { %4575 = vadd.xlane.f32.xlu1 %v4574_v0  ;;  %5840 = vmatprep.subr.bf16.mxu0 %v6555_v33  ;;  %v4375_v40 = vsel %vm4359_vm11, %v4358_v25, %v4194_v41 }
 0xaf3   :  { %v4256_v29 = vpop.permute.xlu1 %4255 }
 0xaf4   :  { %v4391_v15 = vsel %vm4376_vm14, %v4374_v27, %v4256_v29 }
 0xaf5   :  { %v4414_v38 = vadd.f32 %v9910_v19, %v4391_v15  ;;  %v4258_v54 = vpop.permute.xlu0 %4257 }
 0xaf6   :  { %v4392_v50 = vsel %vm4376_vm14, %v4375_v40, %v4258_v54 }
 0xaf7   :  { %v4446_v12 = vmin.f32 %v4414_v38, 0.0  ;;  %v4415_v62 = vadd.f32 %v9910_v19, %v4392_v50  ;;  %vm4430_vm7 = vcmp.gt.f32.partialorder %v4414_v38, 0.0 }
 0xaf9   :  { %v4476_v33 = vmul.f32 1.442695, %v4446_v12  ;;  %v4447_v35 = vmin.f32 %v4415_v62, 0.0  ;;  %vm4431_vm11 = vcmp.gt.f32.partialorder %v4415_v62, 0.0 }
 0xafb   :  { %6406 = vpow2.f32 %v4476_v33  ;;  %v4478_v22 = vmul.f32 1.442695, %v4447_v35 }
 0xafd   :  { %6408 = vpow2.f32 %v4478_v22 }
 0xb05   :  { %v6407_v47 = vpop.eup %6406 }
 0xb06   :  { %v5294_v46 = vadd.f32 -1.0, %v6407_v47 }
 0xb07   :  { %v6409_v49 = vpop.eup %6408 }
 0xb08   :  { %v5295_v30 = vadd.f32 -1.0, %v6409_v49  ;;  %v4510_v36 = vsel %vm4430_vm7, %v4414_v38, %v5294_v46 }
 0xb09   :  { %v4533_v28 = vmul.f32 %v10105_v1, %v4510_v36 }
 0xb0a   :  { %v4511_v17 = vsel %vm4431_vm11, %v4415_v62, %v5295_v30 }
 0xb0b   :  { %v4577_v32 = vsel %vm11648_vm4, %v4533_v28, 0.0  ;;  %v5841_v45 = vpack.c.bf16 %v4511_v17, %v4510_v36  ;;  %v4534_v19 = vmul.f32 %v10105_v1, %v4511_v17 }
 0xb0c   :  { %4578 = vadd.xlane.f32.xlu0 %v4577_v32 }
 0xb0d   :  { %5843 = vmatpush3.bf16.xpose.msk.msra.mxu0 %vm9951_vm3, %v5841_v45  ;;  %v4580_v18 = vsel %vm11649_vm5, %v4534_v19, 0.0 }
 0xb0e   :  { %4581 = vadd.xlane.f32.xlu1 %v4580_v18  ;;  %v11652_v18 = vld [vmem:[#allocation25_spill] sm:$0xff] }
 0xb0f   :  { %vm11653_vm2 = vcmp.gt.f32.partialorder %v11652_v18, 0.0  ;;  %v11673_v18 = vld [vmem:[#allocation112_spill] sm:$0xff] }
 0xb14   :  { %5810 = vmatmul.mubr.msk.f32.vlgmr.msra.gmra.mrb[80].mxu0 %vm11650_vm6, %v10098_v24 }
 0xb22   :  { %4729 = vperm.xlu0 %5864, %v4726_v23  }
 0xb2f   :  { %v4540_v44 = vpop.xlane.xlu0 %4539 }
 0xb30   :  { %v4711_v11 = vmul.f32 %v5313_v51, %v4540_v44 }
 0xb32   :  { %v4537_v53 = vpop.xlane.xlu1 %4536 }
 0xb33   :  { %v4710_v7 = vmul.f32 %v5313_v51, %v4537_v53  ;;  %v4543_v1 = vpop.xlane.xlu0 %4542 }
 0xb34   :  { %v4712_v42 = vmul.f32 %v5313_v51, %v4543_v1 }
 0xb35   :  { %4739 = vperm.xlu1 %5865, %v4710_v7  }
 0xb36   :  { %v4546_v63 = vpop.xlane.xlu1 %4545 }
 0xb37   :  { %v4713_v26 = vmul.f32 %v5313_v51, %v4546_v63  ;;  %v4549_v56 = vpop.xlane.xlu0 %4548 }
 0xb38   :  { %v4714_v24 = vmul.f32 %v5313_v51, %v4549_v56 }
 0xb39   :  { %4744 = vperm.xlu1 %5865, %v4711_v11  }
 0xb3a   :  { %v4552_v4 = vpop.xlane.xlu1 %4551 }
 0xb3b   :  { %v4715_v14 = vmul.f32 %v5313_v51, %v4552_v4  ;;  %v4555_v16 = vpop.xlane.xlu0 %4554 }
 0xb3c   :  { %v4716_v31 = vmul.f32 %v5313_v51, %v4555_v16 }
 0xb3d   :  { %4749 = vperm.xlu1 %5865, %v4712_v42   ;;  %v11654_v42 = vld [vmem:[#allocation28_spill] sm:$0xff] }
 0xb3e   :  { %v4558_v13 = vpop.xlane.xlu1 %4557 }
 0xb3f   :  { %v4717_v43 = vmul.f32 %v5313_v51, %v4558_v13 }
 0xb41   :  { %4774 = vperm.xlu0 %5864, %v4717_v43   ;;  %4754 = vperm.xlu1 %5865, %v4713_v26  }
 0xb45   :  { %4759 = vperm.xlu1 %5865, %v4714_v24   ;;  %v4561_v58 = vpop.xlane.xlu0 %4560 }
 0xb46   :  { %v4718_v6 = vmul.f32 %v5313_v51, %v4561_v58 }
 0xb47   :  { %v4564_v57 = vpop.xlane.xlu1 %4563 }
 0xb48   :  { %v4719_v20 = vmul.f32 %v5313_v51, %v4564_v57 }
 0xb49   :  { %4764 = vperm.xlu1 %5865, %v4715_v14  }
 0xb4a   :  { %4784 = vperm.xlu0 %5864, %v4719_v20  }
 0xb4d   :  { %4769 = vperm.xlu1 %5865, %v4716_v31  }
 0xb51   :  { %4779 = vperm.xlu1 %5865, %v4718_v6  }
 0xb61   :  { %v4567_v2 = vpop.xlane.xlu0 %4566 }
 0xb62   :  { %v4720_v48 = vmul.f32 %v5313_v51, %v4567_v2 }
 0xb63   :  { %v4570_v55 = vpop.xlane.xlu1 %4569 }
 0xb64   :  { %v4721_v37 = vmul.f32 %v5313_v51, %v4570_v55  ;;  %4789 = vperm.xlu1 %5865, %v4720_v48  }
 0xb66   :  { %4794 = vperm.xlu0 %5864, %v4721_v37  }
 0xb7d   :  { %v4573_v21 = vpop.xlane.xlu0 %4572 }
 0xb7e   :  { %v4722_v39 = vmul.f32 %v5313_v51, %v4573_v21 }
 0xb7f   :  { %v4576_v61 = vpop.xlane.xlu1 %4575 }
 0xb80   :  { %v4723_v9 = vmul.f32 %v5313_v51, %v4576_v61  ;;  %4799 = vperm.xlu1 %5865, %v4722_v39  }
 0xb82   :  { %4804 = vperm.xlu0 %5864, %v4723_v9  }
 0xb99   :  { %v4579_v59 = vpop.xlane.xlu0 %4578 }
 0xb9a   :  { %v4724_v52 = vmul.f32 %v5313_v51, %v4579_v59 }
 0xb9b   :  { %v4582_v10 = vpop.xlane.xlu1 %4581 }
 0xb9c   :  { %v4725_v60 = vmul.f32 %v5313_v51, %v4582_v10  ;;  %4809 = vperm.xlu1 %5865, %v4724_v52   ;;  %v11659_v52 = vld [vmem:[#allocation42_spill] sm:$0xff] }
 0xb9e   :  { %4814 = vperm.xlu0 %5864, %v4725_v60   ;;  %v11661_v60 = vld [vmem:[#allocation98_spill] sm:$0xff] }
 0xba1   :  { %v4730_v27 = vpop.permute.xlu0 %4729 }
 0xba2   :  { %v4735_v29 = vrot.slane %v4730_v27, %v11624_v34 }
 0xbb4   :  { %v4740_v41 = vpop.permute.xlu1 %4739 }
 0xbb8   :  { %v4745_v0 = vpop.permute.xlu1 %4744 }
 0xbbc   :  { %v4750_v3 = vpop.permute.xlu1 %4749 }
 0xbc0   :  { %v4755_v5 = vpop.permute.xlu1 %4754  ;;  %v4775_v28 = vpop.permute.xlu0 %4774 }
 0xbc4   :  { %v4760_v8 = vpop.permute.xlu1 %4759 }
 0xbc8   :  { %v4765_v15 = vpop.permute.xlu1 %4764 }
 0xbc9   :  { %v4785_v1 = vpop.permute.xlu0 %4784 }
 0xbcc   :  { %v4770_v47 = vpop.permute.xlu1 %4769 }
 0xbd0   :  { %v4780_v4 = vpop.permute.xlu1 %4779 }
 0xbe3   :  { %v4790_v31 = vpop.permute.xlu1 %4789 }
 0xbe5   :  { %v4795_v58 = vpop.permute.xlu0 %4794 }
 0xbe7   :  { %v10234_v25 = vpop.f32.mrb[80].mxu0 }
 0xbe8   :  { %v4736_v40 = vmul.f32 %v4735_v29, %v10234_v25  ;;  %v5811_v38 = vpop.f32.mrb[81].mxu0 }
 0xbea   :  { %v10238_v54 = vrot.slane %v4736_v40, %v11624_v34  ;;  %v11663_v40 = vld [vmem:[#allocation51_spill] sm:$0xff] }
 0xbec   :  { %v4822_v50 = vadd.f32 %v10238_v54, %v4745_v0  ;;  %v4821_v12 = vadd.f32 %v10238_v54, %v4740_v41  ;;  %v4823_v62 = vadd.f32 %v10238_v54, %v4750_v3  ;;  %v4824_v33 = vadd.f32 %v10238_v54, %v4755_v5 }
 0xbed   :  { %v4825_v35 = vadd.f32 %v10238_v54, %v4760_v8  ;;  %v4826_v22 = vadd.f32 %v10238_v54, %v4765_v15  ;;  %v4827_v44 = vadd.f32 %v10238_v54, %v4770_v47  ;;  %v4828_v63 = vadd.f32 %v10238_v54, %v4775_v28 }
 0xbee   :  { %vm4838_vm3 = vcmp.gt.f32.partialorder %v4822_v50, 0.0  ;;  %v4854_v46 = vmul.f32 0.2, %v4822_v50  ;;  %vm4837_vm14 = vcmp.gt.f32.partialorder %v4821_v12, 0.0  ;;  %v4853_v49 = vmul.f32 0.2, %v4821_v12 }
 0xbef   :  { %vm4839_vm12 = vcmp.gt.f32.partialorder %v4823_v62, 0.0  ;;  %v4855_v30 = vmul.f32 0.2, %v4823_v62  ;;  %vm4840_vm10 = vcmp.gt.f32.partialorder %v4824_v33, 0.0  ;;  %v4856_v36 = vmul.f32 0.2, %v4824_v33 }
 0xbf0   :  { %v4870_v17 = vsel %vm4838_vm3, %v4822_v50, %v4854_v46  ;;  %v4869_v32 = vsel %vm4837_vm14, %v4821_v12, %v4853_v49  ;;  %v4857_v51 = vmul.f32 0.2, %v4825_v35  ;;  %vm4841_vm1 = vcmp.gt.f32.partialorder %v4825_v35, 0.0  ;;  %v11665_v50 = vld [vmem:[#allocation104_spill] sm:$0xff]  ;;  %v11667_v46 = vld [vmem:[#allocation54_spill] sm:$0xff] }
 0xbf1   :  { %v10248_v19 = vsel %vm75_vm0, %v4870_v17, -1e+30  ;;  %v10252_v23 = vsel %vm11653_vm2, %v4869_v32, -1e+30  ;;  %v4871_v53 = vsel %vm4839_vm12, %v4823_v62, %v4855_v30  ;;  %v4872_v7 = vsel %vm4840_vm10, %v4824_v33, %v4856_v36  ;;  %v11669_v30 = vld [vmem:[#allocation90_spill] sm:$0xff]  ;;  %v11671_v32 = vld [vmem:[#allocation61_spill] sm:$0xff] }
 0xbf2   :  { %4903 = vmax.xlane.f32.xlu0 %v10248_v19  ;;  %4901 = vmax.xlane.f32.xlu1 %v10252_v23  ;;  %vm4842_vm15 = vcmp.gt.f32.partialorder %v4826_v22, 0.0  ;;  %v4858_v11 = vmul.f32 0.2, %v4826_v22  ;;  %vm11655_vm0 = vcmp.gt.f32.partialorder %v11654_v42, 0.0  ;;  %v10264_v43 = vsel %vm77_vm9, %v4872_v7, -1e+30 }
 0xbf3   :  { %v10260_v13 = vsel %vm11655_vm0, %v4871_v53, -1e+30  ;;  %v4873_v56 = vsel %vm4841_vm1, %v4825_v35, %v4857_v51  ;;  %v4859_v24 = vmul.f32 0.2, %v4827_v44  ;;  %v4860_v57 = vmul.f32 0.2, %v4828_v63 }
 0xbf4   :  { %v4874_v14 = vsel %vm4842_vm15, %v4826_v22, %v4858_v11  ;;  %v4829_v16 = vadd.f32 %v10238_v54, %v4780_v4  ;;  %v4830_v20 = vadd.f32 %v10238_v54, %v4785_v1  ;;  %vm4843_vm7 = vcmp.gt.f32.partialorder %v4827_v44, 0.0  ;;  %v11675_v42 = vld [vmem:[#allocation63_spill] sm:$0xff] }
 0xbf5   :  { %vm4844_vm11 = vcmp.gt.f32.partialorder %v4828_v63, 0.0  ;;  %v10272_v2 = vsel %vm78_vm13, %v4873_v56, -1e+30  ;;  %v10276_v55 = vsel %vm79_vm8, %v4874_v14, -1e+30  ;;  %v4831_v37 = vadd.f32 %v10238_v54, %v4790_v31 }
 0xbf6   :  { %4905 = vmax.xlane.f32.xlu0 %v10260_v13  ;;  %4907 = vmax.xlane.f32.xlu1 %v10264_v43  ;;  %v4832_v21 = vadd.f32 %v10238_v54, %v4795_v58  ;;  %v4875_v39 = vsel %vm4843_vm7, %v4827_v44, %v4859_v24  ;;  %v4876_v61 = vsel %vm4844_vm11, %v4828_v63, %v4860_v57  ;;  %v4861_v9 = vmul.f32 0.2, %v4829_v16  ;;  %v11677_v24 = vld [vmem:[#allocation115_spill] sm:$0xff] }
 0xbf7   :  { %v4862_v59 = vmul.f32 0.2, %v4830_v20  ;;  %vm4845_vm9 = vcmp.gt.f32.partialorder %v4829_v16, 0.0  ;;  %vm4846_vm4 = vcmp.gt.f32.partialorder %v4830_v20, 0.0  ;;  %vm11660_vm13 = vcmp.gt.f32.partialorder %v11659_v52, 0.0 }
 0xbf8   :  { %v10284_v10 = vsel %vm11660_vm13, %v4875_v39, -1e+30  ;;  %vm11662_vm8 = vcmp.gt.f32.partialorder %v11661_v60, 0.0  ;;  %v4877_v0 = vsel %vm4845_vm9, %v4829_v16, %v4861_v9  ;;  %v4863_v5 = vmul.f32 0.2, %v4831_v37 }
 0xbf9   :  { %v10288_v41 = vsel %vm11662_vm8, %v4876_v61, -1e+30  ;;  %v4878_v3 = vsel %vm4846_vm4, %v4830_v20, %v4862_v59  ;;  %v4864_v8 = vmul.f32 0.2, %v4832_v21  ;;  %vm4847_vm5 = vcmp.gt.f32.partialorder %v4831_v37, 0.0 }
 0xbfa   :  { %4909 = vmax.xlane.f32.xlu0 %v10272_v2  ;;  %4911 = vmax.xlane.f32.xlu1 %v10276_v55  ;;  %vm4848_vm6 = vcmp.gt.f32.partialorder %v4832_v21, 0.0  ;;  %vm11664_vm3 = vcmp.gt.f32.partialorder %v11663_v40, 0.0  ;;  %vm11666_vm14 = vcmp.gt.f32.partialorder %v11665_v50, 0.0  ;;  %v4879_v35 = vsel %vm4847_vm5, %v4831_v37, %v4863_v5 }
 0xbfb   :  { %v10295_v38 = vsel %vm11664_vm3, %v4877_v0, -1e+30  ;;  %v10299_v12 = vsel %vm11666_vm14, %v4878_v3, -1e+30  ;;  %v4880_v22 = vsel %vm4848_vm6, %v4832_v21, %v4864_v8  ;;  %vm11668_vm2 = vcmp.gt.f32.partialorder %v11667_v46, 0.0 }
 0xbfc   :  { %v10306_v49 = vsel %vm11668_vm2, %v4879_v35, -1e+30  ;;  %vm11670_vm1 = vcmp.gt.f32.partialorder %v11669_v30, 0.0  ;;  %vm11672_vm15 = vcmp.gt.f32.partialorder %v11671_v32, 0.0  ;;  %vm11674_vm0 = vcmp.gt.f32.partialorder %v11673_v18, 0.0 }
 0xbfd   :  { %v10310_v36 = vsel %vm11670_vm1, %v4880_v22, -1e+30  ;;  %vm11676_vm9 = vcmp.gt.f32.partialorder %v11675_v42, 0.0  ;;  %vm11678_vm4 = vcmp.gt.f32.partialorder %v11677_v24, 0.0  ;;  %vm5248_vm13 = vcmask 7168  }
 0xbfe   :  { %4913 = vmax.xlane.f32.xlu0 %v10284_v10  ;;  %4915 = vmax.xlane.f32.xlu1 %v10288_v41 }
 0xbff   :  { %v4800_v27 = vpop.permute.xlu1 %4799 }
 0xc00   :  { %v4833_v29 = vadd.f32 %v10238_v54, %v4800_v27 }
 0xc01   :  { %v4805_v15 = vpop.permute.xlu0 %4804 }
 0xc02   :  { %v4865_v62 = vmul.f32 0.2, %v4833_v29  ;;  %v4834_v33 = vadd.f32 %v10238_v54, %v4805_v15  ;;  %4917 = vmax.xlane.f32.xlu0 %v10295_v38  ;;  %4919 = vmax.xlane.f32.xlu1 %v10299_v12  ;;  %vm4849_vm12 = vcmp.gt.f32.partialorder %v4833_v29, 0.0 }
 0xc04   :  { %v4866_v47 = vmul.f32 0.2, %v4834_v33  ;;  %vm4850_vm10 = vcmp.gt.f32.partialorder %v4834_v33, 0.0  ;;  %v4881_v28 = vsel %vm4849_vm12, %v4833_v29, %v4865_v62 }
 0xc05   :  { %v10316_v45 = vsel %vm11672_vm15, %v4881_v28, -1e+30 }
 0xc06   :  { %4921 = vmax.xlane.f32.xlu0 %v10306_v49  ;;  %4923 = vmax.xlane.f32.xlu1 %v10310_v36  ;;  %v4882_v17 = vsel %vm4850_vm10, %v4834_v33, %v4866_v47 }
 0xc07   :  { %v10320_v51 = vsel %vm11674_vm0, %v4882_v17, -1e+30 }
 0xc0a   :  { %4925 = vmax.xlane.f32.xlu0 %v10316_v45  ;;  %4927 = vmax.xlane.f32.xlu1 %v10320_v51 }
 0xc1b   :  { %v4810_v44 = vpop.permute.xlu1 %4809 }
 0xc1c   :  { %v4835_v53 = vadd.f32 %v10238_v54, %v4810_v44 }
 0xc1d   :  { %v4815_v7 = vpop.permute.xlu0 %4814 }
 0xc1e   :  { %v4867_v63 = vmul.f32 0.2, %v4835_v53  ;;  %v4836_v11 = vadd.f32 %v10238_v54, %v4815_v7  ;;  %vm4851_vm7 = vcmp.gt.f32.partialorder %v4835_v53, 0.0 }
 0xc20   :  { %v4868_v1 = vmul.f32 0.2, %v4836_v11  ;;  %v4883_v4 = vsel %vm4851_vm7, %v4835_v53, %v4867_v63  ;;  %vm4852_vm11 = vcmp.gt.f32.partialorder %v4836_v11, 0.0 }
 0xc21   :  { %v10328_v26 = vsel %vm11676_vm9, %v4883_v4, -1e+30 }
 0xc22   :  { %4929 = vmax.xlane.f32.xlu0 %v10328_v26  ;;  %v4884_v56 = vsel %vm4852_vm11, %v4836_v11, %v4868_v1 }
 0xc23   :  { %v10333_v14 = vsel %vm11678_vm4, %v4884_v56, -1e+30 }
 0xc24   :  { %4931 = vmax.xlane.f32.xlu1 %v10333_v14 }
 0xc7f   :  { %v4902_v57 = vpop.xlane.xlu1 %4901  ;;  %v4904_v16 = vpop.xlane.xlu0 %4903 }
 0xc80   :  { %v4933_v54 = vsub.f32 %v10252_v23, %v4902_v57  ;;  %v4934_v20 = vsub.f32 %v10248_v19, %v4904_v16 }
 0xc82   :  { %v4949_v31 = vmul.f32 1.442695, %v4933_v54  ;;  %v4951_v58 = vmul.f32 1.442695, %v4934_v20 }
 0xc83   :  { %v4908_v6 = vpop.xlane.xlu1 %4907  ;;  %v4906_v48 = vpop.xlane.xlu0 %4905 }
 0xc84   :  { %6410 = vpow2.f32 %v4949_v31  ;;  %v4936_v37 = vsub.f32 %v10264_v43, %v4908_v6  ;;  %v4935_v21 = vsub.f32 %v10260_v13, %v4906_v48  ;;  %v19_v31 = vstv %s10614_s9 }
 0xc85   :  { %6412 = vpow2.f32 %v4951_v58  ;;  %20 = vst [vmem:[#allocation4] sm:$0x1] %v19_v31 }
 0xc86   :  { %v4955_v39 = vmul.f32 1.442695, %v4936_v37  ;;  %v4953_v61 = vmul.f32 1.442695, %v4935_v21 }
 0xc87   :  { %v4912_v9 = vpop.xlane.xlu1 %4911  ;;  %v4910_v59 = vpop.xlane.xlu0 %4909 }
 0xc88   :  { %6414 = vpow2.f32 %v4955_v39  ;;  %v4938_v52 = vsub.f32 %v10276_v55, %v4912_v9  ;;  %v4937_v23 = vsub.f32 %v10272_v2, %v4910_v59 }
 0xc89   :  { %6416 = vpow2.f32 %v4953_v61  ;;  %v10405_v61 = vrot.slane %v10234_v25, %v11624_v34 }
 0xc8a   :  { %v4959_v19 = vmul.f32 1.442695, %v4938_v52  ;;  %v4957_v60 = vmul.f32 1.442695, %v4937_v23 }
 0xc8b   :  { %v4916_v0 = vpop.xlane.xlu1 %4915  ;;  %v4914_v3 = vpop.xlane.xlu0 %4913 }
 0xc8c   :  { %6418 = vpow2.f32 %v4959_v19  ;;  %v4940_v43 = vsub.f32 %v10288_v41, %v4916_v0  ;;  %v4939_v13 = vsub.f32 %v10284_v10, %v4914_v3 }
 0xc8d   :  { %6420 = vpow2.f32 %v4957_v60 }
 0xc8e   :  { %v10344_v5 = vpop.eup %6410  ;;  %v4963_v8 = vmul.f32 1.442695, %v4940_v43  ;;  %v4961_v27 = vmul.f32 1.442695, %v4939_v13 }
 0xc8f   :  { %v10346_v29 = vpop.eup %6412  ;;  %4981 = vadd.xlane.f32.xlu0 %v10344_v5  ;;  %v4920_v2 = vpop.xlane.xlu1 %4919 }
 0xc90   :  { %v4918_v55 = vpop.xlane.xlu0 %4917  ;;  %6422 = vpow2.f32 %v4963_v8  ;;  %v4942_v15 = vsub.f32 %v10299_v12, %v4920_v2  ;;  %4983 = vadd.xlane.f32.xlu1 %v10346_v29 }
 0xc91   :  { %v4941_v41 = vsub.f32 %v10295_v38, %v4918_v55  ;;  %6424 = vpow2.f32 %v4961_v27 }
 0xc92   :  { %v10352_v10 = vpop.eup %6414  ;;  %v4967_v40 = vmul.f32 1.442695, %v4942_v15 }
 0xc93   :  { %v4965_v50 = vmul.f32 1.442695, %v4941_v41  ;;  %v10354_v62 = vpop.eup %6416  ;;  %v4924_v33 = vpop.xlane.xlu1 %4923 }
 0xc94   :  { %v4922_v35 = vpop.xlane.xlu0 %4921  ;;  %6426 = vpow2.f32 %v4967_v40  ;;  %v4944_v22 = vsub.f32 %v10310_v36, %v4924_v33  ;;  %4987 = vadd.xlane.f32.xlu1 %v10352_v10  ;;  %4985 = vadd.xlane.f32.xlu0 %v10354_v62 }
 0xc95   :  { %v4943_v12 = vsub.f32 %v10306_v49, %v4922_v35  ;;  %6428 = vpow2.f32 %v4965_v50 }
 0xc96   :  { %v10360_v38 = vpop.eup %6418  ;;  %v4971_v47 = vmul.f32 1.442695, %v4944_v22 }
 0xc97   :  { %v4969_v46 = vmul.f32 1.442695, %v4943_v12  ;;  %v10362_v30 = vpop.eup %6420  ;;  %v4928_v28 = vpop.xlane.xlu1 %4927 }
 0xc98   :  { %v4926_v17 = vpop.xlane.xlu0 %4925  ;;  %6430 = vpow2.f32 %v4971_v47  ;;  %v4946_v32 = vsub.f32 %v10320_v51, %v4928_v28  ;;  %4991 = vadd.xlane.f32.xlu1 %v10360_v38  ;;  %4989 = vadd.xlane.f32.xlu0 %v10362_v30 }
 0xc99   :  { %v4945_v36 = vsub.f32 %v10316_v45, %v4926_v17  ;;  %6432 = vpow2.f32 %v4969_v46 }
 0xc9a   :  { %v10368_v49 = vpop.eup %6422  ;;  %v4975_v18 = vmul.f32 1.442695, %v4946_v32 }
 0xc9b   :  { %v4973_v44 = vmul.f32 1.442695, %v4945_v36  ;;  %v10370_v53 = vpop.eup %6424 }
 0xc9c   :  { %6434 = vpow2.f32 %v4975_v18  ;;  %4995 = vadd.xlane.f32.xlu1 %v10368_v49  ;;  %4993 = vadd.xlane.f32.xlu0 %v10370_v53 }
 0xc9d   :  { %6436 = vpow2.f32 %v4973_v44 }
 0xc9e   :  { %v10374_v51 = vpop.eup %6426 }
 0xc9f   :  { %v10376_v7 = vpop.eup %6428 }
 0xca0   :  { %4999 = vadd.xlane.f32.xlu1 %v10374_v51  ;;  %4997 = vadd.xlane.f32.xlu0 %v10376_v7 }
 0xca2   :  { %v10380_v45 = vpop.eup %6430 }
 0xca3   :  { %v10382_v63 = vpop.eup %6432 }
 0xca4   :  { %5003 = vadd.xlane.f32.xlu1 %v10380_v45  ;;  %5001 = vadd.xlane.f32.xlu0 %v10382_v63 }
 0xca6   :  { %v10386_v11 = vpop.eup %6434 }
 0xca7   :  { %v10388_v1 = vpop.eup %6436 }
 0xca8   :  { %5007 = vadd.xlane.f32.xlu1 %v10386_v11  ;;  %5005 = vadd.xlane.f32.xlu0 %v10388_v1 }
 0xcaf   :  { %v4930_v4 = vpop.xlane.xlu0 %4929 }
 0xcb0   :  { %v4947_v42 = vsub.f32 %v10328_v26, %v4930_v4 }
 0xcb1   :  { %v4932_v56 = vpop.xlane.xlu1 %4931 }
 0xcb2   :  { %v4977_v24 = vmul.f32 1.442695, %v4947_v42  ;;  %v4948_v57 = vsub.f32 %v10333_v14, %v4932_v56 }
 0xcb4   :  { %6438 = vpow2.f32 %v4977_v24  ;;  %v4979_v16 = vmul.f32 1.442695, %v4948_v57 }
 0xcb6   :  { %6440 = vpow2.f32 %v4979_v16 }
 0xcbe   :  { %v10394_v54 = vpop.eup %6438 }
 0xcbf   :  { %5009 = vadd.xlane.f32.xlu0 %v10394_v54 }
 0xcc0   :  { %v10397_v20 = vpop.eup %6440 }
 0xcc1   :  { %5011 = vadd.xlane.f32.xlu1 %v10397_v20 }
 0xd1c   :  { %v4982_v26 = vpop.xlane.xlu0 %4981 }
 0xd1d   :  { %v4984_v58 = vpop.xlane.xlu1 %4983  ;;  %6442 = vrcp.f32 %v4982_v26 }
 0xd1e   :  { %6444 = vrcp.f32 %v4984_v58 }
 0xd21   :  { %v4988_v14 = vpop.xlane.xlu1 %4987  ;;  %v4986_v6 = vpop.xlane.xlu0 %4985 }
 0xd22   :  { %6446 = vrcp.f32 %v4988_v14 }
 0xd23   :  { %6448 = vrcp.f32 %v4986_v6  ;;  %v10439_v6 = vld [vmem:[#allocation4] ss:$0 sm:$0xff] }
 0xd25   :  { %v4992_v48 = vpop.xlane.xlu1 %4991  ;;  %v4990_v37 = vpop.xlane.xlu0 %4989 }
 0xd26   :  { %6450 = vrcp.f32 %v4992_v48 }
 0xd27   :  { %v6443_v21 = vpop.eup %6442  ;;  %6452 = vrcp.f32 %v4990_v37 }
 0xd28   :  { %v6445_v39 = vpop.eup %6444  ;;  %v5014_v9 = vmul.f32 %v6443_v21, %v10344_v5 }
 0xd29   :  { %v4996_v59 = vpop.xlane.xlu1 %4995  ;;  %v4994_v52 = vpop.xlane.xlu0 %4993  ;;  %v5016_v23 = vmul.f32 %v6445_v39, %v10346_v29 }
 0xd2a   :  { %6454 = vrcp.f32 %v4996_v59  ;;  %v5049_v19 = vmul.f32 %v10405_v61, %v5014_v9 }
 0xd2b   :  { %6456 = vrcp.f32 %v4994_v52  ;;  %v5050_v60 = vmul.f32 %v10405_v61, %v5016_v23 }
 0xd2c   :  { %v6447_v0 = vpop.eup %6446  ;;  %5065 = vadd.xlane.f32.xlu0 %v5049_v19 }
 0xd2d   :  { %v6449_v3 = vpop.eup %6448  ;;  %5067 = vadd.xlane.f32.xlu1 %v5050_v60  ;;  %v5000_v43 = vpop.xlane.xlu1 %4999  ;;  %v5020_v34 = vmul.f32 %v6447_v0, %v10352_v10 }
 0xd2e   :  { %v4998_v13 = vpop.xlane.xlu0 %4997  ;;  %6458 = vrcp.f32 %v5000_v43  ;;  %v5018_v25 = vmul.f32 %v6449_v3, %v10354_v62 }
 0xd2f   :  { %6460 = vrcp.f32 %v4998_v13  ;;  %v5052_v5 = vmul.f32 %v10405_v61, %v5020_v34 }
 0xd30   :  { %v6451_v8 = vpop.eup %6450  ;;  %v5051_v27 = vmul.f32 %v10405_v61, %v5018_v25 }
 0xd31   :  { %v6453_v29 = vpop.eup %6452  ;;  %5071 = vadd.xlane.f32.xlu1 %v5052_v5  ;;  %v5004_v2 = vpop.xlane.xlu1 %5003  ;;  %v5024_v15 = vmul.f32 %v6451_v8, %v10360_v38 }
 0xd32   :  { %v5002_v55 = vpop.xlane.xlu0 %5001  ;;  %6462 = vrcp.f32 %v5004_v2  ;;  %5069 = vadd.xlane.f32.xlu0 %v5051_v27  ;;  %v5022_v41 = vmul.f32 %v6453_v29, %v10362_v30 }
 0xd33   :  { %6464 = vrcp.f32 %v5002_v55  ;;  %v5054_v10 = vmul.f32 %v10405_v61, %v5024_v15 }
 0xd34   :  { %v6455_v40 = vpop.eup %6454  ;;  %v5053_v50 = vmul.f32 %v10405_v61, %v5022_v41 }
 0xd35   :  { %v6457_v62 = vpop.eup %6456  ;;  %5075 = vadd.xlane.f32.xlu1 %v5054_v10  ;;  %v5008_v33 = vpop.xlane.xlu1 %5007  ;;  %v5028_v22 = vmul.f32 %v6455_v40, %v10368_v49 }
 0xd36   :  { %v5006_v35 = vpop.xlane.xlu0 %5005  ;;  %6466 = vrcp.f32 %v5008_v33  ;;  %5073 = vadd.xlane.f32.xlu0 %v5053_v50  ;;  %v5026_v12 = vmul.f32 %v6457_v62, %v10370_v53 }
 0xd37   :  { %6468 = vrcp.f32 %v5006_v35  ;;  %v5056_v38 = vmul.f32 %v10405_v61, %v5028_v22 }
 0xd38   :  { %v6459_v47 = vpop.eup %6458  ;;  %v5055_v46 = vmul.f32 %v10405_v61, %v5026_v12 }
 0xd39   :  { %v6461_v30 = vpop.eup %6460  ;;  %5079 = vadd.xlane.f32.xlu1 %v5056_v38  ;;  %v5032_v28 = vmul.f32 %v6459_v47, %v10374_v51 }
 0xd3a   :  { %5077 = vadd.xlane.f32.xlu0 %v5055_v46  ;;  %v5030_v17 = vmul.f32 %v6461_v30, %v10376_v7 }
 0xd3b   :  { %v5058_v32 = vmul.f32 %v10405_v61, %v5032_v28 }
 0xd3c   :  { %v6463_v36 = vpop.eup %6462  ;;  %v5057_v49 = vmul.f32 %v10405_v61, %v5030_v17 }
 0xd3d   :  { %v6465_v18 = vpop.eup %6464  ;;  %5083 = vadd.xlane.f32.xlu1 %v5058_v32  ;;  %v5036_v44 = vmul.f32 %v6463_v36, %v10380_v45 }
 0xd3e   :  { %5081 = vadd.xlane.f32.xlu0 %v5057_v49  ;;  %v5034_v53 = vmul.f32 %v6465_v18, %v10382_v63 }
 0xd3f   :  { %v5060_v4 = vmul.f32 %v10405_v61, %v5036_v44 }
 0xd40   :  { %v6467_v42 = vpop.eup %6466  ;;  %v5059_v51 = vmul.f32 %v10405_v61, %v5034_v53 }
 0xd41   :  { %v6469_v56 = vpop.eup %6468  ;;  %5087 = vadd.xlane.f32.xlu1 %v5060_v4  ;;  %v5040_v7 = vmul.f32 %v6467_v42, %v10386_v11 }
 0xd42   :  { %5085 = vadd.xlane.f32.xlu0 %v5059_v51  ;;  %v5038_v24 = vmul.f32 %v6469_v56, %v10388_v1 }
 0xd43   :  { %v5062_v57 = vmul.f32 %v10405_v61, %v5040_v7 }
 0xd44   :  { %v5061_v16 = vmul.f32 %v10405_v61, %v5038_v24 }
 0xd45   :  { %5091 = vadd.xlane.f32.xlu1 %v5062_v57 }
 0xd46   :  { %5089 = vadd.xlane.f32.xlu0 %v5061_v16 }
 0xd4c   :  { %v5010_v45 = vpop.xlane.xlu0 %5009 }
 0xd4d   :  { %6470 = vrcp.f32 %v5010_v45 }
 0xd4e   :  { %v5012_v63 = vpop.xlane.xlu1 %5011 }
 0xd4f   :  { %6472 = vrcp.f32 %v5012_v63 }
 0xd57   :  { %v6471_v31 = vpop.eup %6470 }
 0xd58   :  { %v5042_v26 = vmul.f32 %v6471_v31, %v10394_v54 }
 0xd59   :  { %v6473_v58 = vpop.eup %6472 }
 0xd5a   :  { %v5063_v14 = vmul.f32 %v10405_v61, %v5042_v26  ;;  %v5044_v11 = vmul.f32 %v6473_v58, %v10397_v20 }
 0xd5c   :  { %5093 = vadd.xlane.f32.xlu0 %v5063_v14  ;;  %v5064_v1 = vmul.f32 %v10405_v61, %v5044_v11 }
 0xd5e   :  { %5095 = vadd.xlane.f32.xlu1 %v5064_v1 }
 0xdb9   :  { %v5066_v48 = vpop.xlane.xlu0 %5065 }
 0xdba   :  { %v5068_v37 = vpop.xlane.xlu1 %5067  ;;  %v10442_v21 = vadd.f32 %v10439_v6, %v5066_v48 }
 0xdbb   :  { %v10445_v39 = vadd.f32 %v10439_v6, %v5068_v37 }
 0xdbc   :  { %v5120_v54 = vsub.f32 %v10442_v21, %v10442_v21 }
 0xdbd   :  { %v5121_v20 = vsub.f32 %v10445_v39, %v10445_v39 }
 0xdbe   :  { %v5136_v9 = vmul.f32 1.442695, %v5120_v54  ;;  %v5072_v59 = vpop.xlane.xlu1 %5071 }
 0xdbf   :  { %v5138_v61 = vmul.f32 1.442695, %v5121_v20  ;;  %v10452_v52 = vadd.f32 %v10439_v6, %v5072_v59  ;;  %v5070_v23 = vpop.xlane.xlu0 %5069 }
 0xdc0   :  { %6474 = vpow2.f32 %v5136_v9  ;;  %v10455_v19 = vadd.f32 %v10439_v6, %v5070_v23 }
 0xdc1   :  { %6476 = vpow2.f32 %v5138_v61  ;;  %v5123_v60 = vsub.f32 %v10452_v52, %v10452_v52 }
 0xdc2   :  { %v5122_v0 = vsub.f32 %v10455_v19, %v10455_v19  ;;  %v5076_v3 = vpop.xlane.xlu1 %5075 }
 0xdc3   :  { %v5142_v43 = vmul.f32 1.442695, %v5123_v60  ;;  %v10462_v13 = vadd.f32 %v10439_v6, %v5076_v3  ;;  %v5074_v34 = vpop.xlane.xlu0 %5073 }
 0xdc4   :  { %v5140_v25 = vmul.f32 1.442695, %v5122_v0  ;;  %v10465_v5 = vadd.f32 %v10439_v6, %v5074_v34 }
 0xdc5   :  { %6478 = vpow2.f32 %v5142_v43  ;;  %v5125_v8 = vsub.f32 %v10462_v13, %v10462_v13 }
 0xdc6   :  { %6480 = vpow2.f32 %v5140_v25  ;;  %v5124_v27 = vsub.f32 %v10465_v5, %v10465_v5  ;;  %v5080_v29 = vpop.xlane.xlu1 %5079 }
 0xdc7   :  { %v5146_v2 = vmul.f32 1.442695, %v5125_v8  ;;  %v10472_v55 = vadd.f32 %v10439_v6, %v5080_v29  ;;  %v5078_v15 = vpop.xlane.xlu0 %5077 }
 0xdc8   :  { %v5144_v41 = vmul.f32 1.442695, %v5124_v27  ;;  %v10475_v10 = vadd.f32 %v10439_v6, %v5078_v15 }
 0xdc9   :  { %6482 = vpow2.f32 %v5146_v2  ;;  %v5127_v40 = vsub.f32 %v10472_v55, %v10472_v55 }
 0xdca   :  { %v6475_v50 = vpop.eup %6474  ;;  %6484 = vpow2.f32 %v5144_v41  ;;  %v5126_v62 = vsub.f32 %v10475_v10, %v10475_v10  ;;  %v5084_v33 = vpop.xlane.xlu1 %5083 }
 0xdcb   :  { %v6477_v35 = vpop.eup %6476  ;;  %6486 = vlog2.f32 %v6475_v50  ;;  %v5150_v22 = vmul.f32 1.442695, %v5127_v40  ;;  %v10482_v12 = vadd.f32 %v10439_v6, %v5084_v33  ;;  %v5082_v38 = vpop.xlane.xlu0 %5081 }
 0xdcc   :  { %6488 = vlog2.f32 %v6477_v35  ;;  %v5148_v47 = vmul.f32 1.442695, %v5126_v62  ;;  %v10485_v46 = vadd.f32 %v10439_v6, %v5082_v38 }
 0xdcd   :  { %6490 = vpow2.f32 %v5150_v22  ;;  %v5129_v30 = vsub.f32 %v10482_v12, %v10482_v12 }
 0xdce   :  { %6492 = vpow2.f32 %v5148_v47  ;;  %v5128_v28 = vsub.f32 %v10485_v46, %v10485_v46  ;;  %v5088_v17 = vpop.xlane.xlu1 %5087 }
 0xdcf   :  { %v6479_v32 = vpop.eup %6478  ;;  %v5154_v36 = vmul.f32 1.442695, %v5129_v30  ;;  %v10492_v49 = vadd.f32 %v10439_v6, %v5088_v17  ;;  %v5086_v18 = vpop.xlane.xlu0 %5085 }
 0xdd0   :  { %v6481_v44 = vpop.eup %6480  ;;  %6494 = vlog2.f32 %v6479_v32  ;;  %v5152_v53 = vmul.f32 1.442695, %v5128_v28  ;;  %v10495_v4 = vadd.f32 %v10439_v6, %v5086_v18 }
 0xdd1   :  { %6496 = vlog2.f32 %v6481_v44  ;;  %v5131_v42 = vsub.f32 %v10492_v49, %v10492_v49 }
 0xdd2   :  { %6498 = vpow2.f32 %v5154_v36  ;;  %v5130_v51 = vsub.f32 %v10495_v4, %v10495_v4  ;;  %v5092_v56 = vpop.xlane.xlu1 %5091 }
 0xdd3   :  { %v6483_v7 = vpop.eup %6482  ;;  %6500 = vpow2.f32 %v5152_v53  ;;  %v5158_v24 = vmul.f32 1.442695, %v5131_v42  ;;  %v10502_v57 = vadd.f32 %v10439_v6, %v5092_v56  ;;  %v5090_v16 = vpop.xlane.xlu0 %5089 }
 0xdd4   :  { %v6485_v45 = vpop.eup %6484  ;;  %6502 = vlog2.f32 %v6483_v7  ;;  %v5156_v63 = vmul.f32 1.442695, %v5130_v51  ;;  %v10505_v31 = vadd.f32 %v10439_v6, %v5090_v16 }
 0xdd5   :  { %v6487_v26 = vpop.eup %6486  ;;  %6504 = vlog2.f32 %v6485_v45  ;;  %v5133_v58 = vsub.f32 %v10502_v57, %v10502_v57 }
 0xdd6   :  { %v6489_v14 = vpop.eup %6488  ;;  %v5185_v11 = vmul.f32 0.6931472, %v6487_v26  ;;  %6506 = vpow2.f32 %v5158_v24  ;;  %v5132_v1 = vsub.f32 %v10505_v31, %v10505_v31 }
 0xdd7   :  { %v6491_v48 = vpop.eup %6490  ;;  %v5187_v37 = vmul.f32 0.6931472, %v6489_v14  ;;  %6508 = vpow2.f32 %v5156_v63  ;;  %v5162_v54 = vmul.f32 1.442695, %v5133_v58 }
 0xdd8   :  { %v6493_v20 = vpop.eup %6492  ;;  %v5216_v9 = vadd.f32 %v5185_v11, %v10442_v21  ;;  %6510 = vlog2.f32 %v6491_v48  ;;  %v5160_v59 = vmul.f32 1.442695, %v5132_v1 }
 0xdd9   :  { %v5217_v61 = vadd.f32 %v5187_v37, %v10445_v39  ;;  %6512 = vlog2.f32 %v6493_v20 }
 0xdda   :  { %v6495_v23 = vpop.eup %6494  ;;  %v5232_v60 = vsub.f32 %v10442_v21, %v5216_v9  ;;  %6514 = vpow2.f32 %v5162_v54 }
 0xddb   :  { %v6497_v0 = vpop.eup %6496  ;;  %v5233_v3 = vsub.f32 %v10445_v39, %v5217_v61  ;;  %v5191_v43 = vmul.f32 0.6931472, %v6495_v23  ;;  %6516 = vpow2.f32 %v5160_v59 }
 0xddc   :  { %v6499_v34 = vpop.eup %6498  ;;  %5249 = vst.msk [vmem:[%s10615_s10] sm:$0xff] %vm5248_vm13, %v5232_v60  ;;  %v5189_v25 = vmul.f32 0.6931472, %v6497_v0 }
 0xddd   :  { %v6501_v8 = vpop.eup %6500  ;;  %5250 = vst.msk [vmem:[%s10615_s10 + $0x8] sm:$0xff] %vm5248_vm13, %v5233_v3  ;;  %v5219_v21 = vadd.f32 %v5191_v43, %v10452_v52  ;;  %6518 = vlog2.f32 %v6499_v34 }
 0xdde   :  { %v6503_v27 = vpop.eup %6502  ;;  %v5218_v39 = vadd.f32 %v5189_v25, %v10455_v19  ;;  %6520 = vlog2.f32 %v6501_v8 }
 0xddf   :  { %v6505_v29 = vpop.eup %6504  ;;  %v5235_v2 = vsub.f32 %v10452_v52, %v5219_v21  ;;  %v5195_v15 = vmul.f32 0.6931472, %v6503_v27 }
 0xde0   :  { %v6507_v41 = vpop.eup %6506  ;;  %v5234_v40 = vsub.f32 %v10455_v19, %v5218_v39  ;;  %v5193_v50 = vmul.f32 0.6931472, %v6505_v29 }
 0xde1   :  { %v6509_v62 = vpop.eup %6508  ;;  %5252 = vst.msk [vmem:[%s10615_s10 + $0x18] sm:$0xff] %vm5248_vm13, %v5235_v2  ;;  %v5221_v33 = vadd.f32 %v5195_v15, %v10462_v13  ;;  %6522 = vlog2.f32 %v6507_v41 }
 0xde2   :  { %v6511_v35 = vpop.eup %6510  ;;  %5251 = vst.msk [vmem:[%s10615_s10 + $0x10] sm:$0xff] %vm5248_vm13, %v5234_v40  ;;  %v5220_v52 = vadd.f32 %v5193_v50, %v10465_v5  ;;  %6524 = vlog2.f32 %v6509_v62 }
 0xde3   :  { %v6513_v19 = vpop.eup %6512  ;;  %v5237_v22 = vsub.f32 %v10462_v13, %v5221_v33  ;;  %v5199_v38 = vmul.f32 0.6931472, %v6511_v35 }
 0xde4   :  { %v6515_v47 = vpop.eup %6514  ;;  %v5236_v30 = vsub.f32 %v10465_v5, %v5220_v52  ;;  %v5197_v28 = vmul.f32 0.6931472, %v6513_v19 }
 0xde5   :  { %v6517_v17 = vpop.eup %6516  ;;  %5254 = vst.msk [vmem:[%s10615_s10 + $0x28] sm:$0xff] %vm5248_vm13, %v5237_v22  ;;  %v5223_v32 = vadd.f32 %v5199_v38, %v10472_v55  ;;  %6526 = vlog2.f32 %v6515_v47 }
 0xde6   :  { %5253 = vst.msk [vmem:[%s10615_s10 + $0x20] sm:$0xff] %vm5248_vm13, %v5236_v30  ;;  %v5222_v13 = vadd.f32 %v5197_v28, %v10475_v10  ;;  %6528 = vlog2.f32 %v6517_v17 }
 0xde7   :  { %v6519_v36 = vpop.eup %6518  ;;  %v5239_v5 = vsub.f32 %v10472_v55, %v5223_v32 }
 0xde8   :  { %v6521_v18 = vpop.eup %6520  ;;  %v5238_v44 = vsub.f32 %v10475_v10, %v5222_v13  ;;  %v5203_v53 = vmul.f32 0.6931472, %v6519_v36 }
 0xde9   :  { %5256 = vst.msk [vmem:[%s10615_s10 + $0x38] sm:$0xff] %vm5248_vm13, %v5239_v5  ;;  %v5201_v42 = vmul.f32 0.6931472, %v6521_v18  ;;  %v5094_v51 = vpop.xlane.xlu0 %5093 }
 0xdea   :  { %5255 = vst.msk [vmem:[%s10615_s10 + $0x30] sm:$0xff] %vm5248_vm13, %v5238_v44  ;;  %v5225_v56 = vadd.f32 %v5203_v53, %v10482_v12  ;;  %v5118_v55 = vadd.f32 %v10439_v6, %v5094_v51 }
 0xdeb   :  { %v6523_v7 = vpop.eup %6522  ;;  %v5224_v10 = vadd.f32 %v5201_v42, %v10485_v46  ;;  %v5096_v24 = vpop.xlane.xlu1 %5095 }
 0xdec   :  { %v6525_v16 = vpop.eup %6524  ;;  %v5241_v45 = vsub.f32 %v10482_v12, %v5225_v56  ;;  %v5207_v63 = vmul.f32 0.6931472, %v6523_v7  ;;  %v5134_v26 = vsub.f32 %v5118_v55, %v5118_v55  ;;  %v5119_v58 = vadd.f32 %v10439_v6, %v5096_v24 }
 0xded   :  { %v5240_v14 = vsub.f32 %v10485_v46, %v5224_v10  ;;  %v5205_v11 = vmul.f32 0.6931472, %v6525_v16 }
 0xdee   :  { %5258 = vst.msk [vmem:[%s10615_s10 + $0x48] sm:$0xff] %vm5248_vm13, %v5241_v45  ;;  %v5227_v1 = vadd.f32 %v5207_v63, %v10492_v49  ;;  %v5164_v48 = vmul.f32 1.442695, %v5134_v26  ;;  %v5135_v37 = vsub.f32 %v5119_v58, %v5119_v58 }
 0xdef   :  { %v6527_v54 = vpop.eup %6526  ;;  %5257 = vst.msk [vmem:[%s10615_s10 + $0x40] sm:$0xff] %vm5248_vm13, %v5240_v14  ;;  %v5226_v6 = vadd.f32 %v5205_v11, %v10495_v4 }
 0xdf0   :  { %v6529_v12 = vpop.eup %6528  ;;  %v5243_v46 = vsub.f32 %v10492_v49, %v5227_v1  ;;  %v5211_v20 = vmul.f32 0.6931472, %v6527_v54  ;;  %6530 = vpow2.f32 %v5164_v48  ;;  %v5166_v9 = vmul.f32 1.442695, %v5135_v37 }
 0xdf1   :  { %v5242_v59 = vsub.f32 %v10495_v4, %v5226_v6  ;;  %v5209_v61 = vmul.f32 0.6931472, %v6529_v12 }
 0xdf2   :  { %5260 = vst.msk [vmem:[%s10615_s10 + $0x58] sm:$0xff] %vm5248_vm13, %v5243_v46  ;;  %v5229_v23 = vadd.f32 %v5211_v20, %v10502_v57  ;;  %6532 = vpow2.f32 %v5166_v9 }
 0xdf3   :  { %5259 = vst.msk [vmem:[%s10615_s10 + $0x50] sm:$0xff] %vm5248_vm13, %v5242_v59  ;;  %v5228_v49 = vadd.f32 %v5209_v61, %v10505_v31 }
 0xdf4   :  { %v5245_v60 = vsub.f32 %v10502_v57, %v5229_v23 }
 0xdf5   :  { %v5244_v4 = vsub.f32 %v10505_v31, %v5228_v49 }
 0xdf6   :  { %5262 = vst.msk [vmem:[%s10615_s10 + $0x68] sm:$0xff] %vm5248_vm13, %v5245_v60 }
 0xdf7   :  { %5261 = vst.msk [vmem:[%s10615_s10 + $0x60] sm:$0xff] %vm5248_vm13, %v5244_v4 }
 0xdfa   :  { %v6531_v0 = vpop.eup %6530 }
 0xdfb   :  { %6534 = vlog2.f32 %v6531_v0 }
 0xdfc   :  { %v6533_v3 = vpop.eup %6532 }
 0xdfd   :  { %6536 = vlog2.f32 %v6533_v3 }
 0xe05   :  { %v6535_v43 = vpop.eup %6534 }
 0xe06   :  { %v5213_v34 = vmul.f32 0.6931472, %v6535_v43 }
 0xe07   :  { %v6537_v25 = vpop.eup %6536 }
 0xe08   :  { %v5230_v57 = vadd.f32 %v5213_v34, %v5118_v55  ;;  %v5215_v8 = vmul.f32 0.6931472, %v6537_v25 }
 0xe0a   :  { %v5246_v31 = vsub.f32 %v5118_v55, %v5230_v57  ;;  %v5231_v21 = vadd.f32 %v5215_v8, %v5119_v58 }
 0xe0c   :  { %5263 = vst.msk [vmem:[%s10615_s10 + $0x70] sm:$0xff] %vm5248_vm13, %v5246_v31  ;;  %v5247_v27 = vsub.f32 %v5119_v58, %v5231_v21 }
 0xe0e   :  { %5264 = vst.msk [vmem:[%s10615_s10 + $0x78] sm:$0xff] %vm5248_vm13, %v5247_v27 }

</bundles_post_ra>
